<compile_context>
chip_gen: v5e
topology: v5e:2x2
jax: 0.10.0
libtpu: 0.0.40
codegen_flags: <defaults>
</compile_context>

<pallas_src>
import functools

import jax
import jax.numpy as jnp
from jax.experimental import pallas as pl
from jax.experimental.pallas import tpu as pltpu

# Layer widths of the PyTorch module: fc1..fc9 + output head.
LAYER_DIMS = [1024, 512, 512, 256, 256, 256, 128, 128, 128, 1]


# --------------------------------------------------------------------------- kernel
def _mlp_kernel(x_ref, *refs):
    """Fused forward pass on transposed activations.

    x_ref : (padded_nf, batch_tile) bf16
    refs  : (w1, b1, ..., w9, b9, w_out, b_out, o_ref)
            hidden wi: (out, in) bf16, bi: (out, 1) f32
            w_out: (128, 1) f32, b_out: (1, 1) f32
    o_ref : (1, batch_tile) f32   (lane-dense output row)
    """
    o_ref = refs[-1]
    param_refs = refs[:-1]
    n_layers = len(param_refs) // 2
    n_hidden = n_layers - 1

    h = x_ref[...]                                  # (in, T) bf16
    for layer in range(n_hidden):
        w = param_refs[2 * layer][...]              # (out, in) bf16
        b = param_refs[2 * layer + 1][...]          # (out, 1)  f32
        z = jnp.dot(w, h, preferred_element_type=jnp.float32) + b
        h = jnp.maximum(z, 0.0)                     # ReLU; dropout == identity (eval)
        if layer < n_hidden - 1:
            h = h.astype(jnp.bfloat16)              # bf16 operand for next MXU matmul

    # Output head (128 -> 1): VPU multiply + sublane reduction; keeps the MXU free
    # and produces a lane-dense (1, batch_tile) result directly.
    w_out = param_refs[-2][...]                     # (128, 1) f32
    b_out = param_refs[-1][...]                     # (1, 1)   f32
    y = jnp.sum(h * w_out, axis=0, keepdims=True) + b_out
    o_ref[...] = y.astype(o_ref.dtype)


# --------------------------------------------------------------------------- helpers
def _round_up(x, m):
    return ((x + m - 1) // m) * m


def _device_config():
    """(target_batch_tile, min_grid_steps) per TPU generation."""
    try:
        kind = jax.devices()[0].device_kind.lower()
    except Exception:
        kind = ""
    if "v5 lite" in kind or "v5e" in kind or "v5lite" in kind:
        return 512, 1          # v5e: fewer grid steps, 128 MiB VMEM is plenty
    if "7" in kind:
        return 512, 2          # v7x: 2 TCs -> force >= 2 grid steps when possible
    return 1024, 1             # v6e and default (v4/v5p): big tiles, 128 MiB VMEM


def _pick_tile(padded_B, target_tile, min_grid):
    """Largest 128-multiple that divides padded_B, <= target, with >= min_grid steps."""
    n_blocks = padded_B // 128
    min_grid = max(1, min(min_grid, n_blocks))
    best = 128
    for d in range(1, n_blocks + 1):
        if n_blocks % d:
            continue
        tile = 128 * d
        if tile <= target_tile and (n_blocks // d) >= min_grid:
            best = max(best, tile)
    return best


def _padded_tile_bytes(shape, dtype):
    r, c = shape
    sub = 16 if dtype == jnp.bfloat16 else 8
    return _round_up(max(r, 1), sub) * _round_up(max(c, 1), 128) * jnp.dtype(dtype).itemsize


def _estimate_vmem_limit(param_specs, padded_nf, batch_tile, single_buffered):
    nbuf = 1 if single_buffered else 2
    total = nbuf * sum(_padded_tile_bytes(s, dt) for s, dt in param_specs)
    total += 2 * _padded_tile_bytes((padded_nf, batch_tile), jnp.bfloat16)  # input  (2 bufs)
    total += 2 * _padded_tile_bytes((1, batch_tile), jnp.float32)           # output (2 bufs)
    total += 3 * 1024 * batch_tile * 4                                      # activation working set
    limit = int(total * 1.5) + (8 << 20)
    return max(16 << 20, min(limit, 48 << 20))


@functools.lru_cache(maxsize=1)
def _buffered1_supported():
    """Narrow, one-time probe: can this jax lower pl.Buffered(1) BlockSpecs?"""
    try:
        def k(w_ref, x_ref, o_ref):
            o_ref[...] = x_ref[...] + w_ref[...]

        f = pl.pallas_call(
            k,
            out_shape=jax.ShapeDtypeStruct((8, 128), jnp.float32),
            grid_spec=pltpu.PrefetchScalarGridSpec(
                num_scalar_prefetch=0,
                grid=(1,),
                in_specs=[
                    pl.BlockSpec((8, 128), lambda i: (0, 0),
                                 pipeline_mode=pl.Buffered(1)),
                    pl.BlockSpec((8, 128), lambda i: (0, 0)),
                ],
                out_specs=pl.BlockSpec((8, 128), lambda i: (0, 0)),
            ),
        )
        z = jnp.zeros((8, 128), jnp.float32)
        jax.block_until_ready(f(z, z))
        return True
    except Exception:
        return False


def _prep_params(params, padded_nf):
    """Cast / reshape PyTorch-layout params for the kernel (runs inside jit).

    params: tuple of (W, b) with W: (out, in), b: (out,)  (nn.Linear layout).
    Hidden layers: W -> bf16 (out, in) (fc1 in-dim zero-padded to padded_nf),
                   b -> f32 (out, 1).
    Output layer : W -> f32 (in, 1), b -> f32 (1, 1).
    """
    flat = []
    n = len(params)
    for i, (w, b) in enumerate(params):
        if i == 0 and w.shape[1] != padded_nf:
            w = jnp.pad(w, ((0, 0), (0, padded_nf - w.shape[1])))
        if i < n - 1:
            flat.append(w.astype(jnp.bfloat16))
            flat.append(b.reshape(-1, 1).astype(jnp.float32))
        else:
            flat.append(w.reshape(-1, 1).astype(jnp.float32))   # (128, 1)
            flat.append(b.reshape(1, 1).astype(jnp.float32))
    return flat


def _param_specs(padded_nf):
    dims = [padded_nf] + LAYER_DIMS
    specs = []
    n = len(LAYER_DIMS)
    for i in range(n):
        out_d, in_d = LAYER_DIMS[i], dims[i]
        if i < n - 1:
            specs.append(((out_d, in_d), jnp.bfloat16))
            specs.append(((out_d, 1), jnp.float32))
        else:
            specs.append(((in_d, 1), jnp.float32))
            specs.append(((1, 1), jnp.float32))
    return specs


def _build_call(padded_nf, padded_B, batch_tile, param_specs, single_buffer_weights):
    grid = (padded_B // batch_tile,)

    x_spec = pl.BlockSpec((padded_nf, batch_tile), lambda i: (0, i))

    weight_specs = []
    for shape, _ in param_specs:
        if single_buffer_weights:
            # Constant index_map => the block is never re-fetched; a single buffer
            # avoids dead double-buffer VMEM for the resident weights.
            spec = pl.BlockSpec(shape, lambda i: (0, 0), pipeline_mode=pl.Buffered(1))
        else:
            spec = pl.BlockSpec(shape, lambda i: (0, 0))
        weight_specs.append(spec)

    out_spec = pl.BlockSpec((1, batch_tile), lambda i: (0, i))

    vmem_limit = _estimate_vmem_limit(param_specs, padded_nf, batch_tile,
                                      single_buffer_weights)

    return pl.pallas_call(
        _mlp_kernel,
        out_shape=jax.ShapeDtypeStruct((1, padded_B), jnp.float32),
        grid_spec=pltpu.PrefetchScalarGridSpec(
            num_scalar_prefetch=0,
            grid=grid,
            in_specs=[x_spec] + weight_specs,
            out_specs=out_spec,
        ),
        compiler_params=pltpu.CompilerParams(
            dimension_semantics=("parallel",),      # batch tiles split across TCs
            vmem_limit_bytes=vmem_limit,            # right-sized; fits v7x 64 MiB
        ),
    )


@functools.lru_cache(maxsize=None)
def _get_forward(B, n_features):
    """Build (once per signature) a jitted forward: (x, params) -> (B, 1)."""
    target_tile, min_grid = _device_config()
    padded_B = _round_up(B, 128)
    batch_tile = _pick_tile(padded_B, target_tile, min_grid)
    padded_nf = _round_up(n_features, 8)
    single = _buffered1_supported()

    p_specs = _param_specs(padded_nf)
    call = _build_call(padded_nf, padded_B, batch_tile, p_specs, single)

    def fwd(x, params):
        flat = _prep_params(params, padded_nf)
        # Transposed, bf16, zero-padded input: (padded_nf, padded_B).
        xt = jnp.zeros((padded_nf, padded_B), jnp.bfloat16)
        xt = xt.at[:n_features, :B].set(x.T.astype(jnp.bfloat16))
        out_row = call(xt, *flat)
        return out_row[0, :B].reshape(B, 1)

    return jax.jit(fwd)


def regression_model_forward(x, params):
    """Run the fused MLP kernel.

    x:      (B, n_features) float array.
    params: sequence of (W, b) in PyTorch nn.Linear layout (W: (out, in), b: (out,)).
    Returns (B, 1) float32.  The pallas_call / jit trace is cached per (B, n_features).
    """
    B, n_features = x.shape
    fwd = _get_forward(int(B), int(n_features))
    return fwd(x, tuple((w, b) for (w, b) in params))


# --------------------------------------------------------------------------- reference
def init_params(key, n_features):
    """nn.Linear-style init: U(-1/sqrt(fan_in), 1/sqrt(fan_in)), PyTorch (out, in) layout."""
    dims = [n_features] + LAYER_DIMS
    params = []
    for i in range(len(LAYER_DIMS)):
        fan_in, fan_out = dims[i], dims[i + 1]
        key, kw, kb = jax.random.split(key, 3)
        bound = 1.0 / jnp.sqrt(jnp.float32(fan_in))
        w = jax.random.uniform(kw, (fan_out, fan_in), jnp.float32,
                               minval=-bound, maxval=bound)
        b = jax.random.uniform(kb, (fan_out,), jnp.float32,
                               minval=-bound, maxval=bound)
        params.append((w, b))
    return params


def reference_forward(x, params):
    """Pure-JAX f32 reference (eval-mode dropout == identity)."""
    h = x
    for i, (w, b) in enumerate(params):
        h = h @ w.T + b
        if i < len(params) - 1:
            h = jnp.maximum(h, 0.0)
    return h


if __name__ == "__main__":
    key = jax.random.PRNGKey(0)
    n_features = 32
    batch = 16   # small demo batch; padded to 128 lanes inside the wrapper

    kx, kp = jax.random.split(key)
    x = jax.random.normal(kx, (batch, n_features), jnp.float32)
    params = init_params(kp, n_features)

    out = regression_model_forward(x, params)
    out = jax.block_until_ready(out)

    ref = reference_forward(x, params)
    assert out.shape == (batch, 1), out.shape
    # bf16 matmul operands with f32 accumulation => small drift vs the f32 reference.
    assert jnp.allclose(out, ref, atol=1e-2, rtol=1e-2), float(
        jnp.max(jnp.abs(out - ref))
    )

    print("KERNEL_OK")
</pallas_src>

<mosaic_0001>
module attributes {stable_mosaic.version = 11 : i64} {
  func.func @k(%arg0: i32, %arg1: memref<8x128xf32, #tpu.memory_space<vmem>>, %arg2: memref<8x128xf32, #tpu.memory_space<vmem>>, %arg3: memref<8x128xf32, #tpu.memory_space<vmem>>) attributes {dimension_semantics = [#tpu.dimension_semantics<arbitrary>], iteration_bounds = array<i64: 1>, scalar_prefetch = 0 : i64, scratch_operands = 0 : i64, tpu.core_type = #tpu.core_type<tc>, window_params = [{pipeline_mode = #tpu.pipeline_mode<synchronous>, transform_indices = @transform_0, window_bounds = array<i64: 8, 128>}, {pipeline_mode = #tpu.pipeline_mode<synchronous>, transform_indices = @transform_1, window_bounds = array<i64: 8, 128>}, {pipeline_mode = #tpu.pipeline_mode<synchronous>, transform_indices = @transform_2, window_bounds = array<i64: 8, 128>}]} {
    %c0 = arith.constant 0 : index
    %c0_0 = arith.constant 0 : index
    %0 = vector.load %arg2[%c0, %c0_0] : memref<8x128xf32, #tpu.memory_space<vmem>>, vector<8x128xf32>
    %c0_1 = arith.constant 0 : index
    %c0_2 = arith.constant 0 : index
    %1 = vector.load %arg1[%c0_1, %c0_2] : memref<8x128xf32, #tpu.memory_space<vmem>>, vector<8x128xf32>
    %2 = arith.addf %0, %1 : vector<8x128xf32>
    %c0_3 = arith.constant 0 : index
    %c0_4 = arith.constant 0 : index
    %3 = vector.load %arg3[%c0_3, %c0_4] : memref<8x128xf32, #tpu.memory_space<vmem>>, vector<8x128xf32>
    tpu.vector_store %arg3[%c0_3, %c0_4], %2 {strides = array<i32>} : memref<8x128xf32, #tpu.memory_space<vmem>>, vector<8x128xf32>,
    return
  }
  func.func @transform_0(%arg0: i32) -> (i32, i32) {
    %c0_i32 = arith.constant 0 : i32
    %c0_i32_0 = arith.constant 0 : i32
    %c0_i32_1 = arith.constant 0 : i32
    return %c0_i32, %c0_i32_0 : i32, i32
  }
  func.func @transform_1(%arg0: i32) -> (i32, i32) {
    %c0_i32 = arith.constant 0 : i32
    %c0_i32_0 = arith.constant 0 : i32
    %c0_i32_1 = arith.constant 0 : i32
    return %c0_i32, %c0_i32_0 : i32, i32
  }
  func.func @transform_2(%arg0: i32) -> (i32, i32) {
    %c0_i32 = arith.constant 0 : i32
    %c0_i32_0 = arith.constant 0 : i32
    %c0_i32_1 = arith.constant 0 : i32
    return %c0_i32, %c0_i32_0 : i32, i32
  }
}

module attributes {stable_mosaic.version = 11 : i64} {
  func.func @_mlp_kernel(%arg0: i32, %arg1: memref<32x128xbf16, #tpu.memory_space<vmem>>, %arg2: memref<1024x32xbf16, #tpu.memory_space<vmem>>, %arg3: memref<1024x1xf32, #tpu.memory_space<vmem>>, %arg4: memref<512x1024xbf16, #tpu.memory_space<vmem>>, %arg5: memref<512x1xf32, #tpu.memory_space<vmem>>, %arg6: memref<512x512xbf16, #tpu.memory_space<vmem>>, %arg7: memref<512x1xf32, #tpu.memory_space<vmem>>, %arg8: memref<256x512xbf16, #tpu.memory_space<vmem>>, %arg9: memref<256x1xf32, #tpu.memory_space<vmem>>, %arg10: memref<256x256xbf16, #tpu.memory_space<vmem>>, %arg11: memref<256x1xf32, #tpu.memory_space<vmem>>, %arg12: memref<256x256xbf16, #tpu.memory_space<vmem>>, %arg13: memref<256x1xf32, #tpu.memory_space<vmem>>, %arg14: memref<128x256xbf16, #tpu.memory_space<vmem>>, %arg15: memref<128x1xf32, #tpu.memory_space<vmem>>, %arg16: memref<128x128xbf16, #tpu.memory_space<vmem>>, %arg17: memref<128x1xf32, #tpu.memory_space<vmem>>, %arg18: memref<128x128xbf16, #tpu.memory_space<vmem>>, %arg19: memref<128x1xf32, #tpu.memory_space<vmem>>, %arg20: memref<128x1xf32, #tpu.memory_space<vmem>>, %arg21: memref<1x1xf32, #tpu.memory_space<vmem>>, %arg22: memref<1x128xf32, #tpu.memory_space<vmem>>) attributes {dimension_semantics = [#tpu.dimension_semantics<parallel>], iteration_bounds = array<i64: 1>, scalar_prefetch = 0 : i64, scratch_operands = 0 : i64, tpu.core_type = #tpu.core_type<tc>, window_params = [{transform_indices = @transform_0, window_bounds = array<i64: 32, 128>}, {pipeline_mode = #tpu.pipeline_mode<synchronous>, transform_indices = @transform_1, window_bounds = array<i64: 1024, 32>}, {pipeline_mode = #tpu.pipeline_mode<synchronous>, transform_indices = @transform_2, window_bounds = array<i64: 1024, 1>}, {pipeline_mode = #tpu.pipeline_mode<synchronous>, transform_indices = @transform_3, window_bounds = array<i64: 512, 1024>}, {pipeline_mode = #tpu.pipeline_mode<synchronous>, transform_indices = @transform_4, window_bounds = array<i64: 512, 1>}, {pipeline_mode = #tpu.pipeline_mode<synchronous>, transform_indices = @transform_5, window_bounds = array<i64: 512, 512>}, {pipeline_mode = #tpu.pipeline_mode<synchronous>, transform_indices = @transform_6, window_bounds = array<i64: 512, 1>}, {pipeline_mode = #tpu.pipeline_mode<synchronous>, transform_indices = @transform_7, window_bounds = array<i64: 256, 512>}, {pipeline_mode = #tpu.pipeline_mode<synchronous>, transform_indices = @transform_8, window_bounds = array<i64: 256, 1>}, {pipeline_mode = #tpu.pipeline_mode<synchronous>, transform_indices = @transform_9, window_bounds = array<i64: 256, 256>}, {pipeline_mode = #tpu.pipeline_mode<synchronous>, transform_indices = @transform_10, window_bounds = array<i64: 256, 1>}, {pipeline_mode = #tpu.pipeline_mode<synchronous>, transform_indices = @transform_11, window_bounds = array<i64: 256, 256>}, {pipeline_mode = #tpu.pipeline_mode<synchronous>, transform_indices = @transform_12, window_bounds = array<i64: 256, 1>}, {pipeline_mode = #tpu.pipeline_mode<synchronous>, transform_indices = @transform_13, window_bounds = array<i64: 128, 256>}, {pipeline_mode = #tpu.pipeline_mode<synchronous>, transform_indices = @transform_14, window_bounds = array<i64: 128, 1>}, {pipeline_mode = #tpu.pipeline_mode<synchronous>, transform_indices = @transform_15, window_bounds = array<i64: 128, 128>}, {pipeline_mode = #tpu.pipeline_mode<synchronous>, transform_indices = @transform_16, window_bounds = array<i64: 128, 1>}, {pipeline_mode = #tpu.pipeline_mode<synchronous>, transform_indices = @transform_17, window_bounds = array<i64: 128, 128>}, {pipeline_mode = #tpu.pipeline_mode<synchronous>, transform_indices = @transform_18, window_bounds = array<i64: 128, 1>}, {pipeline_mode = #tpu.pipeline_mode<synchronous>, transform_indices = @transform_19, window_bounds = array<i64: 128, 1>}, {pipeline_mode = #tpu.pipeline_mode<synchronous>, transform_indices = @transform_20, window_bounds = array<i64: 1, 1>}, {transform_indices = @transform_21, window_bounds = array<i64: 1, 128>}]} {
    %c0 = arith.constant 0 : index
    %c0_0 = arith.constant 0 : index
    %0 = vector.load %arg1[%c0, %c0_0] : memref<32x128xbf16, #tpu.memory_space<vmem>>, vector<32x128xbf16>
    %c0_1 = arith.constant 0 : index
    %c0_2 = arith.constant 0 : index
    %1 = vector.load %arg2[%c0_1, %c0_2] : memref<1024x32xbf16, #tpu.memory_space<vmem>>, vector<1024x32xbf16>
    %c0_3 = arith.constant 0 : index
    %c0_4 = arith.constant 0 : index
    %2 = vector.load %arg3[%c0_3, %c0_4] : memref<1024x1xf32, #tpu.memory_space<vmem>>, vector<1024x1xf32>
    %cst = arith.constant dense<0.000000e+00> : vector<1024x128xf32>
    %3 = tpu.matmul %1, %0, %cst {dimension_numbers = #tpu.dot_dimension_numbers<[1], [0], [0], [1], [0, 0, 1, 1], [], []>} : vector<1024x32xbf16>, vector<32x128xbf16>, vector<1024x128xf32> -> vector<1024x128xf32>
    %4 = vector.broadcast %2 : vector<1024x1xf32> to vector<1024x128xf32>
    %5 = arith.addf %3, %4 : vector<1024x128xf32>
    %cst_5 = arith.constant 0.000000e+00 : f32
    %6 = vector.broadcast %cst_5 : f32 to vector<1024x128xf32>
    %7 = arith.maximumf %5, %6 : vector<1024x128xf32>
    %8 = arith.truncf %7 : vector<1024x128xf32> to vector<1024x128xbf16>
    %c0_6 = arith.constant 0 : index
    %c0_7 = arith.constant 0 : index
    %9 = vector.load %arg4[%c0_6, %c0_7] : memref<512x1024xbf16, #tpu.memory_space<vmem>>, vector<512x1024xbf16>
    %c0_8 = arith.constant 0 : index
    %c0_9 = arith.constant 0 : index
    %10 = vector.load %arg5[%c0_8, %c0_9] : memref<512x1xf32, #tpu.memory_space<vmem>>, vector<512x1xf32>
    %cst_10 = arith.constant dense<0.000000e+00> : vector<512x128xf32>
    %11 = tpu.matmul %9, %8, %cst_10 {dimension_numbers = #tpu.dot_dimension_numbers<[1], [0], [0], [1], [0, 0, 1, 1], [], []>} : vector<512x1024xbf16>, vector<1024x128xbf16>, vector<512x128xf32> -> vector<512x128xf32>
    %12 = vector.broadcast %10 : vector<512x1xf32> to vector<512x128xf32>
    %13 = arith.addf %11, %12 : vector<512x128xf32>
    %cst_11 = arith.constant 0.000000e+00 : f32
    %14 = vector.broadcast %cst_11 : f32 to vector<512x128xf32>
    %15 = arith.maximumf %13, %14 : vector<512x128xf32>
    %16 = arith.truncf %15 : vector<512x128xf32> to vector<512x128xbf16>
    %c0_12 = arith.constant 0 : index
    %c0_13 = arith.constant 0 : index
    %17 = vector.load %arg6[%c0_12, %c0_13] : memref<512x512xbf16, #tpu.memory_space<vmem>>, vector<512x512xbf16>
    %c0_14 = arith.constant 0 : index
    %c0_15 = arith.constant 0 : index
    %18 = vector.load %arg7[%c0_14, %c0_15] : memref<512x1xf32, #tpu.memory_space<vmem>>, vector<512x1xf32>
    %cst_16 = arith.constant dense<0.000000e+00> : vector<512x128xf32>
    %19 = tpu.matmul %17, %16, %cst_16 {dimension_numbers = #tpu.dot_dimension_numbers<[1], [0], [0], [1], [0, 0, 1, 1], [], []>} : vector<512x512xbf16>, vector<512x128xbf16>, vector<512x128xf32> -> vector<512x128xf32>
    %20 = vector.broadcast %18 : vector<512x1xf32> to vector<512x128xf32>
    %21 = arith.addf %19, %20 : vector<512x128xf32>
    %cst_17 = arith.constant 0.000000e+00 : f32
    %22 = vector.broadcast %cst_17 : f32 to vector<512x128xf32>
    %23 = arith.maximumf %21, %22 : vector<512x128xf32>
    %24 = arith.truncf %23 : vector<512x128xf32> to vector<512x128xbf16>
    %c0_18 = arith.constant 0 : index
    %c0_19 = arith.constant 0 : index
    %25 = vector.load %arg8[%c0_18, %c0_19] : memref<256x512xbf16, #tpu.memory_space<vmem>>, vector<256x512xbf16>
    %c0_20 = arith.constant 0 : index
    %c0_21 = arith.constant 0 : index
    %26 = vector.load %arg9[%c0_20, %c0_21] : memref<256x1xf32, #tpu.memory_space<vmem>>, vector<256x1xf32>
    %cst_22 = arith.constant dense<0.000000e+00> : vector<256x128xf32>
    %27 = tpu.matmul %25, %24, %cst_22 {dimension_numbers = #tpu.dot_dimension_numbers<[1], [0], [0], [1], [0, 0, 1, 1], [], []>} : vector<256x512xbf16>, vector<512x128xbf16>, vector<256x128xf32> -> vector<256x128xf32>
    %28 = vector.broadcast %26 : vector<256x1xf32> to vector<256x128xf32>
    %29 = arith.addf %27, %28 : vector<256x128xf32>
    %cst_23 = arith.constant 0.000000e+00 : f32
    %30 = vector.broadcast %cst_23 : f32 to vector<256x128xf32>
    %31 = arith.maximumf %29, %30 : vector<256x128xf32>
    %32 = arith.truncf %31 : vector<256x128xf32> to vector<256x128xbf16>
    %c0_24 = arith.constant 0 : index
    %c0_25 = arith.constant 0 : index
    %33 = vector.load %arg10[%c0_24, %c0_25] : memref<256x256xbf16, #tpu.memory_space<vmem>>, vector<256x256xbf16>
    %c0_26 = arith.constant 0 : index
    %c0_27 = arith.constant 0 : index
    %34 = vector.load %arg11[%c0_26, %c0_27] : memref<256x1xf32, #tpu.memory_space<vmem>>, vector<256x1xf32>
    %cst_28 = arith.constant dense<0.000000e+00> : vector<256x128xf32>
    %35 = tpu.matmul %33, %32, %cst_28 {dimension_numbers = #tpu.dot_dimension_numbers<[1], [0], [0], [1], [0, 0, 1, 1], [], []>} : vector<256x256xbf16>, vector<256x128xbf16>, vector<256x128xf32> -> vector<256x128xf32>
    %36 = vector.broadcast %34 : vector<256x1xf32> to vector<256x128xf32>
    %37 = arith.addf %35, %36 : vector<256x128xf32>
    %cst_29 = arith.constant 0.000000e+00 : f32
    %38 = vector.broadcast %cst_29 : f32 to vector<256x128xf32>
    %39 = arith.maximumf %37, %38 : vector<256x128xf32>
    %40 = arith.truncf %39 : vector<256x128xf32> to vector<256x128xbf16>
    %c0_30 = arith.constant 0 : index
    %c0_31 = arith.constant 0 : index
    %41 = vector.load %arg12[%c0_30, %c0_31] : memref<256x256xbf16, #tpu.memory_space<vmem>>, vector<256x256xbf16>
    %c0_32 = arith.constant 0 : index
    %c0_33 = arith.constant 0 : index
    %42 = vector.load %arg13[%c0_32, %c0_33] : memref<256x1xf32, #tpu.memory_space<vmem>>, vector<256x1xf32>
    %cst_34 = arith.constant dense<0.000000e+00> : vector<256x128xf32>
    %43 = tpu.matmul %41, %40, %cst_34 {dimension_numbers = #tpu.dot_dimension_numbers<[1], [0], [0], [1], [0, 0, 1, 1], [], []>} : vector<256x256xbf16>, vector<256x128xbf16>, vector<256x128xf32> -> vector<256x128xf32>
    %44 = vector.broadcast %42 : vector<256x1xf32> to vector<256x128xf32>
    %45 = arith.addf %43, %44 : vector<256x128xf32>
    %cst_35 = arith.constant 0.000000e+00 : f32
    %46 = vector.broadcast %cst_35 : f32 to vector<256x128xf32>
    %47 = arith.maximumf %45, %46 : vector<256x128xf32>
    %48 = arith.truncf %47 : vector<256x128xf32> to vector<256x128xbf16>
    %c0_36 = arith.constant 0 : index
    %c0_37 = arith.constant 0 : index
    %49 = vector.load %arg14[%c0_36, %c0_37] : memref<128x256xbf16, #tpu.memory_space<vmem>>, vector<128x256xbf16>
    %c0_38 = arith.constant 0 : index
    %c0_39 = arith.constant 0 : index
    %50 = vector.load %arg15[%c0_38, %c0_39] : memref<128x1xf32, #tpu.memory_space<vmem>>, vector<128x1xf32>
    %cst_40 = arith.constant dense<0.000000e+00> : vector<128x128xf32>
    %51 = tpu.matmul %49, %48, %cst_40 {dimension_numbers = #tpu.dot_dimension_numbers<[1], [0], [0], [1], [0, 0, 1, 1], [], []>} : vector<128x256xbf16>, vector<256x128xbf16>, vector<128x128xf32> -> vector<128x128xf32>
    %52 = vector.broadcast %50 : vector<128x1xf32> to vector<128x128xf32>
    %53 = arith.addf %51, %52 : vector<128x128xf32>
    %cst_41 = arith.constant 0.000000e+00 : f32
    %54 = vector.broadcast %cst_41 : f32 to vector<128x128xf32>
    %55 = arith.maximumf %53, %54 : vector<128x128xf32>
    %56 = arith.truncf %55 : vector<128x128xf32> to vector<128x128xbf16>
    %c0_42 = arith.constant 0 : index
    %c0_43 = arith.constant 0 : index
    %57 = vector.load %arg16[%c0_42, %c0_43] : memref<128x128xbf16, #tpu.memory_space<vmem>>, vector<128x128xbf16>
    %c0_44 = arith.constant 0 : index
    %c0_45 = arith.constant 0 : index
    %58 = vector.load %arg17[%c0_44, %c0_45] : memref<128x1xf32, #tpu.memory_space<vmem>>, vector<128x1xf32>
    %cst_46 = arith.constant dense<0.000000e+00> : vector<128x128xf32>
    %59 = tpu.matmul %57, %56, %cst_46 {dimension_numbers = #tpu.dot_dimension_numbers<[1], [0], [0], [1], [0, 0, 1, 1], [], []>} : vector<128x128xbf16>, vector<128x128xbf16>, vector<128x128xf32> -> vector<128x128xf32>
    %60 = vector.broadcast %58 : vector<128x1xf32> to vector<128x128xf32>
    %61 = arith.addf %59, %60 : vector<128x128xf32>
    %cst_47 = arith.constant 0.000000e+00 : f32
    %62 = vector.broadcast %cst_47 : f32 to vector<128x128xf32>
    %63 = arith.maximumf %61, %62 : vector<128x128xf32>
    %64 = arith.truncf %63 : vector<128x128xf32> to vector<128x128xbf16>
    %c0_48 = arith.constant 0 : index
    %c0_49 = arith.constant 0 : index
    %65 = vector.load %arg18[%c0_48, %c0_49] : memref<128x128xbf16, #tpu.memory_space<vmem>>, vector<128x128xbf16>
    %c0_50 = arith.constant 0 : index
    %c0_51 = arith.constant 0 : index
    %66 = vector.load %arg19[%c0_50, %c0_51] : memref<128x1xf32, #tpu.memory_space<vmem>>, vector<128x1xf32>
    %cst_52 = arith.constant dense<0.000000e+00> : vector<128x128xf32>
    %67 = tpu.matmul %65, %64, %cst_52 {dimension_numbers = #tpu.dot_dimension_numbers<[1], [0], [0], [1], [0, 0, 1, 1], [], []>} : vector<128x128xbf16>, vector<128x128xbf16>, vector<128x128xf32> -> vector<128x128xf32>
    %68 = vector.broadcast %66 : vector<128x1xf32> to vector<128x128xf32>
    %69 = arith.addf %67, %68 : vector<128x128xf32>
    %cst_53 = arith.constant 0.000000e+00 : f32
    %70 = vector.broadcast %cst_53 : f32 to vector<128x128xf32>
    %71 = arith.maximumf %69, %70 : vector<128x128xf32>
    %c0_54 = arith.constant 0 : index
    %c0_55 = arith.constant 0 : index
    %72 = vector.load %arg20[%c0_54, %c0_55] : memref<128x1xf32, #tpu.memory_space<vmem>>, vector<128x1xf32>
    %c0_56 = arith.constant 0 : index
    %c0_57 = arith.constant 0 : index
    %73 = vector.load %arg21[%c0_56, %c0_57] : memref<1x1xf32, #tpu.memory_space<vmem>>, vector<1x1xf32>
    %74 = vector.broadcast %72 : vector<128x1xf32> to vector<128x128xf32>
    %75 = arith.mulf %71, %74 : vector<128x128xf32>
    %cst_58 = arith.constant dense<0.000000e+00> : vector<128xf32>
    %76 = vector.multi_reduction <add>, %75, %cst_58 [0] : vector<128x128xf32> to vector<128xf32>
    %77 = vector.shape_cast %76 : vector<128xf32> to vector<1x128xf32>
    %78 = vector.broadcast %73 : vector<1x1xf32> to vector<1x128xf32>
    %79 = arith.addf %77, %78 : vector<1x128xf32>
    %c0_59 = arith.constant 0 : index
    %c0_60 = arith.constant 0 : index
    %80 = vector.load %arg22[%c0_59, %c0_60] : memref<1x128xf32, #tpu.memory_space<vmem>>, vector<1x128xf32>
    tpu.vector_store %arg22[%c0_59, %c0_60], %79 {strides = array<i32>} : memref<1x128xf32, #tpu.memory_space<vmem>>, vector<1x128xf32>,
    return
  }
  func.func @transform_0(%arg0: i32) -> (i32, i32) {
    %c0_i32 = arith.constant 0 : i32
    %c0_i32_0 = arith.constant 0 : i32
    return %c0_i32, %arg0 : i32, i32
  }
  func.func @transform_1(%arg0: i32) -> (i32, i32) {
    %c0_i32 = arith.constant 0 : i32
    %c0_i32_0 = arith.constant 0 : i32
    %c0_i32_1 = arith.constant 0 : i32
    return %c0_i32, %c0_i32_0 : i32, i32
  }
  func.func @transform_2(%arg0: i32) -> (i32, i32) {
    %c0_i32 = arith.constant 0 : i32
    %c0_i32_0 = arith.constant 0 : i32
    %c0_i32_1 = arith.constant 0 : i32
    return %c0_i32, %c0_i32_0 : i32, i32
  }
  func.func @transform_3(%arg0: i32) -> (i32, i32) {
    %c0_i32 = arith.constant 0 : i32
    %c0_i32_0 = arith.constant 0 : i32
    %c0_i32_1 = arith.constant 0 : i32
    return %c0_i32, %c0_i32_0 : i32, i32
  }
  func.func @transform_4(%arg0: i32) -> (i32, i32) {
    %c0_i32 = arith.constant 0 : i32
    %c0_i32_0 = arith.constant 0 : i32
    %c0_i32_1 = arith.constant 0 : i32
    return %c0_i32, %c0_i32_0 : i32, i32
  }
  func.func @transform_5(%arg0: i32) -> (i32, i32) {
    %c0_i32 = arith.constant 0 : i32
    %c0_i32_0 = arith.constant 0 : i32
    %c0_i32_1 = arith.constant 0 : i32
    return %c0_i32, %c0_i32_0 : i32, i32
  }
  func.func @transform_6(%arg0: i32) -> (i32, i32) {
    %c0_i32 = arith.constant 0 : i32
    %c0_i32_0 = arith.constant 0 : i32
    %c0_i32_1 = arith.constant 0 : i32
    return %c0_i32, %c0_i32_0 : i32, i32
  }
  func.func @transform_7(%arg0: i32) -> (i32, i32) {
    %c0_i32 = arith.constant 0 : i32
    %c0_i32_0 = arith.constant 0 : i32
    %c0_i32_1 = arith.constant 0 : i32
    return %c0_i32, %c0_i32_0 : i32, i32
  }
  func.func @transform_8(%arg0: i32) -> (i32, i32) {
    %c0_i32 = arith.constant 0 : i32
    %c0_i32_0 = arith.constant 0 : i32
    %c0_i32_1 = arith.constant 0 : i32
    return %c0_i32, %c0_i32_0 : i32, i32
  }
  func.func @transform_9(%arg0: i32) -> (i32, i32) {
    %c0_i32 = arith.constant 0 : i32
    %c0_i32_0 = arith.constant 0 : i32
    %c0_i32_1 = arith.constant 0 : i32
    return %c0_i32, %c0_i32_0 : i32, i32
  }
  func.func @transform_10(%arg0: i32) -> (i32, i32) {
    %c0_i32 = arith.constant 0 : i32
    %c0_i32_0 = arith.constant 0 : i32
    %c0_i32_1 = arith.constant 0 : i32
    return %c0_i32, %c0_i32_0 : i32, i32
  }
  func.func @transform_11(%arg0: i32) -> (i32, i32) {
    %c0_i32 = arith.constant 0 : i32
    %c0_i32_0 = arith.constant 0 : i32
    %c0_i32_1 = arith.constant 0 : i32
    return %c0_i32, %c0_i32_0 : i32, i32
  }
  func.func @transform_12(%arg0: i32) -> (i32, i32) {
    %c0_i32 = arith.constant 0 : i32
    %c0_i32_0 = arith.constant 0 : i32
    %c0_i32_1 = arith.constant 0 : i32
    return %c0_i32, %c0_i32_0 : i32, i32
  }
  func.func @transform_13(%arg0: i32) -> (i32, i32) {
    %c0_i32 = arith.constant 0 : i32
    %c0_i32_0 = arith.constant 0 : i32
    %c0_i32_1 = arith.constant 0 : i32
    return %c0_i32, %c0_i32_0 : i32, i32
  }
  func.func @transform_14(%arg0: i32) -> (i32, i32) {
    %c0_i32 = arith.constant 0 : i32
    %c0_i32_0 = arith.constant 0 : i32
    %c0_i32_1 = arith.constant 0 : i32
    return %c0_i32, %c0_i32_0 : i32, i32
  }
  func.func @transform_15(%arg0: i32) -> (i32, i32) {
    %c0_i32 = arith.constant 0 : i32
    %c0_i32_0 = arith.constant 0 : i32
    %c0_i32_1 = arith.constant 0 : i32
    return %c0_i32, %c0_i32_0 : i32, i32
  }
  func.func @transform_16(%arg0: i32) -> (i32, i32) {
    %c0_i32 = arith.constant 0 : i32
    %c0_i32_0 = arith.constant 0 : i32
    %c0_i32_1 = arith.constant 0 : i32
    return %c0_i32, %c0_i32_0 : i32, i32
  }
  func.func @transform_17(%arg0: i32) -> (i32, i32) {
    %c0_i32 = arith.constant 0 : i32
    %c0_i32_0 = arith.constant 0 : i32
    %c0_i32_1 = arith.constant 0 : i32
    return %c0_i32, %c0_i32_0 : i32, i32
  }
  func.func @transform_18(%arg0: i32) -> (i32, i32) {
    %c0_i32 = arith.constant 0 : i32
    %c0_i32_0 = arith.constant 0 : i32
    %c0_i32_1 = arith.constant 0 : i32
    return %c0_i32, %c0_i32_0 : i32, i32
  }
  func.func @transform_19(%arg0: i32) -> (i32, i32) {
    %c0_i32 = arith.constant 0 : i32
    %c0_i32_0 = arith.constant 0 : i32
    %c0_i32_1 = arith.constant 0 : i32
    return %c0_i32, %c0_i32_0 : i32, i32
  }
  func.func @transform_20(%arg0: i32) -> (i32, i32) {
    %c0_i32 = arith.constant 0 : i32
    %c0_i32_0 = arith.constant 0 : i32
    %c0_i32_1 = arith.constant 0 : i32
    return %c0_i32, %c0_i32_0 : i32, i32
  }
  func.func @transform_21(%arg0: i32) -> (i32, i32) {
    %c0_i32 = arith.constant 0 : i32
    %c0_i32_0 = arith.constant 0 : i32
    return %c0_i32, %arg0 : i32, i32
  }
}

</mosaic_0001>

<bundles_post_ra>
// kernel: tpu_custom_call.1
= control target key start
LH: loop header
LB: loop body
LE: loop exit
PB: predicated region body
PF: predicated region fallthrough
CT: control target
= control target key end

     0   :  { %7 = vsyncpa [#allocation3], 0  ;;  %s170_s0 = inlined_call_operand.hbm [shape: f32[8,128], index: 0, kind: input, shape index: {}]   ;;  %s171_s1 = inlined_call_operand.hbm [shape: f32[8,128], index: 1, kind: input, shape index: {}]   ;;  %s172_s2 = inlined_call_operand.hbm [shape: f32[8,128], index: 2, kind: output, shape index: {}]  }
   0x1   :  { %8 = vsyncpa [#allocation6], 0 }
   0x2   :  { %9 = vsyncpa [#allocation4], 0  ;;  %s15_s11 = sshll.u32 %s170_s0, 4  ;;  %s143_s12 = smov [#allocation2]   ;;  %s16_s11 = int_to_ptr.hbm [resolvable:$true] %s15_s11 }
   0x3   :  { %s17_s13 = sshll.u32 %s143_s12, 4  ;;  %s26_s16 = sshll.u32 %s171_s1, 4  ;;  %s18_s13 = int_to_ptr.vmem [resolvable:$true] %s17_s13  ;;  %s27_s16 = int_to_ptr.hbm [resolvable:$true] %s26_s16 }
   0x4   :  { %20 = dma.hbm_to_vmem [thread:$0]  %s16_s11, 128, %s18_s13, [#allocation3]  }
   0x5   :  { %s144_s17 = smov [#allocation5]  }
   0x6   :  { %s28_s18 = sshll.u32 %s144_s17, 4  ;;  %s29_s18 = int_to_ptr.vmem [resolvable:$true] %s28_s18 }
   0x7   :  { %31 = dma.hbm_to_vmem [thread:$0]  %s27_s16, 128, %s29_s18, [#allocation6]  }
   0x8   :  { %137 = dma.done.wait [#allocation3], 128  }
   0x9   :  { %138 = vsyncadd [#allocation3], 4294967168 }
   0xa   :  { %139 = dma.done.wait [#allocation6], 128  }
   0xb   :  { %140 = vsyncadd [#allocation6], 4294967168  ;;  %s145_s19 = smov [#allocation7]   ;;  %s51_s22 = sshll.u32 %s172_s2, 4  ;;  %v40_v0 = vld [vmem:[#allocation5] sm:$0xff]  ;;  %v41_v1 = vld [vmem:[#allocation2] sm:$0xff]  ;;  %s52_s22 = int_to_ptr.hbm [resolvable:$true] %s51_s22 }
   0xc   :  { %s49_s0 = sshll.u32 %s145_s19, 4  ;;  %v42_v2 = vadd.f32 %v41_v1, %v40_v0  ;;  %s50_s0 = int_to_ptr.vmem [resolvable:$true] %s49_s0 }
   0xe   :  { %43 = vst [vmem:[#allocation7] sm:$0xff] %v42_v2 }
   0xf   :  { %54 = dma.vmem_to_hbm [thread:$0]  %s50_s0, 128, %s52_s22, [#allocation4]  }
  0x10   :  { %141 = dma.done.wait [#allocation4], 128  }
  0x11   :  { %142 = vsyncadd [#allocation4], 4294967168 }
  0x12   :  { %59 = vsyncpa [#allocation3], 1 }
  0x13   :  { %60 = vsyncpa [#allocation6], 1 }
  0x14   :  { %61 = vsyncpa [#allocation4], 1 }

// kernel: fwd.1
= control target key start
LH: loop header
LB: loop body
LE: loop exit
PB: predicated region body
PF: predicated region fallthrough
CT: control target
= control target key end

     0   :  { %v13545_v0 = vmov 0   ;;  %vm1303_vm0 = vcmask 261120   ;;  %s21898_s2 = inlined_call_operand.vmem [shape: f32[1024,1], index: 2, kind: input, shape index: {}]   ;;  %s21899_s0 = inlined_call_operand.vmem [shape: bf16[32,128], index: 0, kind: input, shape index: {}]   ;;  %s21900_s1 = inlined_call_operand.vmem [shape: bf16[1024,32], index: 1, kind: input, shape index: {}]   ;;  %s21901_s3 = inlined_call_operand.vmem [shape: bf16[512,1024], index: 3, kind: input, shape index: {}]   ;;  %s21902_s4 = inlined_call_operand.vmem [shape: f32[512,1], index: 4, kind: input, shape index: {}]   ;;  %s21903_s6 = inlined_call_operand.vmem [shape: f32[512,1], index: 6, kind: input, shape index: {}]   ;;  %s21904_s8 = inlined_call_operand.vmem [shape: f32[256,1], index: 8, kind: input, shape index: {}]   ;;  %s21905_s10 = inlined_call_operand.vmem [shape: f32[256,1], index: 10, kind: input, shape index: {}]   ;;  %s21906_s12 = inlined_call_operand.vmem [shape: f32[256,1], index: 12, kind: input, shape index: {}]   ;;  %s21907_s14 = inlined_call_operand.vmem [shape: f32[128,1], index: 14, kind: input, shape index: {}]   ;;  %s21908_s16 = inlined_call_operand.vmem [shape: f32[128,1], index: 16, kind: input, shape index: {}]   ;;  %s21909_s18 = inlined_call_operand.vmem [shape: f32[128,1], index: 18, kind: input, shape index: {}]   ;;  %s21910_s19 = inlined_call_operand.vmem [shape: f32[128,1], index: 19, kind: input, shape index: {}]   ;;  %s21911_s20 = inlined_call_operand.<no memory space> [shape: f32[1,1], index: 20, kind: input, shape index: {}]   ;;  %s21912_s5 = inlined_call_operand.vmem [shape: bf16[512,512], index: 5, kind: input, shape index: {}]   ;;  %s21913_s7 = inlined_call_operand.vmem [shape: bf16[256,512], index: 7, kind: input, shape index: {}]   ;;  %s21914_s9 = inlined_call_operand.vmem [shape: bf16[256,256], index: 9, kind: input, shape index: {}]   ;;  %s21915_s11 = inlined_call_operand.vmem [shape: bf16[256,256], index: 11, kind: input, shape index: {}]   ;;  %s21916_s13 = inlined_call_operand.vmem [shape: bf16[128,256], index: 13, kind: input, shape index: {}]   ;;  %s21917_s15 = inlined_call_operand.vmem [shape: bf16[128,128], index: 15, kind: input, shape index: {}]   ;;  %s21918_s17 = inlined_call_operand.vmem [shape: bf16[128,128], index: 17, kind: input, shape index: {}]   ;;  %s21919_s21 = inlined_call_operand.vmem [shape: f32[1,128], index: 21, kind: output, shape index: {}]  }
   0x1   :  { %21926 = sst [smem:[#allocation139_spill]] %s21898_s2  ;;  %13544 = vset.pattern.permute.xlu2 %v13545_v0  ;;  %13543 = vset.pattern.permute.xlu1 %v13545_v0 }
   0x2   :  { %21927 = sst [smem:[#allocation140_spill]] %s21899_s0  ;;  %13542 = vset.pattern.permute.xlu0 %v13545_v0 }
   0x3   :  { %21928 = sst [smem:[#allocation141_spill]] %s21900_s1 }
   0x4   :  { %21929 = sst [smem:[#allocation142_spill]] %s21901_s3 }
   0x5   :  { %21930 = sst [smem:[#allocation143_spill]] %s21902_s4 }
   0x6   :  { %21931 = sst [smem:[#allocation144_spill]] %s21903_s6 }
   0x7   :  { %s21932_s26 = sld [smem:[#allocation139_spill]] }
   0x8   :  { %s21933_s30 = sld [smem:[#allocation140_spill]] }
   0x9   :  { %s21934_s29 = sld [smem:[#allocation141_spill]] }
   0xa   :  { %s21941_s28 = sld [smem:[#allocation142_spill]] }
   0xb   :  { %s21951_s22 = sld [smem:[#allocation143_spill]] }
   0xc   :  { %s22000_s24 = sld [smem:[#allocation144_spill]] }
   0xd   :  { %v217_v1 = vld [vmem:[%s21932_s26 + $0x70] sm:$0xff]  ;;  %v215_v2 = vld [vmem:[%s21932_s26 + $0x60] sm:$0xff]  ;;  %v216_v6 = vld [vmem:[%s21932_s26 + $0x68] sm:$0xff] }
   0xe   :  { %v213_v3 = vld [vmem:[%s21932_s26 + $0x50] sm:$0xff]  ;;  %393 = vperm.xlu1 %13543, %v215_v2   ;;  %v12932_v4 = vld [vmem:[%s21933_s30 + $0x8] sm:$0xff]  ;;  %403 = vperm.xlu0 %13542, %v217_v1   ;;  %v12931_v5 = vld [vmem:[%s21933_s30] sm:$0xff] }
   0xf   :  { %383 = vperm.xlu2 %13544, %v213_v3   ;;  %1502 = vmatpush.bf16.msra.mxu0 %v12932_v4  ;;  %v218_v7 = vld [vmem:[%s21932_s26 + $0x78] sm:$0xff]  ;;  %v12933_v9 = vld [vmem:[%s21934_s29] sm:$0xff]  ;;  %v212_v10 = vld [vmem:[%s21932_s26 + $0x48] sm:$0xff] }
  0x10   :  { %v214_v8 = vld [vmem:[%s21932_s26 + $0x58] sm:$0xff]  ;;  %v211_v11 = vld [vmem:[%s21932_s26 + $0x40] sm:$0xff]  ;;  %v209_v12 = vld [vmem:[%s21932_s26 + $0x30] sm:$0xff] }
  0x11   :  { %v207_v13 = vld [vmem:[%s21932_s26 + $0x20] sm:$0xff]  ;;  %v210_v14 = vld [vmem:[%s21932_s26 + $0x38] sm:$0xff]  ;;  %v208_v15 = vld [vmem:[%s21932_s26 + $0x28] sm:$0xff] }
  0x12   :  { %v12934_v16 = vld [vmem:[%s21934_s29 + $0x8] sm:$0xff]  ;;  %v206_v17 = vld [vmem:[%s21932_s26 + $0x18] sm:$0xff]  ;;  %v205_v18 = vld [vmem:[%s21932_s26 + $0x10] sm:$0xff] }
  0x13   :  { %1503 = vmatpush.bf16.msra.mxu0 %v12931_v5  ;;  %v203_v19 = vld [vmem:[%s21932_s26] sm:$0xff]  ;;  %v233_v20 = vld [vmem:[%s21932_s26 + $0xf0] sm:$0xff]  ;;  %v204_v21 = vld [vmem:[%s21932_s26 + $0x8] sm:$0xff] }
  0x14   :  { %v234_v22 = vld [vmem:[%s21932_s26 + $0xf8] sm:$0xff]  ;;  %v12935_v23 = vld [vmem:[%s21934_s29 + $0x10] sm:$0xff]  ;;  %v231_v26 = vld [vmem:[%s21932_s26 + $0xe0] sm:$0xff] }
  0x15   :  { %v250_v24 = vld [vmem:[%s21932_s26 + $0x178] sm:$0xff]  ;;  %v249_v25 = vld [vmem:[%s21932_s26 + $0x170] sm:$0xff]  ;;  %v247_v27 = vld [vmem:[%s21932_s26 + $0x160] sm:$0xff] }
  0x16   :  { %398 = vperm.xlu1 %13543, %v216_v6   ;;  %408 = vperm.xlu0 %13542, %v218_v7   ;;  %v232_v28 = vld [vmem:[%s21932_s26 + $0xe8] sm:$0xff]  ;;  %v12936_v30 = vld [vmem:[%s21934_s29 + $0x18] sm:$0xff]  ;;  %v229_v32 = vld [vmem:[%s21932_s26 + $0xd0] sm:$0xff] }
  0x17   :  { %388 = vperm.xlu2 %13544, %v214_v8   ;;  %10691 = vmatmul.msk.bf16.vlgmr.msra.gmra.mxu0 %vm1303_vm0, %v12933_v9  ;;  %v248_v29 = vld [vmem:[%s21932_s26 + $0x168] sm:$0xff]  ;;  %v230_v31 = vld [vmem:[%s21932_s26 + $0xd8] sm:$0xff]  ;;  %v245_v33 = vld [vmem:[%s21932_s26 + $0x150] sm:$0xff] }
  0x18   :  { %v227_v34 = vld [vmem:[%s21932_s26 + $0xc0] sm:$0xff]  ;;  %v246_v35 = vld [vmem:[%s21932_s26 + $0x158] sm:$0xff]  ;;  %v228_v36 = vld [vmem:[%s21932_s26 + $0xc8] sm:$0xff] }
  0x19   :  { %v12937_v37 = vld [vmem:[%s21934_s29 + $0x20] sm:$0xff]  ;;  %v266_v38 = vld [vmem:[%s21932_s26 + $0x1f8] sm:$0xff]  ;;  %v265_v39 = vld [vmem:[%s21932_s26 + $0x1f0] sm:$0xff] }
  0x1a   :  { %v243_v40 = vld [vmem:[%s21932_s26 + $0x140] sm:$0xff]  ;;  %v225_v41 = vld [vmem:[%s21932_s26 + $0xb0] sm:$0xff]  ;;  %v244_v42 = vld [vmem:[%s21932_s26 + $0x148] sm:$0xff] }
  0x1b   :  { %v226_v43 = vld [vmem:[%s21932_s26 + $0xb8] sm:$0xff]  ;;  %v12938_v44 = vld [vmem:[%s21934_s29 + $0x28] sm:$0xff]  ;;  %v263_v47 = vld [vmem:[%s21932_s26 + $0x1e0] sm:$0xff] }
  0x1c   :  { %v264_v46 = vld [vmem:[%s21932_s26 + $0x1e8] sm:$0xff]  ;;  %v241_v48 = vld [vmem:[%s21932_s26 + $0x130] sm:$0xff]  ;;  %v223_v50 = vld [vmem:[%s21932_s26 + $0xa0] sm:$0xff] }
  0x1d   :  { %v242_v51 = vld [vmem:[%s21932_s26 + $0x138] sm:$0xff]  ;;  %v224_v52 = vld [vmem:[%s21932_s26 + $0xa8] sm:$0xff]  ;;  %v12939_v53 = vld [vmem:[%s21934_s29 + $0x30] sm:$0xff] }
  0x1e   :  { %378 = vperm.xlu1 %13543, %v212_v10   ;;  %373 = vperm.xlu0 %13542, %v211_v11   ;;  %v262_v55 = vld [vmem:[%s21932_s26 + $0x1d8] sm:$0xff]  ;;  %v261_v56 = vld [vmem:[%s21932_s26 + $0x1d0] sm:$0xff]  ;;  %v239_v57 = vld [vmem:[%s21932_s26 + $0x120] sm:$0xff] }
  0x1f   :  { %363 = vperm.xlu2 %13544, %v209_v12   ;;  %v221_v61 = vld [vmem:[%s21932_s26 + $0x90] sm:$0xff]  ;;  %v240_v62 = vld [vmem:[%s21932_s26 + $0x128] sm:$0xff]  ;;  %v222_v63 = vld [vmem:[%s21932_s26 + $0x98] sm:$0xff] }
  0x20   :  { %v12940_v0 = vld [vmem:[%s21934_s29 + $0x38] sm:$0xff]  ;;  %v260_v4 = vld [vmem:[%s21932_s26 + $0x1c8] sm:$0xff]  ;;  %v259_v5 = vld [vmem:[%s21932_s26 + $0x1c0] sm:$0xff] }
  0x21   :  { %v237_v6 = vld [vmem:[%s21932_s26 + $0x110] sm:$0xff]  ;;  %v219_v10 = vld [vmem:[%s21932_s26 + $0x80] sm:$0xff]  ;;  %v238_v11 = vld [vmem:[%s21932_s26 + $0x118] sm:$0xff] }
  0x22   :  { %v220_v12 = vld [vmem:[%s21932_s26 + $0x88] sm:$0xff] }
  0x26   :  { %353 = vperm.xlu1 %13543, %v207_v13   ;;  %368 = vperm.xlu0 %13542, %v210_v14   ;;  %v12941_v13 = vld [vmem:[%s21934_s29 + $0x40] sm:$0xff] }
  0x27   :  { %358 = vperm.xlu2 %13544, %v208_v15   ;;  %10692 = vmatmul.msk.bf16.gmra.mxu0 %vm1303_vm0, %v12934_v16 }
  0x2e   :  { %348 = vperm.xlu1 %13543, %v206_v17   ;;  %343 = vperm.xlu0 %13542, %v205_v18   ;;  %v258_v18 = vld [vmem:[%s21932_s26 + $0x1b8] sm:$0xff] }
  0x2f   :  { %333 = vperm.xlu2 %13544, %v203_v19   ;;  %v257_v19 = vld [vmem:[%s21932_s26 + $0x1b0] sm:$0xff] }
  0x36   :  { %483 = vperm.xlu1 %13543, %v233_v20   ;;  %338 = vperm.xlu0 %13542, %v204_v21   ;;  %v235_v20 = vld [vmem:[%s21932_s26 + $0x100] sm:$0xff] }
  0x37   :  { %488 = vperm.xlu2 %13544, %v234_v22   ;;  %10693 = vmatmul.msk.bf16.gmra.mxu0 %vm1303_vm0, %v12935_v23 }
  0x3e   :  { %568 = vperm.xlu1 %13543, %v250_v24   ;;  %563 = vperm.xlu0 %13542, %v249_v25   ;;  %v255_v25 = vld [vmem:[%s21932_s26 + $0x1a0] sm:$0xff] }
  0x3f   :  { %473 = vperm.xlu2 %13544, %v231_v26   ;;  %v236_v26 = vld [vmem:[%s21932_s26 + $0x108] sm:$0xff] }
  0x46   :  { %553 = vperm.xlu1 %13543, %v247_v27   ;;  %478 = vperm.xlu0 %13542, %v232_v28   ;;  %v256_v27 = vld [vmem:[%s21932_s26 + $0x1a8] sm:$0xff] }
  0x47   :  { %558 = vperm.xlu2 %13544, %v248_v29   ;;  %10694 = vmatmul.msk.bf16.gmra.mxu0 %vm1303_vm0, %v12936_v30  ;;  %v12942_v28 = vld [vmem:[%s21934_s29 + $0x48] sm:$0xff] }
  0x4e   :  { %468 = vperm.xlu1 %13543, %v230_v31   ;;  %463 = vperm.xlu0 %13542, %v229_v32  }
  0x4f   :  { %543 = vperm.xlu2 %13544, %v245_v33  }
  0x56   :  { %453 = vperm.xlu1 %13543, %v227_v34   ;;  %548 = vperm.xlu0 %13542, %v246_v35   ;;  %v254_v35 = vld [vmem:[%s21932_s26 + $0x198] sm:$0xff] }
  0x57   :  { %458 = vperm.xlu2 %13544, %v228_v36   ;;  %10695 = vmatmul.msk.bf16.gmra.mxu0 %vm1303_vm0, %v12937_v37 }
  0x5e   :  { %648 = vperm.xlu1 %13543, %v266_v38   ;;  %643 = vperm.xlu0 %13542, %v265_v39   ;;  %v253_v39 = vld [vmem:[%s21932_s26 + $0x190] sm:$0xff] }
  0x5f   :  { %533 = vperm.xlu2 %13544, %v243_v40   ;;  %v251_v40 = vld [vmem:[%s21932_s26 + $0x180] sm:$0xff] }
  0x66   :  { %443 = vperm.xlu1 %13543, %v225_v41   ;;  %538 = vperm.xlu0 %13542, %v244_v42  }
  0x67   :  { %448 = vperm.xlu2 %13544, %v226_v43   ;;  %10696 = vmatmul.msk.bf16.gmra.mxu0 %vm1303_vm0, %v12938_v44 }
  0x69   :  { %v13794_v45 = vpop.permute.xlu2 %383 }
  0x6e   :  { %638 = vperm.xlu1 %13543, %v264_v46   ;;  %633 = vperm.xlu0 %13542, %v263_v47  }
  0x6f   :  { %523 = vperm.xlu2 %13544, %v241_v48  }
  0x71   :  { %v13805_v49 = vpop.permute.xlu2 %388 }
  0x76   :  { %433 = vperm.xlu1 %13543, %v223_v50   ;;  %528 = vperm.xlu0 %13542, %v242_v51   ;;  %v281_v51 = vld [vmem:[%s21932_s26 + $0x270] sm:$0xff] }
  0x77   :  { %438 = vperm.xlu2 %13544, %v224_v52   ;;  %10697 = vmatmul.msk.bf16.gmra.mxu0 %vm1303_vm0, %v12939_v53  ;;  %v252_v52 = vld [vmem:[%s21932_s26 + $0x188] sm:$0xff]  ;;  %v282_v53 = vld [vmem:[%s21932_s26 + $0x278] sm:$0xff] }
  0x79   :  { %v13820_v54 = vpop.permute.xlu2 %363 }
  0x7e   :  { %628 = vperm.xlu1 %13543, %v262_v55   ;;  %623 = vperm.xlu0 %13542, %v261_v56   ;;  %v12943_v55 = vld [vmem:[%s21934_s29 + $0x50] sm:$0xff] }
  0x7f   :  { %513 = vperm.xlu2 %13544, %v239_v57  }
  0x80   :  { %v13831_v58 = vpop.permute.xlu1 %393  ;;  %v13833_v59 = vpop.permute.xlu0 %403 }
  0x81   :  { %v13835_v60 = vpop.permute.xlu2 %358 }
  0x86   :  { %423 = vperm.xlu1 %13543, %v221_v61   ;;  %518 = vperm.xlu0 %13542, %v240_v62   ;;  %v298_v62 = vld [vmem:[%s21932_s26 + $0x2f8] sm:$0xff] }
  0x87   :  { %428 = vperm.xlu2 %13544, %v222_v63   ;;  %10698 = vmatmul.msk.bf16.gmra.mxu0 %vm1303_vm0, %v12940_v0  ;;  %v297_v0 = vld [vmem:[%s21932_s26 + $0x2f0] sm:$0xff] }
  0x88   :  { %v13850_v1 = vpop.permute.xlu1 %398  ;;  %v13852_v2 = vpop.permute.xlu0 %408 }
  0x89   :  { %v334_v3 = vpop.permute.xlu2 %333 }
  0x8e   :  { %618 = vperm.xlu1 %13543, %v260_v4   ;;  %613 = vperm.xlu0 %13542, %v259_v5  }
  0x8f   :  { %503 = vperm.xlu2 %13544, %v237_v6  }
  0x90   :  { %v13863_v7 = vpop.permute.xlu1 %378  ;;  %v13865_v8 = vpop.permute.xlu0 %373 }
  0x91   :  { %v13867_v9 = vpop.permute.xlu2 %488 }
  0x94   :  { %v1505_v14 = vpop.f32.mrf.mxu0 }
  0x95   :  { %v1506_v30 = vadd.f32 %v1505_v14, %v334_v3  ;;  %v279_v3 = vld [vmem:[%s21932_s26 + $0x260] sm:$0xff] }
  0x96   :  { %413 = vperm.xlu1 %13543, %v219_v10   ;;  %508 = vperm.xlu0 %13542, %v238_v11  }
  0x97   :  { %418 = vperm.xlu2 %13544, %v220_v12   ;;  %10699 = vmatmul.msk.bf16.gmra.mxu0 %vm1303_vm0, %v12941_v13  ;;  %v1825_v36 = vmax.f32 %v1506_v30, 0.0 }
  0x98   :  { %v354_v15 = vpop.permute.xlu1 %353  ;;  %v13882_v16 = vpop.permute.xlu0 %368 }
  0x99   :  { %v13884_v17 = vpop.permute.xlu2 %473 }
  0x9c   :  { %v1507_v21 = vpop.f32.mrf.mxu0 }
  0x9e   :  { %608 = vperm.xlu1 %13543, %v258_v18   ;;  %603 = vperm.xlu0 %13542, %v257_v19   ;;  %v280_v18 = vld [vmem:[%s21932_s26 + $0x268] sm:$0xff]  ;;  %v12944_v19 = vld [vmem:[%s21934_s29 + $0x58] sm:$0xff] }
  0x9f   :  { %493 = vperm.xlu2 %13544, %v235_v20  }
  0xa0   :  { %v349_v22 = vpop.permute.xlu1 %348  ;;  %v344_v23 = vpop.permute.xlu0 %343 }
  0xa1   :  { %v13895_v24 = vpop.permute.xlu2 %558 }
  0xa4   :  { %v1510_v29 = vpop.f32.mrf.mxu0 }
  0xa5   :  { %v1511_v37 = vadd.f32 %v1510_v29, %v344_v23 }
  0xa6   :  { %593 = vperm.xlu1 %13543, %v255_v25   ;;  %498 = vperm.xlu0 %13542, %v236_v26   ;;  %v278_v25 = vld [vmem:[%s21932_s26 + $0x258] sm:$0xff] }
  0xa7   :  { %598 = vperm.xlu2 %13544, %v256_v27   ;;  %10700 = vmatmul.msk.bf16.gmra.mxu0 %vm1303_vm0, %v12942_v28  ;;  %v1827_v44 = vmax.f32 %v1511_v37, 0.0  ;;  %v277_v27 = vld [vmem:[%s21932_s26 + $0x250] sm:$0xff] }
  0xa8   :  { %v13910_v31 = vpop.permute.xlu1 %483  ;;  %v339_v32 = vpop.permute.xlu0 %338  ;;  %v293_v28 = vld [vmem:[%s21932_s26 + $0x2d0] sm:$0xff] }
  0xa9   :  { %v13912_v33 = vpop.permute.xlu2 %543  ;;  %v1508_v34 = vadd.f32 %v1507_v21, %v339_v32 }
  0xab   :  { %v1826_v38 = vmax.f32 %v1508_v34, 0.0 }
  0xac   :  { %v1512_v41 = vpop.f32.mrf.mxu0 }
  0xad   :  { %v1513_v42 = vadd.f32 %v1512_v41, %v349_v22  ;;  %v13923_v43 = vpack.c.bf16 %v1826_v38, %v1825_v36  ;;  %v313_v38 = vld [vmem:[%s21932_s26 + $0x370] sm:$0xff] }
  0xae   :  { %588 = vperm.xlu1 %13543, %v254_v35   ;;  %583 = vperm.xlu0 %13542, %v253_v39   ;;  %v314_v39 = vld [vmem:[%s21932_s26 + $0x378] sm:$0xff] }
  0xaf   :  { %573 = vperm.xlu2 %13544, %v251_v40   ;;  %v1828_v46 = vmax.f32 %v1513_v42, 0.0  ;;  %v12945_v40 = vld [vmem:[%s21934_s29 + $0x60] sm:$0xff] }
  0xb0   :  { %v13925_v47 = vpop.permute.xlu1 %568  ;;  %v13957_v5 = vpop.permute.xlu0 %563 }
  0xb1   :  { %v13927_v48 = vpop.permute.xlu2 %458  ;;  %v13929_v50 = vpack.c.bf16 %v1828_v46, %v1827_v44  ;;  %v276_v46 = vld [vmem:[%s21932_s26 + $0x248] sm:$0xff] }
  0xb4   :  { %v1515_v56 = vpop.f32.mrf.mxu0 }
  0xb5   :  { %v1516_v63 = vadd.f32 %v1515_v56, %v354_v15  ;;  %v295_v15 = vld [vmem:[%s21932_s26 + $0x2e0] sm:$0xff] }
  0xb6   :  { %723 = vperm.xlu1 %13543, %v281_v51   ;;  %578 = vperm.xlu0 %13542, %v252_v52   ;;  %v275_v52 = vld [vmem:[%s21932_s26 + $0x240] sm:$0xff] }
  0xb7   :  { %728 = vperm.xlu2 %13544, %v282_v53   ;;  %10701 = vmatmul.msk.bf16.gmra.mxu0 %vm1303_vm0, %v12943_v55  ;;  %v1829_v10 = vmax.f32 %v1516_v63, 0.0  ;;  %v329_v53 = vld [vmem:[%s21932_s26 + $0x3f0] sm:$0xff] }
  0xb8   :  { %v13944_v57 = vpop.permute.xlu1 %553  ;;  %v13978_v21 = vpop.permute.xlu0 %478 }
  0xb9   :  { %v13946_v61 = vpop.permute.xlu2 %533 }
  0xbc   :  { %v1517_v4 = vpop.f32.mrf.mxu0 }
  0xbd   :  { %v1518_v6 = vadd.f32 %v1517_v4, %v13835_v60  ;;  %v296_v60 = vld [vmem:[%s21932_s26 + $0x2e8] sm:$0xff] }
  0xbe   :  { %808 = vperm.xlu1 %13543, %v298_v62   ;;  %803 = vperm.xlu0 %13542, %v297_v0   ;;  %v291_v62 = vld [vmem:[%s21932_s26 + $0x2c0] sm:$0xff]  ;;  %v330_v0 = vld [vmem:[%s21932_s26 + $0x3f8] sm:$0xff]  ;;  %v12946_v4 = vld [vmem:[%s21934_s29 + $0x68] sm:$0xff] }
  0xbf   :  { %713 = vperm.xlu2 %13544, %v279_v3   ;;  %v1830_v11 = vmax.f32 %v1518_v6, 0.0  ;;  %v292_v3 = vld [vmem:[%s21932_s26 + $0x2c8] sm:$0xff] }
  0xc0   :  { %v13960_v12 = vpop.permute.xlu1 %468 }
  0xc1   :  { %v13962_v13 = vpop.permute.xlu2 %448  ;;  %v13964_v14 = vpack.c.bf16 %v1830_v11, %v1829_v10 }
  0xc4   :  { %v1520_v20 = vpop.f32.mrf.mxu0 }
  0xc5   :  { %v1521_v26 = vadd.f32 %v1520_v20, %v13820_v54  ;;  %v14000_v54 = vpop.permute.xlu0 %463 }
  0xc6   :  { %793 = vperm.xlu1 %13543, %v295_v15   ;;  %718 = vperm.xlu0 %13542, %v280_v18   ;;  %v312_v15 = vld [vmem:[%s21932_s26 + $0x368] sm:$0xff]  ;;  %v311_v18 = vld [vmem:[%s21932_s26 + $0x360] sm:$0xff] }
  0xc7   :  { %798 = vperm.xlu2 %13544, %v296_v60   ;;  %10702 = vmatmul.msk.bf16.gmra.mxu0 %vm1303_vm0, %v12944_v19  ;;  %v1831_v32 = vmax.f32 %v1521_v26, 0.0  ;;  %v273_v60 = vld [vmem:[%s21932_s26 + $0x230] sm:$0xff]  ;;  %v327_v26 = vld [vmem:[%s21932_s26 + $0x3e0] sm:$0xff] }
  0xc8   :  { %v13981_v22 = vpop.permute.xlu1 %453 }
  0xc9   :  { %v13983_v23 = vpop.permute.xlu2 %523 }
  0xcc   :  { %v1522_v29 = vpop.f32.mrf.mxu0 }
  0xcd   :  { %v1523_v30 = vadd.f32 %v1522_v29, %v13882_v16  ;;  %v294_v16 = vld [vmem:[%s21932_s26 + $0x2d8] sm:$0xff]  ;;  %v14026_v51 = vpop.permute.xlu0 %548  ;;  %v328_v29 = vld [vmem:[%s21932_s26 + $0x3e8] sm:$0xff] }
  0xce   :  { %708 = vperm.xlu1 %13543, %v278_v25   ;;  %703 = vperm.xlu0 %13542, %v277_v27  }
  0xcf   :  { %783 = vperm.xlu2 %13544, %v293_v28   ;;  %v1832_v34 = vmax.f32 %v1523_v30, 0.0  ;;  %v274_v28 = vld [vmem:[%s21932_s26 + $0x238] sm:$0xff]  ;;  %v12947_v30 = vld [vmem:[%s21934_s29 + $0x70] sm:$0xff] }
  0xd0   :  { %v13996_v35 = vpop.permute.xlu1 %648 }
  0xd1   :  { %v13998_v36 = vpop.permute.xlu2 %438  ;;  %v14002_v37 = vpack.c.bf16 %v1832_v34, %v1831_v32 }
  0xd4   :  { %v14016_v41 = vpop.f32.mrf.mxu0 }
  0xd5   :  { %v14054_v10 = vpop.permute.xlu0 %643 }
  0xd6   :  { %883 = vperm.xlu1 %13543, %v313_v38   ;;  %788 = vperm.xlu0 %13542, %v294_v16   ;;  %v290_v16 = vld [vmem:[%s21932_s26 + $0x2b8] sm:$0xff] }
  0xd7   :  { %888 = vperm.xlu2 %13544, %v314_v39   ;;  %10703 = vmatmul.msk.bf16.gmra.mxu0 %vm1303_vm0, %v12945_v40  ;;  %v289_v39 = vld [vmem:[%s21932_s26 + $0x2b0] sm:$0xff] }
  0xd8   :  { %v14019_v42 = vpop.permute.xlu1 %443  ;;  %v309_v40 = vld [vmem:[%s21932_s26 + $0x350] sm:$0xff] }
  0xd9   :  { %v14021_v44 = vpop.permute.xlu2 %513 }
  0xdc   :  { %v14034_v55 = vpop.f32.mrf.mxu0 }
  0xdd   :  { %v14070_v25 = vpop.permute.xlu0 %538 }
  0xde   :  { %698 = vperm.xlu1 %13543, %v276_v46   ;;  %693 = vperm.xlu0 %13542, %v275_v52  }
  0xdf   :  { %963 = vperm.xlu2 %13544, %v329_v53  }
  0xe0   :  { %v14036_v56 = vpop.permute.xlu1 %638 }
  0xe1   :  { %v14041_v63 = vpop.permute.xlu2 %428 }
  0xe4   :  { %v14052_v6 = vpop.f32.mrf.mxu0 }
  0xe5   :  { %v14089_v38 = vpop.permute.xlu0 %633 }
  0xe6   :  { %773 = vperm.xlu1 %13543, %v291_v62   ;;  %968 = vperm.xlu0 %13542, %v330_v0   ;;  %21936 = vst [vmem:[#allocation4_spill] sm:$0xff] %v14089_v38  ;;  %v271_v62 = vld [vmem:[%s21932_s26 + $0x220] sm:$0xff] }
  0xe7   :  { %778 = vperm.xlu2 %13544, %v292_v3   ;;  %10704 = vmatmul.msk.bf16.gmra.mxu0 %vm1303_vm0, %v12946_v4  ;;  %v310_v3 = vld [vmem:[%s21932_s26 + $0x358] sm:$0xff]  ;;  %v272_v4 = vld [vmem:[%s21932_s26 + $0x228] sm:$0xff] }
  0xe8   :  { %v14057_v11 = vpop.permute.xlu1 %433 }
  0xe9   :  { %v14068_v20 = vpop.permute.xlu2 %503 }
  0xec   :  { %v1532_v19 = vpop.f32.mrf.mxu0 }
  0xed   :  { %v14107_v0 = vpop.permute.xlu0 %528 }
  0xee   :  { %878 = vperm.xlu1 %13543, %v312_v15   ;;  %873 = vperm.xlu0 %13542, %v311_v18   ;;  %v12948_v15 = vld [vmem:[%s21934_s29 + $0x78] sm:$0xff] }
  0xef   :  { %683 = vperm.xlu2 %13544, %v273_v60  }
  0xf0   :  { %v14075_v27 = vpop.permute.xlu1 %628 }
  0xf1   :  { %21935 = vst [vmem:[#allocation3_spill] sm:$0xff] %v14075_v27  ;;  %v14086_v34 = vpop.permute.xlu2 %418 }
  0xf4   :  { %v1535_v32 = vpop.f32.mrf.mxu0 }
  0xf6   :  { %953 = vperm.xlu1 %13543, %v327_v26   ;;  %688 = vperm.xlu0 %13542, %v274_v28   ;;  %v326_v26 = vld [vmem:[%s21932_s26 + $0x3d8] sm:$0xff] }
  0xf7   :  { %958 = vperm.xlu2 %13544, %v328_v29   ;;  %10705 = vmatmul.msk.bf16.gmra.mxu0 %vm1303_vm0, %v12947_v30  ;;  %v325_v30 = vld [vmem:[%s21932_s26 + $0x3d0] sm:$0xff] }
  0xf8   :  { %v14100_v52 = vpop.permute.xlu1 %423 }
  0xf9   :  { %v14102_v53 = vpop.permute.xlu2 %493 }
  0xfc   :  { %v1537_v46 = vpop.f32.mrf.mxu0 }
  0xfe   :  { %768 = vperm.xlu1 %13543, %v290_v16   ;;  %763 = vperm.xlu0 %13542, %v289_v39   ;;  %v287_v16 = vld [vmem:[%s21932_s26 + $0x2a0] sm:$0xff] }
  0xff   :  { %863 = vperm.xlu2 %13544, %v309_v40   ;;  %v14133_v40 = vpop.permute.xlu0 %623 }
 0x100   :  { %v14118_v60 = vpop.permute.xlu1 %618  ;;  %21938 = vst [vmem:[#allocation6_spill] sm:$0xff] %v14133_v40  ;;  %v307_v40 = vld [vmem:[%s21932_s26 + $0x340] sm:$0xff] }
 0x101   :  { %21937 = vst [vmem:[#allocation5_spill] sm:$0xff] %v14118_v60  ;;  %v14124_v28 = vpop.permute.xlu2 %598 }
 0x104   :  { %v1540_v18 = vpop.f32.mrf.mxu0 }
 0x105   :  { %v1541_v29 = vadd.f32 %v1540_v18, %v13833_v59  ;;  %v1536_v59 = vadd.f32 %v1535_v32, %v13831_v58  ;;  %v1533_v18 = vadd.f32 %v1532_v19, %v13805_v49  ;;  %v288_v58 = vld [vmem:[%s21932_s26 + $0x2a8] sm:$0xff]  ;;  %v12949_v19 = vld [vmem:[%s21934_s29 + $0x80] sm:$0xff] }
 0x106   :  { %673 = vperm.xlu1 %13543, %v271_v62   ;;  %868 = vperm.xlu0 %13542, %v310_v3   ;;  %v1538_v62 = vadd.f32 %v1537_v46, %v13850_v1  ;;  %v1531_v1 = vadd.f32 %v14052_v6, %v13794_v45  ;;  %v308_v49 = vld [vmem:[%s21932_s26 + $0x348] sm:$0xff]  ;;  %v1528_v46 = vadd.f32 %v14034_v55, %v13863_v7  ;;  %v270_v7 = vld [vmem:[%s21932_s26 + $0x218] sm:$0xff] }
 0x107   :  { %678 = vperm.xlu2 %13544, %v272_v4   ;;  %10706 = vmatmul.msk.bf16.gmra.mxu0 %vm1303_vm0, %v12948_v15  ;;  %v1839_v4 = vmax.f32 %v1541_v29, 0.0 }
 0x108   :  { %v1838_v60 = vmax.f32 %v1538_v62, 0.0  ;;  %v414_v27 = vpop.permute.xlu1 %413  ;;  %v1835_v29 = vmax.f32 %v1531_v1, 0.0 }
 0x109   :  { %v14155_v45 = vpop.permute.xlu2 %573 }
 0x10c   :  { %v1542_v39 = vpop.f32.mrf.mxu0 }
 0x10d   :  { %v1543_v3 = vadd.f32 %v1542_v39, %v13852_v2  ;;  %v1837_v2 = vmax.f32 %v1536_v59, 0.0 }
 0x10e   :  { %948 = vperm.xlu1 %13543, %v326_v26   ;;  %943 = vperm.xlu0 %13542, %v325_v30   ;;  %v1836_v26 = vmax.f32 %v1533_v18, 0.0  ;;  %v14159_v30 = vpop.permute.xlu0 %518 }
 0x10f   :  { %753 = vperm.xlu2 %13544, %v287_v16   ;;  %v1840_v15 = vmax.f32 %v1543_v3, 0.0  ;;  %v1959_v6 = vpack.c.bf16 %v1838_v60, %v1837_v2  ;;  %v1834_v16 = vmax.f32 %v1528_v46, 0.0  ;;  %v285_v2 = vld [vmem:[%s21932_s26 + $0x290] sm:$0xff]  ;;  %v306_v46 = vld [vmem:[%s21932_s26 + $0x338] sm:$0xff] }
 0x110   :  { %v1958_v39 = vpack.c.bf16 %v1836_v26, %v1835_v29  ;;  %v305_v26 = vld [vmem:[%s21932_s26 + $0x330] sm:$0xff]  ;;  %v10757_v29 = vld [vmem:[%s21941_s28] sm:$0xf] }
 0x111   :  { %v1960_v38 = vpack.c.bf16 %v1840_v15, %v1839_v4  ;;  %v14174_v4 = vpop.permute.xlu2 %728 }
 0x112   :  { %21939 = vst [vmem:[#allocation7_spill] sm:$0xff] %v14174_v4 }
 0x113   :  { %3937 = vmatpush.bf16.msra.mxu1 %v1960_v38  ;;  %v1526_v38 = vadd.f32 %v14016_v41, %v13865_v8  ;;  %v269_v8 = vld [vmem:[%s21932_s26 + $0x210] sm:$0xff]  ;;  %v323_v41 = vld [vmem:[%s21932_s26 + $0x3c0] sm:$0xff] }
 0x114   :  { %v1545_v32 = vpop.f32.mrf.mxu0 }
 0x115   :  { %v1833_v55 = vmax.f32 %v1526_v38, 0.0  ;;  %v1546_v60 = vadd.f32 %v1545_v32, %v414_v27 }
 0x116   :  { %853 = vperm.xlu1 %13543, %v307_v40   ;;  %758 = vperm.xlu0 %13542, %v288_v58   ;;  %v14165_v40 = vpop.permute.xlu1 %608  ;;  %v14176_v18 = vpop.permute.xlu0 %613  ;;  %v286_v58 = vld [vmem:[%s21932_s26 + $0x298] sm:$0xff] }
 0x117   :  { %858 = vperm.xlu2 %13544, %v308_v49   ;;  %10707 = vmatmul.msk.bf16.gmra.mxu0 %vm1303_vm0, %v12949_v19  ;;  %v1957_v59 = vpack.c.bf16 %v1834_v16, %v1833_v55  ;;  %v1841_v15 = vmax.f32 %v1546_v60, 0.0  ;;  %v12950_v49 = vld [vmem:[%s21934_s29 + $0x88] sm:$0xff]  ;;  %v13001_v16 = vld [vmem:[%s21941_s28 + $0x1c] sm:$0xf0] }
 0x118   :  { %3938 = vmatpush.bf16.msra.mxu1 %v1959_v6 }
 0x11c   :  { %3939 = vmatpush.bf16.msra.mxu1 %v1958_v39  ;;  %v1547_v62 = vpop.f32.mrf.mxu0 }
 0x11d   :  { %v1548_v3 = vadd.f32 %v1547_v62, %v14086_v34  ;;  %v324_v34 = vld [vmem:[%s21932_s26 + $0x3c8] sm:$0xff] }
 0x11e   :  { %668 = vperm.xlu1 %13543, %v270_v7   ;;  %663 = vperm.xlu0 %13542, %v269_v8   ;;  %v14193_v32 = vpop.permute.xlu1 %593  ;;  %v14205_v6 = vpop.permute.xlu0 %508 }
 0x11f   :  { %933 = vperm.xlu2 %13544, %v323_v41   ;;  %v1842_v27 = vmax.f32 %v1548_v3, 0.0  ;;  %v321_v41 = vld [vmem:[%s21932_s26 + $0x3b0] sm:$0xff]  ;;  %v322_v3 = vld [vmem:[%s21932_s26 + $0x3b8] sm:$0xff] }
 0x120   :  { %3940 = vmatpush.bf16.msra.mxu1 %v1957_v59 }
 0x121   :  { %v14178_v1 = vpack.c.bf16 %v1842_v27, %v1841_v15 }
 0x124   :  { %3941 = vmatpush.bf16.msra.mxu1 %v14002_v37  ;;  %v1550_v19 = vpop.f32.mrf.mxu0  ;;  %v14197_v37 = vpop.permute.xlu2 %713 }
 0x125   :  { %21940 = vst [vmem:[#allocation8_spill] sm:$0xff] %v14197_v37  ;;  %v1551_v38 = vadd.f32 %v1550_v19, %v14100_v52  ;;  %v10758_v52 = vor.u32 %v13001_v16, %v10757_v29  ;;  %v10789_v19 = vld [vmem:[%s21941_s28 + $0x40] sm:$0xf] }
 0x126   :  { %743 = vperm.xlu1 %13543, %v285_v2   ;;  %938 = vperm.xlu0 %13542, %v324_v34   ;;  %v14238_v15 = vpop.permute.xlu0 %603  ;;  %v284_v2 = vld [vmem:[%s21932_s26 + $0x288] sm:$0xff]  ;;  %v283_v34 = vld [vmem:[%s21932_s26 + $0x280] sm:$0xff] }
 0x127   :  { %748 = vperm.xlu2 %13544, %v286_v58   ;;  %10708 = vmatmul.msk.bf16.gmra.mxu0 %vm1303_vm0, %v12950_v49  ;;  %v1843_v55 = vmax.f32 %v1551_v38, 0.0  ;;  %v303_v49 = vld [vmem:[%s21932_s26 + $0x320] sm:$0xff] }
 0x128   :  { %3942 = vmatpush.bf16.msra.mxu1 %v13964_v14  ;;  %v267_v14 = vld [vmem:[%s21932_s26 + $0x200] sm:$0xff] }
 0x12c   :  { %3943 = vmatpush.bf16.msra.mxu1 %v13929_v50  ;;  %v1552_v39 = vpop.f32.mrf.mxu0  ;;  %v14219_v50 = vpop.permute.xlu1 %588 }
 0x12d   :  { %v1553_v7 = vadd.f32 %v1552_v39, %v14041_v63  ;;  %v14227_v62 = vpop.permute.xlu2 %798  ;;  %v268_v63 = vld [vmem:[%s21932_s26 + $0x208] sm:$0xff] }
 0x12e   :  { %848 = vperm.xlu1 %13543, %v306_v46   ;;  %843 = vperm.xlu0 %13542, %v305_v26   ;;  %21942 = vst [vmem:[#allocation9_spill] sm:$0xff] %v14227_v62  ;;  %v13009_v46 = vld [vmem:[%s21941_s28 + $0x5c] sm:$0xf0]  ;;  %v14262_v29 = vpop.permute.xlu0 %498 }
 0x12f   :  { %653 = vperm.xlu2 %13544, %v267_v14   ;;  %v1844_v60 = vmax.f32 %v1553_v7, 0.0 }
 0x130   :  { %3944 = vmatpush.bf16.msra.mxu1 %v13923_v43  ;;  %v12951_v43 = vld [vmem:[%s21934_s29 + $0x90] sm:$0xff] }
 0x131   :  { %v14222_v8 = vpack.c.bf16 %v1844_v60, %v1843_v55  ;;  %v320_v60 = vld [vmem:[%s21932_s26 + $0x3a8] sm:$0xff] }
 0x133   :  { %3945 = vmatmul.bf16.vlgmr.msra.gmra.mxu1 %v10758_v52  ;;  %v319_v52 = vld [vmem:[%s21932_s26 + $0x3a0] sm:$0xff] }
 0x134   :  { %v1555_v59 = vpop.f32.mrf.mxu0  ;;  %v14241_v27 = vpop.permute.xlu1 %723 }
 0x135   :  { %21943 = vst [vmem:[#allocation10_spill] sm:$0xff] %v14241_v27  ;;  %v1556_v58 = vadd.f32 %v1555_v59, %v14057_v11  ;;  %v14259_v38 = vpop.permute.xlu2 %783  ;;  %v10790_v11 = vor.u32 %v13009_v46, %v10789_v19  ;;  %v302_v59 = vld [vmem:[%s21932_s26 + $0x318] sm:$0xff]  ;;  %v13017_v19 = vld [vmem:[%s21941_s28 + $0x9c] sm:$0xf0] }
 0x136   :  { %923 = vperm.xlu1 %13543, %v321_v41   ;;  %658 = vperm.xlu0 %13542, %v268_v63   ;;  %21944 = vst [vmem:[#allocation11_spill] sm:$0xff] %v14259_v38  ;;  %v12952_v41 = vld [vmem:[%s21934_s29 + $0x98] sm:$0xff]  ;;  %v2283_v38 = vld [vmem:[%s21951_s22 + $0x50] sm:$0xff] }
 0x137   :  { %928 = vperm.xlu2 %13544, %v322_v3   ;;  %10709 = vmatmul.msk.bf16.gmra.mxu0 %vm1303_vm0, %v12951_v43  ;;  %v1845_v16 = vmax.f32 %v1556_v58, 0.0  ;;  %v14283_v43 = vpop.permute.xlu0 %583  ;;  %v317_v58 = vld [vmem:[%s21932_s26 + $0x390] sm:$0xff] }
 0x13c   :  { %v1557_v26 = vpop.f32.mrf.mxu0  ;;  %v14269_v55 = vpop.permute.xlu1 %808 }
 0x13d   :  { %v1558_v14 = vadd.f32 %v1557_v26, %v13998_v36  ;;  %21945 = vst [vmem:[#allocation12_spill] sm:$0xff] %v14269_v55  ;;  %v304_v36 = vld [vmem:[%s21932_s26 + $0x328] sm:$0xff]  ;;  %v14280_v3 = vpop.permute.xlu2 %888 }
 0x13e   :  { %738 = vperm.xlu1 %13543, %v284_v2   ;;  %733 = vperm.xlu0 %13542, %v283_v34   ;;  %21946 = vst [vmem:[#allocation13_spill] sm:$0xff] %v14280_v3  ;;  %v301_v2 = vld [vmem:[%s21932_s26 + $0x310] sm:$0xff] }
 0x13f   :  { %833 = vperm.xlu2 %13544, %v303_v49   ;;  %v1846_v39 = vmax.f32 %v1558_v14, 0.0  ;;  %v10821_v49 = vld [vmem:[%s21941_s28 + $0x80] sm:$0xf] }
 0x141   :  { %v14264_v7 = vpack.c.bf16 %v1846_v39, %v1845_v16 }
 0x143   :  { %3950 = vmatmul.bf16.gmra.mxu1 %v10790_v11 }
 0x144   :  { %v1560_v63 = vpop.f32.mrf.mxu0  ;;  %v14301_v26 = vpop.permute.xlu1 %793 }
 0x145   :  { %v1561_v34 = vadd.f32 %v1560_v63, %v14019_v42  ;;  %21947 = vst [vmem:[#allocation14_spill] sm:$0xff] %v14301_v26  ;;  %v10822_v42 = vor.u32 %v13017_v19, %v10821_v49  ;;  %v14304_v39 = vpop.permute.xlu2 %963  ;;  %v12953_v63 = vld [vmem:[%s21934_s29 + $0xa0] sm:$0xff]  ;;  %v2287_v19 = vld [vmem:[%s21951_s22 + $0x70] sm:$0xff]  ;;  %v2302_v26 = vld [vmem:[%s21951_s22 + $0xe8] sm:$0xff] }
 0x146   :  { %913 = vperm.xlu1 %13543, %v319_v52   ;;  %838 = vperm.xlu0 %13542, %v304_v36   ;;  %21948 = vst [vmem:[#allocation15_spill] sm:$0xff] %v14304_v39  ;;  %v299_v36 = vld [vmem:[%s21932_s26 + $0x300] sm:$0xff] }
 0x147   :  { %918 = vperm.xlu2 %13544, %v320_v60   ;;  %10710 = vmatmul.msk.bf16.gmra.mxu0 %vm1303_vm0, %v12952_v41  ;;  %v1847_v11 = vmax.f32 %v1561_v34, 0.0  ;;  %v14311_v60 = vpop.permute.xlu0 %578  ;;  %v300_v41 = vld [vmem:[%s21932_s26 + $0x308] sm:$0xff] }
 0x148   :  { %v316_v34 = vld [vmem:[%s21932_s26 + $0x388] sm:$0xff] }
 0x14c   :  { %v1562_v46 = vpop.f32.mrf.mxu0 }
 0x14d   :  { %v1563_v14 = vadd.f32 %v1562_v46, %v13962_v13  ;;  %v318_v13 = vld [vmem:[%s21932_s26 + $0x398] sm:$0xff]  ;;  %v14333_v49 = vpop.permute.xlu2 %778  ;;  %v10853_v46 = vld [vmem:[%s21941_s28 + $0xc0] sm:$0xf] }
 0x14e   :  { %828 = vperm.xlu1 %13543, %v302_v59   ;;  %823 = vperm.xlu0 %13542, %v301_v2   ;;  %v14324_v2 = vpop.permute.xlu1 %708  ;;  %21950 = vst [vmem:[#allocation17_spill] sm:$0xff] %v14333_v49 }
 0x14f   :  { %903 = vperm.xlu2 %13544, %v317_v58   ;;  %v1848_v16 = vmax.f32 %v1563_v14, 0.0  ;;  %21949 = vst [vmem:[#allocation16_spill] sm:$0xff] %v14324_v2  ;;  %v315_v58 = vld [vmem:[%s21932_s26 + $0x380] sm:$0xff] }
 0x150   :  { %v13025_v14 = vld [vmem:[%s21941_s28 + $0xdc] sm:$0xf0] }
 0x151   :  { %v14306_v52 = vpack.c.bf16 %v1848_v16, %v1847_v11  ;;  %v14346_v11 = vpop.permute.xlu0 %803  ;;  %v10854_v16 = vor.u32 %v13025_v14, %v10853_v46  ;;  %v2286_v14 = vld [vmem:[%s21951_s22 + $0x68] sm:$0xff] }
 0x152   :  { %21952 = vst [vmem:[#allocation18_spill] sm:$0xff] %v14346_v11  ;;  %v2282_v11 = vld [vmem:[%s21951_s22 + $0x48] sm:$0xff] }
 0x153   :  { %3955 = vmatmul.bf16.gmra.mxu1 %v10822_v42 }
 0x154   :  { %v14322_v59 = vpop.f32.mrf.mxu0 }
 0x156   :  { %813 = vperm.xlu1 %13543, %v299_v36   ;;  %908 = vperm.xlu0 %13542, %v318_v13   ;;  %v14348_v36 = vpop.permute.xlu1 %883  ;;  %v2303_v13 = vld [vmem:[%s21951_s22 + $0xf0] sm:$0xff] }
 0x157   :  { %818 = vperm.xlu2 %13544, %v300_v41   ;;  %10711 = vmatmul.msk.bf16.gmra.mxu0 %vm1303_vm0, %v12953_v63  ;;  %21953 = vst [vmem:[#allocation19_spill] sm:$0xff] %v14348_v36  ;;  %v2288_v41 = vld [vmem:[%s21951_s22 + $0x78] sm:$0xff] }
 0x158   :  { %v2304_v63 = vld [vmem:[%s21951_s22 + $0xf8] sm:$0xff] }
 0x159   :  { %v14366_v46 = vpop.permute.xlu0 %718 }
 0x15a   :  { %21955 = vst [vmem:[#allocation21_spill] sm:$0xff] %v14366_v46 }
 0x15c   :  { %v14344_v42 = vpop.f32.mrf.mxu0 }
 0x15e   :  { %898 = vperm.xlu1 %13543, %v316_v34   ;;  %893 = vperm.xlu0 %13542, %v315_v58   ;;  %v12954_v34 = vld [vmem:[%s21934_s29 + $0xa8] sm:$0xff]  ;;  %v14375_v39 = vpop.permute.xlu1 %698 }
 0x15f   :  { %2409 = vperm.xlu2 %13544, %v2287_v19   ;;  %v14364_v19 = vpop.permute.xlu2 %683  ;;  %21956 = vst [vmem:[#allocation22_spill] sm:$0xff] %v14375_v39 }
 0x160   :  { %21954 = vst [vmem:[#allocation20_spill] sm:$0xff] %v14364_v19 }
 0x161   :  { %v14388_v49 = vpop.permute.xlu0 %703 }
 0x162   :  { %21958 = vst [vmem:[#allocation24_spill] sm:$0xff] %v14388_v49 }
 0x163   :  { %3960 = vmatmul.bf16.gmra.mxu1 %v10854_v16  ;;  %v2285_v16 = vld [vmem:[%s21951_s22 + $0x60] sm:$0xff] }
 0x164   :  { %v14362_v58 = vpop.f32.mrf.mxu0 }
 0x166   :  { %2489 = vperm.xlu1 %13543, %v2303_v13   ;;  %2414 = vperm.xlu0 %13542, %v2288_v41   ;;  %v2301_v13 = vld [vmem:[%s21951_s22 + $0xe0] sm:$0xff] }
 0x167   :  { %2494 = vperm.xlu2 %13544, %v2304_v63   ;;  %10712 = vmatmul.msk.bf16.gmra.mxu0 %vm1303_vm0, %v12954_v34  ;;  %v10885_v41 = vld [vmem:[%s21941_s28 + $0x100] sm:$0xf]  ;;  %v14386_v36 = vpop.permute.xlu2 %958 }
 0x168   :  { %v13033_v63 = vld [vmem:[%s21941_s28 + $0x11c] sm:$0xf0]  ;;  %21957 = vst [vmem:[#allocation23_spill] sm:$0xff] %v14386_v36  ;;  %v2299_v36 = vld [vmem:[%s21951_s22 + $0xd0] sm:$0xff] }
 0x169   :  { %v10886_v3 = vor.u32 %v13033_v63, %v10885_v41  ;;  %v14402_v41 = vpop.permute.xlu1 %773  ;;  %v2300_v63 = vld [vmem:[%s21951_s22 + $0xd8] sm:$0xff]  ;;  %v14413_v62 = vpop.permute.xlu0 %788 }
 0x16a   :  { %21959 = vst [vmem:[#allocation25_spill] sm:$0xff] %v14402_v41 }
 0x16b   :  { %21961 = vst [vmem:[#allocation27_spill] sm:$0xff] %v14413_v62  ;;  %v2297_v62 = vld [vmem:[%s21951_s22 + $0xc0] sm:$0xff] }
 0x16c   :  { %v1572_v34 = vpop.f32.mrf.mxu0 }
 0x16d   :  { %v1573_v46 = vadd.f32 %v1572_v34, %v13960_v12  ;;  %v2278_v12 = vld [vmem:[%s21951_s22 + $0x28] sm:$0xff] }
 0x16e   :  { %2404 = vperm.xlu1 %13543, %v2286_v14   ;;  %2399 = vperm.xlu0 %13542, %v2285_v16   ;;  %v2284_v14 = vld [vmem:[%s21951_s22 + $0x58] sm:$0xff]  ;;  %v12955_v16 = vld [vmem:[%s21934_s29 + $0xb0] sm:$0xff] }
 0x16f   :  { %2479 = vperm.xlu2 %13544, %v2301_v13  }
 0x171   :  { %v14424_v41 = vpop.permute.xlu1 %878 }
 0x172   :  { %21962 = vst [vmem:[#allocation28_spill] sm:$0xff] %v14424_v41  ;;  %v2279_v41 = vld [vmem:[%s21951_s22 + $0x30] sm:$0xff] }
 0x173   :  { %3965 = vmatmul.bf16.gmra.mxu1 %v10886_v3  ;;  %v14405_v3 = vpop.permute.xlu2 %863 }
 0x174   :  { %v1575_v13 = vpop.f32.mrf.mxu0  ;;  %21960 = vst [vmem:[#allocation26_spill] sm:$0xff] %v14405_v3 }
 0x175   :  { %v1576_v2 = vadd.f32 %v1575_v13, %v13884_v17  ;;  %v2296_v17 = vld [vmem:[%s21951_s22 + $0xb8] sm:$0xff] }
 0x176   :  { %2389 = vperm.xlu1 %13543, %v2283_v38   ;;  %2484 = vperm.xlu0 %13542, %v2302_v26   ;;  %v2281_v38 = vld [vmem:[%s21951_s22 + $0x40] sm:$0xff] }
 0x177   :  { %2394 = vperm.xlu2 %13544, %v2284_v14   ;;  %10713 = vmatmul.msk.bf16.gmra.mxu0 %vm1303_vm0, %v12955_v16  ;;  %v10917_v26 = vld [vmem:[%s21941_s28 + $0x140] sm:$0xf] }
 0x178   :  { %v13041_v14 = vld [vmem:[%s21941_s28 + $0x15c] sm:$0xf0] }
 0x179   :  { %v10918_v3 = vor.u32 %v13041_v14, %v10917_v26  ;;  %v14443_v26 = vpop.permute.xlu1 %953  ;;  %v2280_v14 = vld [vmem:[%s21951_s22 + $0x38] sm:$0xff] }
 0x17a   :  { %21965 = vst [vmem:[#allocation31_spill] sm:$0xff] %v14443_v26 }
 0x17b   :  { %v14429_v55 = vpop.permute.xlu2 %678 }
 0x17c   :  { %v1577_v16 = vpop.f32.mrf.mxu0  ;;  %21963 = vst [vmem:[#allocation29_spill] sm:$0xff] %v14429_v55 }
 0x17e   :  { %2474 = vperm.xlu1 %13543, %v2300_v63   ;;  %2469 = vperm.xlu0 %13542, %v2299_v36   ;;  %v2298_v63 = vld [vmem:[%s21951_s22 + $0xc8] sm:$0xff]  ;;  %v12956_v36 = vld [vmem:[%s21934_s29 + $0xb8] sm:$0xff] }
 0x17f   :  { %2379 = vperm.xlu2 %13544, %v2281_v38  }
 0x183   :  { %3970 = vmatmul.bf16.gmra.mxu1 %v10918_v3  ;;  %v14440_v3 = vpop.permute.xlu0 %693  ;;  %v14461_v26 = vpop.permute.xlu2 %753 }
 0x184   :  { %v1580_v38 = vpop.f32.mrf.mxu0  ;;  %21964 = vst [vmem:[#allocation30_spill] sm:$0xff] %v14440_v3  ;;  %v1578_v3 = vadd.f32 %v1577_v16, %v13978_v21  ;;  %v2277_v21 = vld [vmem:[%s21951_s22 + $0x20] sm:$0xff]  ;;  %v1853_v16 = vmax.f32 %v1576_v2, 0.0 }
 0x185   :  { %v1581_v39 = vadd.f32 %v1580_v38, %v13910_v31  ;;  %21966 = vst [vmem:[#allocation32_spill] sm:$0xff] %v14461_v26 }
 0x186   :  { %2459 = vperm.xlu1 %13543, %v2297_v62   ;;  %2384 = vperm.xlu0 %13542, %v2282_v11   ;;  %v2295_v62 = vld [vmem:[%s21951_s22 + $0xb0] sm:$0xff]  ;;  %v10949_v11 = vld [vmem:[%s21941_s28 + $0x180] sm:$0xf]  ;;  %v1854_v27 = vmax.f32 %v1578_v3, 0.0 }
 0x187   :  { %2464 = vperm.xlu2 %13544, %v2298_v63   ;;  %10714 = vmatmul.msk.bf16.gmra.mxu0 %vm1303_vm0, %v12956_v36  ;;  %v13049_v63 = vld [vmem:[%s21941_s28 + $0x19c] sm:$0xf0]  ;;  %v1855_v37 = vmax.f32 %v1581_v39, 0.0  ;;  %v1852_v39 = vmax.f32 %v1573_v46, 0.0 }
 0x188   :  { %v10950_v31 = vor.u32 %v13049_v63, %v10949_v11  ;;  %v1967_v2 = vpack.c.bf16 %v1854_v27, %v1853_v16  ;;  %v2293_v27 = vld [vmem:[%s21951_s22 + $0xa0] sm:$0xff] }
 0x189   :  { %v10981_v46 = vld [vmem:[%s21941_s28 + $0x1c0] sm:$0xf] }
 0x18b   :  { %v14465_v38 = vpop.permute.xlu0 %968 }
 0x18c   :  { %v1582_v36 = vpop.f32.mrf.mxu0  ;;  %21967 = vst [vmem:[#allocation33_spill] sm:$0xff] %v14465_v38 }
 0x18d   :  { %v1583_v49 = vadd.f32 %v1582_v36, %v13867_v9  ;;  %v1571_v9 = vadd.f32 %v14362_v58, %v14000_v54  ;;  %v1568_v54 = vadd.f32 %v14344_v42, %v13927_v48  ;;  %v2294_v48 = vld [vmem:[%s21951_s22 + $0xa8] sm:$0xff] }
 0x18e   :  { %2374 = vperm.xlu1 %13543, %v2280_v14   ;;  %2369 = vperm.xlu0 %13542, %v2279_v41   ;;  %v14474_v41 = vpop.permute.xlu1 %768  ;;  %v13057_v14 = vld [vmem:[%s21941_s28 + $0x1dc] sm:$0xf0] }
 0x18f   :  { %2449 = vperm.xlu2 %13544, %v2295_v62   ;;  %v1856_v4 = vmax.f32 %v1583_v49, 0.0  ;;  %21968 = vst [vmem:[#allocation34_spill] sm:$0xff] %v14474_v41  ;;  %v1566_v49 = vadd.f32 %v14322_v59, %v13981_v22  ;;  %v1851_v58 = vmax.f32 %v1571_v9, 0.0  ;;  %v1850_v34 = vmax.f32 %v1568_v54, 0.0  ;;  %v2275_v59 = vld [vmem:[%s21951_s22 + $0x10] sm:$0xff] }
 0x190   :  { %v10982_v36 = vor.u32 %v13057_v14, %v10981_v46 }
 0x191   :  { %v1968_v19 = vpack.c.bf16 %v1856_v4, %v1855_v37  ;;  %v12957_v4 = vld [vmem:[%s21934_s29 + $0xc0] sm:$0xff]  ;;  %v1966_v3 = vpack.c.bf16 %v1852_v39, %v1851_v58  ;;  %v1849_v42 = vmax.f32 %v1566_v49, 0.0 }
 0x192   :  { %v2289_v49 = vld [vmem:[%s21951_s22 + $0x80] sm:$0xff] }
 0x193   :  { %3975 = vmatmul.bf16.gmra.mxu1 %v10950_v31  ;;  %4106 = vmatpush.bf16.msra.mxu2 %v1968_v19  ;;  %v14489_v19 = vpop.permute.xlu2 %858  ;;  %v14492_v13 = vpop.permute.xlu0 %873  ;;  %v11013_v58 = vld [vmem:[%s21941_s28 + $0x200] sm:$0xf] }
 0x194   :  { %v1585_v37 = vpop.f32.mrf.mxu0  ;;  %21969 = vst [vmem:[#allocation35_spill] sm:$0xff] %v14489_v19 }
 0x195   :  { %21970 = vst [vmem:[#allocation36_spill] sm:$0xff] %v14492_v13  ;;  %v1586_v22 = vadd.f32 %v1585_v37, %v14102_v53  ;;  %v1965_v53 = vpack.c.bf16 %v1850_v34, %v1849_v42  ;;  %v12958_v37 = vld [vmem:[%s21934_s29 + $0xc8] sm:$0xff] }
 0x196   :  { %2359 = vperm.xlu1 %13543, %v2277_v21   ;;  %2454 = vperm.xlu0 %13542, %v2296_v17   ;;  %v14510_v11 = vpop.permute.xlu1 %673  ;;  %v2291_v17 = vld [vmem:[%s21951_s22 + $0x90] sm:$0xff] }
 0x197   :  { %2364 = vperm.xlu2 %13544, %v2278_v12   ;;  %10715 = vmatmul.msk.bf16.gmra.mxu0 %vm1303_vm0, %v12957_v4  ;;  %21971 = vst [vmem:[#allocation37_spill] sm:$0xff] %v14510_v11  ;;  %v1857_v31 = vmax.f32 %v1586_v22, 0.0  ;;  %v2292_v4 = vld [vmem:[%s21951_s22 + $0x98] sm:$0xff] }
 0x198   :  { %4107 = vmatpush.bf16.msra.mxu2 %v1967_v2  ;;  %v2273_v2 = vld [vmem:[%s21951_s22] sm:$0xff] }
 0x19b   :  { %v14513_v9 = vpop.permute.xlu2 %933  ;;  %v14520_v12 = vpop.permute.xlu0 %688 }
 0x19c   :  { %4108 = vmatpush.bf16.msra.mxu2 %v1966_v3  ;;  %v1587_v62 = vpop.f32.mrf.mxu0  ;;  %21972 = vst [vmem:[#allocation38_spill] sm:$0xff] %v14513_v9  ;;  %v13065_v3 = vld [vmem:[%s21941_s28 + $0x21c] sm:$0xf0] }
 0x19d   :  { %v1588_v63 = vadd.f32 %v1587_v62, %v14262_v29  ;;  %21973 = vst [vmem:[#allocation39_spill] sm:$0xff] %v14520_v12  ;;  %v2276_v29 = vld [vmem:[%s21951_s22 + $0x18] sm:$0xff] }
 0x19e   :  { %2444 = vperm.xlu1 %13543, %v2294_v48   ;;  %2439 = vperm.xlu0 %13542, %v2293_v27   ;;  %v14532_v39 = vpop.permute.xlu1 %948  ;;  %v12997_v48 = vld [vmem:[%s21941_s28 + $0x4] sm:$0xf] }
 0x19f   :  { %2349 = vperm.xlu2 %13544, %v2275_v59   ;;  %v1858_v21 = vmax.f32 %v1588_v63, 0.0  ;;  %21974 = vst [vmem:[#allocation40_spill] sm:$0xff] %v14532_v39  ;;  %v10759_v27 = vld [vmem:[%s21941_s28 + $0x20] sm:$0xf0]  ;;  %v2327_v39 = vld [vmem:[%s21951_s22 + $0x1b0] sm:$0xff] }
 0x1a0   :  { %4109 = vmatpush.bf16.msra.mxu2 %v1965_v53 }
 0x1a1   :  { %v14515_v16 = vpack.c.bf16 %v1858_v21, %v1857_v31  ;;  %v2320_v31 = vld [vmem:[%s21951_s22 + $0x178] sm:$0xff] }
 0x1a3   :  { %3980 = vmatmul.bf16.gmra.mxu1 %v10982_v36  ;;  %v14548_v34 = vpop.permute.xlu2 %748  ;;  %v14561_v22 = vpop.permute.xlu0 %763  ;;  %v2290_v36 = vld [vmem:[%s21951_s22 + $0x88] sm:$0xff] }
 0x1a4   :  { %4110 = vmatpush.bf16.msra.mxu2 %v14306_v52  ;;  %v1590_v54 = vpop.f32.mrf.mxu0  ;;  %v2274_v52 = vld [vmem:[%s21951_s22 + $0x8] sm:$0xff]  ;;  %21975 = vst [vmem:[#allocation41_spill] sm:$0xff] %v14548_v34  ;;  %v2321_v34 = vld [vmem:[%s21951_s22 + $0x180] sm:$0xff] }
 0x1a5   :  { %21976 = vst [vmem:[#allocation42_spill] sm:$0xff] %v14561_v22 }
 0x1a6   :  { %2429 = vperm.xlu1 %13543, %v2291_v17   ;;  %2354 = vperm.xlu0 %13542, %v2276_v29   ;;  %v14567_v63 = vpop.permute.xlu1 %853 }
 0x1a7   :  { %2434 = vperm.xlu2 %13544, %v2292_v4   ;;  %10716 = vmatmul.msk.bf16.gmra.mxu0 %vm1303_vm0, %v12958_v37  ;;  %21977 = vst [vmem:[#allocation43_spill] sm:$0xff] %v14567_v63  ;;  %v2336_v37 = vld [vmem:[%s21951_s22 + $0x1f8] sm:$0xff] }
 0x1a8   :  { %4111 = vmatpush.bf16.msra.mxu2 %v14264_v7  ;;  %v1591_v7 = vadd.f32 %v1590_v54, %v14068_v20  ;;  %v11014_v20 = vor.u32 %v13065_v3, %v11013_v58  ;;  %v2335_v54 = vld [vmem:[%s21951_s22 + $0x1f0] sm:$0xff]  ;;  %v13005_v3 = vld [vmem:[%s21941_s28 + $0x44] sm:$0xf] }
 0x1aa   :  { %v1859_v46 = vmax.f32 %v1591_v7, 0.0  ;;  %v13073_v7 = vld [vmem:[%s21941_s28 + $0x25c] sm:$0xf0] }
 0x1ab   :  { %v14583_v17 = vpop.permute.xlu2 %653  ;;  %v14585_v29 = vpop.permute.xlu0 %868 }
 0x1ac   :  { %4112 = vmatpush.bf16.msra.mxu2 %v14222_v8  ;;  %v1592_v42 = vpop.f32.mrf.mxu0  ;;  %v10762_v8 = vor.u32 %v12997_v48, %v10759_v27  ;;  %21978 = vst [vmem:[#allocation44_spill] sm:$0xff] %v14585_v29  ;;  %v10791_v48 = vld [vmem:[%s21941_s28 + $0x60] sm:$0xf0] }
 0x1ad   :  { %v1593_v59 = vadd.f32 %v1592_v42, %v14205_v6  ;;  %v2319_v6 = vld [vmem:[%s21951_s22 + $0x170] sm:$0xff] }
 0x1ae   :  { %2344 = vperm.xlu1 %13543, %v2274_v52   ;;  %2339 = vperm.xlu0 %13542, %v2273_v2   ;;  %v2317_v52 = vld [vmem:[%s21951_s22 + $0x160] sm:$0xff] }
 0x1af   :  { %2419 = vperm.xlu2 %13544, %v2289_v49   ;;  %v1860_v14 = vmax.f32 %v1593_v59, 0.0  ;;  %v11045_v2 = vld [vmem:[%s21941_s28 + $0x240] sm:$0xf]  ;;  %v14602_v49 = vpop.permute.xlu1 %668 }
 0x1b0   :  { %v14564_v62 = vpop.f32.mrf.mxu1  ;;  %4113 = vmatpush.bf16.msra.mxu2 %v14178_v1  ;;  %v12959_v1 = vld [vmem:[%s21934_s29 + $0xd0] sm:$0xff]  ;;  %v11046_v59 = vor.u32 %v13073_v7, %v11045_v2 }
 0x1b1   :  { %v14569_v53 = vpack.c.bf16 %v1860_v14, %v1859_v46  ;;  %v2315_v7 = vld [vmem:[%s21951_s22 + $0x150] sm:$0xff] }
 0x1b3   :  { %3985 = vmatmul.bf16.gmra.mxu1 %v11014_v20  ;;  %4114 = vmatmul.bf16.vlgmr.msra.gmra.mxu2 %v10762_v8  ;;  %v14615_v20 = vpop.permute.xlu2 %928 }
 0x1b4   :  { %v1595_v21 = vpop.f32.mrf.mxu0  ;;  %21979 = vst [vmem:[#allocation45_spill] sm:$0xff] %v14615_v20 }
 0x1b5   :  { %v1596_v58 = vadd.f32 %v1595_v21, %v14021_v44  ;;  %v10794_v44 = vor.u32 %v13005_v3, %v10791_v48  ;;  %v12960_v21 = vld [vmem:[%s21934_s29 + $0xd8] sm:$0xff]  ;;  %v2331_v3 = vld [vmem:[%s21951_s22 + $0x1d0] sm:$0xff]  ;;  %v11077_v48 = vld [vmem:[%s21941_s28 + $0x280] sm:$0xf] }
 0x1b6   :  { %2569 = vperm.xlu1 %13543, %v2319_v6   ;;  %2424 = vperm.xlu0 %13542, %v2290_v36   ;;  %v14619_v6 = vpop.permute.xlu0 %943 }
 0x1b7   :  { %2574 = vperm.xlu2 %13544, %v2320_v31   ;;  %10717 = vmatmul.msk.bf16.gmra.mxu0 %vm1303_vm0, %v12959_v1  ;;  %v1861_v8 = vmax.f32 %v1596_v58, 0.0  ;;  %21980 = vst [vmem:[#allocation46_spill] sm:$0xff] %v14619_v6  ;;  %v2318_v31 = vld [vmem:[%s21951_s22 + $0x168] sm:$0xff]  ;;  %v2316_v58 = vld [vmem:[%s21951_s22 + $0x158] sm:$0xff]  ;;  %v2313_v6 = vld [vmem:[%s21951_s22 + $0x140] sm:$0xff] }
 0x1b8   :  { %v14588_v4 = vpop.f32.mrf.mxu1  ;;  %v2334_v1 = vld [vmem:[%s21951_s22 + $0x1e8] sm:$0xff] }
 0x1bb   :  { %v14640_v2 = vpop.permute.xlu2 %833 }
 0x1bc   :  { %v1597_v27 = vpop.f32.mrf.mxu0  ;;  %21983 = vst [vmem:[#allocation49_spill] sm:$0xff] %v14640_v2 }
 0x1bd   :  { %v1598_v42 = vadd.f32 %v1597_v27, %v14159_v30  ;;  %v2333_v30 = vld [vmem:[%s21951_s22 + $0x1e0] sm:$0xff] }
 0x1be   :  { %2654 = vperm.xlu1 %13543, %v2336_v37   ;;  %2649 = vperm.xlu0 %13542, %v2335_v54   ;;  %v14635_v54 = vpop.permute.xlu1 %743  ;;  %v14654_v27 = vpop.permute.xlu0 %758 }
 0x1bf   :  { %2559 = vperm.xlu2 %13544, %v2317_v52   ;;  %v1862_v46 = vmax.f32 %v1598_v42, 0.0  ;;  %21981 = vst [vmem:[#allocation47_spill] sm:$0xff] %v14635_v54 }
 0x1c0   :  { %v14617_v14 = vpop.f32.mrf.mxu1  ;;  %21984 = vst [vmem:[#allocation50_spill] sm:$0xff] %v14654_v27 }
 0x1c1   :  { %v14621_v36 = vpack.c.bf16 %v1862_v46, %v1861_v8  ;;  %v10823_v8 = vld [vmem:[%s21941_s28 + $0xa0] sm:$0xf0] }
 0x1c3   :  { %3990 = vmatmul.bf16.gmra.mxu1 %v11046_v59  ;;  %4119 = vmatmul.bf16.gmra.mxu2 %v10794_v44  ;;  %v13081_v59 = vld [vmem:[%s21941_s28 + $0x29c] sm:$0xf0]  ;;  %v13013_v44 = vld [vmem:[%s21941_s28 + $0x84] sm:$0xf] }
 0x1c4   :  { %v1600_v37 = vpop.f32.mrf.mxu0 }
 0x1c5   :  { %v1601_v42 = vadd.f32 %v1600_v37, %v13983_v23  ;;  %v10826_v23 = vor.u32 %v13013_v44, %v10823_v8  ;;  %v2330_v8 = vld [vmem:[%s21951_s22 + $0x1c8] sm:$0xff] }
 0x1c6   :  { %2639 = vperm.xlu1 %13543, %v2333_v30   ;;  %2564 = vperm.xlu0 %13542, %v2318_v31   ;;  %v11078_v31 = vor.u32 %v13081_v59, %v11077_v48 }
 0x1c7   :  { %2644 = vperm.xlu2 %13544, %v2334_v1   ;;  %10718 = vmatmul.msk.bf16.gmra.mxu0 %vm1303_vm0, %v12960_v21  ;;  %v14667_v1 = vpop.permute.xlu1 %848  ;;  %v1863_v21 = vmax.f32 %v1601_v42, 0.0  ;;  %v14689_v42 = vpop.permute.xlu0 %663 }
 0x1c8   :  { %v14638_v52 = vpop.f32.mrf.mxu1  ;;  %21985 = vst [vmem:[#allocation51_spill] sm:$0xff] %v14667_v1 }
 0x1c9   :  { %21982 = vst [vmem:[#allocation48_spill] sm:$0xff] %v14638_v52 }
 0x1cc   :  { %v1602_v46 = vpop.f32.mrf.mxu0 }
 0x1cd   :  { %v1603_v30 = vadd.f32 %v1602_v46, %v14107_v0  ;;  %v14676_v0 = vpop.permute.xlu2 %918  ;;  %v2329_v46 = vld [vmem:[%s21951_s22 + $0x1c0] sm:$0xff] }
 0x1ce   :  { %2554 = vperm.xlu1 %13543, %v2316_v58   ;;  %2549 = vperm.xlu0 %13542, %v2315_v7   ;;  %21986 = vst [vmem:[#allocation52_spill] sm:$0xff] %v14676_v0  ;;  %v2332_v58 = vld [vmem:[%s21951_s22 + $0x1d8] sm:$0xff]  ;;  %v2314_v7 = vld [vmem:[%s21951_s22 + $0x148] sm:$0xff] }
 0x1cf   :  { %2629 = vperm.xlu2 %13544, %v2331_v3   ;;  %v1864_v37 = vmax.f32 %v1603_v30, 0.0  ;;  %v12961_v3 = vld [vmem:[%s21934_s29 + $0xe0] sm:$0xff]  ;;  %v14694_v44 = vpop.permute.xlu1 %923  ;;  %v14721_v0 = vpop.permute.xlu0 %938 }
 0x1d0   :  { %v14669_v20 = vpop.f32.mrf.mxu1  ;;  %21987 = vst [vmem:[#allocation53_spill] sm:$0xff] %v14694_v44  ;;  %v11109_v30 = vld [vmem:[%s21941_s28 + $0x2c0] sm:$0xf] }
 0x1d1   :  { %v14671_v9 = vpack.c.bf16 %v1864_v37, %v1863_v21  ;;  %v10855_v21 = vld [vmem:[%s21941_s28 + $0xe0] sm:$0xf0]  ;;  %21989 = vst [vmem:[#allocation55_spill] sm:$0xff] %v14721_v0 }
 0x1d3   :  { %3995 = vmatmul.bf16.gmra.mxu1 %v11078_v31  ;;  %4124 = vmatmul.bf16.gmra.mxu2 %v10826_v23  ;;  %v13089_v31 = vld [vmem:[%s21941_s28 + $0x2dc] sm:$0xf0]  ;;  %v13021_v23 = vld [vmem:[%s21941_s28 + $0xc4] sm:$0xf] }
 0x1d4   :  { %v14687_v48 = vpop.f32.mrf.mxu0 }
 0x1d6   :  { %2539 = vperm.xlu1 %13543, %v2313_v6   ;;  %2634 = vperm.xlu0 %13542, %v2332_v58   ;;  %v2311_v6 = vld [vmem:[%s21951_s22 + $0x130] sm:$0xff]  ;;  %v14719_v58 = vpop.permute.xlu2 %903 }
 0x1d7   :  { %2544 = vperm.xlu2 %13544, %v2314_v7   ;;  %10719 = vmatmul.msk.bf16.gmra.mxu0 %vm1303_vm0, %v12961_v3  ;;  %21988 = vst [vmem:[#allocation54_spill] sm:$0xff] %v14719_v58  ;;  %v11110_v7 = vor.u32 %v13089_v31, %v11109_v30  ;;  %v10858_v3 = vor.u32 %v13021_v23, %v10855_v21  ;;  %v14728_v38 = vpop.permute.xlu1 %738  ;;  %v14746_v21 = vpop.permute.xlu0 %843  ;;  %v10887_v58 = vld [vmem:[%s21941_s28 + $0x120] sm:$0xf0] }
 0x1d8   :  { %v14692_v59 = vpop.f32.mrf.mxu1  ;;  %21990 = vst [vmem:[#allocation56_spill] sm:$0xff] %v14728_v38 }
 0x1d9   :  { %21992 = vst [vmem:[#allocation58_spill] sm:$0xff] %v14746_v21  ;;  %v2307_v21 = vld [vmem:[%s21951_s22 + $0x110] sm:$0xff] }
 0x1dc   :  { %v14717_v37 = vpop.f32.mrf.mxu0 }
 0x1de   :  { %2624 = vperm.xlu1 %13543, %v2330_v8   ;;  %2619 = vperm.xlu0 %13542, %v2329_v46   ;;  %v2312_v8 = vld [vmem:[%s21951_s22 + $0x138] sm:$0xff]  ;;  %v14741_v31 = vpop.permute.xlu2 %818 }
 0x1df   :  { %2529 = vperm.xlu2 %13544, %v2311_v6   ;;  %v2328_v46 = vld [vmem:[%s21951_s22 + $0x1b8] sm:$0xff]  ;;  %v12962_v6 = vld [vmem:[%s21934_s29 + $0xe8] sm:$0xff]  ;;  %21991 = vst [vmem:[#allocation57_spill] sm:$0xff] %v14741_v31  ;;  %v14771_v63 = vpop.permute.xlu1 %913  ;;  %v14780_v2 = vpop.permute.xlu0 %658 }
 0x1e0   :  { %v14723_v44 = vpop.f32.mrf.mxu1  ;;  %21993 = vst [vmem:[#allocation59_spill] sm:$0xff] %v14771_v63  ;;  %v10919_v63 = vld [vmem:[%s21941_s28 + $0x160] sm:$0xf0] }
 0x1e3   :  { %4000 = vmatmul.bf16.gmra.mxu1 %v11110_v7  ;;  %4129 = vmatmul.bf16.gmra.mxu2 %v10858_v3  ;;  %v2310_v7 = vld [vmem:[%s21951_s22 + $0x128] sm:$0xff]  ;;  %v2309_v3 = vld [vmem:[%s21951_s22 + $0x120] sm:$0xff] }
 0x1e4   :  { %v14739_v30 = vpop.f32.mrf.mxu0 }
 0x1e6   :  { %2609 = vperm.xlu1 %13543, %v2327_v39   ;;  %2534 = vperm.xlu0 %13542, %v2312_v8   ;;  %v2325_v39 = vld [vmem:[%s21951_s22 + $0x1a0] sm:$0xff]  ;;  %v14775_v1 = vpop.permute.xlu2 %2409 }
 0x1e7   :  { %2614 = vperm.xlu2 %13544, %v2328_v46   ;;  %10720 = vmatmul.msk.bf16.gmra.mxu0 %vm1303_vm0, %v12962_v6  ;;  %v11141_v8 = vld [vmem:[%s21941_s28 + $0x300] sm:$0xf]  ;;  %v13029_v6 = vld [vmem:[%s21941_s28 + $0x104] sm:$0xf]  ;;  %v14819_v31 = vpop.permute.xlu0 %733 }
 0x1e8   :  { %v14744_v23 = vpop.f32.mrf.mxu1  ;;  %v13097_v46 = vld [vmem:[%s21941_s28 + $0x31c] sm:$0xf0]  ;;  %v10890_v29 = vor.u32 %v13029_v6, %v10887_v58  ;;  %v2308_v58 = vld [vmem:[%s21951_s22 + $0x118] sm:$0xff]  ;;  %21996 = vst [vmem:[#allocation62_spill] sm:$0xff] %v14819_v31 }
 0x1e9   :  { %v11142_v19 = vor.u32 %v13097_v46, %v11141_v8  ;;  %v2324_v8 = vld [vmem:[%s21951_s22 + $0x198] sm:$0xff]  ;;  %v2323_v46 = vld [vmem:[%s21951_s22 + $0x190] sm:$0xff]  ;;  %v11173_v6 = vld [vmem:[%s21941_s28 + $0x340] sm:$0xf] }
 0x1ec   :  { %v14769_v0 = vpop.f32.mrf.mxu0 }
 0x1ee   :  { %2524 = vperm.xlu1 %13543, %v2310_v7   ;;  %2519 = vperm.xlu0 %13542, %v2309_v3   ;;  %v2326_v7 = vld [vmem:[%s21951_s22 + $0x1a8] sm:$0xff]  ;;  %v12963_v3 = vld [vmem:[%s21934_s29 + $0xf0] sm:$0xff] }
 0x1ef   :  { %2599 = vperm.xlu2 %13544, %v2325_v39  }
 0x1f0   :  { %v14773_v13 = vpop.f32.mrf.mxu1 }
 0x1f3   :  { %4005 = vmatmul.bf16.gmra.mxu1 %v11142_v19  ;;  %4134 = vmatmul.bf16.gmra.mxu2 %v10890_v29  ;;  %v14791_v29 = vpop.permute.xlu1 %828 }
 0x1f4   :  { %v1615_v19 = vpop.f32.mrf.mxu0  ;;  %21994 = vst [vmem:[#allocation60_spill] sm:$0xff] %v14791_v29 }
 0x1f6   :  { %2509 = vperm.xlu1 %13543, %v2307_v21   ;;  %2604 = vperm.xlu0 %13542, %v2326_v7   ;;  %v2305_v21 = vld [vmem:[%s21951_s22 + $0x100] sm:$0xff]  ;;  %v14808_v7 = vpop.permute.xlu2 %2494 }
 0x1f7   :  { %2514 = vperm.xlu2 %13544, %v2308_v58   ;;  %10721 = vmatmul.msk.bf16.gmra.mxu0 %vm1303_vm0, %v12963_v3  ;;  %21995 = vst [vmem:[#allocation61_spill] sm:$0xff] %v14808_v7  ;;  %v13105_v58 = vld [vmem:[%s21941_s28 + $0x35c] sm:$0xf0]  ;;  %v13037_v3 = vld [vmem:[%s21941_s28 + $0x144] sm:$0xf]  ;;  %v2306_v7 = vld [vmem:[%s21951_s22 + $0x108] sm:$0xff] }
 0x1f8   :  { %v14794_v39 = vpop.f32.mrf.mxu1  ;;  %v11174_v41 = vor.u32 %v13105_v58, %v11173_v6  ;;  %v10922_v22 = vor.u32 %v13037_v3, %v10919_v63  ;;  %v12964_v63 = vld [vmem:[%s21934_s29 + $0xf8] sm:$0xff]  ;;  %v5527_v58 = vld [vmem:[%s22000_s24 + $0x70] sm:$0xff] }
 0x1f9   :  { %v5528_v6 = vld [vmem:[%s22000_s24 + $0x78] sm:$0xff] }
 0x1fb   :  { %v14823_v26 = vpop.permute.xlu1 %813 }
 0x1fc   :  { %v1617_v29 = vpop.f32.mrf.mxu0  ;;  %21997 = vst [vmem:[#allocation63_spill] sm:$0xff] %v14823_v26  ;;  %v10951_v26 = vld [vmem:[%s21941_s28 + $0x1a0] sm:$0xf0] }
 0x1fd   :  { %v1618_v38 = vadd.f32 %v1617_v29, %v13895_v24  ;;  %v1613_v24 = vadd.f32 %v14769_v0, %v14026_v51  ;;  %v5526_v51 = vld [vmem:[%s22000_s24 + $0x68] sm:$0xff] }
 0x1fe   :  { %2594 = vperm.xlu1 %13543, %v2324_v8   ;;  %2589 = vperm.xlu0 %13542, %v2323_v46   ;;  %v2322_v8 = vld [vmem:[%s21951_s22 + $0x188] sm:$0xff] }
 0x1ff   :  { %2499 = vperm.xlu2 %13544, %v2305_v21   ;;  %v14837_v21 = vpop.permute.xlu2 %2479  ;;  %v1870_v29 = vmax.f32 %v1618_v38, 0.0  ;;  %v1868_v0 = vmax.f32 %v1613_v24, 0.0  ;;  %v10983_v24 = vld [vmem:[%s21941_s28 + $0x1e0] sm:$0xf0] }
 0x200   :  { %v14821_v27 = vpop.f32.mrf.mxu1  ;;  %21998 = vst [vmem:[#allocation64_spill] sm:$0xff] %v14837_v21  ;;  %v1616_v21 = vadd.f32 %v1615_v19, %v13944_v57  ;;  %v1611_v57 = vadd.f32 %v14739_v30, %v13912_v33  ;;  %v1608_v33 = vadd.f32 %v14717_v37, %v14070_v25  ;;  %v1606_v19 = vadd.f32 %v14687_v48, %v13946_v61  ;;  %v5542_v25 = vld [vmem:[%s22000_s24 + $0xe8] sm:$0xff]  ;;  %v5541_v61 = vld [vmem:[%s22000_s24 + $0xe0] sm:$0xff]  ;;  %v5523_v48 = vld [vmem:[%s22000_s24 + $0x50] sm:$0xff] }
 0x202   :  { %v1865_v37 = vmax.f32 %v1606_v19, 0.0  ;;  %v12966_v19 = vld [vmem:[%s21934_s29 + $0x108] sm:$0xff] }
 0x203   :  { %4010 = vmatmul.bf16.gmra.mxu1 %v11174_v41  ;;  %4139 = vmatmul.bf16.gmra.mxu2 %v10922_v22  ;;  %v14839_v41 = vpop.permute.xlu0 %838  ;;  %v14856_v3 = vpop.permute.xlu1 %898 }
 0x204   :  { %v1620_v46 = vpop.f32.mrf.mxu0  ;;  %21999 = vst [vmem:[#allocation65_spill] sm:$0xff] %v14839_v41  ;;  %v13045_v41 = vld [vmem:[%s21941_s28 + $0x184] sm:$0xf] }
 0x205   :  { %22001 = vst [vmem:[#allocation66_spill] sm:$0xff] %v14856_v3 }
 0x206   :  { %2579 = vperm.xlu1 %13543, %v2321_v34   ;;  %2504 = vperm.xlu0 %13542, %v2306_v7   ;;  %v5543_v34 = vld [vmem:[%s22000_s24 + $0xf0] sm:$0xff]  ;;  %v11205_v7 = vld [vmem:[%s21941_s28 + $0x380] sm:$0xf] }
 0x207   :  { %2584 = vperm.xlu2 %13544, %v2322_v8   ;;  %10722 = vmatmul.msk.bf16.gmra.mxu0 %vm1303_vm0, %v12964_v63  ;;  %v1621_v8 = vadd.f32 %v1620_v46, %v13957_v5  ;;  %v13113_v63 = vld [vmem:[%s21941_s28 + $0x39c] sm:$0xf0]  ;;  %v10954_v46 = vor.u32 %v13045_v41, %v10951_v26  ;;  %v14870_v3 = vpop.permute.xlu2 %2394 }
 0x208   :  { %v14842_v22 = vpop.f32.mrf.mxu1  ;;  %v11206_v5 = vor.u32 %v13113_v63, %v11205_v7  ;;  %v5525_v26 = vld [vmem:[%s22000_s24 + $0x60] sm:$0xff] }
 0x209   :  { %v1871_v12 = vmax.f32 %v1621_v8, 0.0  ;;  %v11237_v7 = vld [vmem:[%s21941_s28 + $0x3c0] sm:$0xf] }
 0x20b   :  { %v14875_v11 = vpop.permute.xlu0 %823 }
 0x20c   :  { %v1622_v54 = vpop.f32.mrf.mxu0  ;;  %22002 = vst [vmem:[#allocation67_spill] sm:$0xff] %v14875_v11 }
 0x20d   :  { %v1623_v31 = vadd.f32 %v1622_v54, %v13925_v47  ;;  %v1869_v54 = vmax.f32 %v1616_v21, 0.0  ;;  %v1867_v21 = vmax.f32 %v1611_v57, 0.0 }
 0x20e   :  { %5654 = vperm.xlu1 %13543, %v5528_v6   ;;  %5649 = vperm.xlu0 %13542, %v5527_v58   ;;  %v1866_v58 = vmax.f32 %v1608_v33, 0.0 }
 0x20f   :  { %5729 = vperm.xlu2 %13544, %v5543_v34   ;;  %v1872_v55 = vmax.f32 %v1623_v31, 0.0  ;;  %v5544_v31 = vld [vmem:[%s22000_s24 + $0xf8] sm:$0xff]  ;;  %v1975_v30 = vpack.c.bf16 %v1870_v29, %v1869_v54  ;;  %v14902_v6 = vpop.permute.xlu2 %2379  ;;  %v1974_v34 = vpack.c.bf16 %v1868_v0, %v1867_v21 }
 0x210   :  { %v14873_v52 = vpop.f32.mrf.mxu1  ;;  %v5524_v0 = vld [vmem:[%s22000_s24 + $0x58] sm:$0xff] }
 0x211   :  { %v1976_v47 = vpack.c.bf16 %v1872_v55, %v1871_v12  ;;  %v12965_v55 = vld [vmem:[%s21934_s29 + $0x100] sm:$0xff]  ;;  %v14893_v12 = vpop.permute.xlu1 %2489 }
 0x212   :  { %22003 = vst [vmem:[#allocation68_spill] sm:$0xff] %v14893_v12 }
 0x213   :  { %4015 = vmatmul.bf16.gmra.mxu1 %v11206_v5  ;;  %4144 = vmatmul.bf16.gmra.mxu2 %v10954_v46  ;;  %v14916_v8 = vpop.permute.xlu0 %908  ;;  %v13121_v5 = vld [vmem:[%s21941_s28 + $0x3dc] sm:$0xf0]  ;;  %v13053_v46 = vld [vmem:[%s21941_s28 + $0x1c4] sm:$0xf] }
 0x214   :  { %4275 = vmatpush.bf16.msra.mxu3 %v1976_v47  ;;  %v1625_v38 = vpop.f32.mrf.mxu0  ;;  %22004 = vst [vmem:[#allocation69_spill] sm:$0xff] %v14916_v8  ;;  %v10986_v57 = vor.u32 %v13053_v46, %v10983_v24  ;;  %v10765_v24 = vld [vmem:[%s21941_s28 + $0x8] sm:$0xf] }
 0x215   :  { %v1626_v63 = vadd.f32 %v1625_v38, %v14155_v45  ;;  %v11238_v45 = vor.u32 %v13121_v5, %v11237_v7  ;;  %v13129_v7 = vld [vmem:[%s21941_s28 + $0x41c] sm:$0xf0]  ;;  %v11015_v5 = vld [vmem:[%s21941_s28 + $0x220] sm:$0xf0] }
 0x216   :  { %5639 = vperm.xlu1 %13543, %v5525_v26   ;;  %5734 = vperm.xlu0 %13542, %v5544_v31   ;;  %v1973_v26 = vpack.c.bf16 %v1866_v58, %v1865_v37  ;;  %v5521_v37 = vld [vmem:[%s22000_s24 + $0x40] sm:$0xff] }
 0x217   :  { %5644 = vperm.xlu2 %13544, %v5526_v51   ;;  %10723 = vmatmul.msk.bf16.gmra.mxu0 %vm1303_vm0, %v12965_v55  ;;  %v1873_v31 = vmax.f32 %v1626_v63, 0.0  ;;  %v14938_v33 = vpop.permute.xlu2 %2464  ;;  %v13061_v63 = vld [vmem:[%s21941_s28 + $0x204] sm:$0xf] }
 0x218   :  { %v14900_v41 = vpop.f32.mrf.mxu1  ;;  %4276 = vmatpush.bf16.msra.mxu3 %v1975_v30  ;;  %22005 = vst [vmem:[#allocation70_spill] sm:$0xff] %v14938_v33  ;;  %v5540_v30 = vld [vmem:[%s22000_s24 + $0xd8] sm:$0xff] }
 0x219   :  { %v14929_v54 = vpop.permute.xlu1 %2404 }
 0x21b   :  { %v14950_v58 = vpop.permute.xlu0 %893 }
 0x21c   :  { %4277 = vmatpush.bf16.msra.mxu3 %v1974_v34  ;;  %v1627_v29 = vpop.f32.mrf.mxu0  ;;  %22006 = vst [vmem:[#allocation71_spill] sm:$0xff] %v14950_v58 }
 0x21d   :  { %v1628_v47 = vadd.f32 %v1627_v29, %v14311_v60  ;;  %v5539_v60 = vld [vmem:[%s22000_s24 + $0xd0] sm:$0xff] }
 0x21e   :  { %5724 = vperm.xlu1 %13543, %v5542_v25   ;;  %5719 = vperm.xlu0 %13542, %v5541_v61   ;;  %v5522_v25 = vld [vmem:[%s22000_s24 + $0x48] sm:$0xff]  ;;  %v5537_v61 = vld [vmem:[%s22000_s24 + $0xc0] sm:$0xff] }
 0x21f   :  { %5629 = vperm.xlu2 %13544, %v5523_v48   ;;  %v1874_v51 = vmax.f32 %v1628_v47, 0.0  ;;  %v11269_v48 = vld [vmem:[%s21941_s28 + $0x400] sm:$0xf] }
 0x220   :  { %v14931_v55 = vpop.f32.mrf.mxu1  ;;  %4278 = vmatpush.bf16.msra.mxu3 %v1973_v26  ;;  %v11270_v47 = vor.u32 %v13129_v7, %v11269_v48  ;;  %v11018_v26 = vor.u32 %v13061_v63, %v11015_v5  ;;  %v5536_v7 = vld [vmem:[%s22000_s24 + $0xb8] sm:$0xff]  ;;  %v5535_v63 = vld [vmem:[%s22000_s24 + $0xb0] sm:$0xff]  ;;  %v5517_v5 = vld [vmem:[%s22000_s24 + $0x20] sm:$0xff] }
 0x221   :  { %v14933_v38 = vpack.c.bf16 %v1874_v51, %v1873_v31  ;;  %v14956_v34 = vpop.permute.xlu1 %2389 }
 0x223   :  { %4020 = vmatmul.bf16.gmra.mxu1 %v11238_v45  ;;  %4149 = vmatmul.bf16.gmra.mxu2 %v10986_v57  ;;  %v14990_v45 = vpop.permute.xlu0 %2414 }
 0x224   :  { %4279 = vmatpush.bf16.msra.mxu3 %v14671_v9  ;;  %v1630_v21 = vpop.f32.mrf.mxu0 }
 0x226   :  { %5709 = vperm.xlu1 %13543, %v5539_v60   ;;  %5634 = vperm.xlu0 %13542, %v5524_v0  }
 0x227   :  { %5714 = vperm.xlu2 %13544, %v5540_v30   ;;  %10724 = vmatmul.msk.bf16.gmra.mxu0 %vm1303_vm0, %v12966_v19  ;;  %v5538_v19 = vld [vmem:[%s22000_s24 + $0xc8] sm:$0xff] }
 0x228   :  { %v14953_v9 = vpop.f32.mrf.mxu1  ;;  %4280 = vmatpush.bf16.msra.mxu3 %v14621_v36  ;;  %v1631_v36 = vadd.f32 %v1630_v21, %v14283_v43  ;;  %v13002_v43 = vld [vmem:[%s21941_s28 + $0x24] sm:$0xf0]  ;;  %v12967_v21 = vld [vmem:[%s21934_s29 + $0x110] sm:$0xff] }
 0x229   :  { %v10766_v60 = vor.u32 %v13002_v43, %v10765_v24  ;;  %v15000_v30 = vpop.permute.xlu1 %2474  ;;  %v13137_v43 = vld [vmem:[%s21941_s28 + $0x45c] sm:$0xf0] }
 0x22a   :  { %v1875_v57 = vmax.f32 %v1631_v36, 0.0  ;;  %22008 = vst [vmem:[#allocation73_spill] sm:$0xff] %v15000_v30 }
 0x22b   :  { %v15018_v36 = vpop.permute.xlu0 %2399 }
 0x22c   :  { %4281 = vmatpush.bf16.msra.mxu3 %v14569_v53  ;;  %v1632_v46 = vpop.f32.mrf.mxu0  ;;  %v14987_v53 = vpop.permute.xlu2 %2449 }
 0x22d   :  { %22007 = vst [vmem:[#allocation72_spill] sm:$0xff] %v14987_v53  ;;  %v1633_v29 = vadd.f32 %v1632_v46, %v14219_v50  ;;  %v5519_v50 = vld [vmem:[%s22000_s24 + $0x30] sm:$0xff]  ;;  %v11301_v46 = vld [vmem:[%s21941_s28 + $0x440] sm:$0xf] }
 0x22e   :  { %5624 = vperm.xlu1 %13543, %v5522_v25   ;;  %5619 = vperm.xlu0 %13542, %v5521_v37  }
 0x22f   :  { %5699 = vperm.xlu2 %13544, %v5537_v61   ;;  %v1876_v31 = vmax.f32 %v1633_v29, 0.0  ;;  %v13069_v29 = vld [vmem:[%s21941_s28 + $0x244] sm:$0xf] }
 0x230   :  { %v14992_v51 = vpop.f32.mrf.mxu1  ;;  %4282 = vmatpush.bf16.msra.mxu3 %v14515_v16  ;;  %v5520_v16 = vld [vmem:[%s22000_s24 + $0x38] sm:$0xff] }
 0x231   :  { %v14995_v0 = vpack.c.bf16 %v1876_v31, %v1875_v57  ;;  %v10797_v57 = vld [vmem:[%s21941_s28 + $0x48] sm:$0xf]  ;;  %v15048_v31 = vpop.permute.xlu1 %2459 }
 0x232   :  { %22009 = vst [vmem:[#allocation74_spill] sm:$0xff] %v15048_v31 }
 0x233   :  { %4025 = vmatmul.bf16.gmra.mxu1 %v11270_v47  ;;  %4154 = vmatmul.bf16.gmra.mxu2 %v11018_v26  ;;  %v11047_v47 = vld [vmem:[%s21941_s28 + $0x260] sm:$0xf0] }
 0x234   :  { %4283 = vmatmul.bf16.vlgmr.msra.gmra.mxu3 %v10766_v60  ;;  %v1635_v25 = vpop.f32.mrf.mxu0  ;;  %v15013_v61 = vpop.permute.xlu2 %2364 }
 0x235   :  { %v1636_v24 = vadd.f32 %v1635_v25, %v14193_v32  ;;  %v13010_v32 = vld [vmem:[%s21941_s28 + $0x64] sm:$0xf0] }
 0x236   :  { %v15011_v37 = vpop.f32.mrf.mxu2  ;;  %5609 = vperm.xlu1 %13543, %v5519_v50   ;;  %5704 = vperm.xlu0 %13542, %v5538_v19   ;;  %v11302_v19 = vor.u32 %v13137_v43, %v11301_v46  ;;  %v10798_v8 = vor.u32 %v13010_v32, %v10797_v57  ;;  %v5516_v57 = vld [vmem:[%s22000_s24 + $0x18] sm:$0xff]  ;;  %v11333_v32 = vld [vmem:[%s21941_s28 + $0x480] sm:$0xf] }
 0x237   :  { %5614 = vperm.xlu2 %13544, %v5520_v16   ;;  %10725 = vmatmul.msk.bf16.gmra.mxu0 %vm1303_vm0, %v12967_v21  ;;  %v11050_v16 = vor.u32 %v13069_v29, %v11047_v47  ;;  %v1877_v21 = vmax.f32 %v1636_v24, 0.0 }
 0x238   :  { %v15016_v48 = vpop.f32.mrf.mxu1 }
 0x23c   :  { %v1637_v26 = vpop.f32.mrf.mxu0  ;;  %v2350_v11 = vpop.permute.xlu2 %2349 }
 0x23d   :  { %v1638_v60 = vadd.f32 %v1637_v26, %v14124_v28  ;;  %v5533_v28 = vld [vmem:[%s22000_s24 + $0xa0] sm:$0xff]  ;;  %v15060_v26 = vpop.permute.xlu0 %2484  ;;  %v3952_v46 = vadd.f32 %v14617_v14, %v2350_v11  ;;  %v5515_v11 = vld [vmem:[%s22000_s24 + $0x10] sm:$0xff] }
 0x23e   :  { %v15051_v50 = vpop.f32.mrf.mxu2  ;;  %5694 = vperm.xlu1 %13543, %v5536_v7   ;;  %5689 = vperm.xlu0 %13542, %v5535_v63   ;;  %22010 = vst [vmem:[#allocation75_spill] sm:$0xff] %v15060_v26  ;;  %v5518_v7 = vld [vmem:[%s22000_s24 + $0x28] sm:$0xff]  ;;  %v5531_v14 = vld [vmem:[%s22000_s24 + $0x90] sm:$0xff] }
 0x23f   :  { %5599 = vperm.xlu2 %13544, %v5517_v5   ;;  %v1878_v25 = vmax.f32 %v1638_v60, 0.0  ;;  %v5534_v63 = vld [vmem:[%s22000_s24 + $0xa8] sm:$0xff]  ;;  %v12968_v5 = vld [vmem:[%s21934_s29 + $0x118] sm:$0xff] }
 0x240   :  { %v15053_v58 = vpop.f32.mrf.mxu1 }
 0x241   :  { %v15055_v12 = vpack.c.bf16 %v1878_v25, %v1877_v21  ;;  %v11079_v21 = vld [vmem:[%s21941_s28 + $0x2a0] sm:$0xf0] }
 0x243   :  { %4030 = vmatmul.bf16.gmra.mxu1 %v11302_v19  ;;  %4159 = vmatmul.bf16.gmra.mxu2 %v11050_v16  ;;  %v13145_v19 = vld [vmem:[%s21941_s28 + $0x49c] sm:$0xf0]  ;;  %v13077_v16 = vld [vmem:[%s21941_s28 + $0x284] sm:$0xf] }
 0x244   :  { %4288 = vmatmul.bf16.gmra.mxu3 %v10798_v8  ;;  %v1640_v24 = vpop.f32.mrf.mxu0  ;;  %v15074_v8 = vpop.permute.xlu1 %2374 }
 0x245   :  { %v1641_v60 = vadd.f32 %v1640_v24, %v14238_v15  ;;  %v13018_v15 = vld [vmem:[%s21941_s28 + $0xa4] sm:$0xf0]  ;;  %v11082_v24 = vor.u32 %v13077_v16, %v11079_v21 }
 0x246   :  { %v4120_v43 = vpop.f32.mrf.mxu2  ;;  %5679 = vperm.xlu1 %13543, %v5533_v28   ;;  %5604 = vperm.xlu0 %13542, %v5518_v7   ;;  %v10829_v28 = vld [vmem:[%s21941_s28 + $0x88] sm:$0xf]  ;;  %v15107_v7 = vpop.permute.xlu0 %2469 }
 0x247   :  { %v15072_v29 = vadd.f32 %v4120_v43, %v3952_v46  ;;  %5684 = vperm.xlu2 %13544, %v5534_v63   ;;  %10726 = vmatmul.msk.bf16.gmra.mxu0 %vm1303_vm0, %v12968_v5  ;;  %22011 = vst [vmem:[#allocation76_spill] sm:$0xff] %v15107_v7  ;;  %v11334_v46 = vor.u32 %v13145_v19, %v11333_v32  ;;  %v1879_v43 = vmax.f32 %v1641_v60, 0.0  ;;  %v5530_v21 = vld [vmem:[%s22000_s24 + $0x88] sm:$0xff]  ;;  %v5575_v7 = vld [vmem:[%s22000_s24 + $0x1f0] sm:$0xff] }
 0x248   :  { %v15077_v47 = vpop.f32.mrf.mxu1  ;;  %v10830_v33 = vor.u32 %v13018_v15, %v10829_v28  ;;  %v13153_v28 = vld [vmem:[%s21941_s28 + $0x4dc] sm:$0xf0]  ;;  %v13085_v15 = vld [vmem:[%s21941_s28 + $0x2c4] sm:$0xf] }
 0x24c   :  { %v1642_v25 = vpop.f32.mrf.mxu0  ;;  %v2360_v31 = vpop.permute.xlu1 %2359 }
 0x24d   :  { %v1643_v63 = vadd.f32 %v1642_v25, %v14165_v40  ;;  %v5513_v40 = vld [vmem:[%s22000_s24] sm:$0xff] }
 0x24e   :  { %v15110_v5 = vpop.f32.mrf.mxu2  ;;  %5594 = vperm.xlu1 %13543, %v5516_v57   ;;  %5589 = vperm.xlu0 %13542, %v5515_v11   ;;  %v5532_v57 = vld [vmem:[%s22000_s24 + $0x98] sm:$0xff]  ;;  %v5514_v11 = vld [vmem:[%s22000_s24 + $0x8] sm:$0xff]  ;;  %v11365_v25 = vld [vmem:[%s21941_s28 + $0x4c0] sm:$0xf] }
 0x24f   :  { %5669 = vperm.xlu2 %13544, %v5531_v14   ;;  %v1880_v26 = vmax.f32 %v1643_v63, 0.0  ;;  %v3957_v14 = vadd.f32 %v14669_v20, %v2360_v31  ;;  %v5529_v20 = vld [vmem:[%s22000_s24 + $0x80] sm:$0xff]  ;;  %v5559_v31 = vld [vmem:[%s22000_s24 + $0x170] sm:$0xff] }
 0x250   :  { %v15112_v30 = vpop.f32.mrf.mxu1  ;;  %v11111_v63 = vld [vmem:[%s21941_s28 + $0x2e0] sm:$0xf0] }
 0x251   :  { %v15114_v53 = vpack.c.bf16 %v1880_v26, %v1879_v43  ;;  %v12969_v26 = vld [vmem:[%s21934_s29 + $0x120] sm:$0xff]  ;;  %v10861_v43 = vld [vmem:[%s21941_s28 + $0xc8] sm:$0xf] }
 0x253   :  { %4035 = vmatmul.bf16.gmra.mxu1 %v11334_v46  ;;  %4164 = vmatmul.bf16.gmra.mxu2 %v11082_v24  ;;  %v3959_v46 = vadd.f32 %v14692_v59, %v15013_v61 }
 0x254   :  { %4293 = vmatmul.bf16.gmra.mxu3 %v10830_v33  ;;  %v15129_v32 = vpop.f32.mrf.mxu0  ;;  %v15133_v33 = vpop.permute.xlu0 %2384 }
 0x256   :  { %v4125_v60 = vpop.f32.mrf.mxu2  ;;  %5579 = vperm.xlu1 %13543, %v5513_v40   ;;  %5674 = vperm.xlu0 %13542, %v5532_v57   ;;  %v13026_v40 = vld [vmem:[%s21941_s28 + $0xe4] sm:$0xf0] }
 0x257   :  { %v15131_v19 = vadd.f32 %v4125_v60, %v3957_v14  ;;  %5584 = vperm.xlu2 %13544, %v5514_v11   ;;  %10727 = vmatmul.msk.bf16.gmra.mxu0 %vm1303_vm0, %v12969_v26  ;;  %v11366_v26 = vor.u32 %v13153_v28, %v11365_v25  ;;  %v11114_v14 = vor.u32 %v13085_v15, %v11111_v63 }
 0x258   :  { %v15136_v16 = vpop.f32.mrf.mxu1  ;;  %v10862_v59 = vor.u32 %v13026_v40, %v10861_v43  ;;  %v5558_v43 = vld [vmem:[%s22000_s24 + $0x168] sm:$0xff]  ;;  %v11397_v40 = vld [vmem:[%s21941_s28 + $0x500] sm:$0xf] }
 0x25c   :  { %v15161_v24 = vpop.f32.mrf.mxu0  ;;  %v2370_v61 = vpop.permute.xlu0 %2369 }
 0x25d   :  { %v3962_v25 = vadd.f32 %v14723_v44, %v2370_v61  ;;  %v5557_v44 = vld [vmem:[%s22000_s24 + $0x160] sm:$0xff] }
 0x25e   :  { %v4127_v57 = vpop.f32.mrf.mxu2  ;;  %5664 = vperm.xlu1 %13543, %v5530_v21   ;;  %5659 = vperm.xlu0 %13542, %v5529_v20   ;;  %v5560_v21 = vld [vmem:[%s22000_s24 + $0x178] sm:$0xff] }
 0x25f   :  { %v15169_v11 = vadd.f32 %v4127_v57, %v3959_v46  ;;  %5809 = vperm.xlu2 %13544, %v5559_v31   ;;  %v5576_v20 = vld [vmem:[%s22000_s24 + $0x1f8] sm:$0xff]  ;;  %v12970_v31 = vld [vmem:[%s21934_s29 + $0x128] sm:$0xff]  ;;  %v13161_v57 = vld [vmem:[%s21941_s28 + $0x51c] sm:$0xf0] }
 0x260   :  { %v15171_v60 = vpop.f32.mrf.mxu1 }
 0x261   :  { %22012 = vst [vmem:[#allocation77_spill] sm:$0xff] %v15171_v60  ;;  %v22024_v60 = vld [vmem:[#allocation3_spill] sm:$0xff] }
 0x263   :  { %4040 = vmatmul.bf16.gmra.mxu1 %v11366_v26  ;;  %4169 = vmatmul.bf16.gmra.mxu2 %v11114_v14  ;;  %v13093_v26 = vld [vmem:[%s21941_s28 + $0x304] sm:$0xf] }
 0x264   :  { %4298 = vmatmul.bf16.gmra.mxu3 %v10862_v59  ;;  %v15186_v28 = vpop.f32.mrf.mxu0  ;;  %v11143_v14 = vld [vmem:[%s21941_s28 + $0x320] sm:$0xf0]  ;;  %v3964_v59 = vadd.f32 %v14744_v23, %v15074_v8  ;;  %v5555_v8 = vld [vmem:[%s22000_s24 + $0x150] sm:$0xff] }
 0x266   :  { %v4130_v15 = vpop.f32.mrf.mxu2  ;;  %5889 = vperm.xlu1 %13543, %v5575_v7   ;;  %5814 = vperm.xlu0 %13542, %v5560_v21   ;;  %v5573_v7 = vld [vmem:[%s22000_s24 + $0x1e0] sm:$0xff]  ;;  %v10893_v21 = vld [vmem:[%s21941_s28 + $0x108] sm:$0xf] }
 0x267   :  { %v15188_v63 = vadd.f32 %v4130_v15, %v3962_v25  ;;  %5894 = vperm.xlu2 %13544, %v5576_v20   ;;  %10728 = vmatmul.msk.bf16.gmra.mxu0 %vm1303_vm0, %v12970_v31  ;;  %v13034_v20 = vld [vmem:[%s21941_s28 + $0x124] sm:$0xf0]  ;;  %v11398_v15 = vor.u32 %v13161_v57, %v11397_v40 }
 0x268   :  { %v15191_v46 = vpop.f32.mrf.mxu1  ;;  %v10894_v23 = vor.u32 %v13034_v20, %v10893_v21  ;;  %v11429_v21 = vld [vmem:[%s21941_s28 + $0x540] sm:$0xf] }
 0x269   :  { %22013 = vst [vmem:[#allocation78_spill] sm:$0xff] %v15188_v63  ;;  %v13169_v20 = vld [vmem:[%s21941_s28 + $0x55c] sm:$0xf0] }
 0x26a   :  { %22014 = vst [vmem:[#allocation79_spill] sm:$0xff] %v15191_v46  ;;  %v11146_v46 = vor.u32 %v13093_v26, %v11143_v14 }
 0x26c   :  { %v15216_v61 = vpop.f32.mrf.mxu0 }
 0x26e   :  { %v4132_v31 = vpop.f32.mrf.mxu2  ;;  %5804 = vperm.xlu1 %13543, %v5558_v43   ;;  %5799 = vperm.xlu0 %13542, %v5557_v44   ;;  %v5574_v43 = vld [vmem:[%s22000_s24 + $0x1e8] sm:$0xff]  ;;  %v5556_v44 = vld [vmem:[%s22000_s24 + $0x158] sm:$0xff] }
 0x26f   :  { %v15224_v25 = vadd.f32 %v4132_v31, %v3964_v59  ;;  %5879 = vperm.xlu2 %13544, %v5573_v7   ;;  %v12971_v7 = vld [vmem:[%s21934_s29 + $0x130] sm:$0xff]  ;;  %v5572_v59 = vld [vmem:[%s22000_s24 + $0x1d8] sm:$0xff]  ;;  %v13101_v31 = vld [vmem:[%s21941_s28 + $0x344] sm:$0xf] }
 0x270   :  { %v15226_v63 = vpop.f32.mrf.mxu1 }
 0x271   :  { %22015 = vst [vmem:[#allocation80_spill] sm:$0xff] %v15224_v25 }
 0x272   :  { %22016 = vst [vmem:[#allocation81_spill] sm:$0xff] %v15226_v63 }
 0x273   :  { %4045 = vmatmul.bf16.gmra.mxu1 %v11398_v15  ;;  %4174 = vmatmul.bf16.gmra.mxu2 %v11146_v46  ;;  %v3967_v46 = vadd.f32 %v14773_v13, %v14902_v6  ;;  %v5571_v13 = vld [vmem:[%s22000_s24 + $0x1d0] sm:$0xff]  ;;  %v5553_v6 = vld [vmem:[%s22000_s24 + $0x140] sm:$0xff] }
 0x274   :  { %4303 = vmatmul.bf16.gmra.mxu3 %v10894_v23  ;;  %v15242_v40 = vpop.f32.mrf.mxu0  ;;  %v11175_v15 = vld [vmem:[%s21941_s28 + $0x360] sm:$0xf0]  ;;  %v3969_v23 = vadd.f32 %v14794_v39, %v15133_v33 }
 0x275   :  { %v5569_v33 = vld [vmem:[%s22000_s24 + $0x1c0] sm:$0xff] }
 0x276   :  { %v4135_v57 = vpop.f32.mrf.mxu2  ;;  %5789 = vperm.xlu1 %13543, %v5555_v8   ;;  %5884 = vperm.xlu0 %13542, %v5574_v43   ;;  %v10925_v43 = vld [vmem:[%s21941_s28 + $0x148] sm:$0xf] }
 0x277   :  { %v15244_v26 = vadd.f32 %v4135_v57, %v3967_v46  ;;  %5794 = vperm.xlu2 %13544, %v5556_v44   ;;  %10729 = vmatmul.msk.bf16.gmra.mxu0 %vm1303_vm0, %v12971_v7  ;;  %v13042_v44 = vld [vmem:[%s21941_s28 + $0x164] sm:$0xf0]  ;;  %v11430_v57 = vor.u32 %v13169_v20, %v11429_v21 }
 0x278   :  { %v15247_v14 = vpop.f32.mrf.mxu1  ;;  %v10926_v39 = vor.u32 %v13042_v44, %v10925_v43  ;;  %v5551_v43 = vld [vmem:[%s22000_s24 + $0x130] sm:$0xff] }
 0x279   :  { %22017 = vst [vmem:[#allocation82_spill] sm:$0xff] %v15244_v26 }
 0x27a   :  { %22018 = vst [vmem:[#allocation83_spill] sm:$0xff] %v15247_v14  ;;  %v11178_v14 = vor.u32 %v13101_v31, %v11175_v15 }
 0x27c   :  { %v1657_v8 = vpop.f32.mrf.mxu0 }
 0x27e   :  { %v4137_v7 = vpop.f32.mrf.mxu2  ;;  %5874 = vperm.xlu1 %13543, %v5572_v59   ;;  %5869 = vperm.xlu0 %13542, %v5571_v13   ;;  %v5554_v59 = vld [vmem:[%s22000_s24 + $0x148] sm:$0xff] }
 0x27f   :  { %v15278_v46 = vadd.f32 %v4137_v7, %v3969_v23  ;;  %5779 = vperm.xlu2 %13544, %v5553_v6   ;;  %v5570_v13 = vld [vmem:[%s22000_s24 + $0x1c8] sm:$0xff]  ;;  %v12972_v6 = vld [vmem:[%s21934_s29 + $0x138] sm:$0xff]  ;;  %v13177_v7 = vld [vmem:[%s21941_s28 + $0x59c] sm:$0xf0] }
 0x280   :  { %v15280_v26 = vpop.f32.mrf.mxu1  ;;  %v5552_v23 = vld [vmem:[%s22000_s24 + $0x138] sm:$0xff] }
 0x281   :  { %22019 = vst [vmem:[#allocation84_spill] sm:$0xff] %v15278_v46 }
 0x282   :  { %22020 = vst [vmem:[#allocation85_spill] sm:$0xff] %v15280_v26 }
 0x283   :  { %4050 = vmatmul.bf16.gmra.mxu1 %v11430_v57  ;;  %4179 = vmatmul.bf16.gmra.mxu2 %v11178_v14  ;;  %v3972_v14 = vadd.f32 %v14821_v27, %v14956_v34  ;;  %v5567_v27 = vld [vmem:[%s22000_s24 + $0x1b0] sm:$0xff]  ;;  %v11461_v34 = vld [vmem:[%s21941_s28 + $0x580] sm:$0xf]  ;;  %v13109_v57 = vld [vmem:[%s21941_s28 + $0x384] sm:$0xf] }
 0x284   :  { %4308 = vmatmul.bf16.gmra.mxu3 %v10926_v39  ;;  %v1660_v21 = vpop.f32.mrf.mxu0  ;;  %v11207_v39 = vld [vmem:[%s21941_s28 + $0x3a0] sm:$0xf0] }
 0x285   :  { %v1661_v44 = vadd.f32 %v1660_v21, %v14054_v10  ;;  %v10957_v10 = vld [vmem:[%s21941_s28 + $0x188] sm:$0xf] }
 0x286   :  { %v4140_v20 = vpop.f32.mrf.mxu2  ;;  %5859 = vperm.xlu1 %13543, %v5569_v33   ;;  %5784 = vperm.xlu0 %13542, %v5554_v59   ;;  %v3974_v33 = vadd.f32 %v14842_v22, %v14870_v3  ;;  %v11462_v22 = vor.u32 %v13177_v7, %v11461_v34  ;;  %v11210_v3 = vor.u32 %v13109_v57, %v11207_v39 }
 0x287   :  { %v15296_v31 = vadd.f32 %v4140_v20, %v3972_v14  ;;  %5864 = vperm.xlu2 %13544, %v5570_v13   ;;  %10730 = vmatmul.msk.bf16.gmra.mxu0 %vm1303_vm0, %v12972_v6  ;;  %v13050_v13 = vld [vmem:[%s21941_s28 + $0x1a4] sm:$0xf0]  ;;  %v1658_v6 = vadd.f32 %v1657_v8, %v14036_v56  ;;  %v1887_v26 = vmax.f32 %v1661_v44, 0.0  ;;  %v1653_v56 = vadd.f32 %v15216_v61, %v22024_v60  ;;  %v5568_v60 = vld [vmem:[%s22000_s24 + $0x1b8] sm:$0xff] }
 0x288   :  { %v15299_v15 = vpop.f32.mrf.mxu1  ;;  %v10958_v25 = vor.u32 %v13050_v13, %v10957_v10  ;;  %v5550_v61 = vld [vmem:[%s22000_s24 + $0x128] sm:$0xff]  ;;  %v1646_v57 = vadd.f32 %v15129_v32, %v14176_v18  ;;  %v5565_v18 = vld [vmem:[%s22000_s24 + $0x1a0] sm:$0xff]  ;;  %v5547_v32 = vld [vmem:[%s22000_s24 + $0x110] sm:$0xff] }
 0x289   :  { %22021 = vst [vmem:[#allocation86_spill] sm:$0xff] %v15296_v31  ;;  %v11493_v13 = vld [vmem:[%s21941_s28 + $0x5c0] sm:$0xf] }
 0x28a   :  { %22022 = vst [vmem:[#allocation87_spill] sm:$0xff] %v15299_v15  ;;  %v22023_v15 = vld [vmem:[#allocation4_spill] sm:$0xff]  ;;  %v1881_v10 = vmax.f32 %v1646_v57, 0.0 }
 0x28b   :  { %v1656_v31 = vadd.f32 %v15242_v40, %v22023_v15 }
 0x28c   :  { %v1662_v59 = vpop.f32.mrf.mxu0 }
 0x28d   :  { %v1663_v14 = vadd.f32 %v1662_v59, %v13996_v35  ;;  %v1886_v35 = vmax.f32 %v1658_v6, 0.0  ;;  %v1885_v15 = vmax.f32 %v1656_v31, 0.0  ;;  %v1884_v31 = vmax.f32 %v1653_v56, 0.0 }
 0x28e   :  { %v4142_v21 = vpop.f32.mrf.mxu2  ;;  %5774 = vperm.xlu1 %13543, %v5552_v23   ;;  %5769 = vperm.xlu0 %13542, %v5551_v43   ;;  %v15341_v23 = vpop.permute.xlu0 %2454  ;;  %v5549_v43 = vld [vmem:[%s22000_s24 + $0x120] sm:$0xff]  ;;  %v3979_v56 = vadd.f32 %v14900_v41, %v14929_v54 }
 0x28f   :  { %v15333_v20 = vadd.f32 %v4142_v21, %v3974_v33  ;;  %5849 = vperm.xlu2 %13544, %v5567_v27   ;;  %v1888_v46 = vmax.f32 %v1663_v14, 0.0  ;;  %v22025_v27 = vld [vmem:[#allocation6_spill] sm:$0xff]  ;;  %v1983_v7 = vpack.c.bf16 %v1886_v35, %v1885_v15  ;;  %v13117_v21 = vld [vmem:[%s21941_s28 + $0x3c4] sm:$0xf] }
 0x290   :  { %v15337_v63 = vpop.f32.mrf.mxu1  ;;  %v1651_v40 = vadd.f32 %v15186_v28, %v22025_v27  ;;  %v22026_v28 = vld [vmem:[#allocation5_spill] sm:$0xff]  ;;  %v13185_v14 = vld [vmem:[%s21941_s28 + $0x5dc] sm:$0xf0] }
 0x291   :  { %v1984_v8 = vpack.c.bf16 %v1888_v46, %v1887_v26  ;;  %v12973_v26 = vld [vmem:[%s21934_s29 + $0x140] sm:$0xff]  ;;  %v3977_v46 = vadd.f32 %v14873_v52, %v15018_v36 }
 0x292   :  { %v1883_v33 = vmax.f32 %v1651_v40, 0.0 }
 0x293   :  { %4055 = vmatmul.bf16.gmra.mxu1 %v11462_v22  ;;  %4184 = vmatmul.bf16.gmra.mxu2 %v11210_v3  ;;  %v11239_v22 = vld [vmem:[%s21941_s28 + $0x3e0] sm:$0xf0] }
 0x294   :  { %4313 = vmatmul.bf16.gmra.mxu3 %v10958_v25  ;;  %4444 = vmatpush.bf16.msrb.mxu1 %v1984_v8  ;;  %v1665_v34 = vpop.f32.mrf.mxu0  ;;  %v1648_v25 = vadd.f32 %v15161_v24, %v22026_v28  ;;  %v1982_v36 = vpack.c.bf16 %v1884_v31, %v1883_v33  ;;  %v5566_v24 = vld [vmem:[%s22000_s24 + $0x1a8] sm:$0xff]  ;;  %v11242_v41 = vor.u32 %v13117_v21, %v11239_v22  ;;  %v5548_v28 = vld [vmem:[%s22000_s24 + $0x118] sm:$0xff] }
 0x295   :  { %v1666_v6 = vadd.f32 %v1665_v34, %v14583_v17  ;;  %v10989_v17 = vld [vmem:[%s21941_s28 + $0x1c8] sm:$0xf] }
 0x296   :  { %v4145_v44 = vpop.f32.mrf.mxu2  ;;  %5759 = vperm.xlu1 %13543, %v5549_v43   ;;  %5854 = vperm.xlu0 %13542, %v5568_v60   ;;  %v1882_v52 = vmax.f32 %v1648_v25, 0.0  ;;  %v15390_v3 = vpop.permute.xlu0 %2439  ;;  %v13058_v8 = vld [vmem:[%s21941_s28 + $0x1e4] sm:$0xf0]  ;;  %v11494_v60 = vor.u32 %v13185_v14, %v11493_v13  ;;  %v5564_v25 = vld [vmem:[%s22000_s24 + $0x198] sm:$0xff]  ;;  %v13125_v13 = vld [vmem:[%s21941_s28 + $0x404] sm:$0xf]  ;;  %v3984_v14 = vadd.f32 %v14953_v9, %v14990_v45 }
 0x297   :  { %v15363_v39 = vadd.f32 %v4145_v44, %v3977_v46  ;;  %5764 = vperm.xlu2 %13544, %v5550_v61   ;;  %10731 = vmatmul.msk.bf16.gmra.mxu0 %vm1303_vm0, %v12973_v26  ;;  %v1889_v54 = vmax.f32 %v1666_v6, 0.0  ;;  %v10990_v46 = vor.u32 %v13058_v8, %v10989_v17  ;;  %v12974_v31 = vld [vmem:[%s21934_s29 + $0x148] sm:$0xff]  ;;  %v15420_v44 = vpop.permute.xlu1 %2444  ;;  %v11271_v6 = vld [vmem:[%s21941_s28 + $0x420] sm:$0xf0] }
 0x298   :  { %v15366_v59 = vpop.f32.mrf.mxu1  ;;  %4445 = vmatpush.bf16.msrb.mxu1 %v1983_v7  ;;  %v1981_v40 = vpack.c.bf16 %v1882_v52, %v1881_v10  ;;  %v3982_v7 = vadd.f32 %v14931_v55, %v14775_v1  ;;  %v5546_v1 = vld [vmem:[%s22000_s24 + $0x108] sm:$0xff]  ;;  %v5545_v55 = vld [vmem:[%s22000_s24 + $0x100] sm:$0xff]  ;;  %v11274_v45 = vor.u32 %v13125_v13, %v11271_v6  ;;  %v22028_v13 = vld [vmem:[#allocation37_spill] sm:$0xff] }
 0x299   :  { %v5561_v10 = vld [vmem:[%s22000_s24 + $0x180] sm:$0xff] }
 0x29c   :  { %4446 = vmatpush.bf16.msrb.mxu1 %v1982_v36  ;;  %v1667_v35 = vpop.f32.mrf.mxu0 }
 0x29d   :  { %v1668_v43 = vadd.f32 %v1667_v35, %v14780_v2  ;;  %v5563_v2 = vld [vmem:[%s22000_s24 + $0x190] sm:$0xff] }
 0x29e   :  { %v4147_v27 = vpop.f32.mrf.mxu2  ;;  %5844 = vperm.xlu1 %13543, %v5566_v24   ;;  %5839 = vperm.xlu0 %13542, %v5565_v18   ;;  %v15432_v24 = vpop.permute.xlu2 %2434  ;;  %v11525_v18 = vld [vmem:[%s21941_s28 + $0x600] sm:$0xf] }
 0x29f   :  { %v15401_v15 = vadd.f32 %v4147_v27, %v3979_v56  ;;  %5749 = vperm.xlu2 %13544, %v5547_v32   ;;  %v1890_v61 = vmax.f32 %v1668_v43, 0.0  ;;  %v13193_v32 = vld [vmem:[%s21941_s28 + $0x61c] sm:$0xf0]  ;;  %v15466_v35 = vpop.permute.xlu1 %2429 }
 0x2a0   :  { %v15403_v26 = vpop.f32.mrf.mxu1  ;;  %4447 = vmatpush.bf16.msrb.mxu1 %v1981_v40  ;;  %v11526_v9 = vor.u32 %v13193_v32, %v11525_v18  ;;  %v11557_v18 = vld [vmem:[%s21941_s28 + $0x640] sm:$0xf] }
 0x2a1   :  { %v15405_v34 = vpack.c.bf16 %v1890_v61, %v1889_v54 }
 0x2a3   :  { %4060 = vmatmul.bf16.gmra.mxu1 %v11494_v60  ;;  %4189 = vmatmul.bf16.gmra.mxu2 %v11242_v41 }
 0x2a4   :  { %4318 = vmatmul.bf16.gmra.mxu3 %v10990_v46  ;;  %4448 = vmatpush.bf16.msrb.mxu1 %v15114_v53  ;;  %v1670_v57 = vpop.f32.mrf.mxu0  ;;  %v15424_v53 = vpop.permute.xlu0 %2354  ;;  %v5562_v46 = vld [vmem:[%s22000_s24 + $0x188] sm:$0xff] }
 0x2a6   :  { %v4150_v33 = vpop.f32.mrf.mxu2  ;;  %5829 = vperm.xlu1 %13543, %v5563_v2   ;;  %5754 = vperm.xlu0 %13542, %v5548_v28   ;;  %v2420_v54 = vpop.permute.xlu2 %2419  ;;  %v12975_v2 = vld [vmem:[%s21934_s29 + $0x150] sm:$0xff] }
 0x2a7   :  { %v15426_v52 = vadd.f32 %v4150_v33, %v3982_v7  ;;  %5834 = vperm.xlu2 %13544, %v5564_v25   ;;  %10732 = vmatmul.msk.bf16.gmra.mxu0 %vm1303_vm0, %v12974_v31  ;;  %v3987_v28 = vadd.f32 %v14992_v51, %v2420_v54  ;;  %v7404_v51 = vld [vmem:[%s21904_s8 + $0xf8] sm:$0xff] }
 0x2a8   :  { %v15429_v36 = vpop.f32.mrf.mxu1  ;;  %4449 = vmatpush.bf16.msrb.mxu1 %v15055_v12  ;;  %v1671_v12 = vadd.f32 %v1670_v57, %v14689_v42  ;;  %v11021_v42 = vld [vmem:[%s21941_s28 + $0x208] sm:$0xf] }
 0x2aa   :  { %v1891_v8 = vmax.f32 %v1671_v12, 0.0 }
 0x2ac   :  { %4450 = vmatpush.bf16.msrb.mxu1 %v14995_v0  ;;  %v1672_v21 = vpop.f32.mrf.mxu0  ;;  %v13066_v0 = vld [vmem:[%s21941_s28 + $0x224] sm:$0xf0]  ;;  %v2340_v60 = vpop.permute.xlu0 %2339 }
 0x2ad   :  { %v1673_v22 = vadd.f32 %v1672_v21, %v14602_v49  ;;  %v11022_v40 = vor.u32 %v13066_v0, %v11021_v42  ;;  %v7387_v49 = vld [vmem:[%s21904_s8 + $0x70] sm:$0xff]  ;;  %v3947_v61 = vadd.f32 %v14564_v62, %v2340_v60  ;;  %v13133_v21 = vld [vmem:[%s21941_s28 + $0x444] sm:$0xf] }
 0x2ae   :  { %v4152_v56 = vpop.f32.mrf.mxu2  ;;  %5744 = vperm.xlu1 %13543, %v5546_v1   ;;  %5739 = vperm.xlu0 %13542, %v5545_v55   ;;  %v2345_v55 = vpop.permute.xlu1 %2344  ;;  %v11303_v42 = vld [vmem:[%s21941_s28 + $0x460] sm:$0xf0] }
 0x2af   :  { %v15468_v17 = vadd.f32 %v4152_v56, %v3984_v14  ;;  %5819 = vperm.xlu2 %13544, %v5561_v10   ;;  %v1892_v43 = vmax.f32 %v1673_v22, 0.0  ;;  %v4116_v31 = vadd.f32 %v15011_v37, %v3947_v61  ;;  %v7403_v37 = vld [vmem:[%s21904_s8 + $0xf0] sm:$0xff]  ;;  %v7385_v10 = vld [vmem:[%s21904_s8 + $0x60] sm:$0xff]  ;;  %v3949_v12 = vadd.f32 %v14588_v4, %v2345_v55  ;;  %v11053_v4 = vld [vmem:[%s21941_s28 + $0x248] sm:$0xf] }
 0x2b0   :  { %v15470_v27 = vpop.f32.mrf.mxu1  ;;  %4451 = vmatpush.bf16.msrb.mxu1 %v14933_v38  ;;  %v7388_v38 = vld [vmem:[%s21904_s8 + $0x78] sm:$0xff]  ;;  %v13201_v14 = vld [vmem:[%s21941_s28 + $0x65c] sm:$0xf0]  ;;  %v13074_v56 = vld [vmem:[%s21941_s28 + $0x264] sm:$0xf0] }
 0x2b1   :  { %v15473_v41 = vpack.c.bf16 %v1892_v43, %v1891_v8 }
 0x2b3   :  { %4065 = vmatmul.bf16.gmra.mxu1 %v11526_v9  ;;  %4194 = vmatmul.bf16.gmra.mxu2 %v11274_v45  ;;  %v4118_v9 = vadd.f32 %v15051_v50, %v3949_v12  ;;  %v22029_v45 = vld [vmem:[#allocation29_spill] sm:$0xff]  ;;  %v7401_v50 = vld [vmem:[%s21904_s8 + $0xe0] sm:$0xff] }
 0x2b4   :  { %4323 = vmatmul.bf16.gmra.mxu3 %v11022_v40  ;;  %v1675_v25 = vpop.f32.mrf.mxu0  ;;  %v2425_v32 = vpop.permute.xlu0 %2424 }
 0x2b5   :  { %v1676_v6 = vadd.f32 %v1675_v25, %v22028_v13  ;;  %v3989_v0 = vadd.f32 %v15016_v48, %v2425_v32  ;;  %v11558_v48 = vor.u32 %v13201_v14, %v11557_v18  ;;  %v7386_v25 = vld [vmem:[%s21904_s8 + $0x68] sm:$0xff]  ;;  %v7384_v32 = vld [vmem:[%s21904_s8 + $0x58] sm:$0xff] }
 0x2b6   :  { %v4155_v7 = vpop.f32.mrf.mxu2  ;;  %7477 = vperm.xlu1 %13543, %v7387_v49   ;;  %5824 = vperm.xlu0 %13542, %v5562_v46   ;;  %v11306_v49 = vor.u32 %v13133_v21, %v11303_v42  ;;  %v22032_v13 = vld [vmem:[#allocation48_spill] sm:$0xff]  ;;  %v13209_v42 = vld [vmem:[%s21941_s28 + $0x69c] sm:$0xf0] }
 0x2b7   :  { %v15490_v62 = vadd.f32 %v4155_v7, %v3987_v28  ;;  %v4284_v57 = vpop.f32.mrf.mxu3  ;;  %7482 = vperm.xlu2 %13544, %v7388_v38   ;;  %10733 = vmatmul.msk.bf16.gmra.mxu0 %vm1303_vm0, %v12975_v2  ;;  %v1893_v54 = vmax.f32 %v1676_v6, 0.0  ;;  %v11054_v2 = vor.u32 %v13074_v56, %v11053_v4  ;;  %v12976_v7 = vld [vmem:[%s21934_s29 + $0x158] sm:$0xff]  ;;  %v3954_v6 = vadd.f32 %v22032_v13, %v15424_v53  ;;  %v22033_v14 = vld [vmem:[#allocation20_spill] sm:$0xff] }
 0x2b8   :  { %v15492_v33 = vadd.f32 %v4284_v57, %v4116_v31  ;;  %v15495_v1 = vpop.f32.mrf.mxu1  ;;  %v7402_v31 = vld [vmem:[%s21904_s8 + $0xe8] sm:$0xff]  ;;  %v3992_v57 = vadd.f32 %v15053_v58, %v15466_v35  ;;  %v7383_v58 = vld [vmem:[%s21904_s8 + $0x50] sm:$0xff]  ;;  %v3994_v4 = vadd.f32 %v15077_v47, %v15432_v24 }
 0x2b9   :  { %v7399_v35 = vld [vmem:[%s21904_s8 + $0xd0] sm:$0xff]  ;;  %v11085_v53 = vld [vmem:[%s21941_s28 + $0x288] sm:$0xf] }
 0x2ba   :  { %22027 = vst [vmem:[#allocation4_spill] sm:$0xff] %v15492_v33 }
 0x2bc   :  { %v1677_v22 = vpop.f32.mrf.mxu0 }
 0x2bd   :  { %v1678_v8 = vadd.f32 %v1677_v22, %v22029_v45  ;;  %v11335_v22 = vld [vmem:[%s21941_s28 + $0x4a0] sm:$0xf0]  ;;  %v4123_v45 = vadd.f32 %v15110_v5, %v3954_v6  ;;  %v15625_v6 = vpop.permute.xlu2 %2574 }
 0x2be   :  { %v4157_v43 = vpop.f32.mrf.mxu2  ;;  %7562 = vperm.xlu1 %13543, %v7404_v51   ;;  %7557 = vperm.xlu0 %13542, %v7403_v37   ;;  %v7381_v5 = vld [vmem:[%s21904_s8 + $0x40] sm:$0xff]  ;;  %22037 = vst [vmem:[#allocation29_spill] sm:$0xff] %v15625_v6 }
 0x2bf   :  { %v15529_v40 = vadd.f32 %v4157_v43, %v3989_v0  ;;  %v4286_v60 = vpop.f32.mrf.mxu3  ;;  %7467 = vperm.xlu2 %13544, %v7385_v10   ;;  %v1894_v61 = vmax.f32 %v1678_v8, 0.0  ;;  %v13141_v0 = vld [vmem:[%s21941_s28 + $0x484] sm:$0xf] }
 0x2c0   :  { %v15531_v46 = vadd.f32 %v4286_v60, %v4118_v9  ;;  %v15533_v38 = vpop.f32.mrf.mxu1  ;;  %v13082_v9 = vld [vmem:[%s21941_s28 + $0x2a4] sm:$0xf0]  ;;  %v11338_v24 = vor.u32 %v13141_v0, %v11335_v22  ;;  %v11367_v0 = vld [vmem:[%s21941_s28 + $0x4e0] sm:$0xf0]  ;;  %v3999_v22 = vadd.f32 %v15136_v16, %v15420_v44 }
 0x2c1   :  { %v15535_v28 = vpack.c.bf16 %v1894_v61, %v1893_v54  ;;  %v22034_v8 = vld [vmem:[#allocation39_spill] sm:$0xff] }
 0x2c2   :  { %22030 = vst [vmem:[#allocation3_spill] sm:$0xff] %v15531_v46 }
 0x2c3   :  { %4070 = vmatmul.bf16.gmra.mxu1 %v11558_v48  ;;  %4199 = vmatmul.bf16.gmra.mxu2 %v11306_v49 }
 0x2c4   :  { %4328 = vmatmul.bf16.gmra.mxu3 %v11054_v2  ;;  %v1680_v55 = vpop.f32.mrf.mxu0 }
 0x2c5   :  { %v1681_v21 = vadd.f32 %v1680_v55, %v22033_v14  ;;  %v12977_v55 = vld [vmem:[%s21934_s29 + $0x160] sm:$0xff]  ;;  %v7379_v14 = vld [vmem:[%s21904_s8 + $0x30] sm:$0xff] }
 0x2c6   :  { %v4160_v51 = vpop.f32.mrf.mxu2  ;;  %7547 = vperm.xlu1 %13543, %v7401_v50   ;;  %7472 = vperm.xlu0 %13542, %v7386_v25   ;;  %v11086_v25 = vor.u32 %v13082_v9, %v11085_v53  ;;  %v13090_v53 = vld [vmem:[%s21941_s28 + $0x2e4] sm:$0xf0] }
 0x2c7   :  { %v15551_v37 = vadd.f32 %v4160_v51, %v3992_v57  ;;  %v4289_v10 = vpop.f32.mrf.mxu3  ;;  %7552 = vperm.xlu2 %13544, %v7402_v31   ;;  %10734 = vmatmul.msk.bf16.gmra.mxu0 %vm1303_vm0, %v12976_v7  ;;  %v1895_v54 = vmax.f32 %v1681_v21, 0.0  ;;  %v7400_v7 = vld [vmem:[%s21904_s8 + $0xd8] sm:$0xff]  ;;  %v7382_v57 = vld [vmem:[%s21904_s8 + $0x48] sm:$0xff]  ;;  %v3997_v51 = vadd.f32 %v15112_v30, %v15390_v3  ;;  %v7397_v3 = vld [vmem:[%s21904_s8 + $0xc0] sm:$0xff] }
 0x2c8   :  { %v15554_v18 = vadd.f32 %v4289_v10, %v15072_v29  ;;  %v15557_v12 = vpop.f32.mrf.mxu1  ;;  %v11589_v29 = vld [vmem:[%s21941_s28 + $0x680] sm:$0xf]  ;;  %v7398_v30 = vld [vmem:[%s21904_s8 + $0xc8] sm:$0xff] }
 0x2c9   :  { %v11590_v47 = vor.u32 %v13209_v42, %v11589_v29  ;;  %v13217_v21 = vld [vmem:[%s21941_s28 + $0x6dc] sm:$0xf0]  ;;  %v13149_v42 = vld [vmem:[%s21941_s28 + $0x4c4] sm:$0xf] }
 0x2ca   :  { %22031 = vst [vmem:[#allocation6_spill] sm:$0xff] %v15554_v18 }
 0x2cc   :  { %v1682_v56 = vpop.f32.mrf.mxu0 }
 0x2cd   :  { %v1683_v43 = vadd.f32 %v1682_v56, %v22034_v8  ;;  %v11117_v56 = vld [vmem:[%s21941_s28 + $0x2c8] sm:$0xf] }
 0x2ce   :  { %v4162_v60 = vpop.f32.mrf.mxu2  ;;  %7462 = vperm.xlu1 %13543, %v7384_v32   ;;  %7457 = vperm.xlu0 %13542, %v7383_v58  }
 0x2cf   :  { %v15593_v48 = vadd.f32 %v4162_v60, %v3994_v4  ;;  %v4291_v49 = vpop.f32.mrf.mxu3  ;;  %7537 = vperm.xlu2 %13544, %v7399_v35   ;;  %v1896_v61 = vmax.f32 %v1683_v43, 0.0  ;;  %v11370_v60 = vor.u32 %v13149_v42, %v11367_v0  ;;  %v7393_v42 = vld [vmem:[%s21904_s8 + $0xa0] sm:$0xff] }
 0x2d0   :  { %v15595_v2 = vadd.f32 %v4291_v49, %v4123_v45  ;;  %v15597_v50 = vpop.f32.mrf.mxu1  ;;  %v11118_v49 = vor.u32 %v13090_v53, %v11117_v56  ;;  %v11653_v0 = vld [vmem:[%s21941_s28 + $0x700] sm:$0xf]  ;;  %v13157_v53 = vld [vmem:[%s21941_s28 + $0x504] sm:$0xf] }
 0x2d1   :  { %v15599_v31 = vpack.c.bf16 %v1896_v61, %v1895_v54  ;;  %v15670_v54 = vpop.permute.xlu2 %2559  ;;  %v7380_v61 = vld [vmem:[%s21904_s8 + $0x38] sm:$0xff]  ;;  %v13225_v56 = vld [vmem:[%s21941_s28 + $0x71c] sm:$0xf0] }
 0x2d2   :  { %22035 = vst [vmem:[#allocation5_spill] sm:$0xff] %v15595_v2  ;;  %v22064_v2 = vld [vmem:[#allocation84_spill] sm:$0xff] }
 0x2d3   :  { %4075 = vmatmul.bf16.gmra.mxu1 %v11590_v47  ;;  %4204 = vmatmul.bf16.gmra.mxu2 %v11338_v24  ;;  %v15665_v47 = vpop.permute.xlu0 %2649  ;;  %v7395_v24 = vld [vmem:[%s21904_s8 + $0xb0] sm:$0xff]  ;;  %22040 = vst [vmem:[#allocation39_spill] sm:$0xff] %v15670_v54  ;;  %v22080_v54 = vld [vmem:[#allocation7_spill] sm:$0xff] }
 0x2d4   :  { %4333 = vmatmul.bf16.gmra.mxu3 %v11086_v25  ;;  %v15615_v10 = vpop.f32.mrf.mxu0  ;;  %22039 = vst [vmem:[#allocation20_spill] sm:$0xff] %v15665_v47  ;;  %v12978_v25 = vld [vmem:[%s21934_s29 + $0x168] sm:$0xff] }
 0x2d6   :  { %v4165_v32 = vpop.f32.mrf.mxu2  ;;  %7447 = vperm.xlu1 %13543, %v7381_v5   ;;  %7542 = vperm.xlu0 %13542, %v7400_v7   ;;  %v22041_v5 = vld [vmem:[#allocation72_spill] sm:$0xff]  ;;  %v22042_v7 = vld [vmem:[#allocation77_spill] sm:$0xff] }
 0x2d7   :  { %v15617_v58 = vadd.f32 %v4165_v32, %v3997_v51  ;;  %v4294_v35 = vpop.f32.mrf.mxu3  ;;  %7452 = vperm.xlu2 %13544, %v7382_v57   ;;  %10735 = vmatmul.msk.bf16.gmra.mxu0 %vm1303_vm0, %v12977_v55  ;;  %v4002_v57 = vadd.f32 %v22042_v7, %v22041_v5 }
 0x2d8   :  { %v15620_v29 = vadd.f32 %v4294_v35, %v15131_v19  ;;  %v15623_v13 = vpop.f32.mrf.mxu1  ;;  %v11621_v19 = vld [vmem:[%s21941_s28 + $0x6c0] sm:$0xf] }
 0x2d9   :  { %v11622_v43 = vor.u32 %v13217_v21, %v11621_v19  ;;  %v7378_v19 = vld [vmem:[%s21904_s8 + $0x28] sm:$0xff]  ;;  %v7377_v21 = vld [vmem:[%s21904_s8 + $0x20] sm:$0xff] }
 0x2da   :  { %22036 = vst [vmem:[#allocation37_spill] sm:$0xff] %v15620_v29 }
 0x2dc   :  { %v15650_v4 = vpop.f32.mrf.mxu0 }
 0x2de   :  { %v4167_v9 = vpop.f32.mrf.mxu2  ;;  %7532 = vperm.xlu1 %13543, %v7398_v30   ;;  %7527 = vperm.xlu0 %13542, %v7397_v3   ;;  %v22043_v30 = vld [vmem:[#allocation78_spill] sm:$0xff] }
 0x2df   :  { %v15658_v45 = vadd.f32 %v4167_v9, %v3999_v22  ;;  %v4296_v8 = vpop.f32.mrf.mxu3  ;;  %7437 = vperm.xlu2 %13544, %v7379_v14   ;;  %v15705_v22 = vpop.permute.xlu0 %2564  ;;  %v11399_v9 = vld [vmem:[%s21941_s28 + $0x520] sm:$0xf0] }
 0x2e0   :  { %v15661_v16 = vadd.f32 %v4296_v8, %v15169_v11  ;;  %v15663_v44 = vpop.f32.mrf.mxu1  ;;  %v7396_v11 = vld [vmem:[%s21904_s8 + $0xb8] sm:$0xff]  ;;  %22045 = vst [vmem:[#allocation77_spill] sm:$0xff] %v15705_v22  ;;  %v22046_v8 = vld [vmem:[#allocation79_spill] sm:$0xff]  ;;  %v11402_v7 = vor.u32 %v13157_v53, %v11399_v9 }
 0x2e1   :  { %v22052_v53 = vld [vmem:[#allocation81_spill] sm:$0xff] }
 0x2e2   :  { %22038 = vst [vmem:[#allocation48_spill] sm:$0xff] %v15661_v16 }
 0x2e3   :  { %4080 = vmatmul.bf16.gmra.mxu1 %v11622_v43  ;;  %4209 = vmatmul.bf16.gmra.mxu2 %v11370_v60  ;;  %v4004_v43 = vadd.f32 %v22046_v8, %v15341_v23  ;;  %v11654_v23 = vor.u32 %v13225_v56, %v11653_v0  ;;  %v7375_v8 = vld [vmem:[%s21904_s8 + $0x10] sm:$0xff]  ;;  %v22051_v56 = vld [vmem:[#allocation74_spill] sm:$0xff] }
 0x2e4   :  { %4338 = vmatmul.bf16.gmra.mxu3 %v11118_v49  ;;  %v15683_v55 = vpop.f32.mrf.mxu0  ;;  %v11149_v49 = vld [vmem:[%s21941_s28 + $0x308] sm:$0xf]  ;;  %v12979_v0 = vld [vmem:[%s21934_s29 + $0x170] sm:$0xff]  ;;  %v4007_v9 = vadd.f32 %v22052_v53, %v22051_v56  ;;  %v7392_v56 = vld [vmem:[%s21904_s8 + $0x98] sm:$0xff] }
 0x2e5   :  { %v13165_v53 = vld [vmem:[%s21941_s28 + $0x544] sm:$0xf] }
 0x2e6   :  { %v4170_v51 = vpop.f32.mrf.mxu2  ;;  %7517 = vperm.xlu1 %13543, %v7395_v24   ;;  %7442 = vperm.xlu0 %13542, %v7380_v61   ;;  %v13098_v24 = vld [vmem:[%s21941_s28 + $0x324] sm:$0xf0]  ;;  %v15726_v61 = vpop.permute.xlu2 %2644 }
 0x2e7   :  { %v15685_v32 = vadd.f32 %v4170_v51, %v4002_v57  ;;  %v4299_v35 = vpop.f32.mrf.mxu3  ;;  %7522 = vperm.xlu2 %13544, %v7396_v11   ;;  %10736 = vmatmul.msk.bf16.gmra.mxu0 %vm1303_vm0, %v12978_v25  ;;  %22047 = vst [vmem:[#allocation78_spill] sm:$0xff] %v15726_v61  ;;  %v22048_v57 = vld [vmem:[#allocation80_spill] sm:$0xff] }
 0x2e8   :  { %v15688_v3 = vadd.f32 %v4299_v35, %v22043_v30  ;;  %v15691_v14 = vpop.f32.mrf.mxu1  ;;  %v11150_v30 = vor.u32 %v13098_v24, %v11149_v49  ;;  %v15753_v49 = vpop.permute.xlu0 %2549  ;;  %v11181_v61 = vld [vmem:[%s21941_s28 + $0x348] sm:$0xf] }
 0x2e9   :  { %22053 = vst [vmem:[#allocation74_spill] sm:$0xff] %v15753_v49 }
 0x2ea   :  { %22044 = vst [vmem:[#allocation72_spill] sm:$0xff] %v15688_v3 }
 0x2ec   :  { %v15718_v60 = vpop.f32.mrf.mxu0 }
 0x2ee   :  { %v4172_v11 = vpop.f32.mrf.mxu2  ;;  %7432 = vperm.xlu1 %13543, %v7378_v19   ;;  %7427 = vperm.xlu0 %13542, %v7377_v21   ;;  %v15738_v19 = vpop.permute.xlu1 %2569  ;;  %v7394_v21 = vld [vmem:[%s21904_s8 + $0xa8] sm:$0xff] }
 0x2ef   :  { %v15728_v25 = vadd.f32 %v4172_v11, %v4004_v43  ;;  %v4301_v5 = vpop.f32.mrf.mxu3  ;;  %7507 = vperm.xlu2 %13544, %v7393_v42   ;;  %22050 = vst [vmem:[#allocation80_spill] sm:$0xff] %v15738_v19  ;;  %v7376_v42 = vld [vmem:[%s21904_s8 + $0x18] sm:$0xff] }
 0x2f0   :  { %v15731_v51 = vadd.f32 %v4301_v5, %v22048_v57  ;;  %v15733_v35 = vpop.f32.mrf.mxu1  ;;  %v22079_v19 = vld [vmem:[#allocation21_spill] sm:$0xff] }
 0x2f2   :  { %22049 = vst [vmem:[#allocation79_spill] sm:$0xff] %v15731_v51 }
 0x2f3   :  { %4085 = vmatmul.bf16.gmra.mxu1 %v11654_v23  ;;  %4214 = vmatmul.bf16.gmra.mxu2 %v11402_v7  ;;  %v15757_v23 = vpop.permute.xlu2 %2629  ;;  %v22056_v7 = vld [vmem:[#allocation82_spill] sm:$0xff] }
 0x2f4   :  { %4343 = vmatmul.bf16.gmra.mxu3 %v11150_v30  ;;  %v15751_v43 = vpop.f32.mrf.mxu0  ;;  %22055 = vst [vmem:[#allocation88_spill] sm:$0xff] %v15757_v23  ;;  %v13106_v23 = vld [vmem:[%s21941_s28 + $0x364] sm:$0xf0] }
 0x2f5   :  { %v11182_v33 = vor.u32 %v13106_v23, %v11181_v61  ;;  %v22068_v61 = vld [vmem:[#allocation76_spill] sm:$0xff] }
 0x2f6   :  { %v4175_v24 = vpop.f32.mrf.mxu2  ;;  %7417 = vperm.xlu1 %13543, %v7375_v8   ;;  %7512 = vperm.xlu0 %13542, %v7394_v21   ;;  %v7391_v8 = vld [vmem:[%s21904_s8 + $0x90] sm:$0xff]  ;;  %v7373_v21 = vld [vmem:[%s21904_s8] sm:$0xff] }
 0x2f7   :  { %v15755_v11 = vadd.f32 %v4175_v24, %v4007_v9  ;;  %v4304_v5 = vpop.f32.mrf.mxu3  ;;  %7422 = vperm.xlu2 %13544, %v7376_v42   ;;  %10737 = vmatmul.msk.bf16.gmra.mxu0 %vm1303_vm0, %v12979_v0  ;;  %v11685_v42 = vld [vmem:[%s21941_s28 + $0x740] sm:$0xf]  ;;  %v11431_v9 = vld [vmem:[%s21941_s28 + $0x560] sm:$0xf0] }
 0x2f8   :  { %v15760_v57 = vadd.f32 %v4304_v5, %v22056_v7  ;;  %v15763_v30 = vpop.f32.mrf.mxu1  ;;  %v13233_v0 = vld [vmem:[%s21941_s28 + $0x75c] sm:$0xf0] }
 0x2f9   :  { %22054 = vst [vmem:[#allocation81_spill] sm:$0xff] %v15755_v11  ;;  %v22059_v24 = vld [vmem:[#allocation70_spill] sm:$0xff]  ;;  %v22060_v5 = vld [vmem:[#allocation83_spill] sm:$0xff]  ;;  %v11686_v29 = vor.u32 %v13233_v0, %v11685_v42 }
 0x2fa   :  { %22057 = vst [vmem:[#allocation82_spill] sm:$0xff] %v15760_v57  ;;  %v4009_v7 = vadd.f32 %v22060_v5, %v22059_v24  ;;  %v15794_v57 = vpop.permute.xlu1 %2654  ;;  %v11434_v24 = vor.u32 %v13165_v53, %v11431_v9  ;;  %v15798_v5 = vpop.permute.xlu0 %2634  ;;  %v22072_v53 = vld [vmem:[#allocation86_spill] sm:$0xff] }
 0x2fb   :  { %22058 = vst [vmem:[#allocation89_spill] sm:$0xff] %v15763_v30  ;;  %v15805_v6 = vpop.permute.xlu2 %2544  ;;  %v22081_v30 = vld [vmem:[#allocation8_spill] sm:$0xff] }
 0x2fc   :  { %v1697_v47 = vpop.f32.mrf.mxu0  ;;  %22061 = vst [vmem:[#allocation70_spill] sm:$0xff] %v15794_v57  ;;  %v11213_v57 = vld [vmem:[%s21941_s28 + $0x388] sm:$0xf] }
 0x2fd   :  { %22063 = vst [vmem:[#allocation90_spill] sm:$0xff] %v15798_v5  ;;  %v22077_v5 = vld [vmem:[#allocation73_spill] sm:$0xff]  ;;  %v1698_v22 = vadd.f32 %v1697_v47, %v22079_v19  ;;  %v22083_v19 = vld [vmem:[#allocation16_spill] sm:$0xff] }
 0x2fe   :  { %v4177_v51 = vpop.f32.mrf.mxu2  ;;  %7502 = vperm.xlu1 %13543, %v7392_v56   ;;  %7497 = vperm.xlu0 %13542, %v7391_v8   ;;  %22067 = vst [vmem:[#allocation92_spill] sm:$0xff] %v15805_v6  ;;  %v7374_v56 = vld [vmem:[%s21904_s8 + $0x8] sm:$0xff]  ;;  %v1696_v6 = vadd.f32 %v15751_v43, %v22081_v30  ;;  %v8333_v43 = vld [vmem:[%s21905_s10 + $0x60] sm:$0xff] }
 0x2ff   :  { %v15796_v3 = vadd.f32 %v4177_v51, %v4009_v7  ;;  %v4306_v16 = vpop.f32.mrf.mxu3  ;;  %7407 = vperm.xlu2 %13544, %v7373_v21   ;;  %v7389_v51 = vld [vmem:[%s21904_s8 + $0x80] sm:$0xff]  ;;  %v22084_v30 = vld [vmem:[#allocation24_spill] sm:$0xff] }
 0x300   :  { %v15801_v18 = vadd.f32 %v4306_v16, %v22064_v2  ;;  %v15803_v46 = vpop.f32.mrf.mxu1  ;;  %v7390_v2 = vld [vmem:[%s21904_s8 + $0x88] sm:$0xff]  ;;  %v12980_v16 = vld [vmem:[%s21934_s29 + $0x178] sm:$0xff] }
 0x301   :  { %22062 = vst [vmem:[#allocation83_spill] sm:$0xff] %v15796_v3 }
 0x302   :  { %22065 = vst [vmem:[#allocation84_spill] sm:$0xff] %v15801_v18  ;;  %v15823_v0 = vpop.permute.xlu1 %2639 }
 0x303   :  { %22066 = vst [vmem:[#allocation91_spill] sm:$0xff] %v15803_v46  ;;  %4090 = vmatmul.bf16.gmra.mxu1 %v11686_v29  ;;  %4219 = vmatmul.bf16.gmra.mxu2 %v11434_v24  ;;  %v22069_v29 = vld [vmem:[#allocation85_spill] sm:$0xff]  ;;  %v15831_v24 = vpop.permute.xlu0 %2619 }
 0x304   :  { %4348 = vmatmul.bf16.gmra.mxu3 %v11182_v33  ;;  %v4012_v23 = vadd.f32 %v22069_v29, %v22068_v61  ;;  %v1700_v8 = vpop.f32.mrf.mxu0  ;;  %22071 = vst [vmem:[#allocation85_spill] sm:$0xff] %v15823_v0  ;;  %v13241_v61 = vld [vmem:[%s21941_s28 + $0x79c] sm:$0xf0]  ;;  %v13173_v29 = vld [vmem:[%s21941_s28 + $0x584] sm:$0xf] }
 0x305   :  { %22075 = vst [vmem:[#allocation94_spill] sm:$0xff] %v15831_v24  ;;  %v13114_v0 = vld [vmem:[%s21941_s28 + $0x3a4] sm:$0xf0] }
 0x306   :  { %v4180_v21 = vpop.f32.mrf.mxu2  ;;  %7487 = vperm.xlu1 %13543, %v7389_v51   ;;  %7412 = vperm.xlu0 %13542, %v7374_v56   ;;  %v8336_v51 = vld [vmem:[%s21905_s10 + $0x78] sm:$0xff]  ;;  %v8335_v56 = vld [vmem:[%s21905_s10 + $0x70] sm:$0xff]  ;;  %v11214_v3 = vor.u32 %v13114_v0, %v11213_v57 }
 0x307   :  { %v15821_v42 = vadd.f32 %v4180_v21, %v4012_v23  ;;  %v4309_v33 = vpop.f32.mrf.mxu3  ;;  %7492 = vperm.xlu2 %13544, %v7390_v2   ;;  %10738 = vmatmul.msk.bf16.gmra.mxu0 %vm1303_vm0, %v12980_v16  ;;  %v8351_v2 = vld [vmem:[%s21905_s10 + $0xf0] sm:$0xff]  ;;  %v11717_v16 = vld [vmem:[%s21941_s28 + $0x780] sm:$0xf]  ;;  %v15851_v23 = vpop.permute.xlu2 %2529 }
 0x308   :  { %v15826_v9 = vadd.f32 %v4309_v33, %v22072_v53  ;;  %v15829_v7 = vpop.f32.mrf.mxu1  ;;  %v22076_v21 = vld [vmem:[#allocation10_spill] sm:$0xff]  ;;  %v11463_v53 = vld [vmem:[%s21941_s28 + $0x5a0] sm:$0xf0] }
 0x309   :  { %22070 = vst [vmem:[#allocation76_spill] sm:$0xff] %v15821_v42  ;;  %v1701_v33 = vadd.f32 %v1700_v8, %v22076_v21  ;;  %v11466_v49 = vor.u32 %v13173_v29, %v11463_v53 }
 0x30a   :  { %22073 = vst [vmem:[#allocation86_spill] sm:$0xff] %v15826_v9  ;;  %v22078_v9 = vld [vmem:[#allocation87_spill] sm:$0xff] }
 0x30b   :  { %22074 = vst [vmem:[#allocation93_spill] sm:$0xff] %v15829_v7  ;;  %v4014_v18 = vadd.f32 %v22078_v9, %v22077_v5  ;;  %v11718_v7 = vor.u32 %v13241_v61, %v11717_v16  ;;  %v1903_v11 = vmax.f32 %v1701_v33, 0.0  ;;  %v15883_v57 = vpop.permute.xlu0 %2534  ;;  %v22088_v61 = vld [vmem:[#allocation30_spill] sm:$0xff] }
 0x30c   :  { %v1702_v24 = vpop.f32.mrf.mxu0  ;;  %v1686_v29 = vadd.f32 %v15615_v10, %v22088_v61  ;;  %v8350_v10 = vld [vmem:[%s21905_s10 + $0xe8] sm:$0xff] }
 0x30d   :  { %v1703_v8 = vadd.f32 %v1702_v24, %v22080_v54  ;;  %v15876_v54 = vpop.permute.xlu1 %2554  ;;  %v1902_v24 = vmax.f32 %v1698_v22, 0.0  ;;  %v8334_v22 = vld [vmem:[%s21905_s10 + $0x68] sm:$0xff] }
 0x30e   :  { %v4182_v21 = vpop.f32.mrf.mxu2  ;;  %8430 = vperm.xlu1 %13543, %v8336_v51   ;;  %8425 = vperm.xlu0 %13542, %v8335_v56  }
 0x30f   :  { %v15867_v42 = vadd.f32 %v4182_v21, %v4014_v18  ;;  %v4311_v46 = vpop.f32.mrf.mxu3  ;;  %8505 = vperm.xlu2 %13544, %v8351_v2   ;;  %v1904_v5 = vmax.f32 %v1703_v8, 0.0  ;;  %v1693_v18 = vadd.f32 %v15718_v60, %v22083_v19  ;;  %v8352_v60 = vld [vmem:[%s21905_s10 + $0xf8] sm:$0xff]  ;;  %v1897_v19 = vmax.f32 %v1686_v29, 0.0 }
 0x310   :  { %v15872_v9 = vadd.f32 %v4311_v46, %v15333_v20  ;;  %v15874_v47 = vpop.f32.mrf.mxu1  ;;  %v1691_v20 = vadd.f32 %v15683_v55, %v22084_v30  ;;  %v1901_v46 = vmax.f32 %v1696_v6, 0.0  ;;  %v15898_v55 = vpop.permute.xlu2 %2614  ;;  %v22087_v6 = vld [vmem:[#allocation22_spill] sm:$0xff] }
 0x311   :  { %v1992_v51 = vpack.c.bf16 %v1904_v5, %v1903_v11  ;;  %v22085_v11 = vld [vmem:[#allocation64_spill] sm:$0xff]  ;;  %22086 = vst [vmem:[#allocation73_spill] sm:$0xff] %v15898_v55  ;;  %v1900_v56 = vmax.f32 %v1693_v18, 0.0  ;;  %v8349_v18 = vld [vmem:[%s21905_s10 + $0xe0] sm:$0xff] }
 0x312   :  { %22082 = vst [vmem:[#allocation10_spill] sm:$0xff] %v15872_v9  ;;  %v4017_v0 = vadd.f32 %v15337_v63, %v22085_v11  ;;  %v1991_v16 = vpack.c.bf16 %v1902_v24, %v1901_v46  ;;  %v1899_v8 = vmax.f32 %v1691_v20, 0.0  ;;  %v11749_v24 = vld [vmem:[%s21941_s28 + $0x7c0] sm:$0xf]  ;;  %v13181_v46 = vld [vmem:[%s21941_s28 + $0x5c4] sm:$0xf] }
 0x313   :  { %4095 = vmatmul.bf16.gmra.mxu1 %v11718_v7  ;;  %4224 = vmatmul.bf16.gmra.mxu2 %v11466_v49  ;;  %v12981_v49 = vld [vmem:[%s21934_s29 + $0x180] sm:$0xff] }
 0x314   :  { %4353 = vmatmul.bf16.gmra.mxu3 %v11214_v3  ;;  %4613 = vmatpush.bf16.msrb.mxu2 %v1992_v51  ;;  %v1705_v7 = vpop.f32.mrf.mxu0  ;;  %v1688_v3 = vadd.f32 %v15650_v4, %v22087_v6  ;;  %v1990_v5 = vpack.c.bf16 %v1900_v56, %v1899_v8  ;;  %v13249_v20 = vld [vmem:[%s21941_s28 + $0x7dc] sm:$0xf0]  ;;  %v15944_v6 = vpop.permute.xlu0 %2519 }
 0x315   :  { %v15924_v51 = vpop.permute.xlu1 %2539 }
 0x316   :  { %v4185_v2 = vpop.f32.mrf.mxu2  ;;  %8415 = vperm.xlu1 %13543, %v8333_v43   ;;  %8510 = vperm.xlu0 %13542, %v8352_v60   ;;  %v1898_v4 = vmax.f32 %v1688_v3, 0.0  ;;  %v22090_v43 = vld [vmem:[#allocation62_spill] sm:$0xff]  ;;  %v11495_v60 = vld [vmem:[%s21941_s28 + $0x5e0] sm:$0xf0]  ;;  %v22092_v3 = vld [vmem:[#allocation56_spill] sm:$0xff] }
 0x317   :  { %v15904_v33 = vadd.f32 %v4185_v2, %v4017_v0  ;;  %v4314_v53 = vpop.f32.mrf.mxu3  ;;  %8420 = vperm.xlu2 %13544, %v8334_v22   ;;  %10739 = vmatmul.msk.bf16.gmra.mxu0 %vm1303_vm0, %v12981_v49  ;;  %v1706_v30 = vadd.f32 %v1705_v7, %v22090_v43  ;;  %v22091_v22 = vld [vmem:[#allocation75_spill] sm:$0xff] }
 0x318   :  { %v15907_v63 = vadd.f32 %v4314_v53, %v15363_v39  ;;  %v15910_v21 = vpop.f32.mrf.mxu1  ;;  %4614 = vmatpush.bf16.msrb.mxu2 %v1991_v16  ;;  %v8331_v39 = vld [vmem:[%s21905_s10 + $0x50] sm:$0xff]  ;;  %v4019_v49 = vadd.f32 %v15366_v59, %v22091_v22  ;;  %v11245_v0 = vld [vmem:[%s21941_s28 + $0x3c8] sm:$0xf]  ;;  %v1989_v16 = vpack.c.bf16 %v1898_v4, %v1897_v19  ;;  %v11750_v59 = vor.u32 %v13249_v20, %v11749_v24  ;;  %v15949_v8 = vpop.permute.xlu2 %2599  ;;  %v8348_v19 = vld [vmem:[%s21905_s10 + $0xd8] sm:$0xff] }
 0x319   :  { %v13122_v7 = vld [vmem:[%s21941_s28 + $0x3e4] sm:$0xf0]  ;;  %v11498_v53 = vor.u32 %v13181_v46, %v11495_v60  ;;  %v8347_v4 = vld [vmem:[%s21905_s10 + $0xd0] sm:$0xff] }
 0x31a   :  { %22089 = vst [vmem:[#allocation87_spill] sm:$0xff] %v15907_v63 }
 0x31c   :  { %4615 = vmatpush.bf16.msrb.mxu2 %v1990_v5  ;;  %v1707_v11 = vpop.f32.mrf.mxu0  ;;  %v1905_v5 = vmax.f32 %v1706_v30, 0.0 }
 0x31d   :  { %v1708_v56 = vadd.f32 %v1707_v11, %v22092_v3  ;;  %v11246_v11 = vor.u32 %v13122_v7, %v11245_v0  ;;  %v15973_v20 = vpop.permute.xlu1 %2624  ;;  %v8330_v3 = vld [vmem:[%s21905_s10 + $0x48] sm:$0xff] }
 0x31e   :  { %v4187_v2 = vpop.f32.mrf.mxu2  ;;  %8500 = vperm.xlu1 %13543, %v8350_v10   ;;  %8495 = vperm.xlu0 %13542, %v8349_v18   ;;  %v12982_v18 = vld [vmem:[%s21934_s29 + $0x188] sm:$0xff]  ;;  %22095 = vst [vmem:[#allocation7_spill] sm:$0xff] %v15973_v20 }
 0x31f   :  { %v15947_v61 = vadd.f32 %v4187_v2, %v4019_v49  ;;  %v4316_v29 = vpop.f32.mrf.mxu3  ;;  %8405 = vperm.xlu2 %13544, %v8331_v39   ;;  %v1906_v43 = vmax.f32 %v1708_v56, 0.0  ;;  %v22094_v39 = vld [vmem:[#allocation68_spill] sm:$0xff]  ;;  %v15977_v49 = vpop.permute.xlu0 %2604  ;;  %v8329_v56 = vld [vmem:[%s21905_s10 + $0x40] sm:$0xff] }
 0x320   :  { %v15952_v22 = vadd.f32 %v4316_v29, %v15401_v15  ;;  %v15954_v63 = vpop.f32.mrf.mxu1  ;;  %4616 = vmatpush.bf16.msrb.mxu2 %v1989_v16  ;;  %v8332_v15 = vld [vmem:[%s21905_s10 + $0x58] sm:$0xff]  ;;  %v4022_v24 = vadd.f32 %v15403_v26, %v22094_v39  ;;  %v15986_v26 = vpop.permute.xlu2 %2514  ;;  %v13189_v2 = vld [vmem:[%s21941_s28 + $0x604] sm:$0xf] }
 0x321   :  { %v15956_v10 = vpack.c.bf16 %v1906_v43, %v1905_v5  ;;  %v22097_v16 = vld [vmem:[#allocation47_spill] sm:$0xff]  ;;  %v22098_v5 = vld [vmem:[#allocation61_spill] sm:$0xff] }
 0x322   :  { %22093 = vst [vmem:[#allocation21_spill] sm:$0xff] %v15952_v22  ;;  %v11527_v29 = vld [vmem:[%s21941_s28 + $0x620] sm:$0xf0]  ;;  %v4024_v43 = vadd.f32 %v15429_v36, %v22098_v5 }
 0x323   :  { %4100 = vmatmul.bf16.gmra.mxu1 %v11750_v59  ;;  %4229 = vmatmul.bf16.gmra.mxu2 %v11498_v53  ;;  %v12998_v59 = vld [vmem:[%s21941_s28 + $0xc] sm:$0xf] }
 0x324   :  { %4358 = vmatmul.bf16.gmra.mxu3 %v11246_v11  ;;  %4617 = vmatpush.bf16.msrb.mxu2 %v15599_v31  ;;  %v1710_v30 = vpop.f32.mrf.mxu0  ;;  %v10767_v53 = vld [vmem:[%s21941_s28 + $0x28] sm:$0xf0] }
 0x325   :  { %v10770_v36 = vor.u32 %v12998_v59, %v10767_v53 }
 0x326   :  { %v4190_v46 = vpop.f32.mrf.mxu2  ;;  %8485 = vperm.xlu1 %13543, %v8347_v4   ;;  %8410 = vperm.xlu0 %13542, %v8332_v15   ;;  %v13130_v4 = vld [vmem:[%s21941_s28 + $0x424] sm:$0xf0]  ;;  %v22099_v15 = vld [vmem:[#allocation41_spill] sm:$0xff] }
 0x327   :  { %v15975_v31 = vadd.f32 %v4190_v46, %v4022_v24  ;;  %v4319_v60 = vpop.f32.mrf.mxu3  ;;  %8490 = vperm.xlu2 %13544, %v8348_v19   ;;  %10740 = vmatmul.msk.bf16.gmra.mxu0 %vm1303_vm0, %v12982_v18  ;;  %v16022_v46 = vpop.permute.xlu1 %2609 }
 0x328   :  { %v15980_v0 = vadd.f32 %v4319_v60, %v15426_v52  ;;  %v15983_v7 = vpop.f32.mrf.mxu1  ;;  %4618 = vmatpush.bf16.msrb.mxu2 %v15535_v28  ;;  %v8345_v52 = vld [vmem:[%s21905_s10 + $0xc0] sm:$0xff]  ;;  %v1711_v28 = vadd.f32 %v1710_v30, %v22097_v16  ;;  %v11530_v30 = vor.u32 %v13189_v2, %v11527_v29  ;;  %v12983_v2 = vld [vmem:[%s21934_s29 + $0x190] sm:$0xff] }
 0x32a   :  { %22096 = vst [vmem:[#allocation8_spill] sm:$0xff] %v15980_v0  ;;  %v1907_v60 = vmax.f32 %v1711_v28, 0.0 }
 0x32c   :  { %4619 = vmatpush.bf16.msrb.mxu2 %v15473_v41  ;;  %v1712_v11 = vpop.f32.mrf.mxu0  ;;  %v11277_v41 = vld [vmem:[%s21941_s28 + $0x408] sm:$0xf] }
 0x32d   :  { %v1713_v19 = vadd.f32 %v1712_v11, %v22099_v15  ;;  %v11278_v11 = vor.u32 %v13130_v4, %v11277_v41 }
 0x32e   :  { %v4192_v18 = vpop.f32.mrf.mxu2  ;;  %8400 = vperm.xlu1 %13543, %v8330_v3   ;;  %8395 = vperm.xlu0 %13542, %v8329_v56   ;;  %v16030_v3 = vpop.permute.xlu0 %2589  ;;  %v8327_v56 = vld [vmem:[%s21905_s10 + $0x30] sm:$0xff] }
 0x32f   :  { %v16020_v39 = vadd.f32 %v4192_v18, %v4024_v43  ;;  %v4321_v24 = vpop.f32.mrf.mxu3  ;;  %8475 = vperm.xlu2 %13544, %v8345_v52   ;;  %v1908_v16 = vmax.f32 %v1713_v19, 0.0  ;;  %v2500_v52 = vpop.permute.xlu2 %2499  ;;  %v8343_v18 = vld [vmem:[%s21905_s10 + $0xb0] sm:$0xff] }
 0x330   :  { %v16025_v5 = vadd.f32 %v4321_v24, %v15468_v17  ;;  %v16027_v0 = vpop.f32.mrf.mxu1  ;;  %4620 = vmatpush.bf16.msrb.mxu2 %v15405_v34  ;;  %v8346_v17 = vld [vmem:[%s21905_s10 + $0xc8] sm:$0xff]  ;;  %v8328_v34 = vld [vmem:[%s21905_s10 + $0x38] sm:$0xff]  ;;  %v4027_v28 = vadd.f32 %v15470_v27, %v2500_v52  ;;  %v16055_v19 = vpop.permute.xlu1 %2524  ;;  %v8325_v24 = vld [vmem:[%s21905_s10 + $0x20] sm:$0xff] }
 0x331   :  { %v16032_v43 = vpack.c.bf16 %v1908_v16, %v1907_v60  ;;  %v8344_v27 = vld [vmem:[%s21905_s10 + $0xb8] sm:$0xff]  ;;  %v11559_v16 = vld [vmem:[%s21941_s28 + $0x660] sm:$0xf0] }
 0x332   :  { %22100 = vst [vmem:[#allocation16_spill] sm:$0xff] %v16025_v5 }
 0x333   :  { %4234 = vmatmul.bf16.gmra.mxu2 %v11530_v30  ;;  %4452 = vmatmul.bf16.vlgmr.msrb.gmra.mxu1 %v10770_v36  ;;  %v22102_v36 = vld [vmem:[#allocation32_spill] sm:$0xff] }
 0x334   :  { %4363 = vmatmul.bf16.gmra.mxu3 %v11278_v11  ;;  %v1715_v29 = vpop.f32.mrf.mxu0  ;;  %v13006_v11 = vld [vmem:[%s21941_s28 + $0x4c] sm:$0xf] }
 0x335   :  { %v1716_v60 = vadd.f32 %v1715_v29, %v22102_v36 }
 0x336   :  { %v4195_v59 = vpop.f32.mrf.mxu2  ;;  %8385 = vperm.xlu1 %13543, %v8327_v56   ;;  %8480 = vperm.xlu0 %13542, %v8346_v17   ;;  %v2505_v30 = vpop.permute.xlu0 %2504  ;;  %v10799_v56 = vld [vmem:[%s21941_s28 + $0x68] sm:$0xf0] }
 0x337   :  { %v16047_v53 = vadd.f32 %v4195_v59, %v4027_v28  ;;  %v4324_v41 = vpop.f32.mrf.mxu3  ;;  %8390 = vperm.xlu2 %13544, %v8328_v34   ;;  %10741 = vmatmul.msk.bf16.gmra.mxu0 %vm1303_vm0, %v12983_v2  ;;  %v4029_v52 = vadd.f32 %v15495_v1, %v2505_v30  ;;  %v11309_v34 = vld [vmem:[%s21941_s28 + $0x448] sm:$0xf]  ;;  %v22103_v28 = vld [vmem:[#allocation50_spill] sm:$0xff]  ;;  %v10802_v1 = vor.u32 %v13006_v11, %v10799_v56  ;;  %v1909_v30 = vmax.f32 %v1716_v60, 0.0 }
 0x338   :  { %v16050_v4 = vadd.f32 %v4324_v41, %v15490_v62  ;;  %v16053_v15 = vpop.f32.mrf.mxu1  ;;  %v13197_v62 = vld [vmem:[%s21941_s28 + $0x644] sm:$0xf]  ;;  %v13138_v2 = vld [vmem:[%s21941_s28 + $0x464] sm:$0xf0] }
 0x339   :  { %v11310_v20 = vor.u32 %v13138_v2, %v11309_v34  ;;  %v22106_v34 = vld [vmem:[#allocation42_spill] sm:$0xff] }
 0x33a   :  { %22101 = vst [vmem:[#allocation24_spill] sm:$0xff] %v16050_v4  ;;  %v11562_v4 = vor.u32 %v13197_v62, %v11559_v16 }
 0x33c   :  { %v1717_v17 = vpop.f32.mrf.mxu0 }
 0x33d   :  { %v1718_v29 = vadd.f32 %v1717_v17, %v22103_v28  ;;  %v8339_v17 = vld [vmem:[%s21905_s10 + $0x90] sm:$0xff]  ;;  %v11591_v28 = vld [vmem:[%s21941_s28 + $0x6a0] sm:$0xf0] }
 0x33e   :  { %v4197_v59 = vpop.f32.mrf.mxu2  ;;  %8470 = vperm.xlu1 %13543, %v8344_v27   ;;  %8465 = vperm.xlu0 %13542, %v8343_v18   ;;  %v8341_v27 = vld [vmem:[%s21905_s10 + $0xa0] sm:$0xff]  ;;  %v2510_v18 = vpop.permute.xlu1 %2509 }
 0x33f   :  { %v16087_v41 = vadd.f32 %v4197_v59, %v4029_v52  ;;  %v4326_v36 = vpop.f32.mrf.mxu3  ;;  %8375 = vperm.xlu2 %13544, %v8325_v24   ;;  %v1910_v5 = vmax.f32 %v1718_v29, 0.0  ;;  %v8326_v24 = vld [vmem:[%s21905_s10 + $0x28] sm:$0xff]  ;;  %v8324_v52 = vld [vmem:[%s21905_s10 + $0x18] sm:$0xff] }
 0x340   :  { %v16090_v22 = vadd.f32 %v4326_v36, %v15529_v40  ;;  %v16092_v9 = vpop.f32.mrf.mxu1  ;;  %v8342_v40 = vld [vmem:[%s21905_s10 + $0xa8] sm:$0xff]  ;;  %v4034_v36 = vadd.f32 %v15557_v12, %v15986_v26 }
 0x341   :  { %v16094_v55 = vpack.c.bf16 %v1910_v5, %v1909_v30  ;;  %v12984_v5 = vld [vmem:[%s21934_s29 + $0x198] sm:$0xff]  ;;  %v13014_v29 = vld [vmem:[%s21941_s28 + $0x8c] sm:$0xf]  ;;  %v11341_v30 = vld [vmem:[%s21941_s28 + $0x488] sm:$0xf] }
 0x342   :  { %22104 = vst [vmem:[#allocation64_spill] sm:$0xff] %v16090_v22  ;;  %v10831_v59 = vld [vmem:[%s21941_s28 + $0xa8] sm:$0xf0] }
 0x343   :  { %4239 = vmatmul.bf16.gmra.mxu2 %v11562_v4  ;;  %4457 = vmatmul.bf16.gmra.mxu1 %v10802_v1  ;;  %v4032_v4 = vadd.f32 %v15533_v38, %v2510_v18  ;;  %v8323_v38 = vld [vmem:[%s21905_s10 + $0x10] sm:$0xff]  ;;  %v22107_v18 = vld [vmem:[#allocation34_spill] sm:$0xff]  ;;  %v10834_v12 = vor.u32 %v13014_v29, %v10831_v59 }
 0x344   :  { %4368 = vmatmul.bf16.gmra.mxu3 %v11310_v20  ;;  %v1720_v62 = vpop.f32.mrf.mxu0 }
 0x345   :  { %v1721_v2 = vadd.f32 %v1720_v62, %v22106_v34 }
 0x346   :  { %v4200_v60 = vpop.f32.mrf.mxu2  ;;  %8455 = vperm.xlu1 %13543, %v8341_v27   ;;  %8380 = vperm.xlu0 %13542, %v8326_v24   ;;  %v13146_v27 = vld [vmem:[%s21941_s28 + $0x4a4] sm:$0xf0]  ;;  %v16150_v26 = vpop.permute.xlu1 %2594 }
 0x347   :  { %v16109_v16 = vadd.f32 %v4200_v60, %v4032_v4  ;;  %v4329_v20 = vpop.f32.mrf.mxu3  ;;  %8460 = vperm.xlu2 %13544, %v8342_v40   ;;  %10742 = vmatmul.msk.bf16.gmra.mxu0 %vm1303_vm0, %v12984_v5  ;;  %v1911_v60 = vmax.f32 %v1721_v2, 0.0  ;;  %v11342_v22 = vor.u32 %v13146_v27, %v11341_v30  ;;  %v16183_v30 = vpop.permute.xlu2 %2584 }
 0x348   :  { %v16112_v11 = vadd.f32 %v4329_v20, %v15551_v37  ;;  %v16115_v56 = vpop.f32.mrf.mxu1  ;;  %v13205_v37 = vld [vmem:[%s21941_s28 + $0x684] sm:$0xf] }
 0x349   :  { %v11594_v62 = vor.u32 %v13205_v37, %v11591_v28  ;;  %v4037_v37 = vadd.f32 %v15597_v50, %v15944_v6  ;;  %v8338_v50 = vld [vmem:[%s21905_s10 + $0x88] sm:$0xff]  ;;  %v8337_v6 = vld [vmem:[%s21905_s10 + $0x80] sm:$0xff] }
 0x34a   :  { %22105 = vst [vmem:[#allocation22_spill] sm:$0xff] %v16112_v11 }
 0x34c   :  { %v1722_v1 = vpop.f32.mrf.mxu0 }
 0x34d   :  { %v1723_v24 = vadd.f32 %v1722_v1, %v22107_v18  ;;  %v13213_v18 = vld [vmem:[%s21941_s28 + $0x6c4] sm:$0xf] }
 0x34e   :  { %v4202_v40 = vpop.f32.mrf.mxu2  ;;  %8370 = vperm.xlu1 %13543, %v8324_v52   ;;  %8365 = vperm.xlu0 %13542, %v8323_v38   ;;  %v8321_v52 = vld [vmem:[%s21905_s10] sm:$0xff]  ;;  %v8340_v38 = vld [vmem:[%s21905_s10 + $0x98] sm:$0xff]  ;;  %v16185_v27 = vpop.permute.xlu1 %2579 }
 0x34f   :  { %v16148_v5 = vadd.f32 %v4202_v40, %v4034_v36  ;;  %v4331_v4 = vpop.f32.mrf.mxu3  ;;  %8445 = vperm.xlu2 %13544, %v8339_v17   ;;  %v1912_v20 = vmax.f32 %v1723_v24, 0.0  ;;  %v12985_v17 = vld [vmem:[%s21934_s29 + $0x1a0] sm:$0xff]  ;;  %v13022_v40 = vld [vmem:[%s21941_s28 + $0xcc] sm:$0xf] }
 0x350   :  { %v16153_v34 = vadd.f32 %v4331_v4, %v15593_v48  ;;  %v16155_v11 = vpop.f32.mrf.mxu1  ;;  %v8322_v48 = vld [vmem:[%s21905_s10 + $0x8] sm:$0xff]  ;;  %v11623_v24 = vld [vmem:[%s21941_s28 + $0x6e0] sm:$0xf0] }
 0x351   :  { %v16157_v1 = vpack.c.bf16 %v1912_v20, %v1911_v60  ;;  %v10863_v4 = vld [vmem:[%s21941_s28 + $0xe8] sm:$0xf0]  ;;  %v11373_v60 = vld [vmem:[%s21941_s28 + $0x4c8] sm:$0xf] }
 0x352   :  { %22108 = vst [vmem:[#allocation30_spill] sm:$0xff] %v16153_v34  ;;  %v13154_v20 = vld [vmem:[%s21941_s28 + $0x4e4] sm:$0xf0] }
 0x353   :  { %4244 = vmatmul.bf16.gmra.mxu2 %v11594_v62  ;;  %4462 = vmatmul.bf16.gmra.mxu1 %v10834_v12  ;;  %v4039_v62 = vadd.f32 %v15623_v13, %v16055_v19  ;;  %v22134_v34 = vld [vmem:[#allocation83_spill] sm:$0xff] }
 0x354   :  { %4373 = vmatmul.bf16.gmra.mxu3 %v11342_v22  ;;  %v16173_v2 = vpop.f32.mrf.mxu0 }
 0x356   :  { %v4205_v28 = vpop.f32.mrf.mxu2  ;;  %8355 = vperm.xlu1 %13543, %v8321_v52   ;;  %8450 = vperm.xlu0 %13542, %v8340_v38  }
 0x357   :  { %v16175_v22 = vadd.f32 %v4205_v28, %v4037_v37  ;;  %v4334_v29 = vpop.f32.mrf.mxu3  ;;  %8360 = vperm.xlu2 %13544, %v8322_v48   ;;  %10743 = vmatmul.msk.bf16.gmra.mxu0 %vm1303_vm0, %v12985_v17  ;;  %v11626_v17 = vor.u32 %v13213_v18, %v11623_v24  ;;  %v10866_v37 = vor.u32 %v13022_v40, %v10863_v4  ;;  %v16241_v18 = vpop.permute.xlu0 %5649 }
 0x358   :  { %v16178_v59 = vadd.f32 %v4334_v29, %v15617_v58  ;;  %v16181_v36 = vpop.f32.mrf.mxu1  ;;  %v8945_v58 = vld [vmem:[%s21906_s12 + $0x70] sm:$0xff]  ;;  %v11374_v28 = vor.u32 %v13154_v20, %v11373_v60  ;;  %v16225_v29 = vpop.permute.xlu2 %5729  ;;  %22114 = vst [vmem:[#allocation61_spill] sm:$0xff] %v16241_v18  ;;  %v4042_v24 = vadd.f32 %v15663_v44, %v15851_v23  ;;  %v8944_v44 = vld [vmem:[%s21906_s12 + $0x68] sm:$0xff]  ;;  %v8943_v23 = vld [vmem:[%s21906_s12 + $0x60] sm:$0xff] }
 0x359   :  { %22112 = vst [vmem:[#allocation68_spill] sm:$0xff] %v16225_v29 }
 0x35a   :  { %22109 = vst [vmem:[#allocation62_spill] sm:$0xff] %v16178_v59 }
 0x35c   :  { %v16210_v12 = vpop.f32.mrf.mxu0 }
 0x35e   :  { %v4207_v52 = vpop.f32.mrf.mxu2  ;;  %8440 = vperm.xlu1 %13543, %v8338_v50   ;;  %8435 = vperm.xlu0 %13542, %v8337_v6   ;;  %v8961_v50 = vld [vmem:[%s21906_s12 + $0xf0] sm:$0xff]  ;;  %v8946_v6 = vld [vmem:[%s21906_s12 + $0x78] sm:$0xff] }
 0x35f   :  { %v16218_v38 = vadd.f32 %v4207_v52, %v4039_v62  ;;  %v4336_v48 = vpop.f32.mrf.mxu3  ;;  %9035 = vperm.xlu2 %13544, %v8945_v58   ;;  %v16230_v62 = vpop.permute.xlu1 %5654  ;;  %v12986_v58 = vld [vmem:[%s21934_s29 + $0x1a8] sm:$0xff] }
 0x360   :  { %v16221_v13 = vadd.f32 %v4336_v48, %v15658_v45  ;;  %v16223_v19 = vpop.f32.mrf.mxu1  ;;  %22113 = vst [vmem:[#allocation47_spill] sm:$0xff] %v16230_v62  ;;  %v8962_v45 = vld [vmem:[%s21906_s12 + $0xf8] sm:$0xff]  ;;  %v16290_v62 = vpop.permute.xlu0 %5734 }
 0x361   :  { %22111 = vst [vmem:[#allocation56_spill] sm:$0xff] %v16223_v19 }
 0x362   :  { %22110 = vst [vmem:[#allocation75_spill] sm:$0xff] %v16221_v13 }
 0x363   :  { %4249 = vmatmul.bf16.gmra.mxu2 %v11626_v17  ;;  %4467 = vmatmul.bf16.gmra.mxu1 %v10866_v37  ;;  %v8959_v17 = vld [vmem:[%s21906_s12 + $0xe0] sm:$0xff]  ;;  %22120 = vst [vmem:[#allocation95_spill] sm:$0xff] %v16290_v62  ;;  %v11437_v62 = vld [vmem:[%s21941_s28 + $0x548] sm:$0xf] }
 0x364   :  { %4378 = vmatmul.bf16.gmra.mxu3 %v11374_v28  ;;  %v16245_v40 = vpop.f32.mrf.mxu0  ;;  %v11655_v37 = vld [vmem:[%s21941_s28 + $0x720] sm:$0xf0]  ;;  %v13030_v28 = vld [vmem:[%s21941_s28 + $0x10c] sm:$0xf] }
 0x366   :  { %v4210_v4 = vpop.f32.mrf.mxu2  ;;  %9115 = vperm.xlu1 %13543, %v8961_v50   ;;  %9040 = vperm.xlu0 %13542, %v8946_v6   ;;  %v10895_v50 = vld [vmem:[%s21941_s28 + $0x128] sm:$0xf0]  ;;  %v16276_v6 = vpop.permute.xlu2 %5644 }
 0x367   :  { %v16247_v60 = vadd.f32 %v4210_v4, %v4042_v24  ;;  %v4339_v20 = vpop.f32.mrf.mxu3  ;;  %9120 = vperm.xlu2 %13544, %v8962_v45   ;;  %10744 = vmatmul.msk.bf16.gmra.mxu0 %vm1303_vm0, %v12986_v58  ;;  %22118 = vst [vmem:[#allocation42_spill] sm:$0xff] %v16276_v6  ;;  %v4044_v45 = vadd.f32 %v15691_v14, %v15883_v57  ;;  %v11405_v24 = vld [vmem:[%s21941_s28 + $0x508] sm:$0xf] }
 0x368   :  { %v16250_v52 = vadd.f32 %v4339_v20, %v15685_v32  ;;  %v16253_v48 = vpop.f32.mrf.mxu1  ;;  %v13221_v32 = vld [vmem:[%s21941_s28 + $0x704] sm:$0xf]  ;;  %v13162_v4 = vld [vmem:[%s21941_s28 + $0x524] sm:$0xf0]  ;;  %v16288_v20 = vpop.permute.xlu1 %5639  ;;  %v10898_v57 = vor.u32 %v13030_v28, %v10895_v50 }
 0x369   :  { %22115 = vst [vmem:[#allocation41_spill] sm:$0xff] %v16247_v60  ;;  %v11658_v14 = vor.u32 %v13221_v32, %v11655_v37  ;;  %v11406_v59 = vor.u32 %v13162_v4, %v11405_v24 }
 0x36a   :  { %22116 = vst [vmem:[#allocation32_spill] sm:$0xff] %v16250_v52 }
 0x36b   :  { %22117 = vst [vmem:[#allocation50_spill] sm:$0xff] %v16253_v48 }
 0x36c   :  { %v16280_v58 = vpop.f32.mrf.mxu0  ;;  %22119 = vst [vmem:[#allocation34_spill] sm:$0xff] %v16288_v20 }
 0x36e   :  { %v4212_v29 = vpop.f32.mrf.mxu2  ;;  %9030 = vperm.xlu1 %13543, %v8944_v44   ;;  %9025 = vperm.xlu0 %13542, %v8943_v23   ;;  %v8941_v44 = vld [vmem:[%s21906_s12 + $0x50] sm:$0xff]  ;;  %v8942_v23 = vld [vmem:[%s21906_s12 + $0x58] sm:$0xff] }
 0x36f   :  { %v16292_v18 = vadd.f32 %v4212_v29, %v4044_v45  ;;  %v4341_v6 = vpop.f32.mrf.mxu3  ;;  %9105 = vperm.xlu2 %13544, %v8959_v17   ;;  %v8960_v29 = vld [vmem:[%s21906_s12 + $0xe8] sm:$0xff]  ;;  %v4047_v17 = vadd.f32 %v15733_v35, %v15924_v51  ;;  %v22127_v45 = vld [vmem:[#allocation81_spill] sm:$0xff]  ;;  %v16327_v35 = vpop.permute.xlu0 %5719 }
 0x370   :  { %v16295_v52 = vadd.f32 %v4341_v6, %v15728_v25  ;;  %v16297_v13 = vpop.f32.mrf.mxu1  ;;  %v12987_v25 = vld [vmem:[%s21934_s29 + $0x1b0] sm:$0xff]  ;;  %v16319_v6 = vpop.permute.xlu1 %5724  ;;  %22130 = vst [vmem:[#allocation103_spill] sm:$0xff] %v16327_v35  ;;  %v8958_v51 = vld [vmem:[%s21906_s12 + $0xd8] sm:$0xff] }
 0x371   :  { %22121 = vst [vmem:[#allocation96_spill] sm:$0xff] %v16292_v18 }
 0x372   :  { %22122 = vst [vmem:[#allocation97_spill] sm:$0xff] %v16295_v52 }
 0x373   :  { %22123 = vst [vmem:[#allocation98_spill] sm:$0xff] %v16297_v13  ;;  %4254 = vmatmul.bf16.gmra.mxu2 %v11658_v14  ;;  %4472 = vmatmul.bf16.gmra.mxu1 %v10898_v57  ;;  %v8957_v14 = vld [vmem:[%s21906_s12 + $0xd0] sm:$0xff]  ;;  %v8939_v57 = vld [vmem:[%s21906_s12 + $0x40] sm:$0xff] }
 0x374   :  { %4383 = vmatmul.bf16.gmra.mxu3 %v11406_v59  ;;  %v16313_v32 = vpop.f32.mrf.mxu0  ;;  %v16315_v59 = vpop.permute.xlu2 %5629  ;;  %22126 = vst [vmem:[#allocation101_spill] sm:$0xff] %v16319_v6  ;;  %v13170_v6 = vld [vmem:[%s21941_s28 + $0x564] sm:$0xf0] }
 0x375   :  { %22124 = vst [vmem:[#allocation99_spill] sm:$0xff] %v16315_v59 }
 0x376   :  { %v4215_v37 = vpop.f32.mrf.mxu2  ;;  %9015 = vperm.xlu1 %13543, %v8941_v44   ;;  %9110 = vperm.xlu0 %13542, %v8960_v29   ;;  %v13229_v44 = vld [vmem:[%s21941_s28 + $0x744] sm:$0xf] }
 0x377   :  { %v16317_v28 = vadd.f32 %v4215_v37, %v4047_v17  ;;  %v4344_v50 = vpop.f32.mrf.mxu3  ;;  %9020 = vperm.xlu2 %13544, %v8942_v23   ;;  %10745 = vmatmul.msk.bf16.gmra.mxu0 %vm1303_vm0, %v12987_v25  ;;  %v11687_v29 = vld [vmem:[%s21941_s28 + $0x760] sm:$0xf0]  ;;  %v13038_v23 = vld [vmem:[%s21941_s28 + $0x14c] sm:$0xf]  ;;  %v22132_v37 = vld [vmem:[#allocation89_spill] sm:$0xff]  ;;  %v16369_v18 = vpop.permute.xlu0 %5634 }
 0x378   :  { %v16322_v24 = vadd.f32 %v4344_v50, %v22127_v45  ;;  %v16325_v4 = vpop.f32.mrf.mxu1  ;;  %v10927_v25 = vld [vmem:[%s21941_s28 + $0x168] sm:$0xf0]  ;;  %v16367_v13 = vpop.permute.xlu1 %5709  ;;  %22139 = vst [vmem:[#allocation106_spill] sm:$0xff] %v16369_v18 }
 0x379   :  { %22125 = vst [vmem:[#allocation100_spill] sm:$0xff] %v16317_v28  ;;  %v22131_v17 = vld [vmem:[#allocation92_spill] sm:$0xff]  ;;  %v10930_v52 = vor.u32 %v13038_v23, %v10927_v25  ;;  %v8938_v25 = vld [vmem:[%s21906_s12 + $0x38] sm:$0xff] }
 0x37a   :  { %22128 = vst [vmem:[#allocation81_spill] sm:$0xff] %v16322_v24  ;;  %v4049_v50 = vadd.f32 %v22132_v37, %v22131_v17  ;;  %v11690_v24 = vor.u32 %v13229_v44, %v11687_v29  ;;  %v22143_v44 = vld [vmem:[#allocation76_spill] sm:$0xff] }
 0x37b   :  { %22129 = vst [vmem:[#allocation102_spill] sm:$0xff] %v16325_v4  ;;  %v11438_v4 = vor.u32 %v13170_v6, %v11437_v62  ;;  %v8956_v62 = vld [vmem:[%s21906_s12 + $0xc8] sm:$0xff]  ;;  %v22140_v6 = vld [vmem:[#allocation74_spill] sm:$0xff] }
 0x37c   :  { %v1737_v45 = vpop.f32.mrf.mxu0  ;;  %v16365_v28 = vpop.permute.xlu2 %5714  ;;  %22138 = vst [vmem:[#allocation105_spill] sm:$0xff] %v16367_v13  ;;  %v22151_v18 = vld [vmem:[#allocation12_spill] sm:$0xff] }
 0x37d   :  { %22137 = vst [vmem:[#allocation104_spill] sm:$0xff] %v16365_v28  ;;  %v22150_v28 = vld [vmem:[#allocation93_spill] sm:$0xff] }
 0x37e   :  { %v4217_v35 = vpop.f32.mrf.mxu2  ;;  %9100 = vperm.xlu1 %13543, %v8958_v51   ;;  %9095 = vperm.xlu0 %13542, %v8957_v14   ;;  %v4054_v13 = vadd.f32 %v22150_v28, %v15876_v54 }
 0x37f   :  { %v16358_v20 = vadd.f32 %v4217_v35, %v4049_v50  ;;  %v4346_v59 = vpop.f32.mrf.mxu3  ;;  %9005 = vperm.xlu2 %13544, %v8939_v57   ;;  %v8955_v35 = vld [vmem:[%s21906_s12 + $0xc0] sm:$0xff] }
 0x380   :  { %v16361_v17 = vadd.f32 %v4346_v59, %v22134_v34  ;;  %v16363_v37 = vpop.f32.mrf.mxu1  ;;  %v8940_v34 = vld [vmem:[%s21906_s12 + $0x48] sm:$0xff]  ;;  %v12988_v59 = vld [vmem:[%s21934_s29 + $0x1b8] sm:$0xff] }
 0x381   :  { %22133 = vst [vmem:[#allocation92_spill] sm:$0xff] %v16358_v20 }
 0x382   :  { %22135 = vst [vmem:[#allocation89_spill] sm:$0xff] %v16361_v17 }
 0x383   :  { %22136 = vst [vmem:[#allocation83_spill] sm:$0xff] %v16363_v37  ;;  %4259 = vmatmul.bf16.gmra.mxu2 %v11690_v24  ;;  %4477 = vmatmul.bf16.gmra.mxu1 %v10930_v52  ;;  %v22141_v24 = vld [vmem:[#allocation91_spill] sm:$0xff] }
 0x384   :  { %4388 = vmatmul.bf16.gmra.mxu3 %v11438_v4  ;;  %v4052_v52 = vadd.f32 %v22141_v24, %v22140_v6  ;;  %v1740_v51 = vpop.f32.mrf.mxu0  ;;  %v16396_v50 = vpop.permute.xlu2 %5699  ;;  %v22148_v6 = vld [vmem:[#allocation18_spill] sm:$0xff] }
 0x385   :  { %22146 = vst [vmem:[#allocation107_spill] sm:$0xff] %v16396_v50  ;;  %v1741_v24 = vadd.f32 %v1740_v51, %v22148_v6  ;;  %v11469_v51 = vld [vmem:[%s21941_s28 + $0x588] sm:$0xf] }
 0x386   :  { %v4220_v14 = vpop.f32.mrf.mxu2  ;;  %9085 = vperm.xlu1 %13543, %v8955_v35   ;;  %9010 = vperm.xlu0 %13542, %v8940_v34   ;;  %v8937_v35 = vld [vmem:[%s21906_s12 + $0x30] sm:$0xff]  ;;  %v13237_v34 = vld [vmem:[%s21941_s28 + $0x784] sm:$0xf]  ;;  %v13178_v6 = vld [vmem:[%s21941_s28 + $0x5a4] sm:$0xf0] }
 0x387   :  { %v16385_v57 = vadd.f32 %v4220_v14, %v4052_v52  ;;  %v4349_v4 = vpop.f32.mrf.mxu3  ;;  %9090 = vperm.xlu2 %13544, %v8956_v62   ;;  %10746 = vmatmul.msk.bf16.gmra.mxu0 %vm1303_vm0, %v12988_v59  ;;  %v11719_v62 = vld [vmem:[%s21941_s28 + $0x7a0] sm:$0xf0]  ;;  %v16407_v59 = vpop.permute.xlu1 %5624  ;;  %v8953_v52 = vld [vmem:[%s21906_s12 + $0xb0] sm:$0xff]  ;;  %v13046_v14 = vld [vmem:[%s21941_s28 + $0x18c] sm:$0xf]  ;;  %v1919_v28 = vmax.f32 %v1741_v24, 0.0  ;;  %v11470_v19 = vor.u32 %v13178_v6, %v11469_v51 }
 0x388   :  { %v16388_v29 = vadd.f32 %v4349_v4, %v22143_v44  ;;  %v16391_v23 = vpop.f32.mrf.mxu1  ;;  %22147 = vst [vmem:[#allocation108_spill] sm:$0xff] %v16407_v59  ;;  %v10959_v4 = vld [vmem:[%s21941_s28 + $0x1a8] sm:$0xf0]  ;;  %v16419_v44 = vpop.permute.xlu0 %5619  ;;  %v11722_v17 = vor.u32 %v13237_v34, %v11719_v62  ;;  %v22155_v34 = vld [vmem:[#allocation27_spill] sm:$0xff] }
 0x389   :  { %22142 = vst [vmem:[#allocation74_spill] sm:$0xff] %v16385_v57  ;;  %v10962_v54 = vor.u32 %v13046_v14, %v10959_v4  ;;  %v22162_v4 = vld [vmem:[#allocation25_spill] sm:$0xff] }
 0x38a   :  { %22144 = vst [vmem:[#allocation91_spill] sm:$0xff] %v16388_v29  ;;  %v1726_v51 = vadd.f32 %v16173_v2, %v22162_v4  ;;  %v8952_v2 = vld [vmem:[%s21906_s12 + $0xa8] sm:$0xff] }
 0x38b   :  { %22145 = vst [vmem:[#allocation76_spill] sm:$0xff] %v16391_v23  ;;  %v22152_v23 = vld [vmem:[#allocation9_spill] sm:$0xff] }
 0x38c   :  { %22149 = vst [vmem:[#allocation18_spill] sm:$0xff] %v16419_v44  ;;  %v1742_v50 = vpop.f32.mrf.mxu0  ;;  %v1738_v57 = vadd.f32 %v1737_v45, %v22152_v23 }
 0x38d   :  { %v1743_v59 = vadd.f32 %v1742_v50, %v22151_v18  ;;  %v22154_v18 = vld [vmem:[#allocation14_spill] sm:$0xff] }
 0x38e   :  { %v4222_v29 = vpop.f32.mrf.mxu2  ;;  %9000 = vperm.xlu1 %13543, %v8938_v25   ;;  %8995 = vperm.xlu0 %13542, %v8937_v35   ;;  %v1736_v25 = vadd.f32 %v16313_v32, %v22154_v18  ;;  %v1918_v45 = vmax.f32 %v1738_v57, 0.0  ;;  %v8936_v32 = vld [vmem:[%s21906_s12 + $0x28] sm:$0xff] }
 0x38f   :  { %v16431_v44 = vadd.f32 %v4222_v29, %v4054_v13  ;;  %v4351_v37 = vpop.f32.mrf.mxu3  ;;  %9075 = vperm.xlu2 %13544, %v8953_v52   ;;  %v1920_v20 = vmax.f32 %v1743_v59, 0.0  ;;  %v1733_v13 = vadd.f32 %v16280_v58, %v22155_v34  ;;  %v8935_v29 = vld [vmem:[%s21906_s12 + $0x20] sm:$0xff]  ;;  %v16460_v62 = vpop.permute.xlu1 %5609  ;;  %v22160_v59 = vld [vmem:[#allocation17_spill] sm:$0xff] }
 0x390   :  { %v16434_v48 = vadd.f32 %v4351_v37, %v15867_v42  ;;  %v16436_v60 = vpop.f32.mrf.mxu1  ;;  %v8954_v42 = vld [vmem:[%s21906_s12 + $0xb8] sm:$0xff]  ;;  %v12989_v58 = vld [vmem:[%s21934_s29 + $0x1c0] sm:$0xff]  ;;  %v1917_v23 = vmax.f32 %v1736_v25, 0.0  ;;  %22159 = vst [vmem:[#allocation9_spill] sm:$0xff] %v16460_v62  ;;  %v1728_v24 = vadd.f32 %v16210_v12, %v22160_v59  ;;  %v16464_v14 = vpop.permute.xlu0 %5704 }
 0x391   :  { %v2000_v50 = vpack.c.bf16 %v1920_v20, %v1919_v28  ;;  %v16454_v20 = vpop.permute.xlu2 %5614  ;;  %v22158_v57 = vld [vmem:[#allocation11_spill] sm:$0xff]  ;;  %22161 = vst [vmem:[#allocation14_spill] sm:$0xff] %v16464_v14  ;;  %v1916_v6 = vmax.f32 %v1733_v13, 0.0  ;;  %v22166_v59 = vld [vmem:[#allocation57_spill] sm:$0xff] }
 0x392   :  { %22153 = vst [vmem:[#allocation93_spill] sm:$0xff] %v16434_v48  ;;  %v1914_v25 = vmax.f32 %v1728_v24, 0.0  ;;  %v8951_v13 = vld [vmem:[%s21906_s12 + $0xa0] sm:$0xff] }
 0x393   :  { %4264 = vmatmul.bf16.gmra.mxu2 %v11722_v17  ;;  %4482 = vmatmul.bf16.gmra.mxu1 %v10962_v54  ;;  %22156 = vst [vmem:[#allocation12_spill] sm:$0xff] %v16454_v20  ;;  %v22157_v17 = vld [vmem:[#allocation39_spill] sm:$0xff] }
 0x394   :  { %4393 = vmatmul.bf16.gmra.mxu3 %v11470_v19  ;;  %v4057_v37 = vadd.f32 %v15874_v47, %v22157_v17  ;;  %v1731_v19 = vadd.f32 %v16245_v40, %v22158_v57  ;;  %v1745_v35 = vpop.f32.mrf.mxu0  ;;  %v1999_v40 = vpack.c.bf16 %v1918_v45, %v1917_v23  ;;  %v13245_v45 = vld [vmem:[%s21941_s28 + $0x7c4] sm:$0xf]  ;;  %v10991_v17 = vld [vmem:[%s21941_s28 + $0x1e8] sm:$0xf0]  ;;  %v11501_v23 = vld [vmem:[%s21941_s28 + $0x5c8] sm:$0xf] }
 0x395   :  { %4782 = vmatpush.bf16.msrb.mxu3 %v2000_v50  ;;  %v1913_v50 = vmax.f32 %v1726_v51, 0.0 }
 0x396   :  { %v4225_v52 = vpop.f32.mrf.mxu2  ;;  %8985 = vperm.xlu1 %13543, %v8935_v29   ;;  %9080 = vperm.xlu0 %13542, %v8954_v42   ;;  %v1915_v18 = vmax.f32 %v1731_v19, 0.0  ;;  %v22164_v29 = vld [vmem:[#allocation63_spill] sm:$0xff] }
 0x397   :  { %v16468_v47 = vadd.f32 %v4225_v52, %v4057_v37  ;;  %v4354_v54 = vpop.f32.mrf.mxu3  ;;  %8990 = vperm.xlu2 %13544, %v8936_v32   ;;  %10747 = vmatmul.msk.bf16.gmra.mxu0 %vm1303_vm0, %v12989_v58  ;;  %v1746_v42 = vadd.f32 %v1745_v35, %v22164_v29  ;;  %v11751_v32 = vld [vmem:[%s21941_s28 + $0x7e0] sm:$0xf0]  ;;  %v13054_v58 = vld [vmem:[%s21941_s28 + $0x1cc] sm:$0xf]  ;;  %v22165_v37 = vld [vmem:[#allocation77_spill] sm:$0xff]  ;;  %v1997_v4 = vpack.c.bf16 %v1914_v25, %v1913_v50 }
 0x398   :  { %v16471_v28 = vadd.f32 %v4354_v54, %v15904_v33  ;;  %v16474_v12 = vpop.f32.mrf.mxu1  ;;  %v1998_v34 = vpack.c.bf16 %v1916_v6, %v1915_v18  ;;  %v8933_v33 = vld [vmem:[%s21906_s12 + $0x10] sm:$0xff]  ;;  %v4059_v57 = vadd.f32 %v15910_v21, %v22165_v37  ;;  %v13186_v35 = vld [vmem:[%s21941_s28 + $0x5e4] sm:$0xf0]  ;;  %v11754_v54 = vor.u32 %v13245_v45, %v11751_v32  ;;  %v16511_v18 = vpop.permute.xlu1 %5694 }
 0x399   :  { %4783 = vmatpush.bf16.msrb.mxu3 %v1999_v40  ;;  %v16507_v51 = vpop.permute.xlu2 %5599  ;;  %v10994_v40 = vor.u32 %v13054_v58, %v10991_v17  ;;  %22168 = vst [vmem:[#allocation11_spill] sm:$0xff] %v16511_v18  ;;  %v16518_v25 = vpop.permute.xlu0 %5689  ;;  %v12990_v45 = vld [vmem:[%s21934_s29 + $0x1c8] sm:$0xff] }
 0x39a   :  { %22163 = vst [vmem:[#allocation27_spill] sm:$0xff] %v16471_v28 }
 0x39b   :  { %22167 = vst [vmem:[#allocation39_spill] sm:$0xff] %v16507_v51  ;;  %v22192_v51 = vld [vmem:[#allocation6_spill] sm:$0xff] }
 0x39c   :  { %v1747_v19 = vpop.f32.mrf.mxu0  ;;  %22170 = vst [vmem:[#allocation25_spill] sm:$0xff] %v16518_v25 }
 0x39d   :  { %4784 = vmatpush.bf16.msrb.mxu3 %v1998_v34  ;;  %v1748_v24 = vadd.f32 %v1747_v19, %v22166_v59  ;;  %v1921_v34 = vmax.f32 %v1746_v42, 0.0  ;;  %v22171_v42 = vld [vmem:[#allocation80_spill] sm:$0xff] }
 0x39e   :  { %v4227_v52 = vpop.f32.mrf.mxu2  ;;  %9070 = vperm.xlu1 %13543, %v8952_v2   ;;  %9065 = vperm.xlu0 %13542, %v8951_v13   ;;  %v11502_v2 = vor.u32 %v13186_v35, %v11501_v23  ;;  %v8949_v13 = vld [vmem:[%s21906_s12 + $0x90] sm:$0xff]  ;;  %v4062_v32 = vadd.f32 %v15954_v63, %v22171_v42 }
 0x39f   :  { %v16509_v6 = vadd.f32 %v4227_v52, %v4059_v57  ;;  %v4356_v21 = vpop.f32.mrf.mxu3  ;;  %8975 = vperm.xlu2 %13544, %v8933_v33   ;;  %v1922_v29 = vmax.f32 %v1748_v24, 0.0  ;;  %v8950_v33 = vld [vmem:[%s21906_s12 + $0x98] sm:$0xff]  ;;  %v22178_v42 = vld [vmem:[#allocation60_spill] sm:$0xff] }
 0x3a0   :  { %v16514_v37 = vadd.f32 %v4356_v21, %v15947_v61  ;;  %v16516_v19 = vpop.f32.mrf.mxu1  ;;  %v8934_v61 = vld [vmem:[%s21906_s12 + $0x18] sm:$0xff]  ;;  %v16548_v63 = vpop.permute.xlu1 %5679  ;;  %v22176_v21 = vld [vmem:[#allocation67_spill] sm:$0xff] }
 0x3a1   :  { %4785 = vmatpush.bf16.msrb.mxu3 %v1997_v4  ;;  %v16520_v50 = vpack.c.bf16 %v1922_v29, %v1921_v34  ;;  %v16545_v24 = vpop.permute.xlu2 %5684  ;;  %22174 = vst [vmem:[#allocation57_spill] sm:$0xff] %v16548_v63  ;;  %v16553_v52 = vpop.permute.xlu0 %5604  ;;  %v8947_v4 = vld [vmem:[%s21906_s12 + $0x80] sm:$0xff]  ;;  %v10773_v34 = vld [vmem:[%s21941_s28 + $0x10] sm:$0xf] }
 0x3a2   :  { %22169 = vst [vmem:[#allocation17_spill] sm:$0xff] %v16514_v37  ;;  %v13003_v29 = vld [vmem:[%s21941_s28 + $0x2c] sm:$0xf0] }
 0x3a3   :  { %4269 = vmatmul.bf16.gmra.mxu2 %v11754_v54  ;;  %4487 = vmatmul.bf16.gmra.mxu1 %v10994_v40  ;;  %22173 = vst [vmem:[#allocation77_spill] sm:$0xff] %v16545_v24  ;;  %v11023_v40 = vld [vmem:[%s21941_s28 + $0x228] sm:$0xf0] }
 0x3a4   :  { %4398 = vmatmul.bf16.gmra.mxu3 %v11502_v2  ;;  %v1750_v58 = vpop.f32.mrf.mxu0  ;;  %22175 = vst [vmem:[#allocation80_spill] sm:$0xff] %v16553_v52  ;;  %v22177_v2 = vld [vmem:[#allocation29_spill] sm:$0xff]  ;;  %v22180_v24 = vld [vmem:[#allocation4_spill] sm:$0xff] }
 0x3a5   :  { %4786 = vmatpush.bf16.msrb.mxu3 %v16157_v1  ;;  %v8932_v1 = vld [vmem:[%s21906_s12 + $0x8] sm:$0xff]  ;;  %v1751_v54 = vadd.f32 %v1750_v58, %v22176_v21 }
 0x3a6   :  { %v4230_v17 = vpop.f32.mrf.mxu2  ;;  %9055 = vperm.xlu1 %13543, %v8949_v13   ;;  %8980 = vperm.xlu0 %13542, %v8934_v61   ;;  %v4064_v13 = vadd.f32 %v15983_v7, %v22177_v2 }
 0x3a7   :  { %v16537_v57 = vadd.f32 %v4230_v17, %v4062_v32  ;;  %v4359_v23 = vpop.f32.mrf.mxu3  ;;  %9060 = vperm.xlu2 %13544, %v8950_v33   ;;  %10748 = vmatmul.msk.bf16.gmra.mxu0 %vm1303_vm0, %v12990_v45  ;;  %v11533_v33 = vld [vmem:[%s21941_s28 + $0x608] sm:$0xf]  ;;  %v1923_v21 = vmax.f32 %v1751_v54, 0.0 }
 0x3a8   :  { %v16540_v35 = vadd.f32 %v4359_v23, %v15975_v31  ;;  %v16543_v59 = vpop.f32.mrf.mxu1  ;;  %v8931_v31 = vld [vmem:[%s21906_s12] sm:$0xff]  ;;  %v13194_v45 = vld [vmem:[%s21941_s28 + $0x624] sm:$0xf0] }
 0x3a9   :  { %4787 = vmatpush.bf16.msrb.mxu3 %v16094_v55  ;;  %v13062_v55 = vld [vmem:[%s21941_s28 + $0x20c] sm:$0xf]  ;;  %v11534_v25 = vor.u32 %v13194_v45, %v11533_v33  ;;  %v22185_v33 = vld [vmem:[#allocation3_spill] sm:$0xff] }
 0x3aa   :  { %22172 = vst [vmem:[#allocation63_spill] sm:$0xff] %v16540_v35  ;;  %v11026_v7 = vor.u32 %v13062_v55, %v11023_v40  ;;  %v4067_v55 = vadd.f32 %v16027_v0, %v16185_v27  ;;  %v9538_v0 = vld [vmem:[%s21907_s14 + $0x68] sm:$0xff]  ;;  %v9537_v27 = vld [vmem:[%s21907_s14 + $0x60] sm:$0xff]  ;;  %v22259_v35 = vld [vmem:[#allocation13_spill] sm:$0xff] }
 0x3ac   :  { %v1752_v61 = vpop.f32.mrf.mxu0 }
 0x3ad   :  { %4788 = vmatpush.bf16.msrb.mxu3 %v16032_v43  ;;  %v1753_v32 = vadd.f32 %v1752_v61, %v22178_v42  ;;  %v10774_v43 = vor.u32 %v13003_v29, %v10773_v34  ;;  %v9535_v42 = vld [vmem:[%s21907_s14 + $0x50] sm:$0xff] }
 0x3ae   :  { %v4232_v58 = vpop.f32.mrf.mxu2  ;;  %8970 = vperm.xlu1 %13543, %v8932_v1   ;;  %8965 = vperm.xlu0 %13542, %v8931_v31   ;;  %v9539_v31 = vld [vmem:[%s21907_s14 + $0x70] sm:$0xff] }
 0x3af   :  { %v16584_v17 = vadd.f32 %v4232_v58, %v4064_v13  ;;  %v4361_v23 = vpop.f32.mrf.mxu3  ;;  %9045 = vperm.xlu2 %13544, %v8947_v4   ;;  %v1924_v2 = vmax.f32 %v1753_v32, 0.0  ;;  %v16595_v13 = vpop.permute.xlu2 %5669  ;;  %v22186_v32 = vld [vmem:[#allocation49_spill] sm:$0xff] }
 0x3b0   :  { %v16587_v14 = vadd.f32 %v4361_v23, %v16020_v39  ;;  %v4453_v18 = vpop.f32.mrf.mxu1  ;;  %22181 = vst [vmem:[#allocation29_spill] sm:$0xff] %v16595_v13  ;;  %v16600_v4 = vpop.permute.xlu1 %5594  ;;  %v8948_v39 = vld [vmem:[%s21906_s12 + $0x88] sm:$0xff] }
 0x3b1   :  { %v16590_v63 = vadd.f32 %v4453_v18, %v22180_v24  ;;  %4789 = vmatpush.bf16.msrb.mxu3 %v15956_v10  ;;  %v16593_v1 = vpack.c.bf16 %v1924_v2, %v1923_v21  ;;  %22182 = vst [vmem:[#allocation60_spill] sm:$0xff] %v16600_v4  ;;  %v9540_v10 = vld [vmem:[%s21907_s14 + $0x78] sm:$0xff]  ;;  %v12991_v18 = vld [vmem:[%s21934_s29 + $0x1d0] sm:$0xff]  ;;  %v16611_v24 = vpop.permute.xlu0 %5589  ;;  %v11055_v23 = vld [vmem:[%s21941_s28 + $0x268] sm:$0xf0]  ;;  %v4069_v2 = vadd.f32 %v16053_v15, %v16183_v30 }
 0x3b2   :  { %22179 = vst [vmem:[#allocation67_spill] sm:$0xff] %v16587_v14  ;;  %v22202_v4 = vld [vmem:[#allocation37_spill] sm:$0xff] }
 0x3b3   :  { %4492 = vmatmul.bf16.gmra.mxu1 %v11026_v7  ;;  %4621 = vmatmul.bf16.vlgmr.msrb.gmra.mxu2 %v10774_v43  ;;  %22183 = vst [vmem:[#allocation4_spill] sm:$0xff] %v16611_v24  ;;  %v10805_v7 = vld [vmem:[%s21941_s28 + $0x50] sm:$0xf] }
 0x3b4   :  { %4403 = vmatmul.bf16.gmra.mxu3 %v11534_v25  ;;  %v1755_v54 = vpop.f32.mrf.mxu0  ;;  %v13011_v43 = vld [vmem:[%s21941_s28 + $0x6c] sm:$0xf0] }
 0x3b5   :  { %v1756_v58 = vadd.f32 %v1755_v54, %v22186_v32  ;;  %v22223_v24 = vld [vmem:[#allocation96_spill] sm:$0xff] }
 0x3b6   :  { %v4235_v40 = vpop.f32.mrf.mxu2  ;;  %9613 = vperm.xlu1 %13543, %v9539_v31   ;;  %9050 = vperm.xlu0 %13542, %v8948_v39   ;;  %v11565_v39 = vld [vmem:[%s21941_s28 + $0x648] sm:$0xf] }
 0x3b7   :  { %v16615_v25 = vadd.f32 %v4235_v40, %v4067_v55  ;;  %v4364_v34 = vpop.f32.mrf.mxu3  ;;  %9618 = vperm.xlu2 %13544, %v9540_v10   ;;  %10749 = vmatmul.msk.bf16.gmra.mxu0 %vm1303_vm0, %v12991_v18  ;;  %v16646_v21 = vpop.permute.xlu2 %5584  ;;  %v13202_v10 = vld [vmem:[%s21941_s28 + $0x664] sm:$0xf0]  ;;  %v22189_v55 = vld [vmem:[#allocation65_spill] sm:$0xff]  ;;  %v1925_v32 = vmax.f32 %v1756_v58, 0.0 }
 0x3b8   :  { %v16618_v29 = vadd.f32 %v4364_v34, %v16047_v53  ;;  %v4455_v61 = vpop.f32.mrf.mxu1  ;;  %v13070_v53 = vld [vmem:[%s21941_s28 + $0x24c] sm:$0xf]  ;;  %22187 = vst [vmem:[#allocation3_spill] sm:$0xff] %v16646_v21  ;;  %v16656_v18 = vpop.permute.xlu1 %5579  ;;  %v11566_v52 = vor.u32 %v13202_v10, %v11565_v39  ;;  %v9532_v10 = vld [vmem:[%s21907_s14 + $0x38] sm:$0xff] }
 0x3b9   :  { %v16622_v45 = vadd.f32 %v4455_v61, %v22185_v33  ;;  %22188 = vst [vmem:[#allocation49_spill] sm:$0xff] %v16656_v18  ;;  %v16659_v34 = vpop.permute.xlu0 %5674  ;;  %v11058_v30 = vor.u32 %v13070_v53, %v11055_v23  ;;  %v10806_v33 = vor.u32 %v13011_v43, %v10805_v7 }
 0x3ba   :  { %22184 = vst [vmem:[#allocation109_spill] sm:$0xff] %v16618_v29 }
 0x3bb   :  { %22190 = vst [vmem:[#allocation65_spill] sm:$0xff] %v16659_v34 }
 0x3bc   :  { %v1757_v31 = vpop.f32.mrf.mxu0 }
 0x3bd   :  { %v1758_v54 = vadd.f32 %v1757_v31, %v22189_v55  ;;  %v9531_v55 = vld [vmem:[%s21907_s14 + $0x30] sm:$0xff] }
 0x3be   :  { %v4237_v40 = vpop.f32.mrf.mxu2  ;;  %9608 = vperm.xlu1 %13543, %v9538_v0   ;;  %9603 = vperm.xlu0 %13542, %v9537_v27   ;;  %v9533_v27 = vld [vmem:[%s21907_s14 + $0x40] sm:$0xff] }
 0x3bf   :  { %v16661_v61 = vadd.f32 %v4237_v40, %v4069_v2  ;;  %v4366_v15 = vpop.f32.mrf.mxu3  ;;  %9593 = vperm.xlu2 %13544, %v9535_v42   ;;  %v1926_v13 = vmax.f32 %v1758_v54, 0.0  ;;  %v9536_v42 = vld [vmem:[%s21907_s14 + $0x58] sm:$0xff]  ;;  %v16685_v58 = vpop.permute.xlu2 %5809  ;;  %v13078_v54 = vld [vmem:[%s21941_s28 + $0x28c] sm:$0xf] }
 0x3c0   :  { %v16664_v20 = vadd.f32 %v4366_v15, %v16087_v41  ;;  %v4458_v62 = vpop.f32.mrf.mxu1  ;;  %v9534_v41 = vld [vmem:[%s21907_s14 + $0x48] sm:$0xff]  ;;  %22193 = vst [vmem:[#allocation6_spill] sm:$0xff] %v16685_v58  ;;  %v16689_v7 = vpop.permute.xlu1 %5664  ;;  %v22198_v40 = vld [vmem:[#allocation58_spill] sm:$0xff] }
 0x3c1   :  { %v16667_v31 = vadd.f32 %v4458_v62, %v22192_v51  ;;  %v16669_v0 = vpack.c.bf16 %v1926_v13, %v1925_v32  ;;  %v12992_v62 = vld [vmem:[%s21934_s29 + $0x1d8] sm:$0xff]  ;;  %v4072_v51 = vadd.f32 %v16092_v9, %v16030_v3  ;;  %22194 = vst [vmem:[#allocation111_spill] sm:$0xff] %v16689_v7  ;;  %v16695_v39 = vpop.permute.xlu0 %5659  ;;  %v13019_v32 = vld [vmem:[%s21941_s28 + $0xac] sm:$0xf0] }
 0x3c2   :  { %22191 = vst [vmem:[#allocation110_spill] sm:$0xff] %v16664_v20  ;;  %v22197_v9 = vld [vmem:[#allocation5_spill] sm:$0xff]  ;;  %v22241_v20 = vld [vmem:[#allocation86_spill] sm:$0xff] }
 0x3c3   :  { %4497 = vmatmul.bf16.gmra.mxu1 %v11058_v30  ;;  %4626 = vmatmul.bf16.gmra.mxu2 %v10806_v33  ;;  %22196 = vst [vmem:[#allocation113_spill] sm:$0xff] %v16695_v39  ;;  %v11087_v30 = vld [vmem:[%s21941_s28 + $0x2a8] sm:$0xf0]  ;;  %v10837_v33 = vld [vmem:[%s21941_s28 + $0x90] sm:$0xf] }
 0x3c4   :  { %4408 = vmatmul.bf16.gmra.mxu3 %v11566_v52  ;;  %v1760_v13 = vpop.f32.mrf.mxu0 }
 0x3c5   :  { %v1761_v15 = vadd.f32 %v1760_v13, %v22198_v40 }
 0x3c6   :  { %v4240_v53 = vpop.f32.mrf.mxu2  ;;  %9583 = vperm.xlu1 %13543, %v9533_v27   ;;  %9598 = vperm.xlu0 %13542, %v9536_v42   ;;  %v4074_v27 = vadd.f32 %v16115_v56, %v16150_v26  ;;  %v10838_v56 = vor.u32 %v13019_v32, %v10837_v33 }
 0x3c7   :  { %v16687_v52 = vadd.f32 %v4240_v53, %v4072_v51  ;;  %v4369_v23 = vpop.f32.mrf.mxu3  ;;  %9588 = vperm.xlu2 %13544, %v9534_v41   ;;  %10750 = vmatmul.msk.bf16.gmra.mxu0 %vm1303_vm0, %v12992_v62  ;;  %v11597_v41 = vld [vmem:[%s21941_s28 + $0x688] sm:$0xf]  ;;  %v1927_v26 = vmax.f32 %v1761_v15, 0.0  ;;  %v16736_v39 = vpop.permute.xlu2 %5894 }
 0x3c8   :  { %v16692_v43 = vadd.f32 %v4369_v23, %v16109_v16  ;;  %v4460_v2 = vpop.f32.mrf.mxu1  ;;  %v9529_v16 = vld [vmem:[%s21907_s14 + $0x20] sm:$0xff]  ;;  %v13210_v62 = vld [vmem:[%s21941_s28 + $0x6a4] sm:$0xf0]  ;;  %22201 = vst [vmem:[#allocation58_spill] sm:$0xff] %v16736_v39 }
 0x3c9   :  { %v16698_v3 = vadd.f32 %v4460_v2, %v22197_v9  ;;  %v22199_v51 = vld [vmem:[#allocation51_spill] sm:$0xff]  ;;  %v11090_v9 = vor.u32 %v13078_v54, %v11087_v30  ;;  %v11598_v7 = vor.u32 %v13210_v62, %v11597_v41  ;;  %v4077_v54 = vadd.f32 %v16155_v11, %v15949_v8  ;;  %v22206_v62 = vld [vmem:[#allocation48_spill] sm:$0xff] }
 0x3ca   :  { %22195 = vst [vmem:[#allocation112_spill] sm:$0xff] %v16692_v43  ;;  %v9526_v8 = vld [vmem:[%s21907_s14 + $0x8] sm:$0xff] }
 0x3cc   :  { %v1762_v42 = vpop.f32.mrf.mxu0 }
 0x3cd   :  { %v1763_v13 = vadd.f32 %v1762_v42, %v22199_v51 }
 0x3ce   :  { %v4242_v53 = vpop.f32.mrf.mxu2  ;;  %9578 = vperm.xlu1 %13543, %v9532_v10   ;;  %9573 = vperm.xlu0 %13542, %v9531_v55   ;;  %v16741_v10 = vpop.permute.xlu1 %5889 }
 0x3cf   :  { %v16731_v23 = vadd.f32 %v4242_v53, %v4074_v27  ;;  %v4371_v2 = vpop.f32.mrf.mxu3  ;;  %9563 = vperm.xlu2 %13544, %v9529_v16   ;;  %v1928_v40 = vmax.f32 %v1763_v13, 0.0  ;;  %22203 = vst [vmem:[#allocation51_spill] sm:$0xff] %v16741_v10  ;;  %v16745_v55 = vpop.permute.xlu0 %5814  ;;  %v9530_v16 = vld [vmem:[%s21907_s14 + $0x28] sm:$0xff]  ;;  %v9525_v13 = vld [vmem:[%s21907_s14] sm:$0xff] }
 0x3d0   :  { %v16734_v58 = vadd.f32 %v4371_v2, %v16148_v5  ;;  %v4463_v34 = vpop.f32.mrf.mxu1  ;;  %22204 = vst [vmem:[#allocation37_spill] sm:$0xff] %v16745_v55  ;;  %v9527_v5 = vld [vmem:[%s21907_s14 + $0x10] sm:$0xff]  ;;  %v16775_v11 = vpop.permute.xlu2 %5879  ;;  %v13086_v53 = vld [vmem:[%s21941_s28 + $0x2cc] sm:$0xf] }
 0x3d1   :  { %v16739_v42 = vadd.f32 %v4463_v34, %v22202_v4  ;;  %v16743_v27 = vpack.c.bf16 %v1928_v40, %v1927_v26  ;;  %v9528_v4 = vld [vmem:[%s21907_s14 + $0x18] sm:$0xff]  ;;  %v12993_v34 = vld [vmem:[%s21934_s29 + $0x1e0] sm:$0xff]  ;;  %22207 = vst [vmem:[#allocation48_spill] sm:$0xff] %v16775_v11  ;;  %v13027_v26 = vld [vmem:[%s21941_s28 + $0xec] sm:$0xf0] }
 0x3d2   :  { %22200 = vst [vmem:[#allocation5_spill] sm:$0xff] %v16734_v58  ;;  %v22239_v58 = vld [vmem:[#allocation92_spill] sm:$0xff] }
 0x3d3   :  { %4502 = vmatmul.bf16.gmra.mxu1 %v11090_v9  ;;  %4631 = vmatmul.bf16.gmra.mxu2 %v10838_v56  ;;  %v11119_v9 = vld [vmem:[%s21941_s28 + $0x2e8] sm:$0xf0]  ;;  %v10869_v56 = vld [vmem:[%s21941_s28 + $0xd0] sm:$0xf] }
 0x3d4   :  { %4413 = vmatmul.bf16.gmra.mxu3 %v11598_v7  ;;  %v16761_v15 = vpop.f32.mrf.mxu0 }
 0x3d6   :  { %v4245_v30 = vpop.f32.mrf.mxu2  ;;  %9553 = vperm.xlu1 %13543, %v9527_v5   ;;  %9568 = vperm.xlu0 %13542, %v9530_v16   ;;  %v16786_v2 = vpop.permute.xlu1 %5804  ;;  %v4079_v5 = vadd.f32 %v16181_v36, %v15977_v49 }
 0x3d7   :  { %v16763_v7 = vadd.f32 %v4245_v30, %v4077_v54  ;;  %v4374_v33 = vpop.f32.mrf.mxu3  ;;  %9558 = vperm.xlu2 %13544, %v9528_v4   ;;  %10751 = vmatmul.msk.bf16.gmra.mxu0 %vm1303_vm0, %v12993_v34  ;;  %22208 = vst [vmem:[#allocation115_spill] sm:$0xff] %v16786_v2  ;;  %v16797_v40 = vpop.permute.xlu0 %5799  ;;  %v11629_v4 = vld [vmem:[%s21941_s28 + $0x6c8] sm:$0xf] }
 0x3d8   :  { %v16766_v32 = vadd.f32 %v4374_v33, %v16175_v22  ;;  %v4465_v41 = vpop.f32.mrf.mxu1  ;;  %v9853_v22 = vld [vmem:[%s21908_s16 + $0x70] sm:$0xff]  ;;  %22209 = vst [vmem:[#allocation116_spill] sm:$0xff] %v16797_v40  ;;  %v13218_v34 = vld [vmem:[%s21941_s28 + $0x6e4] sm:$0xf0] }
 0x3d9   :  { %v16770_v51 = vadd.f32 %v4465_v41, %v22206_v62  ;;  %v11122_v41 = vor.u32 %v13086_v53, %v11119_v9  ;;  %v10870_v62 = vor.u32 %v13027_v26, %v10869_v56  ;;  %v11630_v39 = vor.u32 %v13218_v34, %v11629_v4  ;;  %v22211_v2 = vld [vmem:[#allocation72_spill] sm:$0xff]  ;;  %v16829_v53 = vpop.permute.xlu2 %5794 }
 0x3da   :  { %22205 = vst [vmem:[#allocation114_spill] sm:$0xff] %v16766_v32  ;;  %v22226_v32 = vld [vmem:[#allocation82_spill] sm:$0xff] }
 0x3db   :  { %22212 = vst [vmem:[#allocation72_spill] sm:$0xff] %v16829_v53 }
 0x3dc   :  { %v16801_v16 = vpop.f32.mrf.mxu0 }
 0x3de   :  { %v4247_v54 = vpop.f32.mrf.mxu2  ;;  %9548 = vperm.xlu1 %13543, %v9526_v8   ;;  %9543 = vperm.xlu0 %13542, %v9525_v13   ;;  %v9851_v8 = vld [vmem:[%s21908_s16 + $0x60] sm:$0xff]  ;;  %v9854_v13 = vld [vmem:[%s21908_s16 + $0x78] sm:$0xff] }
 0x3df   :  { %v16809_v30 = vadd.f32 %v4247_v54, %v4079_v5  ;;  %v4376_v33 = vpop.f32.mrf.mxu3  ;;  %9927 = vperm.xlu2 %13544, %v9853_v22   ;;  %v12994_v22 = vld [vmem:[%s21934_s29 + $0x1e8] sm:$0xff]  ;;  %v16837_v5 = vpop.permute.xlu0 %5884  ;;  %v22216_v54 = vld [vmem:[#allocation41_spill] sm:$0xff] }
 0x3e0   :  { %v16812_v49 = vadd.f32 %v4376_v33, %v16218_v38  ;;  %v4468_v36 = vpop.f32.mrf.mxu1  ;;  %v9852_v38 = vld [vmem:[%s21908_s16 + $0x68] sm:$0xff]  ;;  %22215 = vst [vmem:[#allocation118_spill] sm:$0xff] %v16837_v5 }
 0x3e1   :  { %v16815_v55 = vadd.f32 %v4468_v36, %v22211_v2  ;;  %v22213_v2 = vld [vmem:[#allocation56_spill] sm:$0xff]  ;;  %v9850_v36 = vld [vmem:[%s21908_s16 + $0x58] sm:$0xff]  ;;  %v16879_v10 = vpop.permute.xlu2 %5779 }
 0x3e2   :  { %22210 = vst [vmem:[#allocation117_spill] sm:$0xff] %v16812_v49  ;;  %v4082_v9 = vadd.f32 %v22213_v2, %v16022_v46  ;;  %v22218_v46 = vld [vmem:[#allocation79_spill] sm:$0xff]  ;;  %v10901_v2 = vld [vmem:[%s21941_s28 + $0x110] sm:$0xf] }
 0x3e3   :  { %4507 = vmatmul.bf16.gmra.mxu1 %v11122_v41  ;;  %4636 = vmatmul.bf16.gmra.mxu2 %v10870_v62  ;;  %v13226_v5 = vld [vmem:[%s21941_s28 + $0x724] sm:$0xf0]  ;;  %22221 = vst [vmem:[#allocation79_spill] sm:$0xff] %v16879_v10 }
 0x3e4   :  { %4418 = vmatmul.bf16.gmra.mxu3 %v11630_v39  ;;  %v16833_v56 = vpop.f32.mrf.mxu0  ;;  %v16835_v39 = vpop.permute.xlu1 %5789 }
 0x3e5   :  { %22214 = vst [vmem:[#allocation56_spill] sm:$0xff] %v16835_v39 }
 0x3e6   :  { %v4250_v26 = vpop.f32.mrf.mxu2  ;;  %9917 = vperm.xlu1 %13543, %v9851_v8   ;;  %9932 = vperm.xlu0 %13542, %v9854_v13   ;;  %v9849_v8 = vld [vmem:[%s21908_s16 + $0x50] sm:$0xff]  ;;  %v9847_v13 = vld [vmem:[%s21908_s16 + $0x40] sm:$0xff] }
 0x3e7   :  { %v16839_v4 = vadd.f32 %v4250_v26, %v4082_v9  ;;  %v4379_v34 = vpop.f32.mrf.mxu3  ;;  %9922 = vperm.xlu2 %13544, %v9852_v38   ;;  %10752 = vmatmul.msk.bf16.gmra.mxu0 %vm1303_vm0, %v12994_v22  ;;  %v13094_v38 = vld [vmem:[%s21941_s28 + $0x30c] sm:$0xf]  ;;  %v13035_v9 = vld [vmem:[%s21941_s28 + $0x12c] sm:$0xf0]  ;;  %v16888_v49 = vpop.permute.xlu0 %5869 }
 0x3e8   :  { %v16842_v33 = vadd.f32 %v4379_v34, %v22216_v54  ;;  %v4470_v41 = vpop.f32.mrf.mxu1  ;;  %v11151_v22 = vld [vmem:[%s21941_s28 + $0x328] sm:$0xf0]  ;;  %v22219_v26 = vld [vmem:[#allocation73_spill] sm:$0xff]  ;;  %v22220_v34 = vld [vmem:[#allocation50_spill] sm:$0xff]  ;;  %22225 = vst [vmem:[#allocation96_spill] sm:$0xff] %v16888_v49 }
 0x3e9   :  { %v16846_v62 = vadd.f32 %v4470_v41, %v22218_v46  ;;  %v4084_v54 = vadd.f32 %v22220_v34, %v22219_v26  ;;  %v11661_v46 = vld [vmem:[%s21941_s28 + $0x708] sm:$0xf]  ;;  %v11154_v26 = vor.u32 %v13094_v38, %v11151_v22  ;;  %v10902_v34 = vor.u32 %v13035_v9, %v10901_v2 }
 0x3ea   :  { %22217 = vst [vmem:[#allocation41_spill] sm:$0xff] %v16842_v33  ;;  %v11662_v33 = vor.u32 %v13226_v5, %v11661_v46  ;;  %v22229_v2 = vld [vmem:[#allocation100_spill] sm:$0xff]  ;;  %v16915_v46 = vpop.permute.xlu2 %5864 }
 0x3ec   :  { %v16871_v41 = vpop.f32.mrf.mxu0  ;;  %v16883_v39 = vpop.permute.xlu1 %5874 }
 0x3ed   :  { %22222 = vst [vmem:[#allocation73_spill] sm:$0xff] %v16883_v39  ;;  %v11693_v39 = vld [vmem:[%s21941_s28 + $0x748] sm:$0xf] }
 0x3ee   :  { %v4252_v53 = vpop.f32.mrf.mxu2  ;;  %9912 = vperm.xlu1 %13543, %v9850_v36   ;;  %9907 = vperm.xlu0 %13542, %v9849_v8   ;;  %v9848_v8 = vld [vmem:[%s21908_s16 + $0x48] sm:$0xff] }
 0x3ef   :  { %v16881_v11 = vadd.f32 %v4252_v53, %v4084_v54  ;;  %v4381_v40 = vpop.f32.mrf.mxu3  ;;  %9897 = vperm.xlu2 %13544, %v9847_v13   ;;  %v9845_v53 = vld [vmem:[%s21908_s16 + $0x30] sm:$0xff] }
 0x3f0   :  { %v16886_v21 = vadd.f32 %v4381_v40, %v22223_v24  ;;  %v4473_v18 = vpop.f32.mrf.mxu1  ;;  %v9846_v24 = vld [vmem:[%s21908_s16 + $0x38] sm:$0xff] }
 0x3f1   :  { %v16891_v36 = vadd.f32 %v4473_v18, %v22226_v32  ;;  %v12995_v18 = vld [vmem:[%s21934_s29 + $0x1f0] sm:$0xff]  ;;  %v22227_v32 = vld [vmem:[#allocation94_spill] sm:$0xff] }
 0x3f2   :  { %22224 = vst [vmem:[#allocation50_spill] sm:$0xff] %v16886_v21  ;;  %v22228_v40 = vld [vmem:[#allocation98_spill] sm:$0xff]  ;;  %v16961_v14 = vpop.permute.xlu2 %5849 }
 0x3f3   :  { %4512 = vmatmul.bf16.gmra.mxu1 %v11154_v26  ;;  %4641 = vmatmul.bf16.gmra.mxu2 %v10902_v34  ;;  %v4087_v5 = vadd.f32 %v22228_v40, %v22227_v32  ;;  %22231 = vst [vmem:[#allocation94_spill] sm:$0xff] %v16915_v46  ;;  %v22232_v26 = vld [vmem:[#allocation84_spill] sm:$0xff]  ;;  %v16925_v40 = vpop.permute.xlu0 %5784 }
 0x3f4   :  { %4423 = vmatmul.bf16.gmra.mxu3 %v11662_v33  ;;  %v16907_v13 = vpop.f32.mrf.mxu0  ;;  %v16920_v32 = vpop.permute.xlu1 %5859  ;;  %22235 = vst [vmem:[#allocation84_spill] sm:$0xff] %v16925_v40  ;;  %v13234_v40 = vld [vmem:[%s21941_s28 + $0x764] sm:$0xf0] }
 0x3f5   :  { %22234 = vst [vmem:[#allocation100_spill] sm:$0xff] %v16920_v32  ;;  %v11694_v43 = vor.u32 %v13234_v40, %v11693_v39  ;;  %v22246_v39 = vld [vmem:[#allocation88_spill] sm:$0xff] }
 0x3f6   :  { %v4255_v38 = vpop.f32.mrf.mxu2  ;;  %9887 = vperm.xlu1 %13543, %v9845_v53   ;;  %9902 = vperm.xlu0 %13542, %v9848_v8   ;;  %v9844_v53 = vld [vmem:[%s21908_s16 + $0x28] sm:$0xff]  ;;  %v9843_v8 = vld [vmem:[%s21908_s16 + $0x20] sm:$0xff]  ;;  %22243 = vst [vmem:[#allocation86_spill] sm:$0xff] %v16961_v14 }
 0x3f7   :  { %v16909_v33 = vadd.f32 %v4255_v38, %v4087_v5  ;;  %v4384_v22 = vpop.f32.mrf.mxu3  ;;  %9892 = vperm.xlu2 %13544, %v9846_v24   ;;  %10753 = vmatmul.msk.bf16.gmra.mxu0 %vm1303_vm0, %v12995_v18  ;;  %v9841_v24 = vld [vmem:[%s21908_s16 + $0x10] sm:$0xff]  ;;  %v13102_v18 = vld [vmem:[%s21941_s28 + $0x34c] sm:$0xf]  ;;  %v22255_v14 = vld [vmem:[#allocation90_spill] sm:$0xff] }
 0x3f8   :  { %v16912_v9 = vadd.f32 %v4384_v22, %v22229_v2  ;;  %v4475_v54 = vpop.f32.mrf.mxu1  ;;  %v11183_v5 = vld [vmem:[%s21941_s28 + $0x368] sm:$0xf0]  ;;  %v10933_v38 = vld [vmem:[%s21941_s28 + $0x150] sm:$0xf]  ;;  %v22236_v2 = vld [vmem:[#allocation7_spill] sm:$0xff] }
 0x3f9   :  { %v16918_v34 = vadd.f32 %v4475_v54, %v22232_v26  ;;  %v13043_v22 = vld [vmem:[%s21941_s28 + $0x16c] sm:$0xf0]  ;;  %v22237_v54 = vld [vmem:[#allocation102_spill] sm:$0xff] }
 0x3fa   :  { %22230 = vst [vmem:[#allocation82_spill] sm:$0xff] %v16912_v9  ;;  %v4089_v26 = vadd.f32 %v22237_v54, %v22236_v2  ;;  %v11186_v9 = vor.u32 %v13102_v18, %v11183_v5  ;;  %v10934_v21 = vor.u32 %v13043_v22, %v10933_v38  ;;  %v22249_v5 = vld [vmem:[#allocation74_spill] sm:$0xff] }
 0x3fb   :  { %22233 = vst [vmem:[#allocation98_spill] sm:$0xff] %v16918_v34 }
 0x3fc   :  { %v1777_v46 = vpop.f32.mrf.mxu0 }
 0x3fe   :  { %v4257_v49 = vpop.f32.mrf.mxu2  ;;  %9882 = vperm.xlu1 %13543, %v9844_v53   ;;  %9877 = vperm.xlu0 %13542, %v9843_v8   ;;  %v16966_v53 = vpop.permute.xlu1 %5774 }
 0x3ff   :  { %v16953_v32 = vadd.f32 %v4257_v49, %v4089_v26  ;;  %v4386_v10 = vpop.f32.mrf.mxu3  ;;  %9867 = vperm.xlu2 %13544, %v9841_v24   ;;  %v9839_v49 = vld [vmem:[%s21908_s16] sm:$0xff]  ;;  %22244 = vst [vmem:[#allocation119_spill] sm:$0xff] %v16966_v53  ;;  %v22256_v53 = vld [vmem:[#allocation76_spill] sm:$0xff] }
 0x400   :  { %v16956_v2 = vadd.f32 %v4386_v10, %v22239_v58  ;;  %v4478_v54 = vpop.f32.mrf.mxu1  ;;  %v9842_v58 = vld [vmem:[%s21908_s16 + $0x18] sm:$0xff] }
 0x401   :  { %22238 = vst [vmem:[#allocation7_spill] sm:$0xff] %v16953_v32  ;;  %v16959_v29 = vadd.f32 %v4478_v54, %v22241_v20  ;;  %v9840_v20 = vld [vmem:[%s21908_s16 + $0x8] sm:$0xff]  ;;  %v12996_v10 = vld [vmem:[%s21934_s29 + $0x1f8] sm:$0xff] }
 0x402   :  { %22240 = vst [vmem:[#allocation102_spill] sm:$0xff] %v16956_v2  ;;  %v22251_v26 = vld [vmem:[#allocation10_spill] sm:$0xff] }
 0x403   :  { %22242 = vst [vmem:[#allocation92_spill] sm:$0xff] %v16959_v29  ;;  %4517 = vmatmul.bf16.gmra.mxu1 %v11186_v9  ;;  %4646 = vmatmul.bf16.gmra.mxu2 %v10934_v21  ;;  %v16977_v21 = vpop.permute.xlu0 %5769  ;;  %v22247_v9 = vld [vmem:[#allocation83_spill] sm:$0xff] }
 0x404   :  { %4428 = vmatmul.bf16.gmra.mxu3 %v11694_v43  ;;  %22245 = vst [vmem:[#allocation120_spill] sm:$0xff] %v16977_v21  ;;  %v4092_v40 = vadd.f32 %v22247_v9, %v22246_v39  ;;  %v1780_v8 = vpop.f32.mrf.mxu0  ;;  %v10073_v39 = vld [vmem:[%s21909_s18 + $0x8] sm:$0xff]  ;;  %v4094_v21 = vadd.f32 %v22256_v53, %v22255_v14 }
 0x405   :  { %v13110_v9 = vld [vmem:[%s21941_s28 + $0x38c] sm:$0xf] }
 0x406   :  { %v4260_v24 = vpop.f32.mrf.mxu2  ;;  %9857 = vperm.xlu1 %13543, %v9839_v49   ;;  %9872 = vperm.xlu0 %13542, %v9842_v58   ;;  %v10072_v49 = vld [vmem:[%s21909_s18] sm:$0xff]  ;;  %v10074_v58 = vld [vmem:[%s21909_s18 + $0x10] sm:$0xff]  ;;  %v17022_v2 = vpop.permute.xlu1 %5759 }
 0x407   :  { %v16981_v43 = vadd.f32 %v4260_v24, %v4092_v40  ;;  %v4389_v18 = vpop.f32.mrf.mxu3  ;;  %9862 = vperm.xlu2 %13544, %v9840_v20   ;;  %10754 = vmatmul.msk.bf16.gmra.mxu0 %vm1303_vm0, %v12996_v10  ;;  %v11725_v20 = vld [vmem:[%s21941_s28 + $0x788] sm:$0xf] }
 0x408   :  { %v16984_v38 = vadd.f32 %v4389_v18, %v22249_v5  ;;  %v4480_v22 = vpop.f32.mrf.mxu1  ;;  %v13242_v10 = vld [vmem:[%s21941_s28 + $0x7a4] sm:$0xf0]  ;;  %v11215_v18 = vld [vmem:[%s21941_s28 + $0x3a8] sm:$0xf0]  ;;  %v10965_v5 = vld [vmem:[%s21941_s28 + $0x190] sm:$0xf] }
 0x409   :  { %22248 = vst [vmem:[#allocation88_spill] sm:$0xff] %v16981_v43  ;;  %v16988_v54 = vadd.f32 %v4480_v22, %v22251_v26  ;;  %v22253_v40 = vld [vmem:[#allocation19_spill] sm:$0xff]  ;;  %v13051_v22 = vld [vmem:[%s21941_s28 + $0x1ac] sm:$0xf0]  ;;  %v17018_v26 = vpop.permute.xlu2 %5764 }
 0x40a   :  { %22250 = vst [vmem:[#allocation83_spill] sm:$0xff] %v16984_v38  ;;  %v1781_v24 = vadd.f32 %v1780_v8, %v22253_v40  ;;  %v22258_v8 = vld [vmem:[#allocation28_spill] sm:$0xff]  ;;  %v10966_v32 = vor.u32 %v13051_v22, %v10965_v5  ;;  %v22269_v5 = vld [vmem:[#allocation43_spill] sm:$0xff] }
 0x40b   :  { %22252 = vst [vmem:[#allocation74_spill] sm:$0xff] %v16988_v54  ;;  %v1778_v40 = vadd.f32 %v1777_v46, %v22258_v8  ;;  %v11726_v54 = vor.u32 %v13242_v10, %v11725_v20  ;;  %v17026_v48 = vpop.permute.xlu0 %5854  ;;  %v22261_v14 = vld [vmem:[#allocation36_spill] sm:$0xff]  ;;  %v22267_v10 = vld [vmem:[#allocation35_spill] sm:$0xff]  ;;  %v1766_v22 = vadd.f32 %v16761_v15, %v22269_v5 }
 0x40c   :  { %22254 = vst [vmem:[#allocation10_spill] sm:$0xff] %v17018_v26  ;;  %v1782_v38 = vpop.f32.mrf.mxu0  ;;  %v11218_v26 = vor.u32 %v13110_v9, %v11215_v18  ;;  %v1776_v53 = vadd.f32 %v16907_v13, %v22261_v14  ;;  %v22264_v20 = vld [vmem:[#allocation44_spill] sm:$0xff]  ;;  %v10076_v13 = vld [vmem:[%s21909_s18 + $0x20] sm:$0xff]  ;;  %v1768_v9 = vadd.f32 %v16801_v16, %v22267_v10 }
 0x40d   :  { %22257 = vst [vmem:[#allocation19_spill] sm:$0xff] %v17022_v2  ;;  %v1783_v37 = vadd.f32 %v1782_v38, %v22259_v35  ;;  %v1935_v2 = vmax.f32 %v1781_v24, 0.0  ;;  %v22263_v38 = vld [vmem:[#allocation87_spill] sm:$0xff] }
 0x40e   :  { %v4262_v28 = vpop.f32.mrf.mxu2  ;;  %10095 = vperm.xlu1 %13543, %v10073_v39   ;;  %22260 = vst [vmem:[#allocation90_spill] sm:$0xff] %v17026_v48  ;;  %10090 = vperm.xlu0 %13542, %v10072_v49   ;;  %v13250_v10 = vld [vmem:[%s21941_s28 + $0x7e4] sm:$0xf0] }
 0x40f   :  { %v17028_v43 = vadd.f32 %v4262_v28, %v4094_v21  ;;  %v4391_v29 = vpop.f32.mrf.mxu3  ;;  %10100 = vperm.xlu2 %13544, %v10074_v58   ;;  %v1936_v34 = vmax.f32 %v1783_v37, 0.0  ;;  %v1773_v28 = vadd.f32 %v16871_v41, %v22264_v20  ;;  %v1934_v21 = vmax.f32 %v1778_v40, 0.0  ;;  %v22265_v58 = vld [vmem:[#allocation26_spill] sm:$0xff]  ;;  %v10077_v41 = vld [vmem:[%s21909_s18 + $0x28] sm:$0xff] }
 0x410   :  { %v17033_v46 = vadd.f32 %v4391_v29, %v16431_v44  ;;  %v4483_v35 = vpop.f32.mrf.mxu1  ;;  %v1771_v37 = vadd.f32 %v16833_v56, %v22265_v58  ;;  %v1933_v44 = vmax.f32 %v1776_v53, 0.0  ;;  %v10075_v29 = vld [vmem:[%s21909_s18 + $0x18] sm:$0xff]  ;;  %v1930_v20 = vmax.f32 %v1768_v9, 0.0  ;;  %v11247_v58 = vld [vmem:[%s21941_s28 + $0x3e8] sm:$0xf0] }
 0x411   :  { %v17036_v39 = vadd.f32 %v4483_v35, %v22263_v38  ;;  %v2008_v49 = vpack.c.bf16 %v1936_v34, %v1935_v2  ;;  %v22266_v34 = vld [vmem:[#allocation85_spill] sm:$0xff]  ;;  %v1932_v56 = vmax.f32 %v1773_v28, 0.0  ;;  %v17057_v18 = vpop.permute.xlu2 %5749 }
 0x412   :  { %22262 = vst [vmem:[#allocation76_spill] sm:$0xff] %v17033_v46  ;;  %v1931_v40 = vmax.f32 %v1771_v37, 0.0  ;;  %v22273_v35 = vld [vmem:[#allocation21_spill] sm:$0xff] }
 0x413   :  { %4522 = vmatmul.bf16.gmra.mxu1 %v11218_v26  ;;  %4651 = vmatmul.bf16.gmra.mxu2 %v10966_v32  ;;  %v4097_v32 = vadd.f32 %v16436_v60, %v22266_v34  ;;  %22268 = vst [vmem:[#allocation28_spill] sm:$0xff] %v17057_v18  ;;  %v17063_v60 = vpop.permute.xlu1 %5844  ;;  %v17068_v53 = vpop.permute.xlu0 %5839  ;;  %v10079_v28 = vld [vmem:[%s21909_s18 + $0x38] sm:$0xff]  ;;  %v10997_v37 = vld [vmem:[%s21941_s28 + $0x1d0] sm:$0xf] }
 0x414   :  { %4433 = vmatmul.bf16.gmra.mxu3 %v11726_v54  ;;  %4951 = vmatpush.bf16.msrb.mxu0 %v2008_v49  ;;  %v17053_v2 = vpop.f32.mrf.mxu0  ;;  %v2007_v54 = vpack.c.bf16 %v1934_v21, %v1933_v44  ;;  %22270 = vst [vmem:[#allocation13_spill] sm:$0xff] %v17063_v60  ;;  %v2006_v15 = vpack.c.bf16 %v1932_v56, %v1931_v40  ;;  %v1929_v21 = vmax.f32 %v1766_v22, 0.0  ;;  %v10078_v49 = vld [vmem:[%s21909_s18 + $0x30] sm:$0xff] }
 0x415   :  { %22272 = vst [vmem:[#allocation87_spill] sm:$0xff] %v17068_v53  ;;  %v13059_v44 = vld [vmem:[%s21941_s28 + $0x1ec] sm:$0xf0] }
 0x416   :  { %v4265_v24 = vpop.f32.mrf.mxu2  ;;  %10110 = vperm.xlu1 %13543, %v10076_v13   ;;  %10105 = vperm.xlu0 %13542, %v10075_v29   ;;  %v13118_v13 = vld [vmem:[%s21941_s28 + $0x3cc] sm:$0xf]  ;;  %v22274_v29 = vld [vmem:[#allocation78_spill] sm:$0xff]  ;;  %v2005_v56 = vpack.c.bf16 %v1930_v20, %v1929_v21  ;;  %v10082_v21 = vld [vmem:[%s21909_s18 + $0x50] sm:$0xff] }
 0x417   :  { %v17061_v26 = vadd.f32 %v4265_v24, %v4097_v32  ;;  %v4394_v8 = vpop.f32.mrf.mxu3  ;;  %10115 = vperm.xlu2 %13544, %v10077_v41   ;;  %v4099_v41 = vadd.f32 %v16474_v12, %v22274_v29  ;;  %v11757_v32 = vld [vmem:[%s21941_s28 + $0x7c8] sm:$0xf]  ;;  %v11250_v5 = vor.u32 %v13118_v13, %v11247_v58  ;;  %v10998_v12 = vor.u32 %v13059_v44, %v10997_v37 }
 0x418   :  { %v17066_v14 = vadd.f32 %v4394_v8, %v16468_v47  ;;  %v4485_v16 = vpop.f32.mrf.mxu1  ;;  %4952 = vmatpush.bf16.msrb.mxu0 %v2007_v54  ;;  %v10080_v47 = vld [vmem:[%s21909_s18 + $0x40] sm:$0xff]  ;;  %v11758_v40 = vor.u32 %v13250_v10, %v11757_v32  ;;  %v22282_v32 = vld [vmem:[#allocation16_spill] sm:$0xff] }
 0x419   :  { %v17071_v38 = vadd.f32 %v4485_v16, %v22273_v35  ;;  %v17109_v16 = vpop.permute.xlu2 %5834  ;;  %v22277_v35 = vld [vmem:[#allocation8_spill] sm:$0xff] }
 0x41a   :  { %22271 = vst [vmem:[#allocation36_spill] sm:$0xff] %v17066_v14  ;;  %v22288_v53 = vld [vmem:[#allocation24_spill] sm:$0xff] }
 0x41b   :  { %22276 = vst [vmem:[#allocation26_spill] sm:$0xff] %v17109_v16  ;;  %v17116_v20 = vpop.permute.xlu0 %5754 }
 0x41c   :  { %4953 = vmatpush.bf16.msrb.mxu0 %v2006_v15  ;;  %v17096_v34 = vpop.f32.mrf.mxu0  ;;  %22279 = vst [vmem:[#allocation35_spill] sm:$0xff] %v17116_v20 }
 0x41e   :  { %v4267_v9 = vpop.f32.mrf.mxu2  ;;  %10125 = vperm.xlu1 %13543, %v10079_v28   ;;  %10120 = vperm.xlu0 %13542, %v10078_v49   ;;  %v17114_v28 = vpop.permute.xlu1 %5829  ;;  %v10083_v49 = vld [vmem:[%s21909_s18 + $0x58] sm:$0xff] }
 0x41f   :  { %v17104_v24 = vadd.f32 %v4267_v9, %v4099_v41  ;;  %v4396_v54 = vpop.f32.mrf.mxu3  ;;  %10130 = vperm.xlu2 %13544, %v10080_v47   ;;  %22278 = vst [vmem:[#allocation85_spill] sm:$0xff] %v17114_v28  ;;  %v22280_v47 = vld [vmem:[#allocation20_spill] sm:$0xff]  ;;  %v10084_v9 = vld [vmem:[%s21909_s18 + $0x60] sm:$0xff] }
 0x420   :  { %v17107_v22 = vadd.f32 %v4396_v54, %v16509_v6  ;;  %v4488_v8 = vpop.f32.mrf.mxu1  ;;  %4954 = vmatpush.bf16.msrb.mxu0 %v2005_v56  ;;  %v10081_v6 = vld [vmem:[%s21909_s18 + $0x48] sm:$0xff]  ;;  %v4102_v13 = vadd.f32 %v16516_v19, %v22280_v47  ;;  %v10781_v47 = vld [vmem:[%s21941_s28 + $0x18] sm:$0xf] }
 0x421   :  { %v17112_v15 = vadd.f32 %v4488_v8, %v22277_v35  ;;  %v10085_v19 = vld [vmem:[%s21909_s18 + $0x68] sm:$0xff]  ;;  %v17147_v56 = vpop.permute.xlu2 %5819  ;;  %v13067_v8 = vld [vmem:[%s21941_s28 + $0x22c] sm:$0xf0] }
 0x422   :  { %22275 = vst [vmem:[#allocation44_spill] sm:$0xff] %v17107_v22  ;;  %v11279_v54 = vld [vmem:[%s21941_s28 + $0x428] sm:$0xf0] }
 0x423   :  { %4527 = vmatmul.bf16.gmra.mxu1 %v11250_v5  ;;  %4656 = vmatmul.bf16.gmra.mxu2 %v10998_v12  ;;  %22283 = vst [vmem:[#allocation21_spill] sm:$0xff] %v17147_v56  ;;  %v11029_v12 = vld [vmem:[%s21941_s28 + $0x210] sm:$0xf]  ;;  %v17170_v35 = vpop.permute.xlu0 %5739 }
 0x424   :  { %4438 = vmatmul.bf16.gmra.mxu3 %v11758_v40  ;;  %4955 = vmatpush.bf16.msrb.mxu0 %v16743_v27  ;;  %v17130_v58 = vpop.f32.mrf.mxu0  ;;  %v12999_v40 = vld [vmem:[%s21941_s28 + $0x14] sm:$0xf]  ;;  %22285 = vst [vmem:[#allocation8_spill] sm:$0xff] %v17170_v35 }
 0x426   :  { %v4270_v37 = vpop.f32.mrf.mxu2  ;;  %10140 = vperm.xlu1 %13543, %v10082_v21   ;;  %10135 = vperm.xlu0 %13542, %v10081_v6   ;;  %v17158_v5 = vpop.permute.xlu1 %5744  ;;  %v22286_v21 = vld [vmem:[#allocation70_spill] sm:$0xff] }
 0x427   :  { %v17132_v44 = vadd.f32 %v4270_v37, %v4102_v13  ;;  %v4399_v29 = vpop.f32.mrf.mxu3  ;;  %10145 = vperm.xlu2 %13544, %v10083_v49   ;;  %22284 = vst [vmem:[#allocation78_spill] sm:$0xff] %v17158_v5  ;;  %v4104_v6 = vadd.f32 %v16543_v59, %v22286_v21  ;;  %v13004_v13 = vld [vmem:[%s21941_s28 + $0x34] sm:$0xf0] }
 0x428   :  { %v17135_v27 = vadd.f32 %v4399_v29, %v16537_v57  ;;  %v4490_v41 = vpop.f32.mrf.mxu1  ;;  %4956 = vmatpush.bf16.msrb.mxu0 %v16669_v0  ;;  %v10086_v57 = vld [vmem:[%s21909_s18 + $0x70] sm:$0xff]  ;;  %v13126_v0 = vld [vmem:[%s21941_s28 + $0x40c] sm:$0xf]  ;;  %v10782_v48 = vor.u32 %v13004_v13, %v10781_v47 }
 0x429   :  { %v17139_v10 = vadd.f32 %v4490_v41, %v22282_v32  ;;  %v11282_v59 = vor.u32 %v13126_v0, %v11279_v54  ;;  %v11030_v32 = vor.u32 %v13067_v8, %v11029_v12  ;;  %v26_v8 = vstv %s21911_s20  ;;  %v13134_v47 = vld [vmem:[%s21941_s28 + $0x44c] sm:$0xf] }
 0x42a   :  { %22281 = vst [vmem:[#allocation43_spill] sm:$0xff] %v17135_v27  ;;  %v11311_v13 = vld [vmem:[%s21941_s28 + $0x468] sm:$0xf0] }
 0x42b   :  { %v17209_v0 = vpop.permute.xlu0 %5824  ;;  %27 = vst [vmem:[#allocation2] sm:$0x1] %v26_v8  ;;  %v22315_v27 = vld [vmem:[#allocation32_spill] sm:$0xff] }
 0x42c   :  { %4957 = vmatpush.bf16.msrb.mxu0 %v16593_v1  ;;  %v17174_v49 = vpop.f32.mrf.mxu0  ;;  %v10775_v1 = vld [vmem:[%s21941_s28 + $0x30] sm:$0xf0]  ;;  %22291 = vst [vmem:[#allocation24_spill] sm:$0xff] %v17209_v0 }
 0x42d   :  { %v10778_v60 = vor.u32 %v12999_v40, %v10775_v1  ;;  %v22293_v40 = vld [vmem:[#allocation64_spill] sm:$0xff]  ;;  %v10284_v1 = vld [vmem:[%s21910_s19 + $0x18] sm:$0xff] }
 0x42e   :  { %v4272_v37 = vpop.f32.mrf.mxu2  ;;  %10155 = vperm.xlu1 %13543, %v10085_v19   ;;  %10150 = vperm.xlu0 %13542, %v10084_v9   ;;  %v10281_v19 = vld [vmem:[%s21910_s19] sm:$0xff]  ;;  %v17203_v9 = vpop.permute.xlu2 %7482 }
 0x42f   :  { %v17185_v29 = vadd.f32 %v4272_v37, %v4104_v6  ;;  %v4401_v41 = vpop.f32.mrf.mxu3  ;;  %10160 = vperm.xlu2 %13544, %v10086_v57   ;;  %22289 = vst [vmem:[#allocation16_spill] sm:$0xff] %v17203_v9  ;;  %v11061_v37 = vld [vmem:[%s21941_s28 + $0x250] sm:$0xf] }
 0x430   :  { %v17188_v21 = vadd.f32 %v4401_v41, %v16584_v17  ;;  %v4493_v16 = vpop.f32.mrf.mxu1  ;;  %4958 = vmatpush.bf16.msrb.mxu0 %v16520_v50  ;;  %v10087_v17 = vld [vmem:[%s21909_s18 + $0x78] sm:$0xff]  ;;  %v10282_v50 = vld [vmem:[%s21910_s19 + $0x8] sm:$0xff]  ;;  %v13075_v41 = vld [vmem:[%s21941_s28 + $0x26c] sm:$0xf0] }
 0x431   :  { %v17192_v28 = vadd.f32 %v4493_v16, %v22288_v53  ;;  %v17207_v16 = vpop.permute.xlu1 %7477  ;;  %v11062_v9 = vor.u32 %v13075_v41, %v11061_v37  ;;  %v22301_v41 = vld [vmem:[#allocation30_spill] sm:$0xff] }
 0x432   :  { %22287 = vst [vmem:[#allocation20_spill] sm:$0xff] %v17188_v21 }
 0x433   :  { %4532 = vmatmul.bf16.gmra.mxu1 %v11282_v59  ;;  %4661 = vmatmul.bf16.gmra.mxu2 %v11030_v32  ;;  %22290 = vst [vmem:[#allocation70_spill] sm:$0xff] %v17207_v16  ;;  %v13007_v59 = vld [vmem:[%s21941_s28 + $0x54] sm:$0xf]  ;;  %v17268_v5 = vpop.permute.xlu0 %7557 }
 0x434   :  { %4790 = vmatmul.bf16.vlgmr.msrb.gmra.mxu3 %v10778_v60  ;;  %4959 = vmatmul.bf16.vlgmr.msrb.gmra.mxu0 %v10782_v48  ;;  %v17205_v53 = vpop.f32.mrf.mxu0  ;;  %22297 = vst [vmem:[#allocation124_spill] sm:$0xff] %v17268_v5 }
 0x436   :  { %v4622_v57 = vpop.f32.mrf.mxu2  ;;  %10300 = vperm.xlu1 %13543, %v10281_v19   ;;  %10165 = vperm.xlu0 %13542, %v10087_v17   ;;  %v10807_v19 = vld [vmem:[%s21941_s28 + $0x70] sm:$0xf0]  ;;  %v10813_v17 = vld [vmem:[%s21941_s28 + $0x58] sm:$0xf] }
 0x437   :  { %v4404_v60 = vpop.f32.mrf.mxu3  ;;  %v17212_v54 = vadd.f32 %v4622_v57, %v16590_v63  ;;  %10305 = vperm.xlu2 %13544, %v10282_v50   ;;  %v10283_v63 = vld [vmem:[%s21910_s19 + $0x10] sm:$0xff]  ;;  %v13012_v50 = vld [vmem:[%s21941_s28 + $0x74] sm:$0xf0]  ;;  %v10810_v20 = vor.u32 %v13007_v59, %v10807_v19  ;;  %v10290_v19 = vld [vmem:[%s21910_s19 + $0x48] sm:$0xff] }
 0x438   :  { %v17215_v12 = vadd.f32 %v4404_v60, %v16615_v25  ;;  %v4495_v48 = vpop.f32.mrf.mxu1  ;;  %v10285_v25 = vld [vmem:[%s21910_s19 + $0x20] sm:$0xff]  ;;  %v17258_v60 = vpop.permute.xlu2 %7467  ;;  %v10814_v18 = vor.u32 %v13012_v50, %v10813_v17  ;;  %v13142_v50 = vld [vmem:[%s21941_s28 + $0x48c] sm:$0xf] }
 0x439   :  { %v17221_v6 = vadd.f32 %v4495_v48, %v22293_v40  ;;  %22294 = vst [vmem:[#allocation64_spill] sm:$0xff] %v17258_v60  ;;  %v11314_v40 = vor.u32 %v13134_v47, %v11311_v13  ;;  %v17263_v16 = vpop.permute.xlu1 %7562 }
 0x43a   :  { %22292 = vst [vmem:[#allocation121_spill] sm:$0xff] %v17215_v12 }
 0x43b   :  { %22295 = vst [vmem:[#allocation122_spill] sm:$0xff] %v17263_v16  ;;  %v17303_v17 = vpop.permute.xlu0 %7472 }
 0x43c   :  { %v17247_v32 = vpop.f32.mrf.mxu0  ;;  %22303 = vst [vmem:[#allocation126_spill] sm:$0xff] %v17303_v17 }
 0x43e   :  { %v4624_v57 = vpop.f32.mrf.mxu2  ;;  %10315 = vperm.xlu1 %13543, %v10284_v1   ;;  %10310 = vperm.xlu0 %13542, %v10283_v63   ;;  %v22298_v1 = vld [vmem:[#allocation22_spill] sm:$0xff] }
 0x43f   :  { %v4406_v48 = vpop.f32.mrf.mxu3  ;;  %v17261_v8 = vadd.f32 %v4624_v57, %v16622_v45  ;;  %10320 = vperm.xlu2 %13544, %v10285_v25   ;;  %v10287_v45 = vld [vmem:[%s21910_s19 + $0x30] sm:$0xff]  ;;  %v10288_v63 = vld [vmem:[%s21910_s19 + $0x38] sm:$0xff]  ;;  %v11343_v57 = vld [vmem:[%s21941_s28 + $0x4a8] sm:$0xf0] }
 0x440   :  { %v17266_v0 = vadd.f32 %v4406_v48, %v16661_v61  ;;  %v4498_v56 = vpop.f32.mrf.mxu1  ;;  %v10286_v61 = vld [vmem:[%s21910_s19 + $0x28] sm:$0xff]  ;;  %v17290_v37 = vpop.permute.xlu2 %7552  ;;  %v11093_v48 = vld [vmem:[%s21941_s28 + $0x290] sm:$0xf]  ;;  %v11346_v16 = vor.u32 %v13142_v50, %v11343_v57 }
 0x441   :  { %v17271_v60 = vadd.f32 %v4498_v56, %v22298_v1  ;;  %22300 = vst [vmem:[#allocation125_spill] sm:$0xff] %v17290_v37  ;;  %v13015_v1 = vld [vmem:[%s21941_s28 + $0x94] sm:$0xf]  ;;  %v22310_v57 = vld [vmem:[#allocation75_spill] sm:$0xff] }
 0x442   :  { %22296 = vst [vmem:[#allocation123_spill] sm:$0xff] %v17266_v0 }
 0x443   :  { %4537 = vmatmul.bf16.gmra.mxu1 %v11314_v40  ;;  %4666 = vmatmul.bf16.gmra.mxu2 %v11062_v9  ;;  %v13083_v40 = vld [vmem:[%s21941_s28 + $0x2ac] sm:$0xf0] }
 0x444   :  { %4795 = vmatmul.bf16.gmra.mxu3 %v10810_v20  ;;  %4964 = vmatmul.bf16.gmra.mxu0 %v10814_v18  ;;  %v17282_v25 = vpop.f32.mrf.mxu0  ;;  %v17295_v18 = vpop.permute.xlu1 %7547  ;;  %v11094_v5 = vor.u32 %v13083_v40, %v11093_v48  ;;  %v10295_v40 = vld [vmem:[%s21910_s19 + $0x70] sm:$0xff] }
 0x445   :  { %22302 = vst [vmem:[#allocation30_spill] sm:$0xff] %v17295_v18 }
 0x446   :  { %v4627_v56 = vpop.f32.mrf.mxu2  ;;  %10330 = vperm.xlu1 %13543, %v10287_v45   ;;  %10325 = vperm.xlu0 %13542, %v10286_v61   ;;  %v10839_v61 = vld [vmem:[%s21941_s28 + $0xb0] sm:$0xf0] }
 0x447   :  { %v4409_v47 = vpop.f32.mrf.mxu3  ;;  %v17285_v9 = vadd.f32 %v4627_v56, %v16667_v31  ;;  %10335 = vperm.xlu2 %13544, %v10288_v63   ;;  %v10289_v31 = vld [vmem:[%s21910_s19 + $0x40] sm:$0xff]  ;;  %v10845_v63 = vld [vmem:[%s21941_s28 + $0x98] sm:$0xf]  ;;  %v10842_v17 = vor.u32 %v13015_v1, %v10839_v61  ;;  %v11125_v61 = vld [vmem:[%s21941_s28 + $0x2d0] sm:$0xf] }
 0x448   :  { %v17288_v20 = vadd.f32 %v4409_v47, %v16687_v52  ;;  %v4500_v13 = vpop.f32.mrf.mxu1  ;;  %v10291_v52 = vld [vmem:[%s21910_s19 + $0x50] sm:$0xff]  ;;  %v13020_v56 = vld [vmem:[%s21941_s28 + $0xb4] sm:$0xf0]  ;;  %v17343_v12 = vpop.permute.xlu2 %7537  ;;  %v10297_v1 = vld [vmem:[#allocation2] sm:$0x1] }
 0x449   :  { %v17293_v59 = vadd.f32 %v4500_v13, %v22301_v41  ;;  %v10846_v35 = vor.u32 %v13020_v56, %v10845_v63  ;;  %v13091_v63 = vld [vmem:[%s21941_s28 + $0x2ec] sm:$0xf0]  ;;  %v13023_v56 = vld [vmem:[%s21941_s28 + $0xd4] sm:$0xf] }
 0x44a   :  { %22299 = vst [vmem:[#allocation22_spill] sm:$0xff] %v17288_v20  ;;  %v22305_v20 = vld [vmem:[#allocation62_spill] sm:$0xff] }
 0x44b   :  { %22306 = vst [vmem:[#allocation62_spill] sm:$0xff] %v17343_v12 }
 0x44c   :  { %v17323_v45 = vpop.f32.mrf.mxu0 }
 0x44e   :  { %v4629_v47 = vpop.f32.mrf.mxu2  ;;  %10345 = vperm.xlu1 %13543, %v10290_v19   ;;  %10340 = vperm.xlu0 %13542, %v10289_v31   ;;  %v17348_v19 = vpop.permute.xlu1 %7462 }
 0x44f   :  { %v4411_v13 = vpop.f32.mrf.mxu3  ;;  %v17335_v41 = vadd.f32 %v4629_v47, %v16698_v3  ;;  %10350 = vperm.xlu2 %13544, %v10291_v52   ;;  %v10293_v3 = vld [vmem:[%s21910_s19 + $0x60] sm:$0xff]  ;;  %22307 = vst [vmem:[#allocation128_spill] sm:$0xff] %v17348_v19 }
 0x450   :  { %v17338_v37 = vadd.f32 %v4411_v13, %v16731_v23  ;;  %v4503_v18 = vpop.f32.mrf.mxu1  ;;  %v10292_v23 = vld [vmem:[%s21910_s19 + $0x58] sm:$0xff]  ;;  %v17390_v47 = vpop.permute.xlu2 %7452 }
 0x451   :  { %v17341_v0 = vadd.f32 %v4503_v18, %v22305_v20  ;;  %v10294_v20 = vld [vmem:[%s21910_s19 + $0x68] sm:$0xff]  ;;  %v17356_v18 = vpop.permute.xlu0 %7457  ;;  %22311 = vst [vmem:[#allocation75_spill] sm:$0xff] %v17390_v47 }
 0x452   :  { %22304 = vst [vmem:[#allocation127_spill] sm:$0xff] %v17338_v37 }
 0x453   :  { %4542 = vmatmul.bf16.gmra.mxu1 %v11346_v16  ;;  %4671 = vmatmul.bf16.gmra.mxu2 %v11094_v5  ;;  %22308 = vst [vmem:[#allocation129_spill] sm:$0xff] %v17356_v18  ;;  %v11126_v18 = vor.u32 %v13091_v63, %v11125_v61  ;;  %v13036_v63 = vld [vmem:[%s21941_s28 + $0x134] sm:$0xf0] }
 0x454   :  { %4800 = vmatmul.bf16.gmra.mxu3 %v10842_v17  ;;  %4969 = vmatmul.bf16.gmra.mxu0 %v10846_v35  ;;  %v17358_v16 = vpop.f32.mrf.mxu0  ;;  %v10296_v35 = vld [vmem:[%s21910_s19 + $0x78] sm:$0xff] }
 0x456   :  { %v4632_v5 = vpop.f32.mrf.mxu2  ;;  %10360 = vperm.xlu1 %13543, %v10293_v3   ;;  %10355 = vperm.xlu0 %13542, %v10292_v23   ;;  %v10871_v3 = vld [vmem:[%s21941_s28 + $0xf0] sm:$0xf0]  ;;  %v10877_v23 = vld [vmem:[%s21941_s28 + $0xd8] sm:$0xf] }
 0x457   :  { %v4414_v31 = vpop.f32.mrf.mxu3  ;;  %v17361_v52 = vadd.f32 %v4632_v5, %v16739_v42  ;;  %10365 = vperm.xlu2 %13544, %v10294_v20   ;;  %v13150_v42 = vld [vmem:[%s21941_s28 + $0x4cc] sm:$0xf]  ;;  %v13028_v20 = vld [vmem:[%s21941_s28 + $0xf4] sm:$0xf0]  ;;  %v17403_v5 = vpop.permute.xlu1 %7447  ;;  %v10874_v37 = vor.u32 %v13023_v56, %v10871_v3 }
 0x458   :  { %v17364_v17 = vadd.f32 %v4414_v31, %v16763_v7  ;;  %v4505_v50 = vpop.f32.mrf.mxu1  ;;  %v11375_v7 = vld [vmem:[%s21941_s28 + $0x4e8] sm:$0xf0]  ;;  %22312 = vst [vmem:[#allocation131_spill] sm:$0xff] %v17403_v5  ;;  %v10878_v21 = vor.u32 %v13028_v20, %v10877_v23 }
 0x459   :  { %v17367_v48 = vadd.f32 %v4505_v50, %v22310_v57  ;;  %v17405_v50 = vpop.permute.xlu0 %7542  ;;  %v11378_v19 = vor.u32 %v13150_v42, %v11375_v7  ;;  %v22318_v7 = vld [vmem:[#allocation97_spill] sm:$0xff] }
 0x45a   :  { %22309 = vst [vmem:[#allocation130_spill] sm:$0xff] %v17364_v17 }
 0x45b   :  { %22313 = vst [vmem:[#allocation132_spill] sm:$0xff] %v17405_v50 }
 0x45c   :  { %v17392_v13 = vpop.f32.mrf.mxu0 }
 0x45e   :  { %v4634_v31 = vpop.f32.mrf.mxu2  ;;  %10375 = vperm.xlu1 %13543, %v10296_v35   ;;  %10370 = vperm.xlu0 %13542, %v10295_v40  }
 0x45f   :  { %v4416_v57 = vpop.f32.mrf.mxu3  ;;  %v17408_v12 = vadd.f32 %v4634_v31, %v16770_v51  ;;  %10417 = vperm.xlu2 %13544, %v10297_v1  }
 0x460   :  { %v17411_v47 = vadd.f32 %v4416_v57, %v16809_v30  ;;  %v4508_v17 = vpop.f32.mrf.mxu1 }
 0x461   :  { %v17414_v5 = vadd.f32 %v4508_v17, %v22315_v27  ;;  %v13158_v27 = vld [vmem:[%s21941_s28 + $0x50c] sm:$0xf]  ;;  %v10909_v17 = vld [vmem:[%s21941_s28 + $0x118] sm:$0xf] }
 0x462   :  { %22314 = vst [vmem:[#allocation133_spill] sm:$0xff] %v17411_v47 }
 0x463   :  { %4547 = vmatmul.bf16.gmra.mxu1 %v11378_v19  ;;  %4676 = vmatmul.bf16.gmra.mxu2 %v11126_v18  ;;  %v10903_v18 = vld [vmem:[%s21941_s28 + $0x130] sm:$0xf0] }
 0x464   :  { %4805 = vmatmul.bf16.gmra.mxu3 %v10874_v37  ;;  %4974 = vmatmul.bf16.gmra.mxu0 %v10878_v21  ;;  %v17416_v35 = vpop.f32.mrf.mxu0  ;;  %v11407_v21 = vld [vmem:[%s21941_s28 + $0x528] sm:$0xf0]  ;;  %v13031_v37 = vld [vmem:[%s21941_s28 + $0x114] sm:$0xf] }
 0x465   :  { %v11410_v20 = vor.u32 %v13158_v27, %v11407_v21  ;;  %v22326_v21 = vld [vmem:[#allocation89_spill] sm:$0xff] }
 0x466   :  { %v4637_v51 = vpop.f32.mrf.mxu2 }
 0x467   :  { %v4419_v40 = vpop.f32.mrf.mxu3  ;;  %v17419_v1 = vadd.f32 %v4637_v51, %v16815_v55  ;;  %v11157_v55 = vld [vmem:[%s21941_s28 + $0x310] sm:$0xf] }
 0x468   :  { %v17422_v30 = vadd.f32 %v4419_v40, %v16839_v4  ;;  %v4510_v42 = vpop.f32.mrf.mxu1  ;;  %v13099_v4 = vld [vmem:[%s21941_s28 + $0x32c] sm:$0xf0]  ;;  %v10906_v40 = vor.u32 %v13031_v37, %v10903_v18  ;;  %v11439_v37 = vld [vmem:[%s21941_s28 + $0x568] sm:$0xf0]  ;;  %v10935_v18 = vld [vmem:[%s21941_s28 + $0x170] sm:$0xf0] }
 0x469   :  { %22316 = vst [vmem:[#allocation32_spill] sm:$0xff] %v17419_v1  ;;  %v17425_v61 = vadd.f32 %v4510_v42, %v22318_v7  ;;  %v11158_v31 = vor.u32 %v13099_v4, %v11157_v55  ;;  %v10910_v42 = vor.u32 %v13036_v63, %v10909_v17  ;;  %v22322_v7 = vld [vmem:[#allocation81_spill] sm:$0xff]  ;;  %v13166_v4 = vld [vmem:[%s21941_s28 + $0x54c] sm:$0xf] }
 0x46a   :  { %22317 = vst [vmem:[#allocation134_spill] sm:$0xff] %v17422_v30  ;;  %v10941_v17 = vld [vmem:[%s21941_s28 + $0x158] sm:$0xf] }
 0x46b   :  { %22319 = vst [vmem:[#allocation97_spill] sm:$0xff] %v17425_v61  ;;  %v13044_v63 = vld [vmem:[%s21941_s28 + $0x174] sm:$0xf0]  ;;  %v22346_v61 = vld [vmem:[#allocation40_spill] sm:$0xff] }
 0x46c   :  { %v17442_v19 = vpop.f32.mrf.mxu0 }
 0x46d   :  { %v1813_v1 = vadd.f32 %v17442_v19, %v22346_v61 }
 0x46e   :  { %v4639_v56 = vpop.f32.mrf.mxu2 }
 0x46f   :  { %v4421_v3 = vpop.f32.mrf.mxu3  ;;  %v17454_v23 = vadd.f32 %v4639_v56, %v16846_v62 }
 0x470   :  { %v17457_v57 = vadd.f32 %v4421_v3, %v16881_v11  ;;  %v4513_v51 = vpop.f32.mrf.mxu1 }
 0x471   :  { %22320 = vst [vmem:[#allocation135_spill] sm:$0xff] %v17454_v23  ;;  %v17460_v50 = vadd.f32 %v4513_v51, %v22322_v7  ;;  %v11442_v51 = vor.u32 %v13166_v4, %v11439_v37  ;;  %v22336_v4 = vld [vmem:[#allocation88_spill] sm:$0xff] }
 0x472   :  { %22321 = vst [vmem:[#allocation136_spill] sm:$0xff] %v17457_v57  ;;  %v22332_v57 = vld [vmem:[#allocation91_spill] sm:$0xff] }
 0x473   :  { %22323 = vst [vmem:[#allocation81_spill] sm:$0xff] %v17460_v50  ;;  %4552 = vmatmul.bf16.gmra.mxu1 %v11410_v20  ;;  %4681 = vmatmul.bf16.gmra.mxu2 %v11158_v31  ;;  %v22328_v20 = vld [vmem:[#allocation98_spill] sm:$0xff] }
 0x474   :  { %4810 = vmatmul.bf16.gmra.mxu3 %v10906_v40  ;;  %4979 = vmatmul.bf16.gmra.mxu0 %v10910_v42  ;;  %v1815_v30 = vpop.f32.mrf.mxu0  ;;  %v22330_v42 = vld [vmem:[#allocation7_spill] sm:$0xff] }
 0x476   :  { %v4642_v47 = vpop.f32.mrf.mxu2 }
 0x477   :  { %v4424_v22 = vpop.f32.mrf.mxu3  ;;  %v17463_v62 = vadd.f32 %v4642_v47, %v16891_v36  ;;  %v11189_v36 = vld [vmem:[%s21941_s28 + $0x350] sm:$0xf] }
 0x478   :  { %v17466_v27 = vadd.f32 %v4424_v22, %v16909_v33  ;;  %v4515_v11 = vpop.f32.mrf.mxu1  ;;  %v13107_v33 = vld [vmem:[%s21941_s28 + $0x36c] sm:$0xf0]  ;;  %v13039_v22 = vld [vmem:[%s21941_s28 + $0x154] sm:$0xf] }
 0x479   :  { %22324 = vst [vmem:[#allocation137_spill] sm:$0xff] %v17463_v62  ;;  %v17469_v55 = vadd.f32 %v4515_v11, %v22326_v21  ;;  %v11190_v40 = vor.u32 %v13107_v33, %v11189_v36  ;;  %v10938_v21 = vor.u32 %v13039_v22, %v10935_v18  ;;  %v22338_v33 = vld [vmem:[#allocation93_spill] sm:$0xff]  ;;  %v22340_v18 = vld [vmem:[#allocation15_spill] sm:$0xff] }
 0x47a   :  { %22325 = vst [vmem:[#allocation138_spill] sm:$0xff] %v17466_v27  ;;  %v10942_v27 = vor.u32 %v13044_v63, %v10941_v17  ;;  %v13047_v63 = vld [vmem:[%s21941_s28 + $0x194] sm:$0xf] }
 0x47b   :  { %22327 = vst [vmem:[#allocation89_spill] sm:$0xff] %v17469_v55 }
 0x47c   :  { %v1817_v47 = vpop.f32.mrf.mxu0 }
 0x47e   :  { %v4644_v56 = vpop.f32.mrf.mxu2 }
 0x47f   :  { %v4426_v3 = vpop.f32.mrf.mxu3  ;;  %v17496_v31 = vadd.f32 %v4644_v56, %v22328_v20  ;;  %v22334_v56 = vld [vmem:[#allocation92_spill] sm:$0xff] }
 0x480   :  { %v17499_v7 = vadd.f32 %v4426_v3, %v22330_v42  ;;  %v4518_v11 = vpop.f32.mrf.mxu1  ;;  %v10967_v3 = vld [vmem:[%s21941_s28 + $0x1b0] sm:$0xf0] }
 0x481   :  { %22329 = vst [vmem:[#allocation98_spill] sm:$0xff] %v17496_v31  ;;  %v17502_v14 = vadd.f32 %v4518_v11, %v22332_v57  ;;  %v13174_v57 = vld [vmem:[%s21941_s28 + $0x58c] sm:$0xf]  ;;  %v22342_v11 = vld [vmem:[#allocation33_spill] sm:$0xff]  ;;  %v22345_v31 = vld [vmem:[#allocation27_spill] sm:$0xff] }
 0x482   :  { %22331 = vst [vmem:[#allocation7_spill] sm:$0xff] %v17499_v7 }
 0x483   :  { %22333 = vst [vmem:[#allocation91_spill] sm:$0xff] %v17502_v14  ;;  %4557 = vmatmul.bf16.gmra.mxu1 %v11442_v51  ;;  %4686 = vmatmul.bf16.gmra.mxu2 %v11190_v40  ;;  %v22341_v40 = vld [vmem:[#allocation23_spill] sm:$0xff] }
 0x484   :  { %4815 = vmatmul.bf16.gmra.mxu3 %v10938_v21  ;;  %4984 = vmatmul.bf16.gmra.mxu0 %v10942_v27  ;;  %v1820_v46 = vpop.f32.mrf.mxu0  ;;  %v11471_v27 = vld [vmem:[%s21941_s28 + $0x5a8] sm:$0xf0]  ;;  %v1818_v42 = vadd.f32 %v1817_v47, %v22341_v40 }
 0x485   :  { %v1821_v17 = vadd.f32 %v1820_v46, %v22340_v18  ;;  %v10973_v46 = vld [vmem:[%s21941_s28 + $0x198] sm:$0xf] }
 0x486   :  { %v4647_v55 = vpop.f32.mrf.mxu2 }
 0x487   :  { %v4429_v62 = vpop.f32.mrf.mxu3  ;;  %v17505_v20 = vadd.f32 %v4647_v55, %v22334_v56  ;;  %v11221_v55 = vld [vmem:[%s21941_s28 + $0x390] sm:$0xf]  ;;  %v1951_v40 = vmax.f32 %v1821_v17, 0.0  ;;  %v22349_v17 = vld [vmem:[#allocation38_spill] sm:$0xff] }
 0x488   :  { %v17508_v37 = vadd.f32 %v4429_v62, %v22336_v4  ;;  %v4520_v36 = vpop.f32.mrf.mxu1  ;;  %v13115_v62 = vld [vmem:[%s21941_s28 + $0x3ac] sm:$0xf0]  ;;  %v13052_v4 = vld [vmem:[%s21941_s28 + $0x1b4] sm:$0xf0]  ;;  %v1806_v61 = vadd.f32 %v17358_v16, %v22349_v17 }
 0x489   :  { %22335 = vst [vmem:[#allocation92_spill] sm:$0xff] %v17505_v20  ;;  %v17511_v22 = vadd.f32 %v4520_v36, %v22338_v33  ;;  %v22343_v33 = vld [vmem:[#allocation74_spill] sm:$0xff]  ;;  %v11222_v7 = vor.u32 %v13115_v62, %v11221_v55  ;;  %v22344_v20 = vld [vmem:[#allocation31_spill] sm:$0xff]  ;;  %v10974_v23 = vor.u32 %v13052_v4, %v10973_v46  ;;  %v22352_v16 = vld [vmem:[#allocation53_spill] sm:$0xff] }
 0x48a   :  { %22337 = vst [vmem:[#allocation88_spill] sm:$0xff] %v17508_v37  ;;  %v11474_v37 = vor.u32 %v13174_v57, %v11471_v27  ;;  %v1816_v47 = vadd.f32 %v1815_v30, %v22344_v20  ;;  %v22347_v57 = vld [vmem:[#allocation46_spill] sm:$0xff]  ;;  %v11253_v46 = vld [vmem:[%s21941_s28 + $0x3d0] sm:$0xf]  ;;  %v13055_v4 = vld [vmem:[%s21941_s28 + $0x1d4] sm:$0xf] }
 0x48b   :  { %22339 = vst [vmem:[#allocation93_spill] sm:$0xff] %v17511_v22  ;;  %v10970_v22 = vor.u32 %v13047_v63, %v10967_v3  ;;  %v1811_v30 = vadd.f32 %v17416_v35, %v22347_v57  ;;  %v13060_v57 = vld [vmem:[%s21941_s28 + $0x1f4] sm:$0xf0] }
 0x48c   :  { %v1822_v51 = vpop.f32.mrf.mxu0  ;;  %v1949_v20 = vmax.f32 %v1816_v47, 0.0 }
 0x48d   :  { %v1823_v21 = vadd.f32 %v1822_v51, %v22342_v11 }
 0x48e   :  { %v4649_v56 = vpop.f32.mrf.mxu2 }
 0x48f   :  { %v4431_v36 = vpop.f32.mrf.mxu3  ;;  %v17541_v18 = vadd.f32 %v4649_v56, %v22343_v33  ;;  %v1952_v51 = vmax.f32 %v1823_v21, 0.0  ;;  %v1950_v56 = vmax.f32 %v1818_v42, 0.0  ;;  %v1945_v42 = vmax.f32 %v1806_v61, 0.0 }
 0x490   :  { %v17545_v11 = vadd.f32 %v4431_v36, %v17028_v43  ;;  %v4523_v14 = vpop.f32.mrf.mxu1  ;;  %v22348_v43 = vld [vmem:[#allocation55_spill] sm:$0xff]  ;;  %v1801_v21 = vadd.f32 %v17282_v25, %v22352_v16  ;;  %v10999_v25 = vld [vmem:[%s21941_s28 + $0x1f0] sm:$0xf0]  ;;  %v22353_v36 = vld [vmem:[#allocation52_spill] sm:$0xff] }
 0x491   :  { %v17548_v50 = vadd.f32 %v4523_v14, %v22345_v31  ;;  %v2016_v33 = vpack.c.bf16 %v1952_v51, %v1951_v40  ;;  %v1808_v27 = vadd.f32 %v17392_v13, %v22348_v43  ;;  %v1948_v14 = vmax.f32 %v1813_v1, 0.0  ;;  %v22351_v13 = vld [vmem:[#allocation45_spill] sm:$0xff] }
 0x492   :  { %v2015_v55 = vpack.c.bf16 %v1950_v56, %v1949_v20  ;;  %v1803_v1 = vadd.f32 %v17323_v45, %v22351_v13  ;;  %v13123_v45 = vld [vmem:[%s21941_s28 + $0x3ec] sm:$0xf0]  ;;  %v1798_v47 = vadd.f32 %v17247_v32, %v22353_v36  ;;  %v11002_v61 = vor.u32 %v13055_v4, %v10999_v25  ;;  %v22360_v36 = vld [vmem:[#allocation67_spill] sm:$0xff] }
 0x493   :  { %4562 = vmatmul.bf16.gmra.mxu1 %v11474_v37  ;;  %4691 = vmatmul.bf16.gmra.mxu2 %v11222_v7  ;;  %v1947_v7 = vmax.f32 %v1811_v30, 0.0  ;;  %v1946_v63 = vmax.f32 %v1808_v27, 0.0  ;;  %v11254_v27 = vor.u32 %v13123_v45, %v11253_v46 }
 0x494   :  { %4820 = vmatmul.bf16.gmra.mxu3 %v10970_v22  ;;  %5120 = vmatpush.bf16.msra.mxu1 %v2016_v33  ;;  %v1944_v40 = vmax.f32 %v1803_v1, 0.0  ;;  %v11005_v33 = vld [vmem:[%s21941_s28 + $0x1d8] sm:$0xf]  ;;  %v1942_v13 = vmax.f32 %v1798_v47, 0.0 }
 0x495   :  { %4989 = vmatmul.bf16.gmra.mxu0 %v10974_v23  ;;  %v22350_v23 = vld [vmem:[#allocation17_spill] sm:$0xff]  ;;  %v2014_v3 = vpack.c.bf16 %v1948_v14, %v1947_v7  ;;  %v2013_v56 = vpack.c.bf16 %v1946_v63, %v1945_v42  ;;  %v22354_v14 = vld [vmem:[#allocation59_spill] sm:$0xff]  ;;  %v22357_v63 = vld [vmem:[#allocation54_spill] sm:$0xff] }
 0x496   :  { %v4652_v31 = vpop.f32.mrf.mxu2  ;;  %v1796_v32 = vadd.f32 %v17205_v53, %v22354_v14  ;;  %v1791_v53 = vadd.f32 %v17130_v58, %v22357_v63  ;;  %v13068_v14 = vld [vmem:[%s21941_s28 + $0x234] sm:$0xf0] }
 0x497   :  { %v4434_v19 = vpop.f32.mrf.mxu3  ;;  %v17559_v37 = vadd.f32 %v4652_v31, %v17036_v39  ;;  %v13182_v39 = vld [vmem:[%s21941_s28 + $0x5cc] sm:$0xf]  ;;  %v1943_v31 = vmax.f32 %v1801_v21, 0.0 }
 0x498   :  { %v17562_v35 = vadd.f32 %v4434_v19, %v17061_v26  ;;  %v4525_v22 = vpop.f32.mrf.mxu1  ;;  %5121 = vmatpush.bf16.msra.mxu1 %v2015_v55  ;;  %v11503_v26 = vld [vmem:[%s21941_s28 + $0x5e8] sm:$0xf0]  ;;  %v22355_v19 = vld [vmem:[#allocation63_spill] sm:$0xff]  ;;  %v1939_v4 = vmax.f32 %v1791_v53, 0.0 }
 0x499   :  { %v17565_v62 = vadd.f32 %v4525_v22, %v22350_v23  ;;  %v11506_v43 = vor.u32 %v13182_v39, %v11503_v26  ;;  %v11006_v22 = vor.u32 %v13060_v57, %v11005_v33  ;;  %v22356_v23 = vld [vmem:[#allocation69_spill] sm:$0xff]  ;;  %v2012_v1 = vpack.c.bf16 %v1944_v40, %v1943_v31  ;;  %v22359_v26 = vld [vmem:[#allocation71_spill] sm:$0xff] }
 0x49a   :  { %v13063_v33 = vld [vmem:[%s21941_s28 + $0x214] sm:$0xf] }
 0x49b   :  { %v11031_v57 = vld [vmem:[%s21941_s28 + $0x230] sm:$0xf0] }
 0x49c   :  { %5122 = vmatpush.bf16.msra.mxu1 %v2014_v3  ;;  %v1941_v3 = vmax.f32 %v1796_v32, 0.0 }
 0x49e   :  { %v4654_v51 = vpop.f32.mrf.mxu2  ;;  %v2011_v21 = vpack.c.bf16 %v1942_v13, %v1941_v3 }
 0x49f   :  { %v4436_v30 = vpop.f32.mrf.mxu3  ;;  %v17598_v20 = vadd.f32 %v4654_v51, %v17071_v38  ;;  %v1793_v38 = vadd.f32 %v17174_v49, %v22356_v23  ;;  %v1786_v49 = vadd.f32 %v17053_v2, %v22359_v26  ;;  %v13190_v2 = vld [vmem:[%s21941_s28 + $0x60c] sm:$0xf]  ;;  %v11034_v23 = vor.u32 %v13063_v33, %v11031_v57 }
 0x4a0   :  { %v17603_v55 = vadd.f32 %v4436_v30, %v17104_v24  ;;  %v4528_v17 = vpop.f32.mrf.mxu1  ;;  %5123 = vmatpush.bf16.msra.mxu1 %v2013_v56  ;;  %v22358_v24 = vld [vmem:[#allocation66_spill] sm:$0xff]  ;;  %v13131_v56 = vld [vmem:[%s21941_s28 + $0x42c] sm:$0xf0]  ;;  %v13198_v26 = vld [vmem:[%s21941_s28 + $0x64c] sm:$0xf] }
 0x4a1   :  { %v17606_v7 = vadd.f32 %v4528_v17, %v22355_v19  ;;  %v1788_v42 = vadd.f32 %v17096_v34, %v22358_v24  ;;  %v1940_v39 = vmax.f32 %v1793_v38, 0.0  ;;  %v1937_v51 = vmax.f32 %v1786_v49, 0.0  ;;  %v22361_v38 = vld [vmem:[#allocation109_spill] sm:$0xff]  ;;  %v11567_v49 = vld [vmem:[%s21941_s28 + $0x668] sm:$0xf0] }
 0x4a2   :  { %v22363_v57 = vld [vmem:[#allocation112_spill] sm:$0xff] }
 0x4a3   :  { %4567 = vmatmul.bf16.gmra.mxu1 %v11506_v43  ;;  %4696 = vmatmul.bf16.gmra.mxu2 %v11254_v27  ;;  %v1938_v34 = vmax.f32 %v1788_v42, 0.0  ;;  %v2010_v40 = vpack.c.bf16 %v1940_v39, %v1939_v4  ;;  %v11037_v27 = vld [vmem:[%s21941_s28 + $0x218] sm:$0xf]  ;;  %v11063_v4 = vld [vmem:[%s21941_s28 + $0x270] sm:$0xf0] }
 0x4a4   :  { %4825 = vmatmul.bf16.gmra.mxu3 %v11002_v61  ;;  %5124 = vmatpush.bf16.msra.mxu1 %v2012_v1  ;;  %v11038_v1 = vor.u32 %v13068_v14, %v11037_v27  ;;  %v22362_v42 = vld [vmem:[#allocation110_spill] sm:$0xff] }
 0x4a5   :  { %4994 = vmatmul.bf16.gmra.mxu0 %v11006_v22  ;;  %v2009_v43 = vpack.c.bf16 %v1938_v34, %v1937_v51  ;;  %v13076_v34 = vld [vmem:[%s21941_s28 + $0x274] sm:$0xf0] }
 0x4a6   :  { %v4657_v16 = vpop.f32.mrf.mxu2 }
 0x4a7   :  { %v4439_v46 = vpop.f32.mrf.mxu3  ;;  %v17617_v45 = vadd.f32 %v4657_v16, %v17112_v15  ;;  %v11535_v15 = vld [vmem:[%s21941_s28 + $0x628] sm:$0xf0] }
 0x4a8   :  { %v17620_v58 = vadd.f32 %v4439_v46, %v17132_v44  ;;  %v4530_v25 = vpop.f32.mrf.mxu1  ;;  %5125 = vmatpush.bf16.msra.mxu1 %v2011_v21  ;;  %v11285_v44 = vld [vmem:[%s21941_s28 + $0x410] sm:$0xf]  ;;  %v11538_v17 = vor.u32 %v13190_v2, %v11535_v15  ;;  %v13071_v46 = vld [vmem:[%s21941_s28 + $0x254] sm:$0xf]  ;;  %v11570_v2 = vor.u32 %v13198_v26, %v11567_v49 }
 0x4a9   :  { %v17623_v47 = vadd.f32 %v4530_v25, %v22360_v36  ;;  %v11286_v61 = vor.u32 %v13131_v56, %v11285_v44  ;;  %v11069_v36 = vld [vmem:[%s21941_s28 + $0x258] sm:$0xf]  ;;  %v11066_v33 = vor.u32 %v13071_v46, %v11063_v4 }
 0x4ac   :  { %5126 = vmatpush.bf16.msra.mxu1 %v2010_v40 }
 0x4ae   :  { %v4659_v30 = vpop.f32.mrf.mxu2 }
 0x4af   :  { %v4441_v32 = vpop.f32.mrf.mxu3  ;;  %v17650_v31 = vadd.f32 %v4659_v30, %v17139_v10 }
 0x4b0   :  { %v17653_v19 = vadd.f32 %v4441_v32, %v17185_v29  ;;  %v4533_v22 = vpop.f32.mrf.mxu1  ;;  %5127 = vmatpush.bf16.msra.mxu1 %v2009_v43  ;;  %v11070_v43 = vor.u32 %v13076_v34, %v11069_v36  ;;  %v22365_v36 = vld [vmem:[#allocation114_spill] sm:$0xff] }
 0x4b1   :  { %v17656_v13 = vadd.f32 %v4533_v22, %v22361_v38  ;;  %v4960_v63 = vpop.f32.mrf.mxu0  ;;  %v22364_v22 = vld [vmem:[#allocation5_spill] sm:$0xff] }
 0x4b3   :  { %4572 = vmatmul.bf16.gmra.mxu1 %v11538_v17  ;;  %4701 = vmatmul.bf16.gmra.mxu2 %v11286_v61 }
 0x4b4   :  { %4830 = vmatmul.bf16.gmra.mxu3 %v11034_v23 }
 0x4b5   :  { %4999 = vmatmul.bf16.gmra.mxu0 %v11038_v1 }
 0x4b6   :  { %v4662_v53 = vpop.f32.mrf.mxu2 }
 0x4b7   :  { %v17659_v10 = vadd.f32 %v4662_v53, %v17192_v28  ;;  %v4791_v3 = vpop.f32.mrf.mxu3  ;;  %v11317_v28 = vld [vmem:[%s21941_s28 + $0x450] sm:$0xf]  ;;  %v11599_v53 = vld [vmem:[%s21941_s28 + $0x6a8] sm:$0xf0] }
 0x4b8   :  { %v4792_v29 = vadd.f32 %v4791_v3, %v17212_v54  ;;  %v4535_v24 = vpop.f32.mrf.mxu1  ;;  %v13139_v54 = vld [vmem:[%s21941_s28 + $0x46c] sm:$0xf0]  ;;  %v13079_v3 = vld [vmem:[%s21941_s28 + $0x294] sm:$0xf] }
 0x4b9   :  { %v17663_v39 = vadd.f32 %v4535_v24, %v22362_v42  ;;  %v4962_v21 = vpop.f32.mrf.mxu0  ;;  %v11318_v15 = vor.u32 %v13139_v54, %v11317_v28  ;;  %v11101_v42 = vld [vmem:[%s21941_s28 + $0x298] sm:$0xf] }
 0x4ba   :  { %v17665_v16 = vadd.f32 %v4960_v63, %v4792_v29  ;;  %v13206_v63 = vld [vmem:[%s21941_s28 + $0x68c] sm:$0xf]  ;;  %v11095_v29 = vld [vmem:[%s21941_s28 + $0x2b0] sm:$0xf0] }
 0x4bb   :  { %v11602_v28 = vor.u32 %v13206_v63, %v11599_v53  ;;  %v11133_v63 = vld [vmem:[%s21941_s28 + $0x2d8] sm:$0xf] }
 0x4bc   :  { %v13092_v53 = vld [vmem:[%s21941_s28 + $0x2f4] sm:$0xf0] }
 0x4be   :  { %v4664_v25 = vpop.f32.mrf.mxu2 }
 0x4bf   :  { %v17692_v40 = vadd.f32 %v4664_v25, %v17221_v6  ;;  %v4793_v51 = vpop.f32.mrf.mxu3  ;;  %v11098_v25 = vor.u32 %v13079_v3, %v11095_v29 }
 0x4c0   :  { %v4794_v44 = vadd.f32 %v4793_v51, %v17261_v8  ;;  %v4538_v56 = vpop.f32.mrf.mxu1 }
 0x4c1   :  { %v17696_v30 = vadd.f32 %v4538_v56, %v22363_v57  ;;  %v4965_v14 = vpop.f32.mrf.mxu0  ;;  %v22366_v57 = vld [vmem:[#allocation117_spill] sm:$0xff] }
 0x4c2   :  { %v17698_v27 = vadd.f32 %v4962_v21, %v4794_v44  ;;  %v13084_v21 = vld [vmem:[%s21941_s28 + $0x2b4] sm:$0xf0] }
 0x4c3   :  { %4577 = vmatmul.bf16.gmra.mxu1 %v11570_v2  ;;  %4706 = vmatmul.bf16.gmra.mxu2 %v11318_v15  ;;  %v11102_v51 = vor.u32 %v13084_v21, %v11101_v42 }
 0x4c4   :  { %4835 = vmatmul.bf16.gmra.mxu3 %v11066_v33 }
 0x4c5   :  { %5004 = vmatmul.bf16.gmra.mxu0 %v11070_v43 }
 0x4c6   :  { %v4667_v6 = vpop.f32.mrf.mxu2 }
 0x4c7   :  { %v17701_v32 = vadd.f32 %v4667_v6, %v17271_v60  ;;  %v4796_v17 = vpop.f32.mrf.mxu3  ;;  %v11349_v60 = vld [vmem:[%s21941_s28 + $0x490] sm:$0xf] }
 0x4c8   :  { %v4797_v8 = vadd.f32 %v4796_v17, %v17285_v9  ;;  %v4540_v61 = vpop.f32.mrf.mxu1  ;;  %v13147_v9 = vld [vmem:[%s21941_s28 + $0x4ac] sm:$0xf0]  ;;  %v13214_v17 = vld [vmem:[%s21941_s28 + $0x6cc] sm:$0xf] }
 0x4c9   :  { %v17705_v23 = vadd.f32 %v4540_v61, %v22364_v22  ;;  %v4967_v1 = vpop.f32.mrf.mxu0  ;;  %v11350_v54 = vor.u32 %v13147_v9, %v11349_v60  ;;  %v13087_v61 = vld [vmem:[%s21941_s28 + $0x2d4] sm:$0xf] }
 0x4ca   :  { %v17707_v38 = vadd.f32 %v4965_v14, %v4797_v8  ;;  %v11631_v8 = vld [vmem:[%s21941_s28 + $0x6e8] sm:$0xf0]  ;;  %v11127_v22 = vld [vmem:[%s21941_s28 + $0x2f0] sm:$0xf0] }
 0x4cb   :  { %v11634_v3 = vor.u32 %v13214_v17, %v11631_v8  ;;  %v11130_v21 = vor.u32 %v13087_v61, %v11127_v22  ;;  %v13163_v17 = vld [vmem:[%s21941_s28 + $0x52c] sm:$0xf0]  ;;  %v13095_v8 = vld [vmem:[%s21941_s28 + $0x314] sm:$0xf]  ;;  %v11165_v61 = vld [vmem:[%s21941_s28 + $0x318] sm:$0xf] }
 0x4cc   :  { %v13100_v22 = vld [vmem:[%s21941_s28 + $0x334] sm:$0xf0] }
 0x4ce   :  { %v4669_v24 = vpop.f32.mrf.mxu2 }
 0x4cf   :  { %v17734_v26 = vadd.f32 %v4669_v24, %v17293_v59  ;;  %v4798_v49 = vpop.f32.mrf.mxu3 }
 0x4d0   :  { %v4799_v46 = vadd.f32 %v4798_v49, %v17335_v41  ;;  %v4543_v4 = vpop.f32.mrf.mxu1  ;;  %v22367_v49 = vld [vmem:[#allocation41_spill] sm:$0xff] }
 0x4d1   :  { %v17738_v34 = vadd.f32 %v4543_v4, %v22365_v36  ;;  %v4970_v15 = vpop.f32.mrf.mxu0 }
 0x4d2   :  { %v17740_v2 = vadd.f32 %v4967_v1, %v4799_v46 }
 0x4d3   :  { %4582 = vmatmul.bf16.gmra.mxu1 %v11602_v28  ;;  %4711 = vmatmul.bf16.gmra.mxu2 %v11350_v54  ;;  %v11134_v54 = vor.u32 %v13092_v53, %v11133_v63 }
 0x4d4   :  { %4840 = vmatmul.bf16.gmra.mxu3 %v11098_v25 }
 0x4d5   :  { %5009 = vmatmul.bf16.gmra.mxu0 %v11102_v51  ;;  %v22368_v51 = vld [vmem:[#allocation32_spill] sm:$0xff] }
 0x4d6   :  { %v4672_v59 = vpop.f32.mrf.mxu2 }
 0x4d7   :  { %v17743_v44 = vadd.f32 %v4672_v59, %v17341_v0  ;;  %v4801_v56 = vpop.f32.mrf.mxu3  ;;  %v11381_v0 = vld [vmem:[%s21941_s28 + $0x4d0] sm:$0xf]  ;;  %v22369_v59 = vld [vmem:[#allocation50_spill] sm:$0xff] }
 0x4d8   :  { %v4802_v41 = vadd.f32 %v4801_v56, %v17361_v52  ;;  %v4545_v33 = vpop.f32.mrf.mxu1  ;;  %v13155_v52 = vld [vmem:[%s21941_s28 + $0x4ec] sm:$0xf0] }
 0x4d9   :  { %v17747_v43 = vadd.f32 %v4545_v33, %v22366_v57  ;;  %v4972_v6 = vpop.f32.mrf.mxu0  ;;  %v11382_v29 = vor.u32 %v13155_v52, %v11381_v0  ;;  %v13222_v57 = vld [vmem:[%s21941_s28 + $0x70c] sm:$0xf]  ;;  %v11159_v0 = vld [vmem:[%s21941_s28 + $0x330] sm:$0xf0] }
 0x4da   :  { %v17749_v14 = vadd.f32 %v4970_v15, %v4802_v41 }
 0x4de   :  { %v4674_v1 = vpop.f32.mrf.mxu2 }
 0x4df   :  { %v17776_v60 = vadd.f32 %v4674_v1, %v17367_v48  ;;  %v4803_v9 = vpop.f32.mrf.mxu3  ;;  %v22371_v1 = vld [vmem:[#allocation97_spill] sm:$0xff] }
 0x4e0   :  { %v4804_v24 = vadd.f32 %v4803_v9, %v17408_v12  ;;  %v4548_v42 = vpop.f32.mrf.mxu1 }
 0x4e1   :  { %v17780_v28 = vadd.f32 %v4548_v42, %v22367_v49  ;;  %v4975_v4 = vpop.f32.mrf.mxu0  ;;  %v22373_v49 = vld [vmem:[#allocation82_spill] sm:$0xff] }
 0x4e2   :  { %v17782_v46 = vadd.f32 %v4972_v6, %v4804_v24  ;;  %v11663_v6 = vld [vmem:[%s21941_s28 + $0x728] sm:$0xf0] }
 0x4e3   :  { %4587 = vmatmul.bf16.gmra.mxu1 %v11634_v3  ;;  %4716 = vmatmul.bf16.gmra.mxu2 %v11382_v29  ;;  %v11666_v9 = vor.u32 %v13222_v57, %v11663_v6  ;;  %v22372_v29 = vld [vmem:[#allocation135_spill] sm:$0xff]  ;;  %v22376_v57 = vld [vmem:[#allocation137_spill] sm:$0xff] }
 0x4e4   :  { %4845 = vmatmul.bf16.gmra.mxu3 %v11130_v21  ;;  %v11162_v21 = vor.u32 %v13095_v8, %v11159_v0 }
 0x4e5   :  { %5014 = vmatmul.bf16.gmra.mxu0 %v11134_v54 }
 0x4e6   :  { %v4677_v48 = vpop.f32.mrf.mxu2 }
 0x4e7   :  { %v17785_v25 = vadd.f32 %v4677_v48, %v17414_v5  ;;  %v4806_v36 = vpop.f32.mrf.mxu3  ;;  %v11413_v5 = vld [vmem:[%s21941_s28 + $0x510] sm:$0xf] }
 0x4e8   :  { %v4807_v12 = vadd.f32 %v4806_v36, %v22368_v51  ;;  %v4550_v15 = vpop.f32.mrf.mxu1  ;;  %v11414_v3 = vor.u32 %v13163_v17, %v11413_v5  ;;  %v22377_v17 = vld [vmem:[#allocation102_spill] sm:$0xff] }
 0x4e9   :  { %v17789_v56 = vadd.f32 %v4550_v15, %v22369_v59  ;;  %v4977_v33 = vpop.f32.mrf.mxu0 }
 0x4ea   :  { %v17791_v41 = vadd.f32 %v4975_v4, %v4807_v12  ;;  %v11166_v4 = vor.u32 %v13100_v22, %v11165_v61  ;;  %v22375_v12 = vld [vmem:[#allocation81_spill] sm:$0xff]  ;;  %v11695_v61 = vld [vmem:[%s21941_s28 + $0x768] sm:$0xf0] }
 0x4eb   :  { %v11445_v22 = vld [vmem:[%s21941_s28 + $0x550] sm:$0xf] }
 0x4ec   :  { %22370 = vst [vmem:[#allocation15_spill] sm:$0xff] %v17791_v41 }
 0x4ee   :  { %v4679_v52 = vpop.f32.mrf.mxu2 }
 0x4ef   :  { %v17818_v63 = vadd.f32 %v4679_v52, %v22371_v1  ;;  %v4808_v53 = vpop.f32.mrf.mxu3  ;;  %v13230_v52 = vld [vmem:[%s21941_s28 + $0x74c] sm:$0xf]  ;;  %v13171_v1 = vld [vmem:[%s21941_s28 + $0x56c] sm:$0xf0] }
 0x4f0   :  { %v4809_v24 = vadd.f32 %v4808_v53, %v22372_v29  ;;  %v4553_v42 = vpop.f32.mrf.mxu1  ;;  %v13103_v53 = vld [vmem:[%s21941_s28 + $0x354] sm:$0xf]  ;;  %v11197_v29 = vld [vmem:[%s21941_s28 + $0x358] sm:$0xf] }
 0x4f1   :  { %v17822_v54 = vadd.f32 %v4553_v42, %v22373_v49  ;;  %v4980_v36 = vpop.f32.mrf.mxu0  ;;  %v22380_v42 = vld [vmem:[#allocation89_spill] sm:$0xff] }
 0x4f2   :  { %v17824_v48 = vadd.f32 %v4977_v33, %v4809_v24  ;;  %v13108_v24 = vld [vmem:[%s21941_s28 + $0x374] sm:$0xf0] }
 0x4f3   :  { %4592 = vmatmul.bf16.gmra.mxu1 %v11666_v9  ;;  %4721 = vmatmul.bf16.gmra.mxu2 %v11414_v3  ;;  %v11191_v9 = vld [vmem:[%s21941_s28 + $0x370] sm:$0xf0] }
 0x4f4   :  { %22374 = vst [vmem:[#allocation23_spill] sm:$0xff] %v17824_v48  ;;  %4850 = vmatmul.bf16.gmra.mxu3 %v11162_v21 }
 0x4f5   :  { %5019 = vmatmul.bf16.gmra.mxu0 %v11166_v4  ;;  %v11698_v4 = vor.u32 %v13230_v52, %v11695_v61  ;;  %v22385_v61 = vld [vmem:[#allocation92_spill] sm:$0xff] }
 0x4f6   :  { %v4682_v51 = vpop.f32.mrf.mxu2 }
 0x4f7   :  { %v17827_v15 = vadd.f32 %v4682_v51, %v22375_v12  ;;  %v4811_v59 = vpop.f32.mrf.mxu3  ;;  %v22381_v51 = vld [vmem:[#allocation98_spill] sm:$0xff] }
 0x4f8   :  { %v4812_v6 = vadd.f32 %v4811_v59, %v22376_v57  ;;  %v4555_v5 = vpop.f32.mrf.mxu1  ;;  %v11194_v57 = vor.u32 %v13103_v53, %v11191_v9  ;;  %v22386_v53 = vld [vmem:[#allocation76_spill] sm:$0xff] }
 0x4f9   :  { %v17831_v8 = vadd.f32 %v4555_v5, %v22377_v17  ;;  %v4982_v33 = vpop.f32.mrf.mxu0  ;;  %v11198_v17 = vor.u32 %v13108_v24, %v11197_v29  ;;  %v13238_v29 = vld [vmem:[%s21941_s28 + $0x78c] sm:$0xf] }
 0x4fa   :  { %v17833_v0 = vadd.f32 %v4980_v36, %v4812_v6  ;;  %v11446_v36 = vor.u32 %v13171_v1, %v11445_v22  ;;  %v22382_v6 = vld [vmem:[#allocation83_spill] sm:$0xff]  ;;  %v11727_v24 = vld [vmem:[%s21941_s28 + $0x7a8] sm:$0xf0] }
 0x4fb   :  { %22378 = vst [vmem:[#allocation33_spill] sm:$0xff] %v17831_v8 }
 0x4fc   :  { %22379 = vst [vmem:[#allocation74_spill] sm:$0xff] %v17833_v0 }
 0x4fe   :  { %v4684_v3 = vpop.f32.mrf.mxu2 }
 0x4ff   :  { %v17860_v21 = vadd.f32 %v4684_v3, %v22380_v42  ;;  %v4813_v49 = vpop.f32.mrf.mxu3  ;;  %v22384_v42 = vld [vmem:[#allocation91_spill] sm:$0xff] }
 0x500   :  { %v4814_v12 = vadd.f32 %v4813_v49, %v22381_v51  ;;  %v4558_v59 = vpop.f32.mrf.mxu1  ;;  %v11223_v51 = vld [vmem:[%s21941_s28 + $0x3b0] sm:$0xf0] }
 0x501   :  { %v17864_v5 = vadd.f32 %v4558_v59, %v22382_v6  ;;  %v4985_v0 = vpop.f32.mrf.mxu0  ;;  %v11229_v59 = vld [vmem:[%s21941_s28 + $0x398] sm:$0xf] }
 0x502   :  { %v17866_v8 = vadd.f32 %v4982_v33, %v4814_v12  ;;  %v22389_v6 = vld [vmem:[#allocation93_spill] sm:$0xff] }
 0x503   :  { %4597 = vmatmul.bf16.gmra.mxu1 %v11698_v4  ;;  %4726 = vmatmul.bf16.gmra.mxu2 %v11446_v36  ;;  %v11477_v4 = vld [vmem:[%s21941_s28 + $0x590] sm:$0xf] }
 0x504   :  { %22383 = vst [vmem:[#allocation31_spill] sm:$0xff] %v17866_v8  ;;  %4855 = vmatmul.bf16.gmra.mxu3 %v11194_v57  ;;  %v13179_v36 = vld [vmem:[%s21941_s28 + $0x5ac] sm:$0xf0]  ;;  %v13116_v57 = vld [vmem:[%s21941_s28 + $0x3b4] sm:$0xf0] }
 0x505   :  { %5024 = vmatmul.bf16.gmra.mxu0 %v11198_v17 }
 0x506   :  { %v4687_v3 = vpop.f32.mrf.mxu2 }
 0x507   :  { %v17869_v48 = vadd.f32 %v4687_v3, %v22384_v42  ;;  %v4816_v52 = vpop.f32.mrf.mxu3  ;;  %v11730_v42 = vor.u32 %v13238_v29, %v11727_v24 }
 0x508   :  { %v4817_v22 = vadd.f32 %v4816_v52, %v22385_v61  ;;  %v4560_v1 = vpop.f32.mrf.mxu1  ;;  %v11478_v52 = vor.u32 %v13179_v36, %v11477_v4  ;;  %v22391_v4 = vld [vmem:[#allocation44_spill] sm:$0xff] }
 0x509   :  { %v17873_v9 = vadd.f32 %v4560_v1, %v22386_v53  ;;  %v4987_v33 = vpop.f32.mrf.mxu0  ;;  %v22390_v53 = vld [vmem:[#allocation36_spill] sm:$0xff] }
 0x50a   :  { %v17875_v49 = vadd.f32 %v4985_v0, %v4817_v22  ;;  %v13111_v0 = vld [vmem:[%s21941_s28 + $0x394] sm:$0xf] }
 0x50b   :  { %22387 = vst [vmem:[#allocation27_spill] sm:$0xff] %v17873_v9  ;;  %v11226_v1 = vor.u32 %v13111_v0, %v11223_v51  ;;  %v13246_v51 = vld [vmem:[%s21941_s28 + $0x7cc] sm:$0xf] }
 0x50c   :  { %22388 = vst [vmem:[#allocation40_spill] sm:$0xff] %v17875_v49  ;;  %v11230_v49 = vor.u32 %v13116_v57, %v11229_v59  ;;  %v11255_v59 = vld [vmem:[%s21941_s28 + $0x3f0] sm:$0xf0] }
 0x50e   :  { %v4689_v12 = vpop.f32.mrf.mxu2 }
 0x50f   :  { %v17902_v17 = vadd.f32 %v4689_v12, %v22389_v6  ;;  %v4818_v3 = vpop.f32.mrf.mxu3 }
 0x510   :  { %v4819_v61 = vadd.f32 %v4818_v3, %v17541_v18  ;;  %v4563_v22 = vpop.f32.mrf.mxu1  ;;  %v11261_v3 = vld [vmem:[%s21941_s28 + $0x3d8] sm:$0xf] }
 0x511   :  { %v17906_v9 = vadd.f32 %v4563_v22, %v22390_v53 }
 0x512   :  { %v17908_v8 = vadd.f32 %v4987_v33, %v4819_v61  ;;  %v4990_v41 = vpop.f32.mrf.mxu0 }
 0x513   :  { %4602 = vmatmul.bf16.gmra.mxu1 %v11730_v42  ;;  %4731 = vmatmul.bf16.gmra.mxu2 %v11478_v52  ;;  %v13124_v42 = vld [vmem:[%s21941_s28 + $0x3f4] sm:$0xf0] }
 0x514   :  { %4860 = vmatmul.bf16.gmra.mxu3 %v11226_v1 }
 0x515   :  { %5029 = vmatmul.bf16.gmra.mxu0 %v11230_v49  ;;  %v11759_v49 = vld [vmem:[%s21941_s28 + $0x7e8] sm:$0xf0] }
 0x516   :  { %v4692_v12 = vpop.f32.mrf.mxu2  ;;  %v11762_v22 = vor.u32 %v13246_v51, %v11759_v49 }
 0x517   :  { %v17911_v6 = vadd.f32 %v4692_v12, %v17548_v50  ;;  %v4821_v29 = vpop.f32.mrf.mxu3  ;;  %v11509_v50 = vld [vmem:[%s21941_s28 + $0x5d0] sm:$0xf] }
 0x518   :  { %v4822_v18 = vadd.f32 %v4821_v29, %v17559_v37  ;;  %v4565_v24 = vpop.f32.mrf.mxu1  ;;  %v13187_v37 = vld [vmem:[%s21941_s28 + $0x5ec] sm:$0xf0] }
 0x519   :  { %v17915_v36 = vadd.f32 %v4565_v24, %v22391_v4  ;;  %v11510_v1 = vor.u32 %v13187_v37, %v11509_v50  ;;  %v11262_v4 = vor.u32 %v13124_v42, %v11261_v3  ;;  %v22395_v50 = vld [vmem:[#allocation20_spill] sm:$0xff]  ;;  %v11287_v42 = vld [vmem:[%s21941_s28 + $0x430] sm:$0xf0] }
 0x51a   :  { %v17917_v0 = vadd.f32 %v4990_v41, %v4822_v18  ;;  %v4992_v33 = vpop.f32.mrf.mxu0  ;;  %v13119_v41 = vld [vmem:[%s21941_s28 + $0x3d4] sm:$0xf]  ;;  %v22394_v18 = vld [vmem:[#allocation43_spill] sm:$0xff]  ;;  %v13195_v3 = vld [vmem:[%s21941_s28 + $0x62c] sm:$0xf0] }
 0x51b   :  { %22392 = vst [vmem:[#allocation46_spill] sm:$0xff] %v17915_v36  ;;  %v11258_v29 = vor.u32 %v13119_v41, %v11255_v59  ;;  %v11541_v59 = vld [vmem:[%s21941_s28 + $0x610] sm:$0xf] }
 0x51c   :  { %22393 = vst [vmem:[#allocation55_spill] sm:$0xff] %v17917_v0 }
 0x51e   :  { %v4694_v57 = vpop.f32.mrf.mxu2 }
 0x51f   :  { %v17944_v52 = vadd.f32 %v4694_v57, %v17565_v62  ;;  %v4823_v61 = vpop.f32.mrf.mxu3 }
 0x520   :  { %v4824_v53 = vadd.f32 %v4823_v61, %v17598_v20  ;;  %v4568_v12 = vpop.f32.mrf.mxu1 }
 0x521   :  { %v17948_v24 = vadd.f32 %v4568_v12, %v22394_v18 }
 0x522   :  { %v17950_v36 = vadd.f32 %v4992_v33, %v4824_v53  ;;  %v4995_v0 = vpop.f32.mrf.mxu0 }
 0x523   :  { %4607 = vmatmul.bf16.gmra.mxu1 %v11762_v22  ;;  %4736 = vmatmul.bf16.gmra.mxu2 %v11510_v1  ;;  %v11293_v22 = vld [vmem:[%s21941_s28 + $0x418] sm:$0xf] }
 0x524   :  { %4865 = vmatmul.bf16.gmra.mxu3 %v11258_v29  ;;  %v13132_v1 = vld [vmem:[%s21941_s28 + $0x434] sm:$0xf0]  ;;  %v11542_v29 = vor.u32 %v13195_v3, %v11541_v59 }
 0x525   :  { %5034 = vmatmul.bf16.gmra.mxu0 %v11262_v4 }
 0x526   :  { %v4697_v62 = vpop.f32.mrf.mxu2 }
 0x527   :  { %v17953_v57 = vadd.f32 %v4697_v62, %v17606_v7  ;;  %v4826_v51 = vpop.f32.mrf.mxu3  ;;  %v13000_v7 = vld [vmem:[%s21941_s28 + $0x1c] sm:$0xf] }
 0x528   :  { %v4827_v20 = vadd.f32 %v4826_v51, %v17617_v45  ;;  %v4570_v49 = vpop.f32.mrf.mxu1  ;;  %v10783_v45 = vld [vmem:[%s21941_s28 + $0x38] sm:$0xf0] }
 0x529   :  { %v17957_v37 = vadd.f32 %v4570_v49, %v22395_v50  ;;  %v10786_v18 = vor.u32 %v13000_v7, %v10783_v45  ;;  %v11294_v50 = vor.u32 %v13132_v1, %v11293_v22  ;;  %v22399_v7 = vld [vmem:[#allocation123_spill] sm:$0xff]  ;;  %v13203_v22 = vld [vmem:[%s21941_s28 + $0x66c] sm:$0xf0]  ;;  %v11319_v1 = vld [vmem:[%s21941_s28 + $0x470] sm:$0xf0] }
 0x52a   :  { %v17959_v41 = vadd.f32 %v4995_v0, %v4827_v20  ;;  %v4997_v33 = vpop.f32.mrf.mxu0  ;;  %v13127_v0 = vld [vmem:[%s21941_s28 + $0x414] sm:$0xf] }
 0x52b   :  { %22396 = vst [vmem:[#allocation38_spill] sm:$0xff] %v17957_v37  ;;  %v11290_v51 = vor.u32 %v13127_v0, %v11287_v42  ;;  %v22398_v20 = vld [vmem:[#allocation121_spill] sm:$0xff] }
 0x52c   :  { %22397 = vst [vmem:[#allocation17_spill] sm:$0xff] %v17959_v41  ;;  %v11573_v42 = vld [vmem:[%s21941_s28 + $0x650] sm:$0xf] }
 0x52e   :  { %v4699_v61 = vpop.f32.mrf.mxu2 }
 0x52f   :  { %v17986_v53 = vadd.f32 %v4699_v61, %v17623_v47  ;;  %v4828_v12 = vpop.f32.mrf.mxu3 }
 0x530   :  { %v4829_v4 = vadd.f32 %v4828_v12, %v17650_v31  ;;  %v4573_v62 = vpop.f32.mrf.mxu1 }
 0x531   :  { %v17990_v49 = vadd.f32 %v4573_v62, %v22398_v20 }
 0x532   :  { %v17992_v37 = vadd.f32 %v4997_v33, %v4829_v4  ;;  %v5000_v41 = vpop.f32.mrf.mxu0 }
 0x533   :  { %4741 = vmatmul.bf16.gmra.mxu2 %v11542_v29  ;;  %5128 = vmatmul.bf16.vlgmr.msra.gmra.mxu1 %v10786_v18  ;;  %v11325_v29 = vld [vmem:[%s21941_s28 + $0x458] sm:$0xf] }
 0x534   :  { %4870 = vmatmul.bf16.gmra.mxu3 %v11290_v51  ;;  %v13140_v18 = vld [vmem:[%s21941_s28 + $0x474] sm:$0xf0]  ;;  %v11574_v51 = vor.u32 %v13203_v22, %v11573_v42 }
 0x535   :  { %5039 = vmatmul.bf16.gmra.mxu0 %v11294_v50 }
 0x536   :  { %v4702_v47 = vpop.f32.mrf.mxu2 }
 0x537   :  { %v17995_v61 = vadd.f32 %v4702_v47, %v17656_v13  ;;  %v4831_v59 = vpop.f32.mrf.mxu3  ;;  %v13008_v13 = vld [vmem:[%s21941_s28 + $0x5c] sm:$0xf] }
 0x538   :  { %v4832_v31 = vadd.f32 %v4831_v59, %v17659_v10  ;;  %v4575_v3 = vpop.f32.mrf.mxu1  ;;  %v10815_v10 = vld [vmem:[%s21941_s28 + $0x78] sm:$0xf0] }
 0x539   :  { %v17999_v45 = vadd.f32 %v4575_v3, %v22399_v7  ;;  %v10818_v20 = vor.u32 %v13008_v13, %v10815_v10  ;;  %v11326_v7 = vor.u32 %v13140_v18, %v11325_v29  ;;  %v22403_v13 = vld [vmem:[#allocation127_spill] sm:$0xff]  ;;  %v13211_v29 = vld [vmem:[%s21941_s28 + $0x6ac] sm:$0xf0]  ;;  %v11351_v18 = vld [vmem:[%s21941_s28 + $0x4b0] sm:$0xf0] }
 0x53a   :  { %v18001_v0 = vadd.f32 %v5000_v41, %v4832_v31  ;;  %v5002_v33 = vpop.f32.mrf.mxu0  ;;  %v13135_v41 = vld [vmem:[%s21941_s28 + $0x454] sm:$0xf]  ;;  %v22402_v31 = vld [vmem:[#allocation22_spill] sm:$0xff] }
 0x53b   :  { %22400 = vst [vmem:[#allocation45_spill] sm:$0xff] %v17999_v45  ;;  %v11322_v59 = vor.u32 %v13135_v41, %v11319_v1  ;;  %v11605_v1 = vld [vmem:[%s21941_s28 + $0x690] sm:$0xf] }
 0x53c   :  { %22401 = vst [vmem:[#allocation53_spill] sm:$0xff] %v18001_v0 }
 0x53e   :  { %v4704_v12 = vpop.f32.mrf.mxu2 }
 0x53f   :  { %v18028_v4 = vadd.f32 %v4704_v12, %v17663_v39  ;;  %v4833_v62 = vpop.f32.mrf.mxu3 }
 0x540   :  { %v4834_v50 = vadd.f32 %v4833_v62, %v17692_v40  ;;  %v4578_v47 = vpop.f32.mrf.mxu1 }
 0x541   :  { %v18032_v3 = vadd.f32 %v4578_v47, %v22402_v31 }
 0x542   :  { %v18034_v45 = vadd.f32 %v5002_v33, %v4834_v50  ;;  %v5005_v0 = vpop.f32.mrf.mxu0 }
 0x543   :  { %4746 = vmatmul.bf16.gmra.mxu2 %v11574_v51  ;;  %5133 = vmatmul.bf16.gmra.mxu1 %v10818_v20  ;;  %v11357_v51 = vld [vmem:[%s21941_s28 + $0x498] sm:$0xf] }
 0x544   :  { %4875 = vmatmul.bf16.gmra.mxu3 %v11322_v59  ;;  %v13148_v20 = vld [vmem:[%s21941_s28 + $0x4b4] sm:$0xf0]  ;;  %v11606_v59 = vor.u32 %v13211_v29, %v11605_v1 }
 0x545   :  { %5044 = vmatmul.bf16.gmra.mxu0 %v11326_v7 }
 0x546   :  { %v4707_v39 = vpop.f32.mrf.mxu2 }
 0x547   :  { %v18037_v12 = vadd.f32 %v4707_v39, %v17696_v30  ;;  %v4836_v42 = vpop.f32.mrf.mxu3  ;;  %v13016_v30 = vld [vmem:[%s21941_s28 + $0x9c] sm:$0xf] }
 0x548   :  { %v4837_v40 = vadd.f32 %v4836_v42, %v17701_v32  ;;  %v4580_v22 = vpop.f32.mrf.mxu1  ;;  %v10847_v32 = vld [vmem:[%s21941_s28 + $0xb8] sm:$0xf0] }
 0x549   :  { %v18041_v10 = vadd.f32 %v4580_v22, %v22403_v13  ;;  %v10850_v31 = vor.u32 %v13016_v30, %v10847_v32  ;;  %v11358_v13 = vor.u32 %v13148_v20, %v11357_v51  ;;  %v22407_v30 = vld [vmem:[#allocation133_spill] sm:$0xff] }
 0x54a   :  { %v18043_v41 = vadd.f32 %v5005_v0, %v4837_v40  ;;  %v5007_v33 = vpop.f32.mrf.mxu0  ;;  %v13143_v0 = vld [vmem:[%s21941_s28 + $0x494] sm:$0xf]  ;;  %v22406_v40 = vld [vmem:[#allocation130_spill] sm:$0xff]  ;;  %v13219_v51 = vld [vmem:[%s21941_s28 + $0x6ec] sm:$0xf0] }
 0x54b   :  { %22404 = vst [vmem:[#allocation52_spill] sm:$0xff] %v18041_v10  ;;  %v11354_v42 = vor.u32 %v13143_v0, %v11351_v18  ;;  %v11637_v18 = vld [vmem:[%s21941_s28 + $0x6d0] sm:$0xf]  ;;  %v11383_v20 = vld [vmem:[%s21941_s28 + $0x4f0] sm:$0xf0] }
 0x54c   :  { %22405 = vst [vmem:[#allocation59_spill] sm:$0xff] %v18043_v41 }
 0x54e   :  { %v4709_v62 = vpop.f32.mrf.mxu2 }
 0x54f   :  { %v18070_v50 = vadd.f32 %v4709_v62, %v17705_v23  ;;  %v4838_v47 = vpop.f32.mrf.mxu3 }
 0x550   :  { %v4839_v7 = vadd.f32 %v4838_v47, %v17734_v26  ;;  %v4583_v39 = vpop.f32.mrf.mxu1 }
 0x551   :  { %v18074_v22 = vadd.f32 %v4583_v39, %v22406_v40 }
 0x552   :  { %v18076_v10 = vadd.f32 %v5007_v33, %v4839_v7  ;;  %v5010_v41 = vpop.f32.mrf.mxu0 }
 0x553   :  { %4751 = vmatmul.bf16.gmra.mxu2 %v11606_v59  ;;  %5138 = vmatmul.bf16.gmra.mxu1 %v10850_v31  ;;  %v11389_v59 = vld [vmem:[%s21941_s28 + $0x4d8] sm:$0xf] }
 0x554   :  { %4880 = vmatmul.bf16.gmra.mxu3 %v11354_v42  ;;  %v13156_v31 = vld [vmem:[%s21941_s28 + $0x4f4] sm:$0xf0]  ;;  %v11638_v42 = vor.u32 %v13219_v51, %v11637_v18 }
 0x555   :  { %5049 = vmatmul.bf16.gmra.mxu0 %v11358_v13 }
 0x556   :  { %v4712_v23 = vpop.f32.mrf.mxu2 }
 0x557   :  { %v18079_v62 = vadd.f32 %v4712_v23, %v17738_v34  ;;  %v4841_v1 = vpop.f32.mrf.mxu3  ;;  %v13024_v34 = vld [vmem:[%s21941_s28 + $0xdc] sm:$0xf] }
 0x558   :  { %v4842_v26 = vadd.f32 %v4841_v1, %v17743_v44  ;;  %v4585_v29 = vpop.f32.mrf.mxu1  ;;  %v10879_v44 = vld [vmem:[%s21941_s28 + $0xf8] sm:$0xf0] }
 0x559   :  { %v18083_v32 = vadd.f32 %v4585_v29, %v22407_v30  ;;  %v10882_v40 = vor.u32 %v13024_v34, %v10879_v44  ;;  %v11390_v30 = vor.u32 %v13156_v31, %v11389_v59  ;;  %v22411_v34 = vld [vmem:[#allocation136_spill] sm:$0xff]  ;;  %v11415_v31 = vld [vmem:[%s21941_s28 + $0x530] sm:$0xf0] }
 0x55a   :  { %v18085_v0 = vadd.f32 %v5010_v41, %v4842_v26  ;;  %v5012_v33 = vpop.f32.mrf.mxu0  ;;  %v13151_v41 = vld [vmem:[%s21941_s28 + $0x4d4] sm:$0xf]  ;;  %v22410_v26 = vld [vmem:[#allocation134_spill] sm:$0xff]  ;;  %v13227_v59 = vld [vmem:[%s21941_s28 + $0x72c] sm:$0xf0] }
 0x55b   :  { %22408 = vst [vmem:[#allocation63_spill] sm:$0xff] %v18083_v32  ;;  %v11386_v1 = vor.u32 %v13151_v41, %v11383_v20  ;;  %v11669_v20 = vld [vmem:[%s21941_s28 + $0x710] sm:$0xf] }
 0x55c   :  { %22409 = vst [vmem:[#allocation69_spill] sm:$0xff] %v18085_v0 }
 0x55e   :  { %v4714_v47 = vpop.f32.mrf.mxu2 }
 0x55f   :  { %v18112_v7 = vadd.f32 %v4714_v47, %v17747_v43  ;;  %v4843_v39 = vpop.f32.mrf.mxu3 }
 0x560   :  { %v4844_v13 = vadd.f32 %v4843_v39, %v17776_v60  ;;  %v4588_v23 = vpop.f32.mrf.mxu1 }
 0x561   :  { %v18116_v29 = vadd.f32 %v4588_v23, %v22410_v26 }
 0x562   :  { %v18118_v32 = vadd.f32 %v5012_v33, %v4844_v13  ;;  %v5015_v0 = vpop.f32.mrf.mxu0 }
 0x563   :  { %4756 = vmatmul.bf16.gmra.mxu2 %v11638_v42  ;;  %5143 = vmatmul.bf16.gmra.mxu1 %v10882_v40  ;;  %v11421_v42 = vld [vmem:[%s21941_s28 + $0x518] sm:$0xf] }
 0x564   :  { %4885 = vmatmul.bf16.gmra.mxu3 %v11386_v1  ;;  %v13164_v40 = vld [vmem:[%s21941_s28 + $0x534] sm:$0xf0]  ;;  %v11670_v1 = vor.u32 %v13227_v59, %v11669_v20 }
 0x565   :  { %5054 = vmatmul.bf16.gmra.mxu0 %v11390_v30 }
 0x566   :  { %v4717_v43 = vpop.f32.mrf.mxu2 }
 0x567   :  { %v18121_v47 = vadd.f32 %v4717_v43, %v17780_v28  ;;  %v4846_v18 = vpop.f32.mrf.mxu3  ;;  %v13032_v28 = vld [vmem:[%s21941_s28 + $0x11c] sm:$0xf] }
 0x568   :  { %v4847_v60 = vadd.f32 %v4846_v18, %v17785_v25  ;;  %v4590_v51 = vpop.f32.mrf.mxu1  ;;  %v10911_v25 = vld [vmem:[%s21941_s28 + $0x138] sm:$0xf0] }
 0x569   :  { %v18125_v44 = vadd.f32 %v4590_v51, %v22411_v34  ;;  %v10914_v26 = vor.u32 %v13032_v28, %v10911_v25  ;;  %v11422_v34 = vor.u32 %v13164_v40, %v11421_v42  ;;  %v22415_v28 = vld [vmem:[#allocation7_spill] sm:$0xff]  ;;  %v13235_v42 = vld [vmem:[%s21941_s28 + $0x76c] sm:$0xf0]  ;;  %v11447_v40 = vld [vmem:[%s21941_s28 + $0x570] sm:$0xf0] }
 0x56a   :  { %v18127_v41 = vadd.f32 %v5015_v0, %v4847_v60  ;;  %v5017_v33 = vpop.f32.mrf.mxu0  ;;  %v13159_v0 = vld [vmem:[%s21941_s28 + $0x514] sm:$0xf]  ;;  %v22414_v60 = vld [vmem:[#allocation138_spill] sm:$0xff] }
 0x56b   :  { %22412 = vst [vmem:[#allocation54_spill] sm:$0xff] %v18125_v44  ;;  %v11418_v18 = vor.u32 %v13159_v0, %v11415_v31  ;;  %v11701_v31 = vld [vmem:[%s21941_s28 + $0x750] sm:$0xf] }
 0x56c   :  { %22413 = vst [vmem:[#allocation66_spill] sm:$0xff] %v18127_v41 }
 0x56e   :  { %v4719_v39 = vpop.f32.mrf.mxu2 }
 0x56f   :  { %v18154_v13 = vadd.f32 %v4719_v39, %v17789_v56  ;;  %v4848_v23 = vpop.f32.mrf.mxu3 }
 0x570   :  { %v4849_v30 = vadd.f32 %v4848_v23, %v17818_v63  ;;  %v4593_v43 = vpop.f32.mrf.mxu1 }
 0x571   :  { %v18158_v51 = vadd.f32 %v4593_v43, %v22414_v60  ;;  %v11702_v43 = vor.u32 %v13235_v42, %v11701_v31 }
 0x572   :  { %v18160_v44 = vadd.f32 %v5017_v33, %v4849_v30  ;;  %v5020_v41 = vpop.f32.mrf.mxu0 }
 0x573   :  { %4761 = vmatmul.bf16.gmra.mxu2 %v11670_v1  ;;  %5148 = vmatmul.bf16.gmra.mxu1 %v10914_v26  ;;  %v11453_v1 = vld [vmem:[%s21941_s28 + $0x558] sm:$0xf] }
 0x574   :  { %4890 = vmatmul.bf16.gmra.mxu3 %v11418_v18  ;;  %v13172_v26 = vld [vmem:[%s21941_s28 + $0x574] sm:$0xf0] }
 0x575   :  { %5059 = vmatmul.bf16.gmra.mxu0 %v11422_v34 }
 0x576   :  { %v4722_v56 = vpop.f32.mrf.mxu2 }
 0x577   :  { %v18163_v39 = vadd.f32 %v4722_v56, %v17822_v54  ;;  %v4851_v20 = vpop.f32.mrf.mxu3  ;;  %v13040_v54 = vld [vmem:[%s21941_s28 + $0x15c] sm:$0xf] }
 0x578   :  { %v4852_v63 = vadd.f32 %v4851_v20, %v17827_v15  ;;  %v4595_v59 = vpop.f32.mrf.mxu1  ;;  %v10943_v15 = vld [vmem:[%s21941_s28 + $0x178] sm:$0xf0]  ;;  %v22419_v20 = vld [vmem:[#allocation88_spill] sm:$0xff] }
 0x579   :  { %v18167_v25 = vadd.f32 %v4595_v59, %v22415_v28  ;;  %v10946_v18 = vor.u32 %v13040_v54, %v10943_v15  ;;  %v11454_v59 = vor.u32 %v13172_v26, %v11453_v1  ;;  %v11485_v1 = vld [vmem:[%s21941_s28 + $0x598] sm:$0xf] }
 0x57a   :  { %v18169_v0 = vadd.f32 %v5020_v41, %v4852_v63  ;;  %v5022_v33 = vpop.f32.mrf.mxu0  ;;  %v13167_v41 = vld [vmem:[%s21941_s28 + $0x554] sm:$0xf]  ;;  %v13180_v26 = vld [vmem:[%s21941_s28 + $0x5b4] sm:$0xf0] }
 0x57b   :  { %22416 = vst [vmem:[#allocation71_spill] sm:$0xff] %v18167_v25  ;;  %v11450_v56 = vor.u32 %v13167_v41, %v11447_v40  ;;  %v11733_v41 = vld [vmem:[%s21941_s28 + $0x790] sm:$0xf] }
 0x57c   :  { %22417 = vst [vmem:[#allocation67_spill] sm:$0xff] %v18169_v0  ;;  %v13243_v40 = vld [vmem:[%s21941_s28 + $0x7ac] sm:$0xf0] }
 0x57e   :  { %v18189_v23 = vpop.f32.mrf.mxu2 }
 0x57f   :  { %22418 = vst [vmem:[#allocation109_spill] sm:$0xff] %v18189_v23  ;;  %v4853_v30 = vpop.f32.mrf.mxu3 }
 0x580   :  { %v4854_v60 = vadd.f32 %v4853_v30, %v17860_v21  ;;  %v4598_v34 = vpop.f32.mrf.mxu1 }
 0x581   :  { %v18199_v63 = vadd.f32 %v4598_v34, %v22419_v20 }
 0x582   :  { %v18201_v28 = vadd.f32 %v5022_v33, %v4854_v60  ;;  %v5025_v25 = vpop.f32.mrf.mxu0 }
 0x583   :  { %4766 = vmatmul.bf16.gmra.mxu2 %v11702_v43  ;;  %5153 = vmatmul.bf16.gmra.mxu1 %v10946_v18  ;;  %v11734_v43 = vor.u32 %v13243_v40, %v11733_v41 }
 0x584   :  { %4895 = vmatmul.bf16.gmra.mxu3 %v11450_v56 }
 0x585   :  { %5064 = vmatmul.bf16.gmra.mxu0 %v11454_v59  ;;  %v11486_v59 = vor.u32 %v13180_v26, %v11485_v1  ;;  %v11517_v26 = vld [vmem:[%s21941_s28 + $0x5d8] sm:$0xf] }
 0x586   :  { %v4727_v23 = vpop.f32.mrf.mxu2 }
 0x587   :  { %v18204_v0 = vadd.f32 %v4727_v23, %v17864_v5  ;;  %v4856_v31 = vpop.f32.mrf.mxu3  ;;  %v13048_v5 = vld [vmem:[%s21941_s28 + $0x19c] sm:$0xf] }
 0x588   :  { %v4857_v21 = vadd.f32 %v4856_v31, %v17869_v48  ;;  %v4600_v42 = vpop.f32.mrf.mxu1  ;;  %v13175_v48 = vld [vmem:[%s21941_s28 + $0x594] sm:$0xf] }
 0x589   :  { %v18208_v54 = vadd.f32 %v4600_v42, %v17545_v11  ;;  %v10975_v11 = vld [vmem:[%s21941_s28 + $0x1b8] sm:$0xf0] }
 0x58a   :  { %v18210_v15 = vadd.f32 %v5025_v25, %v4857_v21  ;;  %v5027_v33 = vpop.f32.mrf.mxu0  ;;  %v11479_v25 = vld [vmem:[%s21941_s28 + $0x5b0] sm:$0xf0]  ;;  %v10978_v18 = vor.u32 %v13048_v5, %v10975_v11  ;;  %v11765_v11 = vld [vmem:[%s21941_s28 + $0x7d0] sm:$0xf] }
 0x58b   :  { %22420 = vst [vmem:[#allocation110_spill] sm:$0xff] %v18208_v54  ;;  %v11482_v56 = vor.u32 %v13175_v48, %v11479_v25  ;;  %v13251_v48 = vld [vmem:[%s21941_s28 + $0x7ec] sm:$0xf0]  ;;  %v11511_v25 = vld [vmem:[%s21941_s28 + $0x5f0] sm:$0xf0] }
 0x58e   :  { %v18230_v23 = vpop.f32.mrf.mxu2 }
 0x58f   :  { %v4858_v30 = vpop.f32.mrf.mxu3 }
 0x590   :  { %v4859_v60 = vadd.f32 %v4858_v30, %v17902_v17  ;;  %v4603_v34 = vpop.f32.mrf.mxu1  ;;  %v13188_v30 = vld [vmem:[%s21941_s28 + $0x5f4] sm:$0xf0] }
 0x591   :  { %v18240_v20 = vadd.f32 %v4603_v34, %v17562_v35 }
 0x592   :  { %v18242_v31 = vadd.f32 %v5027_v33, %v4859_v60  ;;  %v5030_v21 = vpop.f32.mrf.mxu0 }
 0x593   :  { %4771 = vmatmul.bf16.gmra.mxu2 %v11734_v43  ;;  %5158 = vmatmul.bf16.gmra.mxu1 %v10978_v18  ;;  %v11766_v18 = vor.u32 %v13251_v48, %v11765_v11 }
 0x594   :  { %4900 = vmatmul.bf16.gmra.mxu3 %v11482_v56 }
 0x595   :  { %5069 = vmatmul.bf16.gmra.mxu0 %v11486_v59 }
 0x596   :  { %v4732_v42 = vpop.f32.mrf.mxu2 }
 0x597   :  { %v18245_v54 = vadd.f32 %v4732_v42, %v17906_v9  ;;  %v4861_v41 = vpop.f32.mrf.mxu3  ;;  %v13056_v9 = vld [vmem:[%s21941_s28 + $0x1dc] sm:$0xf]  ;;  %v11518_v42 = vor.u32 %v13188_v30, %v11517_v26  ;;  %v13196_v26 = vld [vmem:[%s21941_s28 + $0x634] sm:$0xf0] }
 0x598   :  { %v4862_v17 = vadd.f32 %v4861_v41, %v17911_v6  ;;  %v4605_v40 = vpop.f32.mrf.mxu1  ;;  %v13183_v6 = vld [vmem:[%s21941_s28 + $0x5d4] sm:$0xf] }
 0x599   :  { %v18249_v5 = vadd.f32 %v4605_v40, %v17603_v55  ;;  %v11007_v55 = vld [vmem:[%s21941_s28 + $0x1f8] sm:$0xf0]  ;;  %v11514_v59 = vor.u32 %v13183_v6, %v11511_v25  ;;  %v11549_v25 = vld [vmem:[%s21941_s28 + $0x618] sm:$0xf] }
 0x59a   :  { %v18251_v35 = vadd.f32 %v5030_v21, %v4862_v17  ;;  %v5032_v33 = vpop.f32.mrf.mxu0  ;;  %v11010_v60 = vor.u32 %v13056_v9, %v11007_v55  ;;  %v13064_v55 = vld [vmem:[%s21941_s28 + $0x21c] sm:$0xf] }
 0x59b   :  { %22421 = vst [vmem:[#allocation112_spill] sm:$0xff] %v18249_v5  ;;  %v11039_v6 = vld [vmem:[%s21941_s28 + $0x238] sm:$0xf0] }
 0x59e   :  { %v18271_v1 = vpop.f32.mrf.mxu2 }
 0x59f   :  { %v4863_v43 = vpop.f32.mrf.mxu3 }
 0x5a0   :  { %v4864_v34 = vadd.f32 %v4863_v43, %v17944_v52  ;;  %v4608_v56 = vpop.f32.mrf.mxu1  ;;  %v11042_v43 = vor.u32 %v13064_v55, %v11039_v6 }
 0x5a1   :  { %v18281_v21 = vadd.f32 %v4608_v56, %v17620_v58 }
 0x5a2   :  { %v18283_v41 = vadd.f32 %v5032_v33, %v4864_v34  ;;  %v5035_v17 = vpop.f32.mrf.mxu0 }
 0x5a3   :  { %4776 = vmatmul.bf16.gmra.mxu2 %v11766_v18  ;;  %5163 = vmatmul.bf16.gmra.mxu1 %v11010_v60 }
 0x5a4   :  { %4905 = vmatmul.bf16.gmra.mxu3 %v11514_v59  ;;  %v11550_v59 = vor.u32 %v13196_v26, %v11549_v25 }
 0x5a5   :  { %5074 = vmatmul.bf16.gmra.mxu0 %v11518_v42 }
 0x5a6   :  { %v4737_v40 = vpop.f32.mrf.mxu2 }
 0x5a7   :  { %v18286_v5 = vadd.f32 %v4737_v40, %v17948_v24  ;;  %v4866_v11 = vpop.f32.mrf.mxu3  ;;  %v13191_v24 = vld [vmem:[%s21941_s28 + $0x614] sm:$0xf] }
 0x5a8   :  { %v4867_v52 = vadd.f32 %v4866_v11, %v17953_v57  ;;  %v4610_v48 = vpop.f32.mrf.mxu1 }
 0x5a9   :  { %22422 = vst [vmem:[#allocation5_spill] sm:$0xff] %v18286_v5  ;;  %v18290_v9 = vadd.f32 %v4610_v48, %v17653_v19  ;;  %v11543_v19 = vld [vmem:[%s21941_s28 + $0x630] sm:$0xf0] }
 0x5aa   :  { %v18292_v58 = vadd.f32 %v5035_v17, %v4867_v52  ;;  %v5037_v33 = vpop.f32.mrf.mxu0  ;;  %v11546_v34 = vor.u32 %v13191_v24, %v11543_v19  ;;  %v13072_v19 = vld [vmem:[%s21941_s28 + $0x25c] sm:$0xf] }
 0x5ab   :  { %22423 = vst [vmem:[#allocation114_spill] sm:$0xff] %v18290_v9 }
 0x5ae   :  { %v18306_v57 = vpop.f32.mrf.mxu2 }
 0x5af   :  { %22424 = vst [vmem:[#allocation117_spill] sm:$0xff] %v18306_v57  ;;  %v4868_v30 = vpop.f32.mrf.mxu3 }
 0x5b0   :  { %v4869_v18 = vadd.f32 %v4868_v30, %v17986_v53  ;;  %v5129_v60 = vpop.f32.mrf.mxu1  ;;  %v11581_v30 = vld [vmem:[%s21941_s28 + $0x658] sm:$0xf] }
 0x5b1   :  { %v5130_v56 = vadd.f32 %v5129_v60, %v17665_v16 }
 0x5b2   :  { %v18316_v42 = vadd.f32 %v5037_v33, %v4869_v18  ;;  %v5040_v17 = vpop.f32.mrf.mxu0 }
 0x5b3   :  { %5168 = vmatmul.bf16.gmra.mxu1 %v11042_v43  ;;  %v5289_v24 = vmax.f32 %v5130_v56, 0.0  ;;  %v13204_v43 = vld [vmem:[%s21941_s28 + $0x674] sm:$0xf0] }
 0x5b4   :  { %4910 = vmatmul.bf16.gmra.mxu3 %v11546_v34 }
 0x5b5   :  { %5079 = vmatmul.bf16.gmra.mxu0 %v11550_v59 }
 0x5b6   :  { %v4742_v40 = vpop.f32.mrf.mxu2 }
 0x5b7   :  { %v18319_v11 = vadd.f32 %v4742_v40, %v17990_v49  ;;  %v4871_v52 = vpop.f32.mrf.mxu3  ;;  %v11071_v49 = vld [vmem:[%s21941_s28 + $0x278] sm:$0xf0]  ;;  %v11582_v40 = vor.u32 %v13204_v43, %v11581_v30 }
 0x5b8   :  { %v4872_v48 = vadd.f32 %v4871_v52, %v17995_v61  ;;  %v5131_v55 = vpop.f32.mrf.mxu1  ;;  %v13199_v61 = vld [vmem:[%s21941_s28 + $0x654] sm:$0xf]  ;;  %v11074_v60 = vor.u32 %v13072_v19, %v11071_v49 }
 0x5b9   :  { %v5132_v53 = vadd.f32 %v5131_v55, %v17698_v27  ;;  %v11575_v27 = vld [vmem:[%s21941_s28 + $0x670] sm:$0xf0] }
 0x5ba   :  { %v18323_v6 = vadd.f32 %v5040_v17, %v4872_v48  ;;  %v5042_v16 = vpop.f32.mrf.mxu0  ;;  %v11578_v59 = vor.u32 %v13199_v61, %v11575_v27  ;;  %v13080_v27 = vld [vmem:[%s21941_s28 + $0x29c] sm:$0xf] }
 0x5bb   :  { %v5290_v33 = vmax.f32 %v5132_v53, 0.0 }
 0x5bd   :  { %v18337_v25 = vpack.c.bf16 %v5290_v33, %v5289_v24 }
 0x5be   :  { %v18339_v26 = vpop.f32.mrf.mxu2 }
 0x5bf   :  { %22425 = vst [vmem:[#allocation41_spill] sm:$0xff] %v18339_v26  ;;  %v4873_v18 = vpop.f32.mrf.mxu3 }
 0x5c0   :  { %v4874_v34 = vadd.f32 %v4873_v18, %v18028_v4  ;;  %v5134_v56 = vpop.f32.mrf.mxu1  ;;  %v11613_v18 = vld [vmem:[%s21941_s28 + $0x698] sm:$0xf] }
 0x5c1   :  { %v5135_v17 = vadd.f32 %v5134_v56, %v17707_v38 }
 0x5c2   :  { %v18349_v52 = vadd.f32 %v5042_v16, %v4874_v34  ;;  %v5045_v48 = vpop.f32.mrf.mxu0 }
 0x5c3   :  { %5173 = vmatmul.bf16.gmra.mxu1 %v11074_v60  ;;  %v5291_v61 = vmax.f32 %v5135_v17, 0.0  ;;  %v13212_v60 = vld [vmem:[%s21941_s28 + $0x6b4] sm:$0xf0] }
 0x5c4   :  { %4915 = vmatmul.bf16.gmra.mxu3 %v11578_v59 }
 0x5c5   :  { %5084 = vmatmul.bf16.gmra.mxu0 %v11582_v40 }
 0x5c6   :  { %v4747_v55 = vpop.f32.mrf.mxu2 }
 0x5c7   :  { %v18352_v53 = vadd.f32 %v4747_v55, %v18032_v3  ;;  %v4876_v24 = vpop.f32.mrf.mxu3  ;;  %v11103_v3 = vld [vmem:[%s21941_s28 + $0x2b8] sm:$0xf0]  ;;  %v11614_v55 = vor.u32 %v13212_v60, %v11613_v18 }
 0x5c8   :  { %v4877_v33 = vadd.f32 %v4876_v24, %v18037_v12  ;;  %v5136_v19 = vpop.f32.mrf.mxu1  ;;  %v13207_v12 = vld [vmem:[%s21941_s28 + $0x694] sm:$0xf]  ;;  %v11106_v56 = vor.u32 %v13080_v27, %v11103_v3 }
 0x5c9   :  { %v5137_v4 = vadd.f32 %v5136_v19, %v17740_v2  ;;  %v11607_v2 = vld [vmem:[%s21941_s28 + $0x6b0] sm:$0xf0] }
 0x5ca   :  { %v18356_v49 = vadd.f32 %v5045_v48, %v4877_v33  ;;  %v5047_v38 = vpop.f32.mrf.mxu0  ;;  %v11610_v40 = vor.u32 %v13207_v12, %v11607_v2  ;;  %v13088_v2 = vld [vmem:[%s21941_s28 + $0x2dc] sm:$0xf] }
 0x5cb   :  { %v5292_v16 = vmax.f32 %v5137_v4, 0.0 }
 0x5cd   :  { %v18370_v30 = vpack.c.bf16 %v5292_v16, %v5291_v61 }
 0x5ce   :  { %v18372_v43 = vpop.f32.mrf.mxu2 }
 0x5cf   :  { %22426 = vst [vmem:[#allocation32_spill] sm:$0xff] %v18372_v43  ;;  %v4878_v34 = vpop.f32.mrf.mxu3 }
 0x5d0   :  { %v4879_v59 = vadd.f32 %v4878_v34, %v18070_v50  ;;  %v5139_v17 = vpop.f32.mrf.mxu1  ;;  %v11645_v34 = vld [vmem:[%s21941_s28 + $0x6d8] sm:$0xf] }
 0x5d1   :  { %v5140_v48 = vadd.f32 %v5139_v17, %v17749_v14 }
 0x5d2   :  { %v18382_v24 = vadd.f32 %v5047_v38, %v4879_v59  ;;  %v5050_v33 = vpop.f32.mrf.mxu0 }
 0x5d3   :  { %5178 = vmatmul.bf16.gmra.mxu1 %v11106_v56  ;;  %v5293_v12 = vmax.f32 %v5140_v48, 0.0  ;;  %v13220_v56 = vld [vmem:[%s21941_s28 + $0x6f4] sm:$0xf0] }
 0x5d4   :  { %4920 = vmatmul.bf16.gmra.mxu3 %v11610_v40 }
 0x5d5   :  { %5089 = vmatmul.bf16.gmra.mxu0 %v11614_v55 }
 0x5d6   :  { %v4752_v19 = vpop.f32.mrf.mxu2 }
 0x5d7   :  { %v18385_v4 = vadd.f32 %v4752_v19, %v18074_v22  ;;  %v4881_v61 = vpop.f32.mrf.mxu3  ;;  %v11135_v22 = vld [vmem:[%s21941_s28 + $0x2f8] sm:$0xf0] }
 0x5d8   :  { %v4882_v16 = vadd.f32 %v4881_v61, %v18079_v62  ;;  %v5141_v27 = vpop.f32.mrf.mxu1  ;;  %v13215_v62 = vld [vmem:[%s21941_s28 + $0x6d4] sm:$0xf]  ;;  %v11138_v17 = vor.u32 %v13088_v2, %v11135_v22  ;;  %v11646_v61 = vor.u32 %v13220_v56, %v11645_v34  ;;  %v13096_v56 = vld [vmem:[%s21941_s28 + $0x31c] sm:$0xf] }
 0x5d9   :  { %v5142_v50 = vadd.f32 %v5141_v27, %v17782_v46  ;;  %v11639_v46 = vld [vmem:[%s21941_s28 + $0x6f0] sm:$0xf0] }
 0x5da   :  { %v18389_v3 = vadd.f32 %v5050_v33, %v4882_v16  ;;  %v5052_v14 = vpop.f32.mrf.mxu0  ;;  %v11642_v55 = vor.u32 %v13215_v62, %v11639_v46  ;;  %v22428_v33 = vld [vmem:[#allocation15_spill] sm:$0xff] }
 0x5db   :  { %v5294_v38 = vmax.f32 %v5142_v50, 0.0 }
 0x5dd   :  { %v18403_v18 = vpack.c.bf16 %v5294_v38, %v5293_v12 }
 0x5de   :  { %v18405_v60 = vpop.f32.mrf.mxu2 }
 0x5df   :  { %22427 = vst [vmem:[#allocation50_spill] sm:$0xff] %v18405_v60  ;;  %v4883_v59 = vpop.f32.mrf.mxu3 }
 0x5e0   :  { %v4884_v40 = vadd.f32 %v4883_v59, %v18112_v7  ;;  %v5144_v48 = vpop.f32.mrf.mxu1  ;;  %v22429_v7 = vld [vmem:[#allocation23_spill] sm:$0xff] }
 0x5e1   :  { %v5145_v19 = vadd.f32 %v5144_v48, %v22428_v33  ;;  %v13228_v33 = vld [vmem:[%s21941_s28 + $0x734] sm:$0xf0] }
 0x5e2   :  { %v18415_v16 = vadd.f32 %v5052_v14, %v4884_v40  ;;  %v5055_v27 = vpop.f32.mrf.mxu0 }
 0x5e3   :  { %5183 = vmatmul.bf16.gmra.mxu1 %v11138_v17  ;;  %v5295_v34 = vmax.f32 %v5145_v19, 0.0  ;;  %v11671_v17 = vld [vmem:[%s21941_s28 + $0x730] sm:$0xf0] }
 0x5e4   :  { %4925 = vmatmul.bf16.gmra.mxu3 %v11642_v55  ;;  %v11677_v55 = vld [vmem:[%s21941_s28 + $0x718] sm:$0xf] }
 0x5e5   :  { %5094 = vmatmul.bf16.gmra.mxu0 %v11646_v61 }
 0x5e6   :  { %v4757_v50 = vpop.f32.mrf.mxu2 }
 0x5e7   :  { %v18418_v12 = vadd.f32 %v4757_v50, %v18116_v29  ;;  %v4886_v38 = vpop.f32.mrf.mxu3  ;;  %v11167_v29 = vld [vmem:[%s21941_s28 + $0x338] sm:$0xf0] }
 0x5e8   :  { %v4887_v2 = vadd.f32 %v4886_v38, %v18121_v47  ;;  %v5146_v22 = vpop.f32.mrf.mxu1  ;;  %v13223_v47 = vld [vmem:[%s21941_s28 + $0x714] sm:$0xf]  ;;  %v11170_v61 = vor.u32 %v13096_v56, %v11167_v29 }
 0x5e9   :  { %v5147_v59 = vadd.f32 %v5146_v22, %v22429_v7  ;;  %v11674_v38 = vor.u32 %v13223_v47, %v11671_v17  ;;  %v11678_v7 = vor.u32 %v13228_v33, %v11677_v55  ;;  %v13104_v33 = vld [vmem:[%s21941_s28 + $0x35c] sm:$0xf] }
 0x5ea   :  { %v18422_v62 = vadd.f32 %v5055_v27, %v4887_v2  ;;  %v5057_v46 = vpop.f32.mrf.mxu0  ;;  %v22431_v2 = vld [vmem:[#allocation74_spill] sm:$0xff] }
 0x5eb   :  { %v5296_v14 = vmax.f32 %v5147_v59, 0.0 }
 0x5ed   :  { %v18436_v40 = vpack.c.bf16 %v5296_v14, %v5295_v34 }
 0x5ee   :  { %v18438_v48 = vpop.f32.mrf.mxu2 }
 0x5ef   :  { %22430 = vst [vmem:[#allocation97_spill] sm:$0xff] %v18438_v48  ;;  %v4888_v19 = vpop.f32.mrf.mxu3 }
 0x5f0   :  { %v4889_v27 = vadd.f32 %v4888_v19, %v18154_v13  ;;  %v5149_v50 = vpop.f32.mrf.mxu1  ;;  %v22432_v13 = vld [vmem:[#allocation31_spill] sm:$0xff] }
 0x5f1   :  { %v5150_v22 = vadd.f32 %v5149_v50, %v22431_v2  ;;  %v11709_v50 = vld [vmem:[%s21941_s28 + $0x758] sm:$0xf] }
 0x5f2   :  { %v18448_v59 = vadd.f32 %v5057_v46, %v4889_v27  ;;  %v5060_v34 = vpop.f32.mrf.mxu0 }
 0x5f3   :  { %5188 = vmatmul.bf16.gmra.mxu1 %v11170_v61  ;;  %v5297_v46 = vmax.f32 %v5150_v22, 0.0 }
 0x5f4   :  { %4930 = vmatmul.bf16.gmra.mxu3 %v11674_v38  ;;  %v13236_v38 = vld [vmem:[%s21941_s28 + $0x774] sm:$0xf0] }
 0x5f5   :  { %5099 = vmatmul.bf16.gmra.mxu0 %v11678_v7 }
 0x5f6   :  { %v4762_v14 = vpop.f32.mrf.mxu2 }
 0x5f7   :  { %v18451_v9 = vadd.f32 %v4762_v14, %v18158_v51  ;;  %v4891_v48 = vpop.f32.mrf.mxu3  ;;  %v11199_v51 = vld [vmem:[%s21941_s28 + $0x378] sm:$0xf0]  ;;  %v11710_v14 = vor.u32 %v13236_v38, %v11709_v50 }
 0x5f8   :  { %v4892_v56 = vadd.f32 %v4891_v48, %v18163_v39  ;;  %v5151_v29 = vpop.f32.mrf.mxu1  ;;  %v13231_v39 = vld [vmem:[%s21941_s28 + $0x754] sm:$0xf]  ;;  %v11202_v22 = vor.u32 %v13104_v33, %v11199_v51  ;;  %v13112_v50 = vld [vmem:[%s21941_s28 + $0x39c] sm:$0xf] }
 0x5f9   :  { %v5152_v19 = vadd.f32 %v5151_v29, %v22432_v13  ;;  %v11703_v48 = vld [vmem:[%s21941_s28 + $0x770] sm:$0xf0]  ;;  %v22434_v13 = vld [vmem:[#allocation40_spill] sm:$0xff] }
 0x5fa   :  { %v18455_v47 = vadd.f32 %v5060_v34, %v4892_v56  ;;  %v18457_v17 = vpop.f32.mrf.mxu0  ;;  %v11706_v34 = vor.u32 %v13231_v39, %v11703_v48 }
 0x5fb   :  { %v5298_v55 = vmax.f32 %v5152_v19, 0.0 }
 0x5fd   :  { %v18471_v61 = vpack.c.bf16 %v5298_v55, %v5297_v46 }
 0x5fe   :  { %v18473_v27 = vpop.f32.mrf.mxu2 }
 0x5ff   :  { %22433 = vst [vmem:[#allocation135_spill] sm:$0xff] %v18473_v27  ;;  %v18481_v2 = vpop.f32.mrf.mxu3 }
 0x600   :  { %v5154_v7 = vpop.f32.mrf.mxu1 }
 0x601   :  { %v5155_v19 = vadd.f32 %v5154_v7, %v22434_v13  ;;  %v13244_v7 = vld [vmem:[%s21941_s28 + $0x7b4] sm:$0xf0] }
 0x602   :  { %v18483_v56 = vpop.f32.mrf.mxu0 }
 0x603   :  { %5193 = vmatmul.bf16.gmra.mxu1 %v11202_v22  ;;  %v5299_v39 = vmax.f32 %v5155_v19, 0.0  ;;  %v11741_v22 = vld [vmem:[%s21941_s28 + $0x798] sm:$0xf] }
 0x604   :  { %4935 = vmatmul.bf16.gmra.mxu3 %v11706_v34  ;;  %v11742_v19 = vor.u32 %v13244_v7, %v11741_v22  ;;  %v13120_v22 = vld [vmem:[%s21941_s28 + $0x3dc] sm:$0xf]  ;;  %v11773_v7 = vld [vmem:[%s21941_s28 + $0x7d8] sm:$0xf] }
 0x605   :  { %5104 = vmatmul.bf16.gmra.mxu0 %v11710_v14 }
 0x606   :  { %v4767_v29 = vpop.f32.mrf.mxu2 }
 0x607   :  { %v18487_v46 = vadd.f32 %v4767_v29, %v18199_v63  ;;  %v4896_v55 = vpop.f32.mrf.mxu3  ;;  %v11231_v63 = vld [vmem:[%s21941_s28 + $0x3b8] sm:$0xf0] }
 0x608   :  { %v18490_v27 = vadd.f32 %v4896_v55, %v18204_v0  ;;  %v5156_v60 = vpop.f32.mrf.mxu1  ;;  %v13239_v0 = vld [vmem:[%s21941_s28 + $0x794] sm:$0xf]  ;;  %v11234_v14 = vor.u32 %v13112_v50, %v11231_v63 }
 0x609   :  { %v5157_v33 = vadd.f32 %v5156_v60, %v17908_v8  ;;  %v11735_v8 = vld [vmem:[%s21941_s28 + $0x7b0] sm:$0xf0] }
 0x60a   :  { %v18493_v51 = vpop.f32.mrf.mxu0  ;;  %v11738_v13 = vor.u32 %v13239_v0, %v11735_v8 }
 0x60b   :  { %v5300_v48 = vmax.f32 %v5157_v33, 0.0 }
 0x60d   :  { %v5358_v60 = vpack.c.bf16 %v5300_v48, %v5299_v39  ;;  %v22437_v39 = vld [vmem:[#allocation55_spill] sm:$0xff] }
 0x60e   :  { %v18507_v38 = vpop.f32.mrf.mxu2 }
 0x60f   :  { %22435 = vst [vmem:[#allocation82_spill] sm:$0xff] %v18507_v38  ;;  %v18515_v34 = vpop.f32.mrf.mxu3 }
 0x610   :  { %v5159_v29 = vpop.f32.mrf.mxu1 }
 0x611   :  { %v5160_v48 = vadd.f32 %v5159_v29, %v22437_v39 }
 0x612   :  { %v18517_v55 = vpop.f32.mrf.mxu0 }
 0x613   :  { %22436 = vst [vmem:[#allocation81_spill] sm:$0xff] %v18517_v55  ;;  %5198 = vmatmul.bf16.gmra.mxu1 %v11234_v14  ;;  %v5301_v0 = vmax.f32 %v5160_v48, 0.0  ;;  %v13252_v14 = vld [vmem:[%s21941_s28 + $0x7f4] sm:$0xf0] }
 0x614   :  { %4940 = vmatmul.bf16.gmra.mxu3 %v11738_v13  ;;  %v11774_v39 = vor.u32 %v13252_v14, %v11773_v7  ;;  %v11295_v7 = vld [vmem:[%s21941_s28 + $0x438] sm:$0xf0] }
 0x615   :  { %5109 = vmatmul.bf16.gmra.mxu0 %v11742_v19 }
 0x616   :  { %v4772_v33 = vpop.f32.mrf.mxu2 }
 0x617   :  { %v18521_v38 = vadd.f32 %v4772_v33, %v18240_v20  ;;  %v4901_v43 = vpop.f32.mrf.mxu3  ;;  %v11263_v20 = vld [vmem:[%s21941_s28 + $0x3f8] sm:$0xf0] }
 0x618   :  { %v18524_v26 = vadd.f32 %v4901_v43, %v18245_v54  ;;  %v5161_v5 = vpop.f32.mrf.mxu1  ;;  %v13247_v54 = vld [vmem:[%s21941_s28 + $0x7d4] sm:$0xf]  ;;  %v11266_v13 = vor.u32 %v13120_v22, %v11263_v20 }
 0x619   :  { %v5162_v50 = vadd.f32 %v5161_v5, %v17950_v36  ;;  %v11767_v36 = vld [vmem:[%s21941_s28 + $0x7f0] sm:$0xf0] }
 0x61a   :  { %v18527_v63 = vpop.f32.mrf.mxu0  ;;  %v11770_v33 = vor.u32 %v13247_v54, %v11767_v36  ;;  %v13128_v36 = vld [vmem:[%s21941_s28 + $0x41c] sm:$0xf] }
 0x61b   :  { %22438 = vst [vmem:[#allocation137_spill] sm:$0xff] %v18527_v63  ;;  %v5302_v8 = vmax.f32 %v5162_v50, 0.0 }
 0x61d   :  { %v5359_v5 = vpack.c.bf16 %v5302_v8, %v5301_v0  ;;  %v22440_v0 = vld [vmem:[#allocation17_spill] sm:$0xff] }
 0x61e   :  { %v18541_v43 = vpop.f32.mrf.mxu2 }
 0x61f   :  { %22439 = vst [vmem:[#allocation102_spill] sm:$0xff] %v18541_v43  ;;  %v18549_v29 = vpop.f32.mrf.mxu3 }
 0x620   :  { %v5164_v19 = vpop.f32.mrf.mxu1 }
 0x621   :  { %v5165_v8 = vadd.f32 %v5164_v19, %v22440_v0 }
 0x622   :  { %v18551_v48 = vpop.f32.mrf.mxu0 }
 0x623   :  { %5203 = vmatmul.bf16.gmra.mxu1 %v11266_v13  ;;  %v5303_v20 = vmax.f32 %v5165_v8, 0.0  ;;  %v11298_v13 = vor.u32 %v13128_v36, %v11295_v7  ;;  %v13136_v36 = vld [vmem:[%s21941_s28 + $0x45c] sm:$0xf] }
 0x624   :  { %4945 = vmatmul.bf16.gmra.mxu3 %v11770_v33  ;;  %v22442_v33 = vld [vmem:[#allocation53_spill] sm:$0xff] }
 0x625   :  { %5114 = vmatmul.bf16.gmra.mxu0 %v11774_v39 }
 0x626   :  { %v4777_v50 = vpop.f32.mrf.mxu2 }
 0x627   :  { %v18555_v43 = vadd.f32 %v4777_v50, %v18281_v21  ;;  %v18557_v57 = vpop.f32.mrf.mxu3 }
 0x628   :  { %v5166_v63 = vpop.f32.mrf.mxu1 }
 0x629   :  { %22441 = vst [vmem:[#allocation89_spill] sm:$0xff] %v18555_v43  ;;  %v5167_v55 = vadd.f32 %v5166_v63, %v17992_v37 }
 0x62a   :  { %v18560_v22 = vpop.f32.mrf.mxu0 }
 0x62b   :  { %v5304_v54 = vmax.f32 %v5167_v55, 0.0 }
 0x62d   :  { %v5360_v14 = vpack.c.bf16 %v5304_v54, %v5303_v20 }
 0x62f   :  { %v18568_v21 = vpop.f32.mrf.mxu3  ;;  %6537 = vmatpush.bf16.msra.mxu2 %v5360_v14 }
 0x630   :  { %v5169_v19 = vpop.f32.mrf.mxu1 }
 0x631   :  { %v5170_v37 = vadd.f32 %v5169_v19, %v22442_v33 }
 0x632   :  { %v5080_v63 = vpop.f32.mrf.mxu0 }
 0x633   :  { %5208 = vmatmul.bf16.gmra.mxu1 %v11298_v13  ;;  %6538 = vmatpush.bf16.msra.mxu2 %v5359_v5  ;;  %v5305_v54 = vmax.f32 %v5170_v37, 0.0  ;;  %v22443_v13 = vld [vmem:[#allocation59_spill] sm:$0xff] }
 0x634   :  { %v11781_v37 = vld [vmem:[%s21912_s5] sm:$0xf] }
 0x637   :  { %v4911_v55 = vpop.f32.mrf.mxu3  ;;  %6539 = vmatpush.bf16.msra.mxu2 %v5358_v60  ;;  %v11327_v60 = vld [vmem:[%s21941_s28 + $0x478] sm:$0xf0] }
 0x638   :  { %v4912_v39 = vadd.f32 %v4911_v55, %v18319_v11  ;;  %v5171_v50 = vpop.f32.mrf.mxu1 }
 0x639   :  { %v5172_v0 = vadd.f32 %v5171_v50, %v18034_v45  ;;  %v11330_v45 = vor.u32 %v13136_v36, %v11327_v60 }
 0x63a   :  { %v18573_v8 = vadd.f32 %v5080_v63, %v4912_v39  ;;  %v18575_v20 = vpop.f32.mrf.mxu0  ;;  %v13255_v63 = vld [vmem:[%s21912_s5 + $0xc] sm:$0xf0] }
 0x63b   :  { %v5306_v14 = vmax.f32 %v5172_v0, 0.0  ;;  %6540 = vmatpush.bf16.msra.mxu2 %v18471_v61  ;;  %v11782_v0 = vor.u32 %v13255_v63, %v11781_v37 }
 0x63d   :  { %v18584_v11 = vpack.c.bf16 %v5306_v14, %v5305_v54  ;;  %v13144_v14 = vld [vmem:[%s21941_s28 + $0x49c] sm:$0xf] }
 0x63f   :  { %v18586_v5 = vpop.f32.mrf.mxu3  ;;  %6541 = vmatpush.bf16.msra.mxu2 %v18436_v40 }
 0x640   :  { %v5174_v7 = vpop.f32.mrf.mxu1 }
 0x641   :  { %v5175_v19 = vadd.f32 %v5174_v7, %v22443_v13  ;;  %v22444_v7 = vld [vmem:[#allocation69_spill] sm:$0xff] }
 0x642   :  { %v5085_v33 = vpop.f32.mrf.mxu0 }
 0x643   :  { %5213 = vmatmul.bf16.gmra.mxu1 %v11330_v45  ;;  %6542 = vmatpush.bf16.msra.mxu2 %v18403_v18  ;;  %v5307_v54 = vmax.f32 %v5175_v19, 0.0 }
 0x647   :  { %v4916_v61 = vpop.f32.mrf.mxu3  ;;  %6543 = vmatpush.bf16.msra.mxu2 %v18370_v30 }
 0x648   :  { %v4917_v40 = vadd.f32 %v4916_v61, %v18352_v53  ;;  %v5176_v55 = vpop.f32.mrf.mxu1  ;;  %v11359_v53 = vld [vmem:[%s21941_s28 + $0x4b8] sm:$0xf0]  ;;  %v13259_v61 = vld [vmem:[%s21912_s5 + $0x2c] sm:$0xf0] }
 0x649   :  { %v5177_v39 = vadd.f32 %v5176_v55, %v18076_v10  ;;  %v11362_v60 = vor.u32 %v13144_v14, %v11359_v53  ;;  %v13152_v14 = vld [vmem:[%s21941_s28 + $0x4dc] sm:$0xf] }
 0x64a   :  { %v18600_v50 = vadd.f32 %v5085_v33, %v4917_v40  ;;  %v18602_v18 = vpop.f32.mrf.mxu0  ;;  %v11797_v33 = vld [vmem:[%s21912_s5 + $0x20] sm:$0xf]  ;;  %v11391_v53 = vld [vmem:[%s21941_s28 + $0x4f8] sm:$0xf0] }
 0x64b   :  { %v5308_v30 = vmax.f32 %v5177_v39, 0.0  ;;  %6544 = vmatpush.bf16.msra.mxu2 %v18337_v25  ;;  %v11798_v39 = vor.u32 %v13259_v61, %v11797_v33  ;;  %v11813_v33 = vld [vmem:[%s21912_s5 + $0x40] sm:$0xf]  ;;  %v13263_v61 = vld [vmem:[%s21912_s5 + $0x4c] sm:$0xf0] }
 0x64d   :  { %v18611_v36 = vpack.c.bf16 %v5308_v30, %v5307_v54 }
 0x64e   :  { %6545 = vmatmul.bf16.vlgmr.msra.gmra.mxu2 %v11782_v0 }
 0x64f   :  { %v18613_v10 = vpop.f32.mrf.mxu3 }
 0x650   :  { %v5179_v45 = vpop.f32.mrf.mxu1 }
 0x651   :  { %v5180_v13 = vadd.f32 %v5179_v45, %v22444_v7  ;;  %v22445_v7 = vld [vmem:[#allocation66_spill] sm:$0xff] }
 0x652   :  { %v5090_v19 = vpop.f32.mrf.mxu0 }
 0x653   :  { %5218 = vmatmul.bf16.gmra.mxu1 %v11362_v60  ;;  %v5309_v54 = vmax.f32 %v5180_v13, 0.0 }
 0x657   :  { %v4921_v25 = vpop.f32.mrf.mxu3 }
 0x658   :  { %v4922_v37 = vadd.f32 %v4921_v25, %v18385_v4  ;;  %v5181_v63 = vpop.f32.mrf.mxu1 }
 0x659   :  { %v5182_v40 = vadd.f32 %v5181_v63, %v18118_v32  ;;  %v11394_v32 = vor.u32 %v13152_v14, %v11391_v53  ;;  %v13160_v53 = vld [vmem:[%s21941_s28 + $0x51c] sm:$0xf] }
 0x65a   :  { %v18624_v55 = vadd.f32 %v5090_v19, %v4922_v37  ;;  %v18626_v0 = vpop.f32.mrf.mxu0 }
 0x65b   :  { %v5310_v30 = vmax.f32 %v5182_v40, 0.0 }
 0x65d   :  { %v18634_v60 = vpack.c.bf16 %v5310_v30, %v5309_v54  ;;  %v11814_v54 = vor.u32 %v13263_v61, %v11813_v33 }
 0x65e   :  { %6550 = vmatmul.bf16.gmra.mxu2 %v11798_v39 }
 0x65f   :  { %v18636_v4 = vpop.f32.mrf.mxu3 }
 0x660   :  { %v5184_v45 = vpop.f32.mrf.mxu1 }
 0x661   :  { %v5185_v19 = vadd.f32 %v5184_v45, %v22445_v7 }
 0x662   :  { %v5095_v13 = vpop.f32.mrf.mxu0 }
 0x663   :  { %5223 = vmatmul.bf16.gmra.mxu1 %v11394_v32  ;;  %v5311_v30 = vmax.f32 %v5185_v19, 0.0  ;;  %v11423_v32 = vld [vmem:[%s21941_s28 + $0x538] sm:$0xf0] }
 0x667   :  { %v4926_v25 = vpop.f32.mrf.mxu3 }
 0x668   :  { %v4927_v37 = vadd.f32 %v4926_v25, %v18418_v12  ;;  %v5186_v63 = vpop.f32.mrf.mxu1  ;;  %v22446_v25 = vld [vmem:[#allocation67_spill] sm:$0xff] }
 0x669   :  { %v5187_v40 = vadd.f32 %v5186_v63, %v18160_v44  ;;  %v11426_v44 = vor.u32 %v13160_v53, %v11423_v32  ;;  %v13267_v63 = vld [vmem:[%s21912_s5 + $0x6c] sm:$0xf0] }
 0x66a   :  { %v18647_v39 = vadd.f32 %v5095_v13, %v4927_v37  ;;  %v18655_v45 = vpop.f32.mrf.mxu0  ;;  %v11829_v37 = vld [vmem:[%s21912_s5 + $0x60] sm:$0xf] }
 0x66b   :  { %v5312_v14 = vmax.f32 %v5187_v40, 0.0  ;;  %v11830_v53 = vor.u32 %v13267_v63, %v11829_v37  ;;  %v11845_v37 = vld [vmem:[%s21912_s5 + $0x80] sm:$0xf]  ;;  %v13271_v63 = vld [vmem:[%s21912_s5 + $0x8c] sm:$0xf0] }
 0x66d   :  { %v18657_v7 = vpack.c.bf16 %v5312_v14, %v5311_v30 }
 0x66e   :  { %6555 = vmatmul.bf16.gmra.mxu2 %v11814_v54 }
 0x66f   :  { %v18659_v12 = vpop.f32.mrf.mxu3 }
 0x670   :  { %v5189_v13 = vpop.f32.mrf.mxu1 }
 0x671   :  { %v5190_v19 = vadd.f32 %v5189_v13, %v22446_v25  ;;  %v13168_v13 = vld [vmem:[%s21941_s28 + $0x55c] sm:$0xf] }
 0x672   :  { %v5100_v61 = vpop.f32.mrf.mxu0  ;;  %v11455_v25 = vld [vmem:[%s21941_s28 + $0x578] sm:$0xf0] }
 0x673   :  { %5228 = vmatmul.bf16.gmra.mxu1 %v11426_v44  ;;  %v5313_v32 = vmax.f32 %v5190_v19, 0.0 }
 0x677   :  { %v4931_v33 = vpop.f32.mrf.mxu3 }
 0x678   :  { %v4932_v40 = vadd.f32 %v4931_v33, %v18451_v9  ;;  %v5191_v54 = vpop.f32.mrf.mxu1  ;;  %v11458_v33 = vor.u32 %v13168_v13, %v11455_v25  ;;  %v11487_v13 = vld [vmem:[%s21941_s28 + $0x5b8] sm:$0xf0] }
 0x679   :  { %v5192_v30 = vadd.f32 %v5191_v54, %v18201_v28 }
 0x67a   :  { %v18670_v14 = vadd.f32 %v5100_v61, %v4932_v40 }
 0x67b   :  { %v5314_v44 = vmax.f32 %v5192_v30, 0.0 }
 0x67d   :  { %v18678_v43 = vpack.c.bf16 %v5314_v44, %v5313_v32 }
 0x67e   :  { %6560 = vmatmul.bf16.gmra.mxu2 %v11830_v53  ;;  %v11846_v53 = vor.u32 %v13271_v63, %v11845_v37  ;;  %v13275_v37 = vld [vmem:[%s21912_s5 + $0xac] sm:$0xf0] }
 0x67f   :  { %v18680_v9 = vpop.f32.mrf.mxu3 }
 0x680   :  { %v5194_v28 = vpop.f32.mrf.mxu1 }
 0x681   :  { %v5195_v61 = vadd.f32 %v5194_v28, %v18210_v15  ;;  %v13176_v15 = vld [vmem:[%s21941_s28 + $0x59c] sm:$0xf] }
 0x683   :  { %5233 = vmatmul.bf16.gmra.mxu1 %v11458_v33  ;;  %v5315_v32 = vmax.f32 %v5195_v61, 0.0  ;;  %v11861_v61 = vld [vmem:[%s21912_s5 + $0xa0] sm:$0xf] }
 0x687   :  { %v4936_v19 = vpop.f32.mrf.mxu3 }
 0x688   :  { %v18690_v40 = vadd.f32 %v4936_v19, %v18487_v46  ;;  %v5196_v54 = vpop.f32.mrf.mxu1  ;;  %v11490_v46 = vor.u32 %v13176_v15, %v11487_v13  ;;  %v11519_v15 = vld [vmem:[%s21941_s28 + $0x5f8] sm:$0xf0] }
 0x689   :  { %v5197_v30 = vadd.f32 %v5196_v54, %v18242_v31 }
 0x68b   :  { %v5316_v44 = vmax.f32 %v5197_v30, 0.0 }
 0x68d   :  { %v5366_v25 = vpack.c.bf16 %v5316_v44, %v5315_v32 }
 0x68e   :  { %6565 = vmatmul.bf16.gmra.mxu2 %v11846_v53  ;;  %v11862_v53 = vor.u32 %v13275_v37, %v11861_v61 }
 0x68f   :  { %v18699_v33 = vpop.f32.mrf.mxu3 }
 0x690   :  { %v5199_v28 = vpop.f32.mrf.mxu1 }
 0x691   :  { %v5200_v31 = vadd.f32 %v5199_v28, %v18251_v35  ;;  %v13184_v35 = vld [vmem:[%s21941_s28 + $0x5dc] sm:$0xf] }
 0x693   :  { %5238 = vmatmul.bf16.gmra.mxu1 %v11490_v46  ;;  %v5317_v32 = vmax.f32 %v5200_v31, 0.0  ;;  %v11522_v46 = vor.u32 %v13184_v35, %v11519_v15  ;;  %v13279_v31 = vld [vmem:[%s21912_s5 + $0xcc] sm:$0xf0] }
 0x697   :  { %v4941_v19 = vpop.f32.mrf.mxu3 }
 0x698   :  { %v18709_v63 = vadd.f32 %v4941_v19, %v18521_v38  ;;  %v5201_v54 = vpop.f32.mrf.mxu1 }
 0x699   :  { %v5202_v30 = vadd.f32 %v5201_v54, %v18283_v41  ;;  %v11877_v41 = vld [vmem:[%s21912_s5 + $0xc0] sm:$0xf] }
 0x69a   :  { %v11878_v37 = vor.u32 %v13279_v31, %v11877_v41 }
 0x69b   :  { %v5318_v44 = vmax.f32 %v5202_v30, 0.0 }
 0x69d   :  { %v5367_v13 = vpack.c.bf16 %v5318_v44, %v5317_v32 }
 0x69e   :  { %6570 = vmatmul.bf16.gmra.mxu2 %v11862_v53  ;;  %v13192_v53 = vld [vmem:[%s21941_s28 + $0x61c] sm:$0xf] }
 0x6a0   :  { %v5204_v28 = vpop.f32.mrf.mxu1 }
 0x6a1   :  { %v5205_v38 = vadd.f32 %v5204_v28, %v18292_v58  ;;  %v11551_v58 = vld [vmem:[%s21941_s28 + $0x638] sm:$0xf0] }
 0x6a2   :  { %v11554_v44 = vor.u32 %v13192_v53, %v11551_v58 }
 0x6a3   :  { %5243 = vmatmul.bf16.gmra.mxu1 %v11522_v46  ;;  %v5319_v54 = vmax.f32 %v5205_v38, 0.0  ;;  %v13283_v46 = vld [vmem:[%s21912_s5 + $0xec] sm:$0xf0] }
 0x6a8   :  { %v5206_v19 = vpop.f32.mrf.mxu1 }
 0x6a9   :  { %v5207_v61 = vadd.f32 %v5206_v19, %v18316_v42  ;;  %v11893_v42 = vld [vmem:[%s21912_s5 + $0xe0] sm:$0xf] }
 0x6aa   :  { %v11894_v41 = vor.u32 %v13283_v46, %v11893_v42 }
 0x6ab   :  { %v5320_v30 = vmax.f32 %v5207_v61, 0.0 }
 0x6ad   :  { %v5368_v32 = vpack.c.bf16 %v5320_v30, %v5319_v54  ;;  %v13287_v54 = vld [vmem:[%s21912_s5 + $0x10c] sm:$0xf0] }
 0x6ae   :  { %6575 = vmatmul.bf16.gmra.mxu2 %v11878_v37 }
 0x6af   :  { %6706 = vmatpush.bf16.msra.mxu3 %v5368_v32 }
 0x6b0   :  { %v5209_v35 = vpop.f32.mrf.mxu1 }
 0x6b1   :  { %v5210_v15 = vadd.f32 %v5209_v35, %v18323_v6  ;;  %v13200_v6 = vld [vmem:[%s21941_s28 + $0x65c] sm:$0xf] }
 0x6b2   :  { %v13208_v35 = vld [vmem:[%s21941_s28 + $0x69c] sm:$0xf] }
 0x6b3   :  { %5248 = vmatmul.bf16.gmra.mxu1 %v11554_v44  ;;  %6707 = vmatpush.bf16.msra.mxu3 %v5367_v13  ;;  %v5321_v31 = vmax.f32 %v5210_v15, 0.0  ;;  %v11615_v15 = vld [vmem:[%s21941_s28 + $0x6b8] sm:$0xf0] }
 0x6b4   :  { %v11618_v46 = vor.u32 %v13208_v35, %v11615_v15  ;;  %v11815_v35 = vld [vmem:[%s21912_s5 + $0x50] sm:$0xf0] }
 0x6b7   :  { %6708 = vmatpush.bf16.msra.mxu3 %v5366_v25  ;;  %v11583_v25 = vld [vmem:[%s21941_s28 + $0x678] sm:$0xf0] }
 0x6b8   :  { %v5211_v28 = vpop.f32.mrf.mxu1  ;;  %v11586_v61 = vor.u32 %v13200_v6, %v11583_v25 }
 0x6b9   :  { %v5212_v38 = vadd.f32 %v5211_v28, %v18349_v52 }
 0x6bb   :  { %v5322_v19 = vmax.f32 %v5212_v38, 0.0  ;;  %6709 = vmatpush.bf16.msra.mxu3 %v18678_v43  ;;  %v11909_v43 = vld [vmem:[%s21912_s5 + $0x100] sm:$0xf] }
 0x6bc   :  { %v11910_v58 = vor.u32 %v13287_v54, %v11909_v43  ;;  %v13216_v54 = vld [vmem:[%s21941_s28 + $0x6dc] sm:$0xf] }
 0x6bd   :  { %v18747_v13 = vpack.c.bf16 %v5322_v19, %v5321_v31  ;;  %v13257_v31 = vld [vmem:[%s21912_s5 + $0x24] sm:$0xf]  ;;  %v11799_v19 = vld [vmem:[%s21912_s5 + $0x30] sm:$0xf0] }
 0x6be   :  { %6580 = vmatmul.bf16.gmra.mxu2 %v11894_v41  ;;  %v13291_v41 = vld [vmem:[%s21912_s5 + $0x12c] sm:$0xf0] }
 0x6bf   :  { %6710 = vmatpush.bf16.msra.mxu3 %v18657_v7  ;;  %v13253_v7 = vld [vmem:[%s21912_s5 + $0x4] sm:$0xf] }
 0x6c0   :  { %v5214_v52 = vpop.f32.mrf.mxu1 }
 0x6c1   :  { %v5215_v37 = vadd.f32 %v5214_v52, %v18356_v49  ;;  %v11783_v49 = vld [vmem:[%s21912_s5 + $0x10] sm:$0xf0]  ;;  %v11802_v52 = vor.u32 %v13257_v31, %v11799_v19  ;;  %v13224_v31 = vld [vmem:[%s21941_s28 + $0x71c] sm:$0xf] }
 0x6c2   :  { %v11786_v32 = vor.u32 %v13253_v7, %v11783_v49  ;;  %v11647_v7 = vld [vmem:[%s21941_s28 + $0x6f8] sm:$0xf0] }
 0x6c3   :  { %5253 = vmatmul.bf16.gmra.mxu1 %v11586_v61  ;;  %6711 = vmatpush.bf16.msra.mxu3 %v18634_v60  ;;  %v18765_v60 = vpop.f32.mrf.mxu2  ;;  %v11679_v19 = vld [vmem:[%s21941_s28 + $0x738] sm:$0xf0] }
 0x6c7   :  { %6712 = vmatpush.bf16.msra.mxu3 %v18611_v36  ;;  %v5323_v36 = vmax.f32 %v5215_v37, 0.0 }
 0x6c8   :  { %v5216_v30 = vpop.f32.mrf.mxu1 }
 0x6c9   :  { %v5217_v53 = vadd.f32 %v5216_v30, %v18382_v24  ;;  %v11650_v30 = vor.u32 %v13216_v54, %v11647_v7 }
 0x6cb   :  { %v5324_v44 = vmax.f32 %v5217_v53, 0.0  ;;  %6713 = vmatpush.bf16.msra.mxu3 %v18584_v11  ;;  %v11925_v11 = vld [vmem:[%s21912_s5 + $0x120] sm:$0xf] }
 0x6cc   :  { %v11926_v61 = vor.u32 %v13291_v41, %v11925_v11 }
 0x6cd   :  { %v18775_v42 = vpack.c.bf16 %v5324_v44, %v5323_v36  ;;  %v13295_v36 = vld [vmem:[%s21912_s5 + $0x14c] sm:$0xf0]  ;;  %v13261_v44 = vld [vmem:[%s21912_s5 + $0x44] sm:$0xf] }
 0x6ce   :  { %6585 = vmatmul.bf16.gmra.mxu2 %v11910_v58  ;;  %6714 = vmatmul.bf16.vlgmr.msra.gmra.mxu3 %v11786_v32  ;;  %v11941_v32 = vld [vmem:[%s21912_s5 + $0x140] sm:$0xf] }
 0x6d0   :  { %v5219_v24 = vpop.f32.mrf.mxu1 }
 0x6d1   :  { %v5220_v28 = vadd.f32 %v5219_v24, %v18389_v3  ;;  %v18778_v38 = vpop.f32.mrf.mxu2  ;;  %v11942_v24 = vor.u32 %v13295_v36, %v11941_v32  ;;  %v13265_v32 = vld [vmem:[%s21912_s5 + $0x64] sm:$0xf] }
 0x6d3   :  { %5258 = vmatmul.bf16.gmra.mxu1 %v11618_v46  ;;  %v5325_v37 = vmax.f32 %v5220_v28, 0.0  ;;  %v11818_v28 = vor.u32 %v13261_v44, %v11815_v35 }
 0x6d8   :  { %v5221_v3 = vpop.f32.mrf.mxu1 }
 0x6d9   :  { %v5222_v6 = vadd.f32 %v5221_v3, %v18415_v16  ;;  %v18793_v25 = vpop.f32.mrf.mxu2 }
 0x6db   :  { %v5326_v43 = vmax.f32 %v5222_v6, 0.0  ;;  %v11682_v6 = vor.u32 %v13224_v31, %v11679_v19  ;;  %v22449_v19 = vld [vmem:[#allocation27_spill] sm:$0xff] }
 0x6dd   :  { %v18801_v49 = vpack.c.bf16 %v5326_v43, %v5325_v37 }
 0x6de   :  { %6590 = vmatmul.bf16.gmra.mxu2 %v11926_v61  ;;  %6719 = vmatmul.bf16.gmra.mxu3 %v11802_v52  ;;  %v22447_v61 = vld [vmem:[#allocation33_spill] sm:$0xff] }
 0x6df   :  { %v22448_v52 = vld [vmem:[#allocation109_spill] sm:$0xff] }
 0x6e0   :  { %v5224_v16 = vpop.f32.mrf.mxu1  ;;  %v4725_v37 = vadd.f32 %v22448_v52, %v22447_v61  ;;  %v5066_v52 = vadd.f32 %v18483_v56, %v18490_v27 }
 0x6e1   :  { %v5225_v53 = vadd.f32 %v5224_v16, %v18422_v62  ;;  %v18804_v58 = vpop.f32.mrf.mxu2 }
 0x6e2   :  { %v4894_v7 = vadd.f32 %v18481_v2, %v4725_v37  ;;  %v11973_v37 = vld [vmem:[%s21912_s5 + $0x180] sm:$0xf] }
 0x6e3   :  { %5263 = vmatmul.bf16.gmra.mxu1 %v11650_v30  ;;  %v5327_v11 = vmax.f32 %v5225_v53, 0.0  ;;  %v11957_v30 = vld [vmem:[%s21912_s5 + $0x160] sm:$0xf]  ;;  %v13299_v53 = vld [vmem:[%s21912_s5 + $0x16c] sm:$0xf0] }
 0x6e4   :  { %v5063_v16 = vadd.f32 %v18457_v17, %v4894_v7  ;;  %v11958_v35 = vor.u32 %v13299_v53, %v11957_v30  ;;  %v13303_v30 = vld [vmem:[%s21912_s5 + $0x18c] sm:$0xf0] }
 0x6e5   :  { %v11974_v53 = vor.u32 %v13303_v30, %v11973_v37 }
 0x6e8   :  { %v5226_v62 = vpop.f32.mrf.mxu1 }
 0x6e9   :  { %v5227_v15 = vadd.f32 %v5226_v62, %v18448_v59  ;;  %v18819_v46 = vpop.f32.mrf.mxu2 }
 0x6eb   :  { %v5328_v41 = vmax.f32 %v5227_v15, 0.0 }
 0x6ed   :  { %v18827_v3 = vpack.c.bf16 %v5328_v41, %v5327_v11 }
 0x6ee   :  { %6595 = vmatmul.bf16.gmra.mxu2 %v11942_v24  ;;  %6724 = vmatmul.bf16.gmra.mxu3 %v11818_v28  ;;  %v13232_v24 = vld [vmem:[%s21941_s28 + $0x75c] sm:$0xf] }
 0x6ef   :  { %v11711_v28 = vld [vmem:[%s21941_s28 + $0x778] sm:$0xf0] }
 0x6f0   :  { %v5229_v59 = vpop.f32.mrf.mxu1  ;;  %v11714_v41 = vor.u32 %v13232_v24, %v11711_v28 }
 0x6f1   :  { %v5230_v43 = vadd.f32 %v5229_v59, %v18455_v47  ;;  %v18832_v54 = vpop.f32.mrf.mxu2  ;;  %v11831_v47 = vld [vmem:[%s21912_s5 + $0x70] sm:$0xf0] }
 0x6f2   :  { %v11834_v62 = vor.u32 %v13265_v32, %v11831_v47 }
 0x6f3   :  { %5268 = vmatmul.bf16.gmra.mxu1 %v11682_v6  ;;  %v5329_v15 = vmax.f32 %v5230_v43, 0.0  ;;  %v4730_v6 = vadd.f32 %v18230_v23, %v22449_v19  ;;  %v13269_v23 = vld [vmem:[%s21912_s5 + $0x84] sm:$0xf] }
 0x6f5   :  { %v4899_v61 = vadd.f32 %v18515_v34, %v4730_v6  ;;  %v11847_v34 = vld [vmem:[%s21912_s5 + $0x90] sm:$0xf0]  ;;  %v11989_v6 = vld [vmem:[%s21912_s5 + $0x1a0] sm:$0xf] }
 0x6f6   :  { %v11850_v32 = vor.u32 %v13269_v23, %v11847_v34 }
 0x6f7   :  { %v5068_v43 = vadd.f32 %v18493_v51, %v4899_v61  ;;  %v22452_v61 = vld [vmem:[#allocation137_spill] sm:$0xff] }
 0x6f8   :  { %v5231_v2 = vpop.f32.mrf.mxu1 }
 0x6f9   :  { %v5232_v36 = vadd.f32 %v5231_v2, %v5063_v16  ;;  %v18848_v44 = vpop.f32.mrf.mxu2  ;;  %v13240_v2 = vld [vmem:[%s21941_s28 + $0x79c] sm:$0xf] }
 0x6fb   :  { %v5330_v17 = vmax.f32 %v5232_v36, 0.0  ;;  %v11743_v36 = vld [vmem:[%s21941_s28 + $0x7b8] sm:$0xf0] }
 0x6fd   :  { %v18856_v11 = vpack.c.bf16 %v5330_v17, %v5329_v15  ;;  %v22450_v17 = vld [vmem:[#allocation46_spill] sm:$0xff] }
 0x6fe   :  { %6600 = vmatmul.bf16.gmra.mxu2 %v11958_v35  ;;  %6729 = vmatmul.bf16.gmra.mxu3 %v11834_v62  ;;  %v11746_v62 = vor.u32 %v13240_v2, %v11743_v36  ;;  %v4735_v24 = vadd.f32 %v18271_v1, %v22450_v17  ;;  %v13273_v1 = vld [vmem:[%s21912_s5 + $0xa4] sm:$0xf]  ;;  %v22453_v36 = vld [vmem:[#allocation38_spill] sm:$0xff]  ;;  %v22455_v17 = vld [vmem:[#allocation5_spill] sm:$0xff] }
 0x700   :  { %v5234_v31 = vpop.f32.mrf.mxu1 }
 0x701   :  { %v18860_v59 = vpop.f32.mrf.mxu2  ;;  %v5235_v7 = vadd.f32 %v5234_v31, %v5066_v52  ;;  %v22451_v31 = vld [vmem:[#allocation81_spill] sm:$0xff] }
 0x702   :  { %v5071_v19 = vadd.f32 %v22451_v31, %v18524_v26 }
 0x703   :  { %5273 = vmatmul.bf16.gmra.mxu1 %v11714_v41  ;;  %v5331_v51 = vmax.f32 %v5235_v7, 0.0  ;;  %v4904_v41 = vadd.f32 %v18549_v29, %v4735_v24  ;;  %v11863_v29 = vld [vmem:[%s21912_s5 + $0xb0] sm:$0xf0]  ;;  %v4907_v24 = vadd.f32 %v18557_v57, %v22455_v17  ;;  %v13277_v57 = vld [vmem:[%s21912_s5 + $0xc4] sm:$0xf] }
 0x704   :  { %v11866_v34 = vor.u32 %v13273_v1, %v11863_v29  ;;  %v13315_v17 = vld [vmem:[%s21912_s5 + $0x1ec] sm:$0xf0] }
 0x705   :  { %v5073_v52 = vadd.f32 %v22452_v61, %v4904_v41 }
 0x708   :  { %v5236_v27 = vpop.f32.mrf.mxu1 }
 0x709   :  { %v5237_v56 = vadd.f32 %v5236_v27, %v5068_v43  ;;  %v18878_v16 = vpop.f32.mrf.mxu2  ;;  %v13307_v43 = vld [vmem:[%s21912_s5 + $0x1ac] sm:$0xf0] }
 0x70a   :  { %v11990_v23 = vor.u32 %v13307_v43, %v11989_v6  ;;  %v12005_v6 = vld [vmem:[%s21912_s5 + $0x1c0] sm:$0xf] }
 0x70b   :  { %v5332_v47 = vmax.f32 %v5237_v56, 0.0 }
 0x70d   :  { %v5374_v35 = vpack.c.bf16 %v5332_v47, %v5331_v51 }
 0x70e   :  { %6605 = vmatmul.bf16.gmra.mxu2 %v11974_v53  ;;  %6734 = vmatmul.bf16.gmra.mxu3 %v11850_v32  ;;  %v13248_v53 = vld [vmem:[%s21941_s28 + $0x7dc] sm:$0xf] }
 0x70f   :  { %v11775_v32 = vld [vmem:[%s21941_s28 + $0x7f8] sm:$0xf0] }
 0x710   :  { %v5239_v15 = vpop.f32.mrf.mxu1  ;;  %v11778_v47 = vor.u32 %v13248_v53, %v11775_v32 }
 0x711   :  { %v18888_v28 = vpop.f32.mrf.mxu2  ;;  %v5240_v37 = vadd.f32 %v5239_v15, %v5071_v19  ;;  %v5076_v19 = vadd.f32 %v18551_v48, %v4907_v24 }
 0x713   :  { %5278 = vmatmul.bf16.gmra.mxu1 %v11746_v62  ;;  %v5333_v27 = vmax.f32 %v5240_v37, 0.0  ;;  %v22454_v62 = vld [vmem:[#allocation117_spill] sm:$0xff] }
 0x714   :  { %v4740_v15 = vadd.f32 %v22454_v62, %v22453_v36  ;;  %v13311_v37 = vld [vmem:[%s21912_s5 + $0x1cc] sm:$0xf0]  ;;  %v18943_v36 = vpop.f32.mrf.mxu3  ;;  %v12021_v62 = vld [vmem:[%s21912_s5 + $0x1e0] sm:$0xf] }
 0x715   :  { %v12006_v29 = vor.u32 %v13311_v37, %v12005_v6 }
 0x716   :  { %v4909_v31 = vadd.f32 %v18568_v21, %v4740_v15  ;;  %v11879_v21 = vld [vmem:[%s21912_s5 + $0xd0] sm:$0xf0] }
 0x718   :  { %v5241_v26 = vpop.f32.mrf.mxu1  ;;  %v5078_v61 = vadd.f32 %v18560_v22, %v4909_v31 }
 0x719   :  { %v5242_v7 = vadd.f32 %v5241_v26, %v5073_v52  ;;  %v18906_v30 = vpop.f32.mrf.mxu2  ;;  %v11882_v26 = vor.u32 %v13277_v57, %v11879_v21  ;;  %v22458_v57 = vld [vmem:[#allocation52_spill] sm:$0xff] }
 0x71a   :  { %v22459_v21 = vld [vmem:[#allocation32_spill] sm:$0xff] }
 0x71b   :  { %v5334_v56 = vmax.f32 %v5242_v7, 0.0 }
 0x71d   :  { %v5375_v51 = vpack.c.bf16 %v5334_v56, %v5333_v27  ;;  %v22456_v27 = vld [vmem:[#allocation45_spill] sm:$0xff] }
 0x71e   :  { %6610 = vmatmul.bf16.gmra.mxu2 %v11990_v23  ;;  %6739 = vmatmul.bf16.gmra.mxu3 %v11866_v34  ;;  %v22457_v56 = vld [vmem:[#allocation41_spill] sm:$0xff] }
 0x71f   :  { %v4745_v53 = vadd.f32 %v22457_v56, %v22456_v27 }
 0x720   :  { %v5244_v2 = vpop.f32.mrf.mxu1 }
 0x721   :  { %v18918_v41 = vpop.f32.mrf.mxu2  ;;  %v5245_v52 = vadd.f32 %v5244_v2, %v5076_v19  ;;  %v4914_v2 = vadd.f32 %v18586_v5, %v4745_v53  ;;  %v11895_v5 = vld [vmem:[%s21912_s5 + $0xf0] sm:$0xf0]  ;;  %v12022_v19 = vor.u32 %v13315_v17, %v12021_v62 }
 0x723   :  { %5283 = vmatmul.bf16.gmra.mxu1 %v11778_v47  ;;  %v5335_v22 = vmax.f32 %v5245_v52, 0.0  ;;  %v5083_v15 = vadd.f32 %v18575_v20, %v4914_v2  ;;  %v18963_v52 = vpop.f32.mrf.mxu3 }
 0x728   :  { %v5246_v48 = vpop.f32.mrf.mxu1 }
 0x729   :  { %v5247_v43 = vadd.f32 %v5246_v48, %v5078_v61  ;;  %v18935_v1 = vpop.f32.mrf.mxu2  ;;  %v4750_v48 = vadd.f32 %v22459_v21, %v22458_v57  ;;  %v13289_v57 = vld [vmem:[%s21912_s5 + $0x124] sm:$0xf] }
 0x72a   :  { %v22463_v21 = vld [vmem:[#allocation3_spill] sm:$0xff] }
 0x72b   :  { %v5336_v7 = vmax.f32 %v5247_v43, 0.0 }
 0x72d   :  { %v5376_v23 = vpack.c.bf16 %v5336_v7, %v5335_v22  ;;  %v11789_v7 = vld [vmem:[%s21912_s5 + $0x8] sm:$0xf] }
 0x72e   :  { %6615 = vmatmul.bf16.gmra.mxu2 %v12006_v29  ;;  %6744 = vmatmul.bf16.gmra.mxu3 %v11882_v26  ;;  %v4919_v29 = vadd.f32 %v18613_v10, %v4750_v48  ;;  %v11911_v10 = vld [vmem:[%s21912_s5 + $0x110] sm:$0xf0] }
 0x72f   :  { %6875 = vmatpush.bf16.msra.mxu0 %v5376_v23 }
 0x730   :  { %v5249_v34 = vpop.f32.mrf.mxu1  ;;  %v5088_v22 = vadd.f32 %v18602_v18, %v4919_v29  ;;  %v13256_v18 = vld [vmem:[%s21912_s5 + $0x14] sm:$0xf0] }
 0x731   :  { %v5250_v32 = vadd.f32 %v5249_v34, %v18573_v8  ;;  %v18940_v47 = vpop.f32.mrf.mxu2  ;;  %v13281_v8 = vld [vmem:[%s21912_s5 + $0xe4] sm:$0xf]  ;;  %v13260_v29 = vld [vmem:[%s21912_s5 + $0x34] sm:$0xf0] }
 0x732   :  { %v11898_v6 = vor.u32 %v13281_v8, %v11895_v5  ;;  %v22461_v5 = vld [vmem:[#allocation63_spill] sm:$0xff] }
 0x733   :  { %6876 = vmatpush.bf16.msra.mxu0 %v5375_v51  ;;  %v5337_v20 = vmax.f32 %v5250_v32, 0.0  ;;  %v11790_v32 = vor.u32 %v13256_v18, %v11789_v7 }
 0x737   :  { %6877 = vmatpush.bf16.msra.mxu0 %v5374_v35 }
 0x738   :  { %v5251_v51 = vpop.f32.mrf.mxu1 }
 0x739   :  { %v5252_v24 = vadd.f32 %v5251_v51, %v5083_v15  ;;  %v18958_v31 = vpop.f32.mrf.mxu2  ;;  %v22460_v15 = vld [vmem:[#allocation49_spill] sm:$0xff]  ;;  %v22462_v51 = vld [vmem:[#allocation50_spill] sm:$0xff] }
 0x73a   :  { %v6547_v17 = vadd.f32 %v18778_v38, %v22460_v15  ;;  %v13323_v38 = vld [vmem:[%s21912_s5 + $0x22c] sm:$0xf0] }
 0x73b   :  { %v5338_v35 = vmax.f32 %v5252_v24, 0.0  ;;  %6878 = vmatpush.bf16.msra.mxu0 %v18856_v11  ;;  %v12037_v11 = vld [vmem:[%s21912_s5 + $0x200] sm:$0xf]  ;;  %v4755_v24 = vadd.f32 %v22462_v51, %v22461_v5 }
 0x73d   :  { %v18961_v61 = vpack.c.bf16 %v5338_v35, %v5337_v20  ;;  %v12053_v35 = vld [vmem:[%s21912_s5 + $0x220] sm:$0xf] }
 0x73e   :  { %6620 = vmatmul.bf16.gmra.mxu2 %v12022_v19  ;;  %6749 = vmatmul.bf16.gmra.mxu3 %v11898_v6 }
 0x73f   :  { %6879 = vmatpush.bf16.msra.mxu0 %v18827_v3  ;;  %v13319_v3 = vld [vmem:[%s21912_s5 + $0x20c] sm:$0xf0] }
 0x740   :  { %v5254_v37 = vpop.f32.mrf.mxu1  ;;  %v12038_v34 = vor.u32 %v13319_v3, %v12037_v11 }
 0x741   :  { %v5255_v43 = vadd.f32 %v5254_v37, %v18600_v50  ;;  %v18971_v26 = vpop.f32.mrf.mxu2  ;;  %v13285_v50 = vld [vmem:[%s21912_s5 + $0x104] sm:$0xf] }
 0x742   :  { %v11914_v27 = vor.u32 %v13285_v50, %v11911_v10  ;;  %v12054_v50 = vor.u32 %v13323_v38, %v12053_v35  ;;  %v13264_v38 = vld [vmem:[%s21912_s5 + $0x54] sm:$0xf0] }
 0x743   :  { %6880 = vmatpush.bf16.msra.mxu0 %v18801_v49  ;;  %v5339_v56 = vmax.f32 %v5255_v43, 0.0 }
 0x747   :  { %6881 = vmatpush.bf16.msra.mxu0 %v18775_v42  ;;  %v18993_v42 = vpop.f32.mrf.mxu3 }
 0x748   :  { %v5256_v49 = vpop.f32.mrf.mxu1 }
 0x749   :  { %v5257_v23 = vadd.f32 %v5256_v49, %v5088_v22  ;;  %v18998_v62 = vpop.f32.mrf.mxu2 }
 0x74b   :  { %v5340_v53 = vmax.f32 %v5257_v23, 0.0  ;;  %6882 = vmatpush.bf16.msra.mxu0 %v18747_v13  ;;  %v4924_v13 = vadd.f32 %v18636_v4, %v4755_v24  ;;  %v6549_v4 = vadd.f32 %v18793_v25, %v22463_v21  ;;  %v22464_v23 = vld [vmem:[#allocation4_spill] sm:$0xff]  ;;  %v12069_v24 = vld [vmem:[%s21912_s5 + $0x240] sm:$0xf] }
 0x74d   :  { %v18996_v2 = vpack.c.bf16 %v5340_v53, %v5339_v56  ;;  %v5093_v37 = vadd.f32 %v18626_v0, %v4924_v13  ;;  %v11805_v0 = vld [vmem:[%s21912_s5 + $0x28] sm:$0xf]  ;;  %v22465_v56 = vld [vmem:[#allocation54_spill] sm:$0xff]  ;;  %v22466_v53 = vld [vmem:[#allocation97_spill] sm:$0xff]  ;;  %v5102_v13 = vpop.f32.mrf.mxu0 }
 0x74e   :  { %6625 = vmatmul.bf16.gmra.mxu2 %v12038_v34  ;;  %6754 = vmatmul.bf16.gmra.mxu3 %v11914_v27  ;;  %v11806_v25 = vor.u32 %v13260_v29, %v11805_v0  ;;  %v6552_v34 = vadd.f32 %v18804_v58, %v22464_v23  ;;  %v13327_v58 = vld [vmem:[%s21912_s5 + $0x24c] sm:$0xf0] }
 0x74f   :  { %6883 = vmatmul.bf16.vlgmr.msra.gmra.mxu0 %v11790_v32  ;;  %v4760_v32 = vadd.f32 %v22466_v53, %v22465_v56 }
 0x750   :  { %v5259_v8 = vpop.f32.mrf.mxu1 }
 0x751   :  { %v5260_v19 = vadd.f32 %v5259_v8, %v18624_v55  ;;  %v6715_v6 = vpop.f32.mrf.mxu3  ;;  %v11927_v55 = vld [vmem:[%s21912_s5 + $0x130] sm:$0xf0]  ;;  %v19023_v48 = vpop.f32.mrf.mxu2  ;;  %v4929_v51 = vadd.f32 %v18659_v12, %v4760_v32  ;;  %v22467_v12 = vld [vmem:[#allocation60_spill] sm:$0xff] }
 0x752   :  { %v19005_v20 = vadd.f32 %v6715_v6, %v6547_v17  ;;  %v11930_v10 = vor.u32 %v13289_v57, %v11927_v55  ;;  %v11943_v6 = vld [vmem:[%s21912_s5 + $0x150] sm:$0xf0]  ;;  %v6554_v35 = vadd.f32 %v18819_v46, %v22467_v12 }
 0x753   :  { %v5341_v49 = vmax.f32 %v5260_v19, 0.0  ;;  %v5098_v19 = vadd.f32 %v18655_v45, %v4929_v51  ;;  %v11821_v45 = vld [vmem:[%s21912_s5 + $0x48] sm:$0xf] }
 0x755   :  { %v5105_v56 = vpop.f32.mrf.mxu0 }
 0x758   :  { %v5261_v43 = vpop.f32.mrf.mxu1 }
 0x759   :  { %v5262_v11 = vadd.f32 %v5261_v43, %v5093_v37  ;;  %v6717_v22 = vpop.f32.mrf.mxu3  ;;  %v19040_v8 = vpop.f32.mrf.mxu2 }
 0x75a   :  { %v19031_v3 = vadd.f32 %v6717_v22, %v6549_v4  ;;  %v12070_v4 = vor.u32 %v13327_v58, %v12069_v24  ;;  %v11959_v24 = vld [vmem:[%s21912_s5 + $0x170] sm:$0xf0] }
 0x75b   :  { %v5342_v7 = vmax.f32 %v5262_v11, 0.0  ;;  %v11822_v11 = vor.u32 %v13264_v38, %v11821_v45 }
 0x75d   :  { %v19033_v18 = vpack.c.bf16 %v5342_v7, %v5341_v49  ;;  %v22469_v7 = vld [vmem:[#allocation71_spill] sm:$0xff] }
 0x75e   :  { %6630 = vmatmul.bf16.gmra.mxu2 %v12054_v50  ;;  %6759 = vmatmul.bf16.gmra.mxu3 %v11930_v10  ;;  %v22468_v50 = vld [vmem:[#allocation39_spill] sm:$0xff] }
 0x75f   :  { %6888 = vmatmul.bf16.gmra.mxu0 %v11806_v25  ;;  %v6557_v10 = vadd.f32 %v18832_v54, %v22468_v50  ;;  %v22470_v25 = vld [vmem:[#allocation135_spill] sm:$0xff]  ;;  %v13331_v54 = vld [vmem:[%s21912_s5 + $0x26c] sm:$0xf0]  ;;  %v22473_v50 = vld [vmem:[#allocation110_spill] sm:$0xff] }
 0x760   :  { %v5264_v27 = vpop.f32.mrf.mxu1  ;;  %v4765_v23 = vadd.f32 %v22470_v25, %v22469_v7 }
 0x761   :  { %v5265_v15 = vadd.f32 %v5264_v27, %v18647_v39  ;;  %v6720_v17 = vpop.f32.mrf.mxu3  ;;  %v13293_v39 = vld [vmem:[%s21912_s5 + $0x144] sm:$0xf]  ;;  %v19068_v22 = vpop.f32.mrf.mxu2 }
 0x762   :  { %v19042_v5 = vadd.f32 %v6720_v17, %v6552_v34  ;;  %v11946_v43 = vor.u32 %v13293_v39, %v11943_v6  ;;  %v4934_v32 = vadd.f32 %v18680_v9, %v4765_v23  ;;  %v12085_v17 = vld [vmem:[%s21912_s5 + $0x260] sm:$0xf]  ;;  %v22471_v9 = vld [vmem:[#allocation80_spill] sm:$0xff]  ;;  %v13268_v6 = vld [vmem:[%s21912_s5 + $0x74] sm:$0xf0] }
 0x763   :  { %v5343_v0 = vmax.f32 %v5265_v15, 0.0  ;;  %v11837_v39 = vld [vmem:[%s21912_s5 + $0x68] sm:$0xf] }
 0x764   :  { %v5103_v51 = vadd.f32 %v5102_v13, %v4934_v32  ;;  %v12101_v32 = vld [vmem:[%s21912_s5 + $0x280] sm:$0xf] }
 0x768   :  { %v5266_v37 = vpop.f32.mrf.mxu1 }
 0x769   :  { %v5267_v57 = vadd.f32 %v5266_v37, %v5098_v19  ;;  %v6722_v55 = vpop.f32.mrf.mxu3  ;;  %v19080_v15 = vpop.f32.mrf.mxu2  ;;  %v6559_v19 = vadd.f32 %v18848_v44, %v22471_v9  ;;  %v12086_v37 = vor.u32 %v13331_v54, %v12085_v17  ;;  %v13301_v54 = vld [vmem:[%s21912_s5 + $0x184] sm:$0xf]  ;;  %v13272_v9 = vld [vmem:[%s21912_s5 + $0x94] sm:$0xf0] }
 0x76a   :  { %v19066_v21 = vadd.f32 %v6722_v55, %v6554_v35  ;;  %v11838_v55 = vor.u32 %v13268_v6, %v11837_v39 }
 0x76b   :  { %v5344_v29 = vmax.f32 %v5267_v57, 0.0 }
 0x76d   :  { %v19070_v46 = vpack.c.bf16 %v5344_v29, %v5343_v0 }
 0x76e   :  { %6635 = vmatmul.bf16.gmra.mxu2 %v12070_v4  ;;  %6764 = vmatmul.bf16.gmra.mxu3 %v11946_v43  ;;  %v5107_v4 = vpop.f32.mrf.mxu0  ;;  %v22472_v43 = vld [vmem:[#allocation9_spill] sm:$0xff] }
 0x76f   :  { %6893 = vmatmul.bf16.gmra.mxu0 %v11822_v11  ;;  %v6562_v0 = vadd.f32 %v18860_v59, %v22472_v43 }
 0x770   :  { %v5269_v49 = vpop.f32.mrf.mxu1 }
 0x771   :  { %v5270_v34 = vadd.f32 %v5269_v49, %v18670_v14  ;;  %v6725_v27 = vpop.f32.mrf.mxu3  ;;  %v13297_v14 = vld [vmem:[%s21912_s5 + $0x164] sm:$0xf]  ;;  %v19108_v29 = vpop.f32.mrf.mxu2 }
 0x772   :  { %v19077_v53 = vadd.f32 %v6725_v27, %v6557_v10  ;;  %v11962_v45 = vor.u32 %v13297_v14, %v11959_v24  ;;  %v22474_v10 = vld [vmem:[#allocation82_spill] sm:$0xff]  ;;  %v11853_v24 = vld [vmem:[%s21912_s5 + $0x88] sm:$0xf] }
 0x773   :  { %v5345_v38 = vmax.f32 %v5270_v34, 0.0  ;;  %v4770_v49 = vadd.f32 %v22474_v10, %v22473_v50  ;;  %v5106_v34 = vadd.f32 %v5105_v56, %v18690_v40  ;;  %v22475_v40 = vld [vmem:[#allocation12_spill] sm:$0xff] }
 0x774   :  { %v6564_v56 = vadd.f32 %v18878_v16, %v22475_v40  ;;  %v11854_v16 = vor.u32 %v13272_v9, %v11853_v24  ;;  %v13276_v40 = vld [vmem:[%s21912_s5 + $0xb4] sm:$0xf0] }
 0x775   :  { %v4939_v23 = vadd.f32 %v18699_v33, %v4770_v49  ;;  %v11975_v33 = vld [vmem:[%s21912_s5 + $0x190] sm:$0xf0] }
 0x776   :  { %v5110_v27 = vpop.f32.mrf.mxu0 }
 0x777   :  { %v5108_v17 = vadd.f32 %v5107_v4, %v4939_v23 }
 0x778   :  { %v5271_v58 = vpop.f32.mrf.mxu1 }
 0x779   :  { %v5272_v13 = vadd.f32 %v5271_v58, %v5103_v51  ;;  %v6727_v12 = vpop.f32.mrf.mxu3  ;;  %v13335_v51 = vld [vmem:[%s21912_s5 + $0x28c] sm:$0xf0]  ;;  %v19136_v39 = vpop.f32.mrf.mxu2 }
 0x77a   :  { %v19102_v35 = vadd.f32 %v6727_v12, %v6559_v19  ;;  %v11978_v12 = vor.u32 %v13301_v54, %v11975_v33  ;;  %v22479_v54 = vld [vmem:[#allocation108_spill] sm:$0xff] }
 0x77b   :  { %v5346_v57 = vmax.f32 %v5272_v13, 0.0  ;;  %v12102_v13 = vor.u32 %v13335_v51, %v12101_v32  ;;  %v12117_v32 = vld [vmem:[%s21912_s5 + $0x2a0] sm:$0xf]  ;;  %v13305_v51 = vld [vmem:[%s21912_s5 + $0x1a4] sm:$0xf] }
 0x77c   :  { %v11869_v33 = vld [vmem:[%s21912_s5 + $0xa8] sm:$0xf] }
 0x77d   :  { %v19104_v44 = vpack.c.bf16 %v5346_v57, %v5345_v38 }
 0x77e   :  { %6640 = vmatmul.bf16.gmra.mxu2 %v12086_v37  ;;  %6769 = vmatmul.bf16.gmra.mxu3 %v11962_v45  ;;  %v5112_v57 = vpop.f32.mrf.mxu0 }
 0x77f   :  { %6898 = vmatmul.bf16.gmra.mxu0 %v11838_v55  ;;  %v22476_v55 = vld [vmem:[#allocation18_spill] sm:$0xff] }
 0x780   :  { %v5274_v11 = vpop.f32.mrf.mxu1  ;;  %v6567_v4 = vadd.f32 %v18888_v28, %v22476_v55  ;;  %v13339_v28 = vld [vmem:[%s21912_s5 + $0x2ac] sm:$0xf0] }
 0x781   :  { %v6730_v7 = vpop.f32.mrf.mxu3  ;;  %v5275_v59 = vadd.f32 %v5274_v11, %v5106_v34  ;;  %v22478_v11 = vld [vmem:[#allocation102_spill] sm:$0xff]  ;;  %v19149_v23 = vpop.f32.mrf.mxu2  ;;  %v5111_v34 = vadd.f32 %v5110_v27, %v18709_v63  ;;  %v6569_v63 = vadd.f32 %v18906_v30, %v22479_v54 }
 0x782   :  { %v19112_v25 = vadd.f32 %v6730_v7, %v6562_v0  ;;  %v22477_v0 = vld [vmem:[#allocation112_spill] sm:$0xff] }
 0x783   :  { %v5347_v37 = vmax.f32 %v5275_v59, 0.0  ;;  %v4775_v50 = vadd.f32 %v22478_v11, %v22477_v0  ;;  %v22482_v0 = vld [vmem:[#allocation89_spill] sm:$0xff] }
 0x784   :  { %v4947_v11 = vadd.f32 %v18963_v52, %v22482_v0  ;;  %v13309_v52 = vld [vmem:[%s21912_s5 + $0x1c4] sm:$0xf]  ;;  %v12023_v0 = vld [vmem:[%s21912_s5 + $0x1f0] sm:$0xf0] }
 0x785   :  { %v4944_v7 = vadd.f32 %v18943_v36, %v4775_v50  ;;  %v11991_v36 = vld [vmem:[%s21912_s5 + $0x1b0] sm:$0xf0] }
 0x786   :  { %v5115_v24 = vpop.f32.mrf.mxu0 }
 0x788   :  { %v5276_v14 = vpop.f32.mrf.mxu1 }
 0x789   :  { %v5277_v19 = vadd.f32 %v5276_v14, %v5108_v17  ;;  %v6732_v58 = vpop.f32.mrf.mxu3  ;;  %v5113_v17 = vadd.f32 %v5112_v57, %v4944_v7 }
 0x78a   :  { %v19138_v6 = vadd.f32 %v6732_v58, %v6564_v56  ;;  %v11994_v58 = vor.u32 %v13305_v51, %v11991_v36 }
 0x78b   :  { %v5348_v45 = vmax.f32 %v5277_v19, 0.0  ;;  %v12118_v19 = vor.u32 %v13339_v28, %v12117_v32  ;;  %v5116_v32 = vadd.f32 %v5115_v24, %v4947_v11  ;;  %v22483_v28 = vld [vmem:[#allocation106_spill] sm:$0xff] }
 0x78c   :  { %v6574_v51 = vadd.f32 %v18935_v1, %v22483_v28  ;;  %v22485_v11 = vld [vmem:[#allocation42_spill] sm:$0xff] }
 0x78d   :  { %v19140_v38 = vpack.c.bf16 %v5348_v45, %v5347_v37  ;;  %v11870_v37 = vor.u32 %v13276_v40, %v11869_v33  ;;  %v19174_v45 = vpop.f32.mrf.mxu2 }
 0x78e   :  { %6645 = vmatmul.bf16.gmra.mxu2 %v12102_v13  ;;  %6774 = vmatmul.bf16.gmra.mxu3 %v11978_v12 }
 0x78f   :  { %6903 = vmatmul.bf16.gmra.mxu0 %v11854_v16  ;;  %v22480_v16 = vld [vmem:[#allocation99_spill] sm:$0xff] }
 0x790   :  { %v5279_v43 = vpop.f32.mrf.mxu1  ;;  %v6572_v57 = vadd.f32 %v18918_v41, %v22480_v16 }
 0x791   :  { %v6735_v10 = vpop.f32.mrf.mxu3  ;;  %v5280_v59 = vadd.f32 %v5279_v43, %v5111_v34  ;;  %v5117_v34 = vpop.f32.mrf.mxu0 }
 0x792   :  { %v19146_v49 = vadd.f32 %v6735_v10, %v6567_v4  ;;  %v22481_v4 = vld [vmem:[#allocation114_spill] sm:$0xff] }
 0x793   :  { %v5349_v13 = vmax.f32 %v5280_v59, 0.0  ;;  %v4780_v43 = vadd.f32 %v18765_v60, %v22481_v4  ;;  %v13343_v60 = vld [vmem:[%s21912_s5 + $0x2cc] sm:$0xf0]  ;;  %v12149_v4 = vld [vmem:[%s21912_s5 + $0x2e0] sm:$0xf] }
 0x795   :  { %v4949_v7 = vadd.f32 %v18993_v42, %v4780_v43  ;;  %v12007_v42 = vld [vmem:[%s21912_s5 + $0x1d0] sm:$0xf0]  ;;  %v19199_v36 = vpop.f32.mrf.mxu2  ;;  %v13347_v43 = vld [vmem:[%s21912_s5 + $0x2ec] sm:$0xf0] }
 0x796   :  { %v12010_v24 = vor.u32 %v13309_v52, %v12007_v42 }
 0x797   :  { %v5118_v59 = vadd.f32 %v5117_v34, %v4949_v7 }
 0x798   :  { %v5281_v27 = vpop.f32.mrf.mxu1 }
 0x799   :  { %v5282_v56 = vadd.f32 %v5281_v27, %v5113_v17  ;;  %v6737_v14 = vpop.f32.mrf.mxu3  ;;  %v12133_v17 = vld [vmem:[%s21912_s5 + $0x2c0] sm:$0xf]  ;;  %v13280_v27 = vld [vmem:[%s21912_s5 + $0xd4] sm:$0xf0] }
 0x79a   :  { %v19172_v9 = vadd.f32 %v6737_v14, %v6569_v63  ;;  %v11885_v63 = vld [vmem:[%s21912_s5 + $0xc8] sm:$0xf]  ;;  %v12134_v14 = vor.u32 %v13343_v60, %v12133_v17 }
 0x79b   :  { %v5350_v12 = vmax.f32 %v5282_v56, 0.0  ;;  %v11886_v1 = vor.u32 %v13280_v27, %v11885_v63  ;;  %v13288_v27 = vld [vmem:[%s21912_s5 + $0x114] sm:$0xf0] }
 0x79d   :  { %v5383_v30 = vpack.c.bf16 %v5350_v12, %v5349_v13  ;;  %v22484_v12 = vld [vmem:[#allocation34_spill] sm:$0xff] }
 0x79e   :  { %6650 = vmatmul.bf16.gmra.mxu2 %v12118_v19  ;;  %6779 = vmatmul.bf16.gmra.mxu3 %v11994_v58 }
 0x79f   :  { %6908 = vmatmul.bf16.gmra.mxu0 %v11870_v37  ;;  %v6577_v37 = vadd.f32 %v18940_v47, %v22484_v12  ;;  %v13313_v47 = vld [vmem:[%s21912_s5 + $0x1e4] sm:$0xf]  ;;  %v22488_v12 = vld [vmem:[#allocation113_spill] sm:$0xff] }
 0x7a0   :  { %v5284_v55 = vpop.f32.mrf.mxu1  ;;  %v12026_v17 = vor.u32 %v13313_v47, %v12023_v0  ;;  %v13355_v0 = vld [vmem:[%s21912_s5 + $0x32c] sm:$0xf0] }
 0x7a1   :  { %v6740_v50 = vpop.f32.mrf.mxu3  ;;  %v5285_v41 = vadd.f32 %v5284_v55, %v5116_v32  ;;  %v12150_v32 = vor.u32 %v13347_v43, %v12149_v4 }
 0x7a2   :  { %v19182_v10 = vadd.f32 %v6740_v50, %v6572_v57  ;;  %v19211_v57 = vpop.f32.mrf.mxu2  ;;  %v11901_v50 = vld [vmem:[%s21912_s5 + $0xe8] sm:$0xf] }
 0x7a3   :  { %v5351_v19 = vmax.f32 %v5285_v41, 0.0 }
 0x7a8   :  { %v5286_v54 = vpop.f32.mrf.mxu1 }
 0x7a9   :  { %v5287_v33 = vadd.f32 %v5286_v54, %v5118_v59  ;;  %v6742_v40 = vpop.f32.mrf.mxu3  ;;  %v22487_v54 = vld [vmem:[#allocation47_spill] sm:$0xff] }
 0x7aa   :  { %v19207_v56 = vadd.f32 %v6742_v40, %v6574_v51  ;;  %v19239_v41 = vpop.f32.mrf.mxu2  ;;  %v13351_v51 = vld [vmem:[%s21912_s5 + $0x30c] sm:$0xf0]  ;;  %v6584_v63 = vadd.f32 %v18998_v62, %v22487_v54 }
 0x7ab   :  { %v5352_v58 = vmax.f32 %v5287_v33, 0.0  ;;  %v11791_v33 = vld [vmem:[%s21912_s5 + $0x18] sm:$0xf0] }
 0x7ad   :  { %v5384_v13 = vpack.c.bf16 %v5352_v58, %v5351_v19 }
 0x7ae   :  { %6655 = vmatmul.bf16.gmra.mxu2 %v12134_v14  ;;  %6784 = vmatmul.bf16.gmra.mxu3 %v12010_v24 }
 0x7af   :  { %6913 = vmatmul.bf16.gmra.mxu0 %v11886_v1  ;;  %7044 = vmatpush.bf16.msrb.mxu1 %v5384_v13 }
 0x7b1   :  { %v6745_v16 = vpop.f32.mrf.mxu3 }
 0x7b2   :  { %v19213_v55 = vadd.f32 %v6745_v16, %v6577_v37  ;;  %v19247_v28 = vpop.f32.mrf.mxu2  ;;  %v6587_v37 = vadd.f32 %v19023_v48, %v22488_v12  ;;  %v13321_v48 = vld [vmem:[%s21912_s5 + $0x224] sm:$0xf]  ;;  %v11823_v12 = vld [vmem:[%s21912_s5 + $0x58] sm:$0xf0] }
 0x7b3   :  { %7045 = vmatpush.bf16.msrb.mxu1 %v5383_v30  ;;  %v6579_v30 = vadd.f32 %v18958_v31, %v22485_v11  ;;  %v22486_v31 = vld [vmem:[#allocation61_spill] sm:$0xff] }
 0x7b4   :  { %v6582_v60 = vadd.f32 %v18971_v26, %v22486_v31  ;;  %v13317_v26 = vld [vmem:[%s21912_s5 + $0x204] sm:$0xf]  ;;  %v12055_v11 = vld [vmem:[%s21912_s5 + $0x230] sm:$0xf0] }
 0x7b7   :  { %7046 = vmatpush.bf16.msrb.mxu1 %v19140_v38  ;;  %v13284_v38 = vld [vmem:[%s21912_s5 + $0xf4] sm:$0xf0] }
 0x7b8   :  { %v11902_v59 = vor.u32 %v13284_v38, %v11901_v50  ;;  %v13292_v38 = vld [vmem:[%s21912_s5 + $0x134] sm:$0xf0] }
 0x7b9   :  { %v6747_v7 = vpop.f32.mrf.mxu3 }
 0x7ba   :  { %v19236_v34 = vadd.f32 %v6747_v7, %v6579_v30  ;;  %v19284_v16 = vpop.f32.mrf.mxu2  ;;  %v22489_v30 = vld [vmem:[#allocation111_spill] sm:$0xff]  ;;  %v13258_v7 = vld [vmem:[%s21912_s5 + $0x2c] sm:$0xf] }
 0x7bb   :  { %7047 = vmatpush.bf16.msrb.mxu1 %v19104_v44  ;;  %v12165_v44 = vld [vmem:[%s21912_s5 + $0x300] sm:$0xf]  ;;  %v6589_v50 = vadd.f32 %v19040_v8, %v22489_v30  ;;  %v22492_v30 = vld [vmem:[#allocation57_spill] sm:$0xff] }
 0x7bc   :  { %v12166_v24 = vor.u32 %v13351_v51, %v12165_v44 }
 0x7be   :  { %6660 = vmatmul.bf16.gmra.mxu2 %v12150_v32  ;;  %6789 = vmatmul.bf16.gmra.mxu3 %v12026_v17  ;;  %v11807_v32 = vld [vmem:[%s21912_s5 + $0x38] sm:$0xf0] }
 0x7bf   :  { %6918 = vmatmul.bf16.gmra.mxu0 %v11902_v59  ;;  %7048 = vmatpush.bf16.msrb.mxu1 %v19070_v46  ;;  %v11917_v46 = vld [vmem:[%s21912_s5 + $0x108] sm:$0xf]  ;;  %v11810_v44 = vor.u32 %v13258_v7, %v11807_v32 }
 0x7c0   :  { %v11918_v62 = vor.u32 %v13288_v27, %v11917_v46 }
 0x7c1   :  { %v6750_v52 = vpop.f32.mrf.mxu3 }
 0x7c2   :  { %v19244_v42 = vadd.f32 %v6750_v52, %v6582_v60  ;;  %v19317_v59 = vpop.f32.mrf.mxu2  ;;  %v12058_v52 = vor.u32 %v13321_v48, %v12055_v11 }
 0x7c3   :  { %7049 = vmatpush.bf16.msrb.mxu1 %v19033_v18  ;;  %v12039_v18 = vld [vmem:[%s21912_s5 + $0x210] sm:$0xf0] }
 0x7c4   :  { %v12042_v19 = vor.u32 %v13317_v26, %v12039_v18  ;;  %v22490_v18 = vld [vmem:[#allocation29_spill] sm:$0xff] }
 0x7c5   :  { %v6592_v46 = vadd.f32 %v19068_v22, %v22490_v18  ;;  %v13325_v22 = vld [vmem:[%s21912_s5 + $0x244] sm:$0xf]  ;;  %v13300_v18 = vld [vmem:[%s21912_s5 + $0x174] sm:$0xf0] }
 0x7c7   :  { %7050 = vmatpush.bf16.msrb.mxu1 %v18996_v2  ;;  %v13254_v2 = vld [vmem:[%s21912_s5 + $0xc] sm:$0xf] }
 0x7c8   :  { %v11794_v58 = vor.u32 %v13254_v2, %v11791_v33 }
 0x7c9   :  { %v6752_v40 = vpop.f32.mrf.mxu3 }
 0x7ca   :  { %v19276_v14 = vadd.f32 %v6752_v40, %v6584_v63  ;;  %v19328_v27 = vpop.f32.mrf.mxu2  ;;  %v13359_v40 = vld [vmem:[%s21912_s5 + $0x34c] sm:$0xf0] }
 0x7cb   :  { %7051 = vmatpush.bf16.msrb.mxu1 %v18961_v61 }
 0x7cc   :  { %v6884_v1 = vpop.f32.mrf.mxu0 }
 0x7cd   :  { %v19280_v13 = vadd.f32 %v6884_v1, %v19005_v20  ;;  %v12181_v20 = vld [vmem:[%s21912_s5 + $0x320] sm:$0xf]  ;;  %v13262_v1 = vld [vmem:[%s21912_s5 + $0x4c] sm:$0xf] }
 0x7ce   :  { %6665 = vmatmul.bf16.gmra.mxu2 %v12166_v24  ;;  %6794 = vmatmul.bf16.gmra.mxu3 %v12042_v19  ;;  %v12182_v60 = vor.u32 %v13355_v0, %v12181_v20  ;;  %v12071_v24 = vld [vmem:[%s21912_s5 + $0x250] sm:$0xf0]  ;;  %v11826_v48 = vor.u32 %v13262_v1, %v11823_v12 }
 0x7cf   :  { %6923 = vmatmul.bf16.gmra.mxu0 %v11918_v62  ;;  %7052 = vmatmul.bf16.vlgmr.msrb.gmra.mxu1 %v11794_v58  ;;  %v22491_v19 = vld [vmem:[#allocation65_spill] sm:$0xff]  ;;  %v12074_v20 = vor.u32 %v13325_v22, %v12071_v24 }
 0x7d0   :  { %v6594_v62 = vadd.f32 %v19080_v15, %v22491_v19  ;;  %v13296_v58 = vld [vmem:[%s21912_s5 + $0x154] sm:$0xf0] }
 0x7d1   :  { %v6755_v4 = vpop.f32.mrf.mxu3 }
 0x7d2   :  { %v19286_v43 = vadd.f32 %v6755_v4, %v6587_v37 }
 0x7d4   :  { %v6886_v47 = vpop.f32.mrf.mxu0 }
 0x7d5   :  { %v19289_v61 = vadd.f32 %v6886_v47, %v19031_v3  ;;  %v11933_v3 = vld [vmem:[%s21912_s5 + $0x128] sm:$0xf] }
 0x7d6   :  { %v11934_v8 = vor.u32 %v13292_v38, %v11933_v3  ;;  %v19364_v3 = vpop.f32.mrf.mxu2 }
 0x7d9   :  { %v6757_v17 = vpop.f32.mrf.mxu3 }
 0x7da   :  { %v19319_v31 = vadd.f32 %v6757_v17, %v6589_v50  ;;  %v6597_v50 = vadd.f32 %v19108_v29, %v22492_v30  ;;  %v12087_v29 = vld [vmem:[%s21912_s5 + $0x270] sm:$0xf0] }
 0x7dc   :  { %v6889_v51 = vpop.f32.mrf.mxu0 }
 0x7dd   :  { %v19322_v26 = vadd.f32 %v6889_v51, %v19042_v5  ;;  %v12197_v5 = vld [vmem:[%s21912_s5 + $0x340] sm:$0xf] }
 0x7de   :  { %6670 = vmatmul.bf16.gmra.mxu2 %v12182_v60  ;;  %6799 = vmatmul.bf16.gmra.mxu3 %v12058_v52  ;;  %v12198_v47 = vor.u32 %v13359_v40, %v12197_v5  ;;  %v13363_v60 = vld [vmem:[%s21912_s5 + $0x36c] sm:$0xf0]  ;;  %v13329_v52 = vld [vmem:[%s21912_s5 + $0x264] sm:$0xf]  ;;  %v19390_v51 = vpop.f32.mrf.mxu2 }
 0x7df   :  { %6928 = vmatmul.bf16.gmra.mxu0 %v11934_v8  ;;  %7057 = vmatmul.bf16.gmra.mxu1 %v11810_v44  ;;  %v22493_v8 = vld [vmem:[#allocation77_spill] sm:$0xff]  ;;  %v12090_v22 = vor.u32 %v13329_v52, %v12087_v29 }
 0x7e0   :  { %v6599_v44 = vadd.f32 %v19136_v39, %v22493_v8 }
 0x7e1   :  { %v6760_v54 = vpop.f32.mrf.mxu3 }
 0x7e2   :  { %v19326_v63 = vadd.f32 %v6760_v54, %v6592_v46  ;;  %v13266_v46 = vld [vmem:[%s21912_s5 + $0x6c] sm:$0xf]  ;;  %v11839_v54 = vld [vmem:[%s21912_s5 + $0x78] sm:$0xf0] }
 0x7e3   :  { %v11842_v24 = vor.u32 %v13266_v46, %v11839_v54  ;;  %v22496_v46 = vld [vmem:[#allocation107_spill] sm:$0xff] }
 0x7e4   :  { %v6891_v2 = vpop.f32.mrf.mxu0  ;;  %v6607_v54 = vadd.f32 %v19199_v36, %v22496_v46  ;;  %v13337_v36 = vld [vmem:[%s21912_s5 + $0x2a4] sm:$0xf]  ;;  %v13375_v46 = vld [vmem:[%s21912_s5 + $0x3cc] sm:$0xf0] }
 0x7e5   :  { %v19331_v33 = vadd.f32 %v6891_v2, %v19066_v21  ;;  %v11949_v21 = vld [vmem:[%s21912_s5 + $0x148] sm:$0xf] }
 0x7e6   :  { %v11950_v0 = vor.u32 %v13296_v58, %v11949_v21  ;;  %v19408_v12 = vpop.f32.mrf.mxu2 }
 0x7e9   :  { %v6762_v37 = vpop.f32.mrf.mxu3 }
 0x7ea   :  { %v19359_v4 = vadd.f32 %v6762_v37, %v6594_v62  ;;  %v22494_v62 = vld [vmem:[#allocation25_spill] sm:$0xff] }
 0x7eb   :  { %v6602_v58 = vadd.f32 %v19149_v23, %v22494_v62  ;;  %v13333_v23 = vld [vmem:[%s21912_s5 + $0x284] sm:$0xf]  ;;  %v12119_v62 = vld [vmem:[%s21912_s5 + $0x2b0] sm:$0xf0] }
 0x7ec   :  { %v6894_v15 = vpop.f32.mrf.mxu0 }
 0x7ed   :  { %v19362_v11 = vadd.f32 %v6894_v15, %v19077_v53  ;;  %v12213_v53 = vld [vmem:[%s21912_s5 + $0x360] sm:$0xf] }
 0x7ee   :  { %6675 = vmatmul.bf16.gmra.mxu2 %v12198_v47  ;;  %6804 = vmatmul.bf16.gmra.mxu3 %v12074_v20  ;;  %v12214_v40 = vor.u32 %v13363_v60, %v12213_v53  ;;  %v22495_v15 = vld [vmem:[#allocation11_spill] sm:$0xff] }
 0x7ef   :  { %6933 = vmatmul.bf16.gmra.mxu0 %v11950_v0  ;;  %7062 = vmatmul.bf16.gmra.mxu1 %v11826_v48  ;;  %v13367_v0 = vld [vmem:[%s21912_s5 + $0x38c] sm:$0xf0]  ;;  %v12103_v48 = vld [vmem:[%s21912_s5 + $0x290] sm:$0xf0]  ;;  %v6604_v30 = vadd.f32 %v19174_v45, %v22495_v15  ;;  %v19443_v45 = vpop.f32.mrf.mxu2  ;;  %v12122_v15 = vor.u32 %v13337_v36, %v12119_v62  ;;  %v11887_v36 = vld [vmem:[%s21912_s5 + $0xd8] sm:$0xf0] }
 0x7f0   :  { %v12106_v29 = vor.u32 %v13333_v23, %v12103_v48 }
 0x7f1   :  { %v6765_v38 = vpop.f32.mrf.mxu3 }
 0x7f2   :  { %v19368_v7 = vadd.f32 %v6765_v38, %v6597_v50  ;;  %v13304_v50 = vld [vmem:[%s21912_s5 + $0x194] sm:$0xf0]  ;;  %v13270_v38 = vld [vmem:[%s21912_s5 + $0x8c] sm:$0xf] }
 0x7f4   :  { %v6896_v32 = vpop.f32.mrf.mxu0 }
 0x7f5   :  { %v19371_v17 = vadd.f32 %v6896_v32, %v19102_v35  ;;  %v11965_v35 = vld [vmem:[%s21912_s5 + $0x168] sm:$0xf]  ;;  %v11855_v32 = vld [vmem:[%s21912_s5 + $0x98] sm:$0xf0] }
 0x7f6   :  { %v11966_v39 = vor.u32 %v13300_v18, %v11965_v35  ;;  %v11858_v8 = vor.u32 %v13270_v38, %v11855_v32  ;;  %v22498_v32 = vld [vmem:[#allocation105_spill] sm:$0xff] }
 0x7f9   :  { %v6767_v2 = vpop.f32.mrf.mxu3 }
 0x7fa   :  { %v19401_v5 = vadd.f32 %v6767_v2, %v6599_v44 }
 0x7fc   :  { %v6899_v21 = vpop.f32.mrf.mxu0 }
 0x7fd   :  { %v19404_v19 = vadd.f32 %v6899_v21, %v19112_v25  ;;  %v12229_v25 = vld [vmem:[%s21912_s5 + $0x380] sm:$0xf]  ;;  %v13371_v21 = vld [vmem:[%s21912_s5 + $0x3ac] sm:$0xf0] }
 0x7fe   :  { %6680 = vmatmul.bf16.gmra.mxu2 %v12214_v40  ;;  %6809 = vmatmul.bf16.gmra.mxu3 %v12090_v22  ;;  %v12230_v52 = vor.u32 %v13367_v0, %v12229_v25  ;;  %v13274_v25 = vld [vmem:[%s21912_s5 + $0xac] sm:$0xf]  ;;  %v11871_v0 = vld [vmem:[%s21912_s5 + $0xb8] sm:$0xf0] }
 0x7ff   :  { %6938 = vmatmul.bf16.gmra.mxu0 %v11966_v39  ;;  %7067 = vmatmul.bf16.gmra.mxu1 %v11842_v24  ;;  %v19455_v24 = vpop.f32.mrf.mxu2 }
 0x801   :  { %v6770_v1 = vpop.f32.mrf.mxu3 }
 0x802   :  { %v19410_v37 = vadd.f32 %v6770_v1, %v6602_v58  ;;  %v22497_v58 = vld [vmem:[#allocation14_spill] sm:$0xff] }
 0x803   :  { %v6609_v1 = vadd.f32 %v19211_v57, %v22497_v58 }
 0x804   :  { %v6901_v47 = vpop.f32.mrf.mxu0 }
 0x805   :  { %v19413_v20 = vadd.f32 %v6901_v47, %v19138_v6  ;;  %v11981_v6 = vld [vmem:[%s21912_s5 + $0x188] sm:$0xf]  ;;  %v13308_v47 = vld [vmem:[%s21912_s5 + $0x1b4] sm:$0xf0] }
 0x806   :  { %v11982_v35 = vor.u32 %v13304_v50, %v11981_v6  ;;  %v11874_v50 = vor.u32 %v13274_v25, %v11871_v0 }
 0x809   :  { %v6772_v53 = vpop.f32.mrf.mxu3 }
 0x80a   :  { %v19441_v60 = vadd.f32 %v6772_v53, %v6604_v30  ;;  %v6612_v53 = vadd.f32 %v19239_v41, %v22498_v32  ;;  %v13341_v41 = vld [vmem:[%s21912_s5 + $0x2c4] sm:$0xf] }
 0x80c   :  { %v6904_v44 = vpop.f32.mrf.mxu0 }
 0x80d   :  { %v19446_v18 = vadd.f32 %v6904_v44, %v19146_v49  ;;  %v12245_v49 = vld [vmem:[%s21912_s5 + $0x3a0] sm:$0xf] }
 0x80e   :  { %6685 = vmatmul.bf16.gmra.mxu2 %v12230_v52  ;;  %6814 = vmatmul.bf16.gmra.mxu3 %v12106_v29  ;;  %v12246_v6 = vor.u32 %v13371_v21, %v12245_v49  ;;  %v19490_v52 = vpop.f32.mrf.mxu2  ;;  %v13312_v49 = vld [vmem:[%s21912_s5 + $0x1d4] sm:$0xf0]  ;;  %v13278_v21 = vld [vmem:[%s21912_s5 + $0xcc] sm:$0xf] }
 0x80f   :  { %6943 = vmatmul.bf16.gmra.mxu0 %v11982_v35  ;;  %7072 = vmatmul.bf16.gmra.mxu1 %v11858_v8  ;;  %v11890_v25 = vor.u32 %v13278_v21, %v11887_v36 }
 0x811   :  { %v6775_v2 = vpop.f32.mrf.mxu3 }
 0x812   :  { %v19450_v40 = vadd.f32 %v6775_v2, %v6607_v54  ;;  %v12135_v54 = vld [vmem:[%s21912_s5 + $0x2d0] sm:$0xf0]  ;;  %v22499_v2 = vld [vmem:[#allocation104_spill] sm:$0xff] }
 0x814   :  { %v6906_v22 = vpop.f32.mrf.mxu0 }
 0x815   :  { %v19453_v39 = vadd.f32 %v6906_v22, %v19172_v9  ;;  %v11997_v9 = vld [vmem:[%s21912_s5 + $0x1a8] sm:$0xf]  ;;  %v6614_v22 = vadd.f32 %v19247_v28, %v22499_v2 }
 0x816   :  { %v11998_v30 = vor.u32 %v13308_v47, %v11997_v9  ;;  %v19523_v9 = vpop.f32.mrf.mxu2  ;;  %v12138_v47 = vor.u32 %v13341_v41, %v12135_v54  ;;  %v13316_v41 = vld [vmem:[%s21912_s5 + $0x1f4] sm:$0xf0]  ;;  %v13282_v54 = vld [vmem:[%s21912_s5 + $0xec] sm:$0xf] }
 0x819   :  { %v6777_v23 = vpop.f32.mrf.mxu3 }
 0x81a   :  { %v19483_v48 = vadd.f32 %v6777_v23, %v6609_v1 }
 0x81c   :  { %v6909_v57 = vpop.f32.mrf.mxu0 }
 0x81d   :  { %v19486_v38 = vadd.f32 %v6909_v57, %v19182_v10  ;;  %v12261_v10 = vld [vmem:[%s21912_s5 + $0x3c0] sm:$0xf] }
 0x81e   :  { %6690 = vmatmul.bf16.gmra.mxu2 %v12246_v6  ;;  %6819 = vmatmul.bf16.gmra.mxu3 %v12122_v15  ;;  %v12262_v1 = vor.u32 %v13375_v46, %v12261_v10  ;;  %v22500_v6 = vld [vmem:[#allocation103_spill] sm:$0xff]  ;;  %v19534_v57 = vpop.f32.mrf.mxu2  ;;  %v22501_v10 = vld [vmem:[#allocation101_spill] sm:$0xff] }
 0x81f   :  { %6948 = vmatmul.bf16.gmra.mxu0 %v11998_v30  ;;  %7077 = vmatmul.bf16.gmra.mxu1 %v11874_v50  ;;  %v6617_v15 = vadd.f32 %v19284_v16, %v22500_v6  ;;  %v13345_v16 = vld [vmem:[%s21912_s5 + $0x2e4] sm:$0xf]  ;;  %v6619_v46 = vadd.f32 %v19317_v59, %v22501_v10 }
 0x821   :  { %v6780_v29 = vpop.f32.mrf.mxu3 }
 0x822   :  { %v19492_v35 = vadd.f32 %v6780_v29, %v6612_v53  ;;  %v13379_v29 = vld [vmem:[%s21912_s5 + $0x3ec] sm:$0xf0] }
 0x824   :  { %v6911_v8 = vpop.f32.mrf.mxu0 }
 0x825   :  { %v19495_v44 = vadd.f32 %v6911_v8, %v19207_v56  ;;  %v12013_v56 = vld [vmem:[%s21912_s5 + $0x1c8] sm:$0xf]  ;;  %v12151_v8 = vld [vmem:[%s21912_s5 + $0x2f0] sm:$0xf0] }
 0x826   :  { %v12014_v28 = vor.u32 %v13312_v49, %v12013_v56  ;;  %v11903_v56 = vld [vmem:[%s21912_s5 + $0xf8] sm:$0xf0]  ;;  %v12154_v21 = vor.u32 %v13345_v16, %v12151_v8  ;;  %v13286_v16 = vld [vmem:[%s21912_s5 + $0x10c] sm:$0xf] }
 0x827   :  { %v11919_v8 = vld [vmem:[%s21912_s5 + $0x118] sm:$0xf0] }
 0x829   :  { %v6782_v62 = vpop.f32.mrf.mxu3 }
 0x82a   :  { %v19525_v58 = vadd.f32 %v6782_v62, %v6614_v22  ;;  %v11906_v62 = vor.u32 %v13282_v54, %v11903_v56  ;;  %v11922_v54 = vor.u32 %v13286_v16, %v11919_v8 }
 0x82c   :  { %v6914_v0 = vpop.f32.mrf.mxu0 }
 0x82d   :  { %v19528_v23 = vadd.f32 %v6914_v0, %v19213_v55  ;;  %v12277_v55 = vld [vmem:[%s21912_s5 + $0x3e0] sm:$0xf] }
 0x82e   :  { %6695 = vmatmul.bf16.gmra.mxu2 %v12262_v1  ;;  %6824 = vmatmul.bf16.gmra.mxu3 %v12138_v47  ;;  %v12278_v49 = vor.u32 %v13379_v29, %v12277_v55  ;;  %v19570_v47 = vpop.f32.mrf.mxu2  ;;  %v12045_v55 = vld [vmem:[%s21912_s5 + $0x208] sm:$0xf] }
 0x82f   :  { %6953 = vmatmul.bf16.gmra.mxu0 %v12014_v28  ;;  %7082 = vmatmul.bf16.gmra.mxu1 %v11890_v25  ;;  %v22502_v28 = vld [vmem:[#allocation68_spill] sm:$0xff] }
 0x830   :  { %v6622_v25 = vadd.f32 %v19328_v27, %v22502_v28  ;;  %v22503_v27 = vld [vmem:[#allocation95_spill] sm:$0xff] }
 0x831   :  { %v6785_v30 = vpop.f32.mrf.mxu3  ;;  %v6624_v29 = vadd.f32 %v19364_v3, %v22503_v27  ;;  %v13290_v27 = vld [vmem:[%s21912_s5 + $0x12c] sm:$0xf] }
 0x832   :  { %v19532_v50 = vadd.f32 %v6785_v30, %v6617_v15 }
 0x834   :  { %v6916_v32 = vpop.f32.mrf.mxu0 }
 0x835   :  { %v19537_v53 = vadd.f32 %v6916_v32, %v19236_v34  ;;  %v12029_v34 = vld [vmem:[%s21912_s5 + $0x1e8] sm:$0xf]  ;;  %v12167_v32 = vld [vmem:[%s21912_s5 + $0x310] sm:$0xf0] }
 0x836   :  { %v12030_v36 = vor.u32 %v13316_v41, %v12029_v34 }
 0x839   :  { %v6787_v2 = vpop.f32.mrf.mxu3 }
 0x83a   :  { %v19565_v22 = vadd.f32 %v6787_v2, %v6619_v46 }
 0x83c   :  { %v6919_v59 = vpop.f32.mrf.mxu0 }
 0x83d   :  { %v19568_v1 = vadd.f32 %v6919_v59, %v19244_v42  ;;  %v13349_v42 = vld [vmem:[%s21912_s5 + $0x304] sm:$0xf] }
 0x83e   :  { %6700 = vmatmul.bf16.gmra.mxu2 %v12278_v49  ;;  %6829 = vmatmul.bf16.gmra.mxu3 %v12154_v21  ;;  %v12170_v46 = vor.u32 %v13349_v42, %v12167_v32  ;;  %v22504_v21 = vld [vmem:[#allocation8_spill] sm:$0xff] }
 0x83f   :  { %6958 = vmatmul.bf16.gmra.mxu0 %v12030_v36  ;;  %7087 = vmatmul.bf16.gmra.mxu1 %v11906_v62  ;;  %v6627_v36 = vadd.f32 %v19390_v51, %v22504_v21  ;;  %v12183_v51 = vld [vmem:[%s21912_s5 + $0x330] sm:$0xf0]  ;;  %v12061_v32 = vld [vmem:[%s21912_s5 + $0x228] sm:$0xf] }
 0x841   :  { %v6790_v0 = vpop.f32.mrf.mxu3 }
 0x842   :  { %v19574_v6 = vadd.f32 %v6790_v0, %v6622_v25 }
 0x844   :  { %v6921_v15 = vpop.f32.mrf.mxu0 }
 0x845   :  { %v19577_v30 = vadd.f32 %v6921_v15, %v19276_v14  ;;  %v13320_v14 = vld [vmem:[%s21912_s5 + $0x214] sm:$0xf0] }
 0x846   :  { %v12046_v41 = vor.u32 %v13320_v14, %v12045_v55  ;;  %v22505_v55 = vld [vmem:[#allocation78_spill] sm:$0xff] }
 0x849   :  { %v6792_v34 = vpop.f32.mrf.mxu3 }
 0x84a   :  { %v19599_v10 = vadd.f32 %v6792_v34, %v6624_v29  ;;  %v11935_v29 = vld [vmem:[%s21912_s5 + $0x138] sm:$0xf0] }
 0x84c   :  { %v6924_v56 = vpop.f32.mrf.mxu0  ;;  %v7053_v3 = vpop.f32.mrf.mxu1 }
 0x84d   :  { %v19602_v2 = vadd.f32 %v6924_v56, %v19286_v43  ;;  %v7054_v49 = vadd.f32 %v7053_v3, %v19280_v13  ;;  %v13353_v13 = vld [vmem:[%s21912_s5 + $0x324] sm:$0xf] }
 0x84e   :  { %6834 = vmatmul.bf16.gmra.mxu3 %v12170_v46  ;;  %v12186_v34 = vor.u32 %v13353_v13, %v12183_v51  ;;  %v12077_v51 = vld [vmem:[%s21912_s5 + $0x248] sm:$0xf] }
 0x84f   :  { %6963 = vmatmul.bf16.gmra.mxu0 %v12046_v41  ;;  %7092 = vmatmul.bf16.gmra.mxu1 %v11922_v54  ;;  %v7213_v43 = vmax.f32 %v7054_v49, 0.0  ;;  %v22506_v49 = vld [vmem:[#allocation28_spill] sm:$0xff] }
 0x850   :  { %v6632_v21 = vadd.f32 %v19443_v45, %v22506_v49  ;;  %v12199_v45 = vld [vmem:[%s21912_s5 + $0x350] sm:$0xf0]  ;;  %v22508_v49 = vld [vmem:[#allocation19_spill] sm:$0xff] }
 0x851   :  { %v6795_v62 = vpop.f32.mrf.mxu3 }
 0x852   :  { %v19607_v59 = vadd.f32 %v6795_v62, %v6627_v36  ;;  %v19643_v36 = vpop.f32.mrf.mxu2 }
 0x854   :  { %v6926_v28 = vpop.f32.mrf.mxu0  ;;  %v7055_v25 = vpop.f32.mrf.mxu1 }
 0x855   :  { %v19610_v0 = vadd.f32 %v6926_v28, %v19319_v31  ;;  %v7056_v15 = vadd.f32 %v7055_v25, %v19289_v61  ;;  %v6629_v31 = vadd.f32 %v19408_v12, %v22505_v55  ;;  %v13324_v61 = vld [vmem:[%s21912_s5 + $0x234] sm:$0xf0]  ;;  %v11938_v12 = vor.u32 %v13290_v27, %v11935_v29  ;;  %v13294_v55 = vld [vmem:[%s21912_s5 + $0x14c] sm:$0xf] }
 0x856   :  { %v12062_v46 = vor.u32 %v13324_v61, %v12061_v32  ;;  %v22507_v32 = vld [vmem:[#allocation35_spill] sm:$0xff] }
 0x857   :  { %v7214_v42 = vmax.f32 %v7056_v15, 0.0 }
 0x859   :  { %v6797_v14 = vpop.f32.mrf.mxu3  ;;  %v19633_v16 = vpack.c.bf16 %v7214_v42, %v7213_v43 }
 0x85a   :  { %v19635_v8 = vadd.f32 %v6797_v14, %v6629_v31  ;;  %v11951_v31 = vld [vmem:[%s21912_s5 + $0x158] sm:$0xf0] }
 0x85c   :  { %v6929_v41 = vpop.f32.mrf.mxu0  ;;  %v7058_v54 = vpop.f32.mrf.mxu1 }
 0x85d   :  { %v19638_v56 = vadd.f32 %v6929_v41, %v19326_v63  ;;  %v7059_v3 = vadd.f32 %v7058_v54, %v19322_v26  ;;  %v13357_v26 = vld [vmem:[%s21912_s5 + $0x344] sm:$0xf] }
 0x85e   :  { %6839 = vmatmul.bf16.gmra.mxu3 %v12186_v34  ;;  %v12202_v14 = vor.u32 %v13357_v26, %v12199_v45  ;;  %v19675_v34 = vpop.f32.mrf.mxu2 }
 0x85f   :  { %6968 = vmatmul.bf16.gmra.mxu0 %v12062_v46  ;;  %7097 = vmatmul.bf16.gmra.mxu1 %v11938_v12  ;;  %v7215_v43 = vmax.f32 %v7059_v3, 0.0  ;;  %v11954_v46 = vor.u32 %v13294_v55, %v11951_v31 }
 0x861   :  { %v6800_v62 = vpop.f32.mrf.mxu3 }
 0x862   :  { %v19645_v28 = vadd.f32 %v6800_v62, %v6632_v21  ;;  %v6637_v21 = vadd.f32 %v19490_v52, %v22508_v49  ;;  %v12215_v52 = vld [vmem:[%s21912_s5 + $0x370] sm:$0xf0] }
 0x864   :  { %v6931_v25 = vpop.f32.mrf.mxu0  ;;  %v7060_v15 = vpop.f32.mrf.mxu1 }
 0x865   :  { %v19648_v13 = vadd.f32 %v6931_v25, %v19359_v4  ;;  %v7061_v63 = vadd.f32 %v7060_v15, %v19331_v33  ;;  %v6634_v4 = vadd.f32 %v19455_v24, %v22507_v32  ;;  %v13328_v33 = vld [vmem:[%s21912_s5 + $0x254] sm:$0xf0] }
 0x866   :  { %v12078_v24 = vor.u32 %v13328_v33, %v12077_v51  ;;  %v19685_v26 = vpop.f32.mrf.mxu2  ;;  %v12093_v51 = vld [vmem:[%s21912_s5 + $0x268] sm:$0xf]  ;;  %v22509_v32 = vld [vmem:[#allocation10_spill] sm:$0xff] }
 0x867   :  { %v7216_v42 = vmax.f32 %v7061_v63, 0.0  ;;  %v11967_v33 = vld [vmem:[%s21912_s5 + $0x178] sm:$0xf0] }
 0x869   :  { %v6802_v61 = vpop.f32.mrf.mxu3  ;;  %v19671_v27 = vpack.c.bf16 %v7216_v42, %v7215_v43 }
 0x86a   :  { %v19673_v29 = vadd.f32 %v6802_v61, %v6634_v4  ;;  %v13298_v4 = vld [vmem:[%s21912_s5 + $0x16c] sm:$0xf] }
 0x86c   :  { %v6934_v12 = vpop.f32.mrf.mxu0  ;;  %v7063_v41 = vpop.f32.mrf.mxu1 }
 0x86d   :  { %v19678_v54 = vadd.f32 %v6934_v12, %v19368_v7  ;;  %v7064_v3 = vadd.f32 %v7063_v41, %v19362_v11  ;;  %v13361_v11 = vld [vmem:[%s21912_s5 + $0x364] sm:$0xf] }
 0x86e   :  { %6844 = vmatmul.bf16.gmra.mxu3 %v12202_v14  ;;  %v12218_v14 = vor.u32 %v13361_v11, %v12215_v52  ;;  %v19719_v49 = vpop.f32.mrf.mxu2 }
 0x86f   :  { %6973 = vmatmul.bf16.gmra.mxu0 %v12078_v24  ;;  %7102 = vmatmul.bf16.gmra.mxu1 %v11954_v46  ;;  %v7217_v42 = vmax.f32 %v7064_v3, 0.0 }
 0x871   :  { %v6805_v62 = vpop.f32.mrf.mxu3 }
 0x872   :  { %v19683_v25 = vadd.f32 %v6805_v62, %v6637_v21  ;;  %v22510_v21 = vld [vmem:[#allocation120_spill] sm:$0xff] }
 0x873   :  { %v6642_v62 = vadd.f32 %v19534_v57, %v22510_v21  ;;  %v12231_v57 = vld [vmem:[%s21912_s5 + $0x390] sm:$0xf0] }
 0x874   :  { %v6936_v15 = vpop.f32.mrf.mxu0  ;;  %v7065_v63 = vpop.f32.mrf.mxu1 }
 0x875   :  { %v19688_v43 = vadd.f32 %v6936_v15, %v19401_v5  ;;  %v7066_v7 = vadd.f32 %v7065_v63, %v19371_v17  ;;  %v6639_v5 = vadd.f32 %v19523_v9, %v22509_v32  ;;  %v13332_v17 = vld [vmem:[%s21912_s5 + $0x274] sm:$0xf0]  ;;  %v11970_v9 = vor.u32 %v13298_v4, %v11967_v33  ;;  %v22511_v32 = vld [vmem:[#allocation119_spill] sm:$0xff] }
 0x876   :  { %v12094_v24 = vor.u32 %v13332_v17, %v12093_v51  ;;  %v12109_v51 = vld [vmem:[%s21912_s5 + $0x288] sm:$0xf]  ;;  %v11983_v17 = vld [vmem:[%s21912_s5 + $0x198] sm:$0xf0]  ;;  %v19749_v4 = vpop.f32.mrf.mxu2 }
 0x877   :  { %v7218_v45 = vmax.f32 %v7066_v7, 0.0 }
 0x879   :  { %v6807_v55 = vpop.f32.mrf.mxu3  ;;  %v19711_v31 = vpack.c.bf16 %v7218_v45, %v7217_v42 }
 0x87a   :  { %v19713_v61 = vadd.f32 %v6807_v55, %v6639_v5  ;;  %v13302_v5 = vld [vmem:[%s21912_s5 + $0x18c] sm:$0xf] }
 0x87c   :  { %v6939_v46 = vpop.f32.mrf.mxu0  ;;  %v7068_v12 = vpop.f32.mrf.mxu1 }
 0x87d   :  { %v19716_v41 = vadd.f32 %v6939_v46, %v19410_v37  ;;  %v7069_v3 = vadd.f32 %v7068_v12, %v19404_v19  ;;  %v13365_v19 = vld [vmem:[%s21912_s5 + $0x384] sm:$0xf] }
 0x87e   :  { %6849 = vmatmul.bf16.gmra.mxu3 %v12218_v14 }
 0x87f   :  { %6978 = vmatmul.bf16.gmra.mxu0 %v12094_v24  ;;  %7107 = vmatmul.bf16.gmra.mxu1 %v11970_v9  ;;  %v7219_v45 = vmax.f32 %v7069_v3, 0.0  ;;  %v11986_v9 = vor.u32 %v13302_v5, %v11983_v17 }
 0x881   :  { %v6810_v15 = vpop.f32.mrf.mxu3 }
 0x882   :  { %v19723_v63 = vadd.f32 %v6810_v15, %v6642_v62  ;;  %v22512_v62 = vld [vmem:[#allocation79_spill] sm:$0xff] }
 0x883   :  { %v6647_v15 = vadd.f32 %v19643_v36, %v22512_v62  ;;  %v12247_v36 = vld [vmem:[%s21912_s5 + $0x3b0] sm:$0xf0] }
 0x884   :  { %v6941_v7 = vpop.f32.mrf.mxu0  ;;  %v7070_v11 = vpop.f32.mrf.mxu1 }
 0x885   :  { %v19726_v42 = vadd.f32 %v6941_v7, %v19441_v60  ;;  %v7071_v37 = vadd.f32 %v7070_v11, %v19413_v20  ;;  %v6644_v60 = vadd.f32 %v19570_v47, %v22511_v32  ;;  %v13336_v20 = vld [vmem:[%s21912_s5 + $0x294] sm:$0xf0]  ;;  %v12234_v47 = vor.u32 %v13365_v19, %v12231_v57  ;;  %v12125_v32 = vld [vmem:[%s21912_s5 + $0x2a8] sm:$0xf] }
 0x886   :  { %v12110_v24 = vor.u32 %v13336_v20, %v12109_v51 }
 0x887   :  { %v7220_v52 = vmax.f32 %v7071_v37, 0.0  ;;  %v19763_v37 = vpop.f32.mrf.mxu2 }
 0x889   :  { %v6812_v33 = vpop.f32.mrf.mxu3  ;;  %v19751_v55 = vpack.c.bf16 %v7220_v52, %v7219_v45 }
 0x88a   :  { %v19753_v14 = vadd.f32 %v6812_v33, %v6644_v60  ;;  %v11999_v60 = vld [vmem:[%s21912_s5 + $0x1b8] sm:$0xf0] }
 0x88c   :  { %v6944_v46 = vpop.f32.mrf.mxu0  ;;  %v7073_v12 = vpop.f32.mrf.mxu1 }
 0x88d   :  { %v19756_v3 = vadd.f32 %v6944_v46, %v19450_v40  ;;  %v7074_v21 = vadd.f32 %v7073_v12, %v19446_v18  ;;  %v13369_v18 = vld [vmem:[%s21912_s5 + $0x3a4] sm:$0xf] }
 0x88e   :  { %6854 = vmatmul.bf16.gmra.mxu3 %v12234_v47  ;;  %v12250_v17 = vor.u32 %v13369_v18, %v12247_v36 }
 0x88f   :  { %6983 = vmatmul.bf16.gmra.mxu0 %v12110_v24  ;;  %7112 = vmatmul.bf16.gmra.mxu1 %v11986_v9  ;;  %v7221_v57 = vmax.f32 %v7074_v21, 0.0  ;;  %v6661_v46 = vpop.f32.mrf.mxu2  ;;  %v22513_v21 = vld [vmem:[#allocation56_spill] sm:$0xff] }
 0x890   :  { %v6652_v62 = vadd.f32 %v19685_v26, %v22513_v21 }
 0x891   :  { %v6815_v7 = vpop.f32.mrf.mxu3 }
 0x892   :  { %v19761_v11 = vadd.f32 %v6815_v7, %v6647_v15 }
 0x894   :  { %v6946_v19 = vpop.f32.mrf.mxu0  ;;  %v7075_v45 = vpop.f32.mrf.mxu1 }
 0x895   :  { %v19766_v52 = vadd.f32 %v6946_v19, %v19483_v48  ;;  %v7076_v40 = vadd.f32 %v7075_v45, %v19453_v39  ;;  %v13340_v48 = vld [vmem:[%s21912_s5 + $0x2b4] sm:$0xf0]  ;;  %v13306_v39 = vld [vmem:[%s21912_s5 + $0x1ac] sm:$0xf] }
 0x896   :  { %v12126_v33 = vor.u32 %v13340_v48, %v12125_v32  ;;  %v12002_v47 = vor.u32 %v13306_v39, %v11999_v60  ;;  %v12263_v32 = vld [vmem:[%s21912_s5 + $0x3d0] sm:$0xf0]  ;;  %v12015_v48 = vld [vmem:[%s21912_s5 + $0x1d8] sm:$0xf0] }
 0x897   :  { %v7222_v51 = vmax.f32 %v7076_v40, 0.0 }
 0x899   :  { %v19787_v20 = vpop.f32.mrf.mxu3  ;;  %v19789_v5 = vpack.c.bf16 %v7222_v51, %v7221_v57  ;;  %v19806_v51 = vpop.f32.mrf.mxu2 }
 0x89c   :  { %v6949_v24 = vpop.f32.mrf.mxu0  ;;  %v7078_v9 = vpop.f32.mrf.mxu1 }
 0x89d   :  { %v19792_v12 = vadd.f32 %v6949_v24, %v19492_v35  ;;  %v7079_v19 = vadd.f32 %v7078_v9, %v19486_v38  ;;  %v13373_v35 = vld [vmem:[%s21912_s5 + $0x3c4] sm:$0xf]  ;;  %v12141_v38 = vld [vmem:[%s21912_s5 + $0x2c8] sm:$0xf] }
 0x89e   :  { %6859 = vmatmul.bf16.gmra.mxu3 %v12250_v17  ;;  %v12266_v17 = vor.u32 %v13373_v35, %v12263_v32  ;;  %v13377_v32 = vld [vmem:[%s21912_s5 + $0x3e4] sm:$0xf] }
 0x89f   :  { %6988 = vmatmul.bf16.gmra.mxu0 %v12126_v33  ;;  %7117 = vmatmul.bf16.gmra.mxu1 %v12002_v47  ;;  %v7223_v36 = vmax.f32 %v7079_v19, 0.0 }
 0x8a1   :  { %v6820_v15 = vpop.f32.mrf.mxu3  ;;  %v6666_v19 = vpop.f32.mrf.mxu2 }
 0x8a2   :  { %v19796_v7 = vadd.f32 %v6820_v15, %v6652_v62  ;;  %v22514_v62 = vld [vmem:[#allocation116_spill] sm:$0xff] }
 0x8a3   :  { %v6657_v15 = vadd.f32 %v19749_v4, %v22514_v62  ;;  %v12279_v4 = vld [vmem:[%s21912_s5 + $0x3f0] sm:$0xf0] }
 0x8a4   :  { %v6951_v45 = vpop.f32.mrf.mxu0  ;;  %v7080_v40 = vpop.f32.mrf.mxu1 }
 0x8a5   :  { %v19800_v18 = vadd.f32 %v6951_v45, %v19525_v58  ;;  %v7081_v57 = vadd.f32 %v7080_v40, %v19495_v44  ;;  %v13344_v44 = vld [vmem:[%s21912_s5 + $0x2d4] sm:$0xf0]  ;;  %v13310_v58 = vld [vmem:[%s21912_s5 + $0x1cc] sm:$0xf] }
 0x8a6   :  { %v12142_v33 = vor.u32 %v13344_v44, %v12141_v38  ;;  %v12018_v47 = vor.u32 %v13310_v58, %v12015_v48  ;;  %v12031_v58 = vld [vmem:[%s21912_s5 + $0x1f8] sm:$0xf0] }
 0x8a7   :  { %v7224_v26 = vmax.f32 %v7081_v57, 0.0 }
 0x8a9   :  { %v19823_v39 = vpop.f32.mrf.mxu3  ;;  %v19825_v60 = vpack.c.bf16 %v7224_v26, %v7223_v36 }
 0x8ac   :  { %v6954_v24 = vpop.f32.mrf.mxu0  ;;  %v7083_v9 = vpop.f32.mrf.mxu1 }
 0x8ad   :  { %v19828_v21 = vadd.f32 %v6954_v24, %v19532_v50  ;;  %v7084_v57 = vadd.f32 %v7083_v9, %v19528_v23  ;;  %v12157_v23 = vld [vmem:[%s21912_s5 + $0x2e8] sm:$0xf] }
 0x8ae   :  { %6864 = vmatmul.bf16.gmra.mxu3 %v12266_v17 }
 0x8af   :  { %6993 = vmatmul.bf16.gmra.mxu0 %v12142_v33  ;;  %7122 = vmatmul.bf16.gmra.mxu1 %v12018_v47  ;;  %v7225_v38 = vmax.f32 %v7084_v57, 0.0  ;;  %v12282_v33 = vor.u32 %v13377_v32, %v12279_v4  ;;  %v19859_v47 = vpop.f32.mrf.mxu2  ;;  %v22516_v57 = vld [vmem:[#allocation6_spill] sm:$0xff] }
 0x8b0   :  { %22515 = vst [vmem:[#allocation98_spill] sm:$0xff] %v19859_v47 }
 0x8b1   :  { %v6825_v45 = vpop.f32.mrf.mxu3 }
 0x8b2   :  { %v19832_v40 = vadd.f32 %v6825_v45, %v6657_v15 }
 0x8b4   :  { %v6956_v35 = vpop.f32.mrf.mxu0  ;;  %v7085_v36 = vpop.f32.mrf.mxu1 }
 0x8b5   :  { %v19836_v26 = vadd.f32 %v6956_v35, %v19565_v22  ;;  %v7086_v50 = vadd.f32 %v7085_v36, %v19537_v53  ;;  %v13348_v22 = vld [vmem:[%s21912_s5 + $0x2f4] sm:$0xf0]  ;;  %v13314_v53 = vld [vmem:[%s21912_s5 + $0x1ec] sm:$0xf]  ;;  %v6662_v35 = vadd.f32 %v6661_v46, %v22516_v57 }
 0x8b6   :  { %v12158_v24 = vor.u32 %v13348_v22, %v12157_v23  ;;  %v12034_v9 = vor.u32 %v13314_v53, %v12031_v58  ;;  %v12173_v58 = vld [vmem:[%s21912_s5 + $0x308] sm:$0xf]  ;;  %v13352_v46 = vld [vmem:[%s21912_s5 + $0x314] sm:$0xf0] }
 0x8b7   :  { %v7226_v44 = vmax.f32 %v7086_v50, 0.0  ;;  %v6671_v4 = vpop.f32.mrf.mxu2 }
 0x8b9   :  { %v19857_v48 = vpop.f32.mrf.mxu3  ;;  %v7283_v17 = vpack.c.bf16 %v7226_v44, %v7225_v38 }
 0x8bc   :  { %v6959_v62 = vpop.f32.mrf.mxu0  ;;  %v7088_v15 = vpop.f32.mrf.mxu1 }
 0x8bd   :  { %v19862_v45 = vadd.f32 %v6959_v62, %v19574_v6  ;;  %v7089_v38 = vadd.f32 %v7088_v15, %v19568_v1  ;;  %v13318_v1 = vld [vmem:[%s21912_s5 + $0x20c] sm:$0xf] }
 0x8be   :  { %6869 = vmatmul.bf16.gmra.mxu3 %v12282_v33 }
 0x8bf   :  { %6998 = vmatmul.bf16.gmra.mxu0 %v12158_v24  ;;  %7127 = vmatmul.bf16.gmra.mxu1 %v12034_v9  ;;  %v7227_v6 = vmax.f32 %v7089_v38, 0.0  ;;  %v12174_v24 = vor.u32 %v13352_v46, %v12173_v58  ;;  %v22518_v38 = vld [vmem:[#allocation21_spill] sm:$0xff] }
 0x8c1   :  { %v6830_v36 = vpop.f32.mrf.mxu3 }
 0x8c2   :  { %v19865_v50 = vadd.f32 %v6830_v36, %v6662_v35  ;;  %v19890_v36 = vpop.f32.mrf.mxu2 }
 0x8c3   :  { %22517 = vst [vmem:[#allocation83_spill] sm:$0xff] %v19890_v36 }
 0x8c4   :  { %v6961_v32 = vpop.f32.mrf.mxu0  ;;  %v7090_v44 = vpop.f32.mrf.mxu1 }
 0x8c5   :  { %v19869_v23 = vadd.f32 %v6961_v32, %v19599_v10  ;;  %v7091_v22 = vadd.f32 %v7090_v44, %v19577_v30  ;;  %v12047_v10 = vld [vmem:[%s21912_s5 + $0x218] sm:$0xf0]  ;;  %v6667_v32 = vadd.f32 %v6666_v19, %v22518_v38  ;;  %v13356_v19 = vld [vmem:[%s21912_s5 + $0x334] sm:$0xf0] }
 0x8c6   :  { %v12050_v9 = vor.u32 %v13318_v1, %v12047_v10  ;;  %v12189_v1 = vld [vmem:[%s21912_s5 + $0x328] sm:$0xf] }
 0x8c7   :  { %v7228_v53 = vmax.f32 %v7091_v22, 0.0 }
 0x8c9   :  { %v7284_v33 = vpack.c.bf16 %v7228_v53, %v7227_v6  ;;  %v19884_v30 = vpop.f32.mrf.mxu3 }
 0x8cb   :  { %7885 = vmatpush.bf16.msrb.mxu2 %v7284_v33  ;;  %v12190_v33 = vor.u32 %v13356_v19, %v12189_v1  ;;  %v13360_v1 = vld [vmem:[%s21912_s5 + $0x354] sm:$0xf0] }
 0x8cc   :  { %v6964_v62 = vpop.f32.mrf.mxu0  ;;  %v7093_v15 = vpop.f32.mrf.mxu1 }
 0x8cd   :  { %v19887_v57 = vadd.f32 %v6964_v62, %v19607_v59  ;;  %v7094_v35 = vadd.f32 %v7093_v15, %v19602_v2 }
 0x8cf   :  { %7003 = vmatmul.bf16.gmra.mxu0 %v12174_v24  ;;  %7132 = vmatmul.bf16.gmra.mxu1 %v12050_v9  ;;  %v7229_v2 = vmax.f32 %v7094_v35, 0.0  ;;  %v22520_v35 = vld [vmem:[#allocation85_spill] sm:$0xff] }
 0x8d0   :  { %7886 = vmatpush.bf16.msrb.mxu2 %v7283_v17  ;;  %v6672_v38 = vadd.f32 %v6671_v4, %v22520_v35  ;;  %v22523_v35 = vld [vmem:[#allocation87_spill] sm:$0xff] }
 0x8d1   :  { %v6835_v44 = vpop.f32.mrf.mxu3 }
 0x8d2   :  { %v19893_v22 = vadd.f32 %v6835_v44, %v6667_v32 }
 0x8d4   :  { %7887 = vmatpush.bf16.msrb.mxu2 %v19825_v60  ;;  %v6966_v6 = vpop.f32.mrf.mxu0  ;;  %v7095_v53 = vpop.f32.mrf.mxu1  ;;  %v13322_v60 = vld [vmem:[%s21912_s5 + $0x22c] sm:$0xf] }
 0x8d5   :  { %v19897_v58 = vadd.f32 %v6966_v6, %v19635_v8  ;;  %v7096_v59 = vadd.f32 %v7095_v53, %v19610_v0  ;;  %v12063_v0 = vld [vmem:[%s21912_s5 + $0x238] sm:$0xf0]  ;;  %v6676_v8 = vpop.f32.mrf.mxu2 }
 0x8d6   :  { %v12066_v24 = vor.u32 %v13322_v60, %v12063_v0 }
 0x8d7   :  { %v7230_v46 = vmax.f32 %v7096_v59, 0.0 }
 0x8d8   :  { %7888 = vmatpush.bf16.msrb.mxu2 %v19789_v5 }
 0x8d9   :  { %v19913_v17 = vpop.f32.mrf.mxu3  ;;  %v19915_v10 = vpack.c.bf16 %v7230_v46, %v7229_v2 }
 0x8da   :  { %22519 = vst [vmem:[#allocation91_spill] sm:$0xff] %v19913_v17 }
 0x8dc   :  { %7889 = vmatpush.bf16.msrb.mxu2 %v19751_v55  ;;  %v6969_v5 = vpop.f32.mrf.mxu0  ;;  %v7098_v9 = vpop.f32.mrf.mxu1 }
 0x8dd   :  { %v19919_v62 = vadd.f32 %v6969_v5, %v19645_v28  ;;  %v7099_v15 = vadd.f32 %v7098_v9, %v19638_v56  ;;  %v19926_v6 = vpop.f32.mrf.mxu2  ;;  %v12293_v28 = vld [vmem:[%s21913_s7] sm:$0xf]  ;;  %v13383_v56 = vld [vmem:[%s21913_s7 + $0xc] sm:$0xf0] }
 0x8de   :  { %22521 = vst [vmem:[#allocation92_spill] sm:$0xff] %v19926_v6  ;;  %v12294_v46 = vor.u32 %v13383_v56, %v12293_v28  ;;  %v12309_v56 = vld [vmem:[%s21913_s7 + $0x20] sm:$0xf] }
 0x8df   :  { %7008 = vmatmul.bf16.gmra.mxu0 %v12190_v33  ;;  %7137 = vmatmul.bf16.gmra.mxu1 %v12066_v24  ;;  %v7231_v59 = vmax.f32 %v7099_v15, 0.0 }
 0x8e0   :  { %7890 = vmatpush.bf16.msrb.mxu2 %v19711_v31 }
 0x8e1   :  { %v6840_v32 = vpop.f32.mrf.mxu3 }
 0x8e2   :  { %v19924_v44 = vadd.f32 %v6840_v32, %v6672_v38  ;;  %v6677_v38 = vadd.f32 %v6676_v8, %v22523_v35 }
 0x8e4   :  { %7891 = vmatpush.bf16.msrb.mxu2 %v19671_v27  ;;  %v6971_v55 = vpop.f32.mrf.mxu0  ;;  %v7100_v53 = vpop.f32.mrf.mxu1  ;;  %v12205_v27 = vld [vmem:[%s21912_s5 + $0x348] sm:$0xf] }
 0x8e5   :  { %v19936_v4 = vadd.f32 %v6971_v55, %v19673_v29  ;;  %v7101_v31 = vadd.f32 %v7100_v53, %v19648_v13  ;;  %v13326_v29 = vld [vmem:[%s21912_s5 + $0x24c] sm:$0xf]  ;;  %v12079_v13 = vld [vmem:[%s21912_s5 + $0x258] sm:$0xf0]  ;;  %v12206_v0 = vor.u32 %v13360_v1, %v12205_v27  ;;  %v6681_v5 = vpop.f32.mrf.mxu2  ;;  %v12221_v27 = vld [vmem:[%s21912_s5 + $0x368] sm:$0xf] }
 0x8e6   :  { %v12082_v33 = vor.u32 %v13326_v29, %v12079_v13  ;;  %v13364_v1 = vld [vmem:[%s21912_s5 + $0x374] sm:$0xf0] }
 0x8e7   :  { %v7232_v2 = vmax.f32 %v7101_v31, 0.0 }
 0x8e8   :  { %7892 = vmatpush.bf16.msrb.mxu2 %v19633_v16 }
 0x8e9   :  { %v19952_v19 = vpop.f32.mrf.mxu3  ;;  %v19954_v60 = vpack.c.bf16 %v7232_v2, %v7231_v59 }
 0x8ea   :  { %22522 = vst [vmem:[#allocation76_spill] sm:$0xff] %v19952_v19 }
 0x8eb   :  { %7893 = vmatmul.bf16.vlgmr.msrb.gmra.mxu2 %v12294_v46 }
 0x8ec   :  { %v6974_v16 = vpop.f32.mrf.mxu0  ;;  %v7103_v24 = vpop.f32.mrf.mxu1 }
 0x8ed   :  { %v19957_v9 = vadd.f32 %v6974_v16, %v19683_v25  ;;  %v7104_v15 = vadd.f32 %v7103_v24, %v19678_v54  ;;  %v13387_v25 = vld [vmem:[%s21913_s7 + $0x2c] sm:$0xf0]  ;;  %v19973_v59 = vpop.f32.mrf.mxu2 }
 0x8ee   :  { %22524 = vst [vmem:[#allocation93_spill] sm:$0xff] %v19973_v59  ;;  %v12310_v46 = vor.u32 %v13387_v25, %v12309_v56 }
 0x8ef   :  { %7013 = vmatmul.bf16.gmra.mxu0 %v12206_v0  ;;  %7142 = vmatmul.bf16.gmra.mxu1 %v12082_v33  ;;  %v7233_v8 = vmax.f32 %v7104_v15, 0.0  ;;  %v12222_v0 = vor.u32 %v13364_v1, %v12221_v27  ;;  %v12237_v1 = vld [vmem:[%s21912_s5 + $0x388] sm:$0xf] }
 0x8f1   :  { %v6845_v32 = vpop.f32.mrf.mxu3 }
 0x8f2   :  { %v19961_v55 = vadd.f32 %v6845_v32, %v6677_v38  ;;  %v22526_v38 = vld [vmem:[#allocation86_spill] sm:$0xff] }
 0x8f3   :  { %v6682_v32 = vadd.f32 %v6681_v5, %v22526_v38 }
 0x8f4   :  { %v6976_v53 = vpop.f32.mrf.mxu0  ;;  %v7105_v28 = vpop.f32.mrf.mxu1 }
 0x8f5   :  { %v19970_v31 = vadd.f32 %v6976_v53, %v19713_v61  ;;  %v7106_v54 = vadd.f32 %v7105_v28, %v19688_v43  ;;  %v13330_v61 = vld [vmem:[%s21912_s5 + $0x26c] sm:$0xf]  ;;  %v12095_v43 = vld [vmem:[%s21912_s5 + $0x278] sm:$0xf0]  ;;  %v6686_v53 = vpop.f32.mrf.mxu2 }
 0x8f6   :  { %v12098_v33 = vor.u32 %v13330_v61, %v12095_v43  ;;  %v13368_v61 = vld [vmem:[%s21912_s5 + $0x394] sm:$0xf0]  ;;  %v13334_v43 = vld [vmem:[%s21912_s5 + $0x28c] sm:$0xf] }
 0x8f7   :  { %v7234_v2 = vmax.f32 %v7106_v54, 0.0 }
 0x8f9   :  { %v19987_v29 = vpop.f32.mrf.mxu3  ;;  %v19989_v13 = vpack.c.bf16 %v7234_v2, %v7233_v8  ;;  %v12325_v8 = vld [vmem:[%s21913_s7 + $0x40] sm:$0xf] }
 0x8fa   :  { %22525 = vst [vmem:[#allocation36_spill] sm:$0xff] %v19987_v29 }
 0x8fb   :  { %7898 = vmatmul.bf16.gmra.mxu2 %v12310_v46 }
 0x8fc   :  { %v6979_v16 = vpop.f32.mrf.mxu0  ;;  %v7108_v24 = vpop.f32.mrf.mxu1 }
 0x8fd   :  { %v19992_v15 = vadd.f32 %v6979_v16, %v19723_v63  ;;  %v7109_v35 = vadd.f32 %v7108_v24, %v19716_v41  ;;  %v13391_v63 = vld [vmem:[%s21913_s7 + $0x4c] sm:$0xf0]  ;;  %v12238_v16 = vor.u32 %v13368_v61, %v12237_v1 }
 0x8fe   :  { %v12326_v27 = vor.u32 %v13391_v63, %v12325_v8 }
 0x8ff   :  { %7018 = vmatmul.bf16.gmra.mxu0 %v12222_v0  ;;  %7147 = vmatmul.bf16.gmra.mxu1 %v12098_v33  ;;  %v7235_v5 = vmax.f32 %v7109_v35, 0.0  ;;  %v20024_v33 = vpop.f32.mrf.mxu2 }
 0x900   :  { %22528 = vst [vmem:[#allocation43_spill] sm:$0xff] %v20024_v33 }
 0x901   :  { %v6850_v28 = vpop.f32.mrf.mxu3 }
 0x902   :  { %v19996_v56 = vadd.f32 %v6850_v28, %v6682_v32 }
 0x904   :  { %v6981_v25 = vpop.f32.mrf.mxu0  ;;  %v7110_v54 = vpop.f32.mrf.mxu1 }
 0x905   :  { %v20005_v41 = vadd.f32 %v6981_v25, %v19753_v14  ;;  %v7111_v2 = vadd.f32 %v7110_v54, %v19726_v42  ;;  %v12111_v14 = vld [vmem:[%s21912_s5 + $0x298] sm:$0xf0]  ;;  %v22529_v25 = vld [vmem:[#allocation100_spill] sm:$0xff] }
 0x906   :  { %v12114_v24 = vor.u32 %v13334_v43, %v12111_v14  ;;  %v6687_v54 = vadd.f32 %v6686_v53, %v22529_v25  ;;  %v12253_v43 = vld [vmem:[%s21912_s5 + $0x3a8] sm:$0xf]  ;;  %v13372_v14 = vld [vmem:[%s21912_s5 + $0x3b4] sm:$0xf0] }
 0x907   :  { %v7236_v46 = vmax.f32 %v7111_v2, 0.0 }
 0x909   :  { %v20020_v42 = vpop.f32.mrf.mxu3  ;;  %v20022_v0 = vpack.c.bf16 %v7236_v46, %v7235_v5  ;;  %v12341_v46 = vld [vmem:[%s21913_s7 + $0x60] sm:$0xf] }
 0x90a   :  { %22527 = vst [vmem:[#allocation44_spill] sm:$0xff] %v20020_v42 }
 0x90b   :  { %7903 = vmatmul.bf16.gmra.mxu2 %v12326_v27  ;;  %v6691_v27 = vpop.f32.mrf.mxu2 }
 0x90c   :  { %v6984_v35 = vpop.f32.mrf.mxu0  ;;  %v7113_v38 = vpop.f32.mrf.mxu1 }
 0x90d   :  { %v20027_v32 = vadd.f32 %v6984_v35, %v19761_v11  ;;  %v7114_v28 = vadd.f32 %v7113_v38, %v19756_v3  ;;  %v13395_v11 = vld [vmem:[%s21913_s7 + $0x6c] sm:$0xf0]  ;;  %v12254_v38 = vor.u32 %v13372_v14, %v12253_v43 }
 0x90e   :  { %v12342_v53 = vor.u32 %v13395_v11, %v12341_v46 }
 0x90f   :  { %7023 = vmatmul.bf16.gmra.mxu0 %v12238_v16  ;;  %7152 = vmatmul.bf16.gmra.mxu1 %v12114_v24  ;;  %v7237_v1 = vmax.f32 %v7114_v28, 0.0  ;;  %v13338_v16 = vld [vmem:[%s21912_s5 + $0x2ac] sm:$0xf]  ;;  %v12127_v24 = vld [vmem:[%s21912_s5 + $0x2b8] sm:$0xf0] }
 0x910   :  { %v12130_v28 = vor.u32 %v13338_v16, %v12127_v24  ;;  %v13376_v24 = vld [vmem:[%s21912_s5 + $0x3d4] sm:$0xf0] }
 0x911   :  { %v6855_v8 = vpop.f32.mrf.mxu3 }
 0x912   :  { %v20031_v63 = vadd.f32 %v6855_v8, %v6687_v54 }
 0x913   :  { %v20060_v8 = vpop.f32.mrf.mxu2 }
 0x914   :  { %v20033_v2 = vpop.f32.mrf.mxu0  ;;  %v7115_v5 = vpop.f32.mrf.mxu1 }
 0x915   :  { %v7116_v3 = vadd.f32 %v7115_v5, %v19766_v52  ;;  %v22531_v5 = vld [vmem:[#allocation96_spill] sm:$0xff] }
 0x916   :  { %v6692_v46 = vadd.f32 %v6691_v27, %v22531_v5 }
 0x917   :  { %v7238_v61 = vmax.f32 %v7116_v3, 0.0 }
 0x919   :  { %v20054_v52 = vpop.f32.mrf.mxu3  ;;  %v20056_v35 = vpack.c.bf16 %v7238_v61, %v7237_v1  ;;  %v12357_v61 = vld [vmem:[%s21913_s7 + $0x80] sm:$0xf] }
 0x91a   :  { %22530 = vst [vmem:[#allocation20_spill] sm:$0xff] %v20054_v52 }
 0x91b   :  { %7908 = vmatmul.bf16.gmra.mxu2 %v12342_v53  ;;  %v13399_v53 = vld [vmem:[%s21913_s7 + $0x8c] sm:$0xf0] }
 0x91c   :  { %v20058_v25 = vpop.f32.mrf.mxu0  ;;  %v7118_v54 = vpop.f32.mrf.mxu1  ;;  %v12358_v16 = vor.u32 %v13399_v53, %v12357_v61  ;;  %v22534_v61 = vld [vmem:[#allocation48_spill] sm:$0xff] }
 0x91d   :  { %v7119_v17 = vadd.f32 %v7118_v54, %v19792_v12  ;;  %v12269_v12 = vld [vmem:[%s21912_s5 + $0x3c8] sm:$0xf] }
 0x91e   :  { %v12270_v5 = vor.u32 %v13376_v24, %v12269_v12 }
 0x91f   :  { %7028 = vmatmul.bf16.gmra.mxu0 %v12254_v38  ;;  %7157 = vmatmul.bf16.gmra.mxu1 %v12130_v28  ;;  %v7239_v14 = vmax.f32 %v7119_v17, 0.0  ;;  %v13342_v38 = vld [vmem:[%s21912_s5 + $0x2cc] sm:$0xf]  ;;  %v12143_v28 = vld [vmem:[%s21912_s5 + $0x2d8] sm:$0xf0] }
 0x921   :  { %v6860_v11 = vpop.f32.mrf.mxu3 }
 0x922   :  { %v20063_v3 = vadd.f32 %v6860_v11, %v6692_v46  ;;  %v12146_v46 = vor.u32 %v13342_v38, %v12143_v28 }
 0x924   :  { %22532 = vst [vmem:[#allocation121_spill] sm:$0xff] %v20063_v3  ;;  %v20066_v47 = vpop.f32.mrf.mxu0  ;;  %v7120_v1 = vpop.f32.mrf.mxu1 }
 0x925   :  { %v7121_v43 = vadd.f32 %v7120_v1, %v19800_v18  ;;  %v6696_v18 = vpop.f32.mrf.mxu2 }
 0x926   :  { %v6697_v53 = vadd.f32 %v6696_v18, %v22534_v61  ;;  %v13380_v18 = vld [vmem:[%s21912_s5 + $0x3f4] sm:$0xf0] }
 0x927   :  { %v7240_v27 = vmax.f32 %v7121_v43, 0.0 }
 0x929   :  { %v20087_v17 = vpop.f32.mrf.mxu3  ;;  %v7290_v54 = vpack.c.bf16 %v7240_v27, %v7239_v14  ;;  %v12373_v27 = vld [vmem:[%s21913_s7 + $0xa0] sm:$0xf] }
 0x92a   :  { %22533 = vst [vmem:[#allocation123_spill] sm:$0xff] %v20087_v17 }
 0x92b   :  { %7913 = vmatmul.bf16.gmra.mxu2 %v12358_v16  ;;  %v13403_v16 = vld [vmem:[%s21913_s7 + $0xac] sm:$0xf0] }
 0x92c   :  { %v20089_v11 = vpop.f32.mrf.mxu0  ;;  %v7123_v1 = vpop.f32.mrf.mxu1  ;;  %v12374_v28 = vor.u32 %v13403_v16, %v12373_v27  ;;  %v22536_v27 = vld [vmem:[#allocation51_spill] sm:$0xff] }
 0x92d   :  { %v20094_v36 = vpop.f32.mrf.mxu2  ;;  %v7124_v29 = vadd.f32 %v7123_v1, %v19828_v21  ;;  %v12285_v21 = vld [vmem:[%s21912_s5 + $0x3e8] sm:$0xf] }
 0x92e   :  { %v12286_v1 = vor.u32 %v13380_v18, %v12285_v21 }
 0x92f   :  { %7033 = vmatmul.bf16.gmra.mxu0 %v12270_v5  ;;  %7162 = vmatmul.bf16.gmra.mxu1 %v12146_v46  ;;  %v7241_v24 = vmax.f32 %v7124_v29, 0.0  ;;  %v13346_v5 = vld [vmem:[%s21912_s5 + $0x2ec] sm:$0xf]  ;;  %v12159_v46 = vld [vmem:[%s21912_s5 + $0x2f8] sm:$0xf0] }
 0x930   :  { %v12162_v61 = vor.u32 %v13346_v5, %v12159_v46  ;;  %v12175_v46 = vld [vmem:[%s21912_s5 + $0x318] sm:$0xf0] }
 0x931   :  { %v6865_v43 = vpop.f32.mrf.mxu3 }
 0x932   :  { %v20092_v19 = vadd.f32 %v6865_v43, %v6697_v53 }
 0x934   :  { %22535 = vst [vmem:[#allocation22_spill] sm:$0xff] %v20092_v19  ;;  %v20097_v6 = vpop.f32.mrf.mxu0  ;;  %v7125_v14 = vpop.f32.mrf.mxu1 }
 0x935   :  { %v7126_v12 = vadd.f32 %v7125_v14, %v19836_v26  ;;  %v6701_v14 = vpop.f32.mrf.mxu2 }
 0x936   :  { %v6702_v16 = vadd.f32 %v6701_v14, %v22536_v27 }
 0x937   :  { %v7242_v38 = vmax.f32 %v7126_v12, 0.0 }
 0x939   :  { %v20118_v26 = vpop.f32.mrf.mxu3  ;;  %v7291_v29 = vpack.c.bf16 %v7242_v38, %v7241_v24  ;;  %v12389_v24 = vld [vmem:[%s21913_s7 + $0xc0] sm:$0xf]  ;;  %v13407_v38 = vld [vmem:[%s21913_s7 + $0xcc] sm:$0xf0] }
 0x93a   :  { %v12390_v5 = vor.u32 %v13407_v38, %v12389_v24 }
 0x93b   :  { %7918 = vmatmul.bf16.gmra.mxu2 %v12374_v28 }
 0x93c   :  { %v20120_v53 = vpop.f32.mrf.mxu0  ;;  %v7128_v43 = vpop.f32.mrf.mxu1 }
 0x93d   :  { %v7129_v59 = vadd.f32 %v7128_v43, %v19862_v45  ;;  %v13350_v45 = vld [vmem:[%s21912_s5 + $0x30c] sm:$0xf]  ;;  %v7000_v33 = vadd.f32 %v20120_v53, %v19865_v50 }
 0x93f   :  { %7038 = vmatmul.bf16.gmra.mxu0 %v12286_v1  ;;  %7167 = vmatmul.bf16.gmra.mxu1 %v12162_v61  ;;  %v7243_v21 = vmax.f32 %v7129_v59, 0.0  ;;  %v12178_v61 = vor.u32 %v13350_v45, %v12175_v46  ;;  %v13381_v45 = vld [vmem:[%s21913_s7 + $0x4] sm:$0xf] }
 0x941   :  { %v6870_v12 = vpop.f32.mrf.mxu3 }
 0x942   :  { %v20123_v42 = vadd.f32 %v6870_v12, %v6702_v16  ;;  %v12405_v16 = vld [vmem:[%s21913_s7 + $0xe0] sm:$0xf]  ;;  %v13411_v12 = vld [vmem:[%s21913_s7 + $0xec] sm:$0xf0] }
 0x944   :  { %v20126_v3 = vpop.f32.mrf.mxu0  ;;  %v7130_v52 = vpop.f32.mrf.mxu1 }
 0x945   :  { %v7131_v28 = vadd.f32 %v7130_v52, %v19869_v23 }
 0x947   :  { %v7244_v18 = vmax.f32 %v7131_v28, 0.0 }
 0x949   :  { %v7292_v1 = vpack.c.bf16 %v7244_v18, %v7243_v21 }
 0x94b   :  { %7923 = vmatmul.bf16.gmra.mxu2 %v12390_v5  ;;  %7974 = vmatpush.bf16.msrb.mxu3 %v7292_v1 }
 0x94c   :  { %v7004_v43 = vpop.f32.mrf.mxu0  ;;  %v7133_v14 = vpop.f32.mrf.mxu1 }
 0x94d   :  { %v20142_v27 = vadd.f32 %v7004_v43, %v19893_v22  ;;  %v7134_v23 = vadd.f32 %v7133_v14, %v19887_v57  ;;  %v12406_v57 = vor.u32 %v13411_v12, %v12405_v16  ;;  %v12207_v16 = vld [vmem:[%s21912_s5 + $0x358] sm:$0xf0] }
 0x94f   :  { %7172 = vmatmul.bf16.gmra.mxu1 %v12178_v61  ;;  %7975 = vmatpush.bf16.msrb.mxu3 %v7291_v29  ;;  %v7245_v22 = vmax.f32 %v7134_v23, 0.0  ;;  %v12191_v29 = vld [vmem:[%s21912_s5 + $0x338] sm:$0xf0] }
 0x953   :  { %7976 = vmatpush.bf16.msrb.mxu3 %v7290_v54  ;;  %v13354_v54 = vld [vmem:[%s21912_s5 + $0x32c] sm:$0xf] }
 0x954   :  { %v20145_v59 = vpop.f32.mrf.mxu0  ;;  %v7135_v52 = vpop.f32.mrf.mxu1  ;;  %v12194_v21 = vor.u32 %v13354_v54, %v12191_v29  ;;  %v13385_v54 = vld [vmem:[%s21913_s7 + $0x24] sm:$0xf]  ;;  %v12311_v29 = vld [vmem:[%s21913_s7 + $0x30] sm:$0xf0] }
 0x955   :  { %22537 = vst [vmem:[#allocation127_spill] sm:$0xff] %v20145_v59  ;;  %v7136_v24 = vadd.f32 %v7135_v52, %v19897_v58  ;;  %v13358_v52 = vld [vmem:[%s21912_s5 + $0x34c] sm:$0xf] }
 0x957   :  { %v7246_v38 = vmax.f32 %v7136_v24, 0.0  ;;  %7977 = vmatpush.bf16.msrb.mxu3 %v20056_v35 }
 0x959   :  { %v20161_v28 = vpack.c.bf16 %v7246_v38, %v7245_v22 }
 0x95b   :  { %7928 = vmatmul.bf16.gmra.mxu2 %v12406_v57  ;;  %7978 = vmatpush.bf16.msrb.mxu3 %v20022_v0  ;;  %v12295_v0 = vld [vmem:[%s21913_s7 + $0x10] sm:$0xf0] }
 0x95c   :  { %v7009_v58 = vpop.f32.mrf.mxu0  ;;  %v7138_v18 = vpop.f32.mrf.mxu1  ;;  %v12298_v61 = vor.u32 %v13381_v45, %v12295_v0  ;;  %v12314_v45 = vor.u32 %v13385_v54, %v12311_v29 }
 0x95d   :  { %v20165_v5 = vadd.f32 %v7009_v58, %v19924_v44  ;;  %v7139_v35 = vadd.f32 %v7138_v18, %v19919_v62  ;;  %v12421_v62 = vld [vmem:[%s21913_s7 + $0x100] sm:$0xf]  ;;  %v13415_v44 = vld [vmem:[%s21913_s7 + $0x10c] sm:$0xf0] }
 0x95e   :  { %v12422_v23 = vor.u32 %v13415_v44, %v12421_v62  ;;  %v13362_v44 = vld [vmem:[%s21912_s5 + $0x36c] sm:$0xf] }
 0x95f   :  { %7177 = vmatmul.bf16.gmra.mxu1 %v12194_v21  ;;  %7979 = vmatpush.bf16.msrb.mxu3 %v19989_v13  ;;  %v20185_v13 = vpop.f32.mrf.mxu2  ;;  %v7247_v43 = vmax.f32 %v7139_v35, 0.0 }
 0x963   :  { %7980 = vmatpush.bf16.msrb.mxu3 %v19954_v60 }
 0x964   :  { %v20176_v46 = vpop.f32.mrf.mxu0  ;;  %v7140_v1 = vpop.f32.mrf.mxu1 }
 0x965   :  { %22538 = vst [vmem:[#allocation130_spill] sm:$0xff] %v20176_v46  ;;  %v7141_v60 = vadd.f32 %v7140_v1, %v19936_v4  ;;  %v12210_v4 = vor.u32 %v13358_v52, %v12207_v16 }
 0x967   :  { %v7248_v14 = vmax.f32 %v7141_v60, 0.0  ;;  %7981 = vmatpush.bf16.msrb.mxu3 %v19915_v10  ;;  %v12223_v60 = vld [vmem:[%s21912_s5 + $0x378] sm:$0xf0] }
 0x969   :  { %v20194_v12 = vpack.c.bf16 %v7248_v14, %v7247_v43  ;;  %v12226_v43 = vor.u32 %v13362_v44, %v12223_v60 }
 0x96a   :  { %7982 = vmatmul.bf16.vlgmr.msrb.gmra.mxu3 %v12298_v61 }
 0x96b   :  { %7933 = vmatmul.bf16.gmra.mxu2 %v12422_v23 }
 0x96c   :  { %v7014_v24 = vpop.f32.mrf.mxu0  ;;  %v7143_v22 = vpop.f32.mrf.mxu1 }
 0x96d   :  { %v20197_v38 = vadd.f32 %v7014_v24, %v19961_v55  ;;  %v7144_v10 = vadd.f32 %v7143_v22, %v19957_v9  ;;  %v12437_v55 = vld [vmem:[%s21913_s7 + $0x120] sm:$0xf]  ;;  %v13419_v9 = vld [vmem:[%s21913_s7 + $0x12c] sm:$0xf0]  ;;  %v12327_v24 = vld [vmem:[%s21913_s7 + $0x50] sm:$0xf0] }
 0x96e   :  { %v20200_v57 = vpop.f32.mrf.mxu2  ;;  %v12438_v62 = vor.u32 %v13419_v9, %v12437_v55 }
 0x96f   :  { %7182 = vmatmul.bf16.gmra.mxu1 %v12210_v4  ;;  %v7249_v0 = vmax.f32 %v7144_v10, 0.0  ;;  %v13389_v4 = vld [vmem:[%s21913_s7 + $0x44] sm:$0xf] }
 0x974   :  { %v20208_v21 = vpop.f32.mrf.mxu0  ;;  %v7145_v58 = vpop.f32.mrf.mxu1 }
 0x975   :  { %22539 = vst [vmem:[#allocation133_spill] sm:$0xff] %v20208_v21  ;;  %v7146_v18 = vadd.f32 %v7145_v58, %v19970_v31  ;;  %v12330_v58 = vor.u32 %v13389_v4, %v12327_v24  ;;  %v22541_v21 = vld [vmem:[#allocation37_spill] sm:$0xff] }
 0x976   :  { %v20217_v35 = vpop.f32.mrf.mxu2 }
 0x977   :  { %v7250_v1 = vmax.f32 %v7146_v18, 0.0 }
 0x979   :  { %v20225_v61 = vpack.c.bf16 %v7250_v1, %v7249_v0  ;;  %v12239_v0 = vld [vmem:[%s21912_s5 + $0x398] sm:$0xf0] }
 0x97a   :  { %7987 = vmatmul.bf16.gmra.mxu3 %v12314_v45  ;;  %v13366_v45 = vld [vmem:[%s21912_s5 + $0x38c] sm:$0xf] }
 0x97b   :  { %7938 = vmatmul.bf16.gmra.mxu2 %v12438_v62  ;;  %v12242_v62 = vor.u32 %v13366_v45, %v12239_v0  ;;  %v12359_v45 = vld [vmem:[%s21913_s7 + $0x90] sm:$0xf0] }
 0x97c   :  { %v7019_v31 = vpop.f32.mrf.mxu0  ;;  %v7148_v14 = vpop.f32.mrf.mxu1 }
 0x97d   :  { %v20228_v23 = vadd.f32 %v7019_v31, %v19996_v56  ;;  %v7149_v52 = vadd.f32 %v7148_v14, %v19992_v15  ;;  %v12453_v56 = vld [vmem:[%s21913_s7 + $0x140] sm:$0xf]  ;;  %v13423_v15 = vld [vmem:[%s21913_s7 + $0x14c] sm:$0xf0]  ;;  %v13393_v14 = vld [vmem:[%s21913_s7 + $0x64] sm:$0xf] }
 0x97e   :  { %v20231_v16 = vpop.f32.mrf.mxu2  ;;  %v12454_v18 = vor.u32 %v13423_v15, %v12453_v56  ;;  %v13370_v15 = vld [vmem:[%s21912_s5 + $0x3ac] sm:$0xf] }
 0x97f   :  { %7187 = vmatmul.bf16.gmra.mxu1 %v12226_v43  ;;  %v7251_v55 = vmax.f32 %v7149_v52, 0.0  ;;  %v12343_v52 = vld [vmem:[%s21913_s7 + $0x70] sm:$0xf0] }
 0x984   :  { %v20239_v22 = vpop.f32.mrf.mxu0  ;;  %v7150_v10 = vpop.f32.mrf.mxu1 }
 0x985   :  { %22540 = vst [vmem:[#allocation134_spill] sm:$0xff] %v20239_v22  ;;  %v7151_v54 = vadd.f32 %v7150_v10, %v20005_v41  ;;  %v12346_v10 = vor.u32 %v13393_v14, %v12343_v52  ;;  %v6664_v22 = vadd.f32 %v19806_v51, %v22541_v21  ;;  %v13405_v51 = vld [vmem:[%s21913_s7 + $0xc4] sm:$0xf]  ;;  %v22544_v21 = vld [vmem:[#allocation72_spill] sm:$0xff] }
 0x986   :  { %v20248_v29 = vpop.f32.mrf.mxu2 }
 0x987   :  { %v7252_v9 = vmax.f32 %v7151_v54, 0.0  ;;  %v12255_v54 = vld [vmem:[%s21912_s5 + $0x3b8] sm:$0xf0] }
 0x989   :  { %v20256_v1 = vpack.c.bf16 %v7252_v9, %v7251_v55 }
 0x98a   :  { %7992 = vmatmul.bf16.gmra.mxu3 %v12330_v58  ;;  %v12258_v58 = vor.u32 %v13370_v15, %v12255_v54  ;;  %v13401_v54 = vld [vmem:[%s21913_s7 + $0xa4] sm:$0xf] }
 0x98b   :  { %7943 = vmatmul.bf16.gmra.mxu2 %v12454_v18  ;;  %v13397_v18 = vld [vmem:[%s21913_s7 + $0x84] sm:$0xf] }
 0x98c   :  { %v7024_v41 = vpop.f32.mrf.mxu0  ;;  %v7153_v44 = vpop.f32.mrf.mxu1  ;;  %v12362_v14 = vor.u32 %v13397_v18, %v12359_v45  ;;  %v12501_v45 = vld [vmem:[%s21913_s7 + $0x1a0] sm:$0xf] }
 0x98d   :  { %v20259_v60 = vadd.f32 %v7024_v41, %v20031_v63  ;;  %v20262_v43 = vadd.f32 %v7153_v44, %v20027_v32  ;;  %v12469_v63 = vld [vmem:[%s21913_s7 + $0x160] sm:$0xf]  ;;  %v13427_v32 = vld [vmem:[%s21913_s7 + $0x16c] sm:$0xf0] }
 0x98e   :  { %v20264_v31 = vpop.f32.mrf.mxu2  ;;  %v12470_v56 = vor.u32 %v13427_v32, %v12469_v63  ;;  %v13431_v41 = vld [vmem:[%s21913_s7 + $0x18c] sm:$0xf0]  ;;  %v13374_v63 = vld [vmem:[%s21912_s5 + $0x3cc] sm:$0xf]  ;;  %v12271_v32 = vld [vmem:[%s21912_s5 + $0x3d8] sm:$0xf0] }
 0x98f   :  { %7192 = vmatmul.bf16.gmra.mxu1 %v12242_v62  ;;  %v12485_v62 = vld [vmem:[%s21913_s7 + $0x180] sm:$0xf] }
 0x990   :  { %v12486_v52 = vor.u32 %v13431_v41, %v12485_v62  ;;  %v13435_v62 = vld [vmem:[%s21913_s7 + $0x1ac] sm:$0xf0] }
 0x994   :  { %v20272_v4 = vpop.f32.mrf.mxu1 }
 0x996   :  { %v20280_v24 = vpop.f32.mrf.mxu2 }
 0x99a   :  { %7997 = vmatmul.bf16.gmra.mxu3 %v12346_v10  ;;  %v12274_v10 = vor.u32 %v13374_v63, %v12271_v32  ;;  %v13378_v63 = vld [vmem:[%s21912_s5 + $0x3ec] sm:$0xf]  ;;  %v12287_v32 = vld [vmem:[%s21912_s5 + $0x3f8] sm:$0xf0] }
 0x99b   :  { %7948 = vmatmul.bf16.gmra.mxu2 %v12470_v56 }
 0x99c   :  { %v20288_v55 = vpop.f32.mrf.mxu1 }
 0x99e   :  { %v20290_v9 = vpop.f32.mrf.mxu2 }
 0x99f   :  { %7197 = vmatmul.bf16.gmra.mxu1 %v12258_v58  ;;  %v12375_v58 = vld [vmem:[%s21913_s7 + $0xb0] sm:$0xf0] }
 0x9a4   :  { %v7160_v0 = vpop.f32.mrf.mxu1 }
 0x9a6   :  { %v20304_v44 = vpop.f32.mrf.mxu2 }
 0x9aa   :  { %8002 = vmatmul.bf16.gmra.mxu3 %v12362_v14  ;;  %v12378_v14 = vor.u32 %v13401_v54, %v12375_v58  ;;  %v22542_v54 = vld [vmem:[#allocation115_spill] sm:$0xff] }
 0x9ab   :  { %7953 = vmatmul.bf16.gmra.mxu2 %v12486_v52  ;;  %v12502_v52 = vor.u32 %v13435_v62, %v12501_v45  ;;  %v6659_v58 = vadd.f32 %v19763_v37, %v22542_v54  ;;  %v20340_v45 = vpop.permute.xlu0 %7527  ;;  %v6833_v62 = vadd.f32 %v19884_v30, %v6664_v22  ;;  %v12391_v37 = vld [vmem:[%s21913_s7 + $0xd0] sm:$0xf0]  ;;  %v6654_v30 = vadd.f32 %v19719_v49, %v22544_v21 }
 0x9ac   :  { %v7163_v56 = vpop.f32.mrf.mxu1  ;;  %22543 = vst [vmem:[#allocation136_spill] sm:$0xff] %v20340_v45  ;;  %v6995_v22 = vadd.f32 %v20089_v11, %v19832_v40  ;;  %v12394_v49 = vor.u32 %v13405_v51, %v12391_v37 }
 0x9ae   :  { %v20312_v15 = vpop.f32.mrf.mxu2  ;;  %v7164_v19 = vadd.f32 %v7163_v56, %v6995_v22 }
 0x9af   :  { %7202 = vmatmul.bf16.gmra.mxu1 %v12274_v10  ;;  %v12290_v10 = vor.u32 %v13378_v63, %v12287_v32  ;;  %v7002_v63 = vadd.f32 %v20126_v3, %v6833_v62 }
 0x9b4   :  { %v7165_v18 = vpop.f32.mrf.mxu1 }
 0x9b6   :  { %v20326_v41 = vpop.f32.mrf.mxu2 }
 0x9ba   :  { %8007 = vmatmul.bf16.gmra.mxu3 %v12378_v14  ;;  %v6828_v14 = vadd.f32 %v19857_v48, %v6659_v58  ;;  %v12517_v48 = vld [vmem:[%s21913_s7 + $0x1c0] sm:$0xf] }
 0x9bb   :  { %7958 = vmatmul.bf16.gmra.mxu2 %v12502_v52  ;;  %v20346_v52 = vpop.permute.xlu2 %7437 }
 0x9bc   :  { %v7168_v59 = vpop.f32.mrf.mxu1  ;;  %v6997_v50 = vadd.f32 %v20097_v6, %v6828_v14  ;;  %v22545_v14 = vld [vmem:[#allocation84_spill] sm:$0xff] }
 0x9bd   :  { %v7169_v32 = vadd.f32 %v7168_v59, %v7000_v33  ;;  %v13439_v33 = vld [vmem:[%s21913_s7 + $0x1cc] sm:$0xf0]  ;;  %v6823_v59 = vadd.f32 %v19823_v39, %v6654_v30  ;;  %v6649_v21 = vadd.f32 %v19675_v34, %v22545_v14  ;;  %v6990_v39 = vadd.f32 %v20058_v25, %v19796_v7  ;;  %v13413_v14 = vld [vmem:[%s21913_s7 + $0x104] sm:$0xf] }
 0x9be   :  { %v20334_v46 = vpop.f32.mrf.mxu2  ;;  %v12518_v62 = vor.u32 %v13439_v33, %v12517_v48  ;;  %v7257_v34 = vmax.f32 %v7164_v19, 0.0  ;;  %v13409_v19 = vld [vmem:[%s21913_s7 + $0xe4] sm:$0xf] }
 0x9bf   :  { %7207 = vmatmul.bf16.gmra.mxu1 %v12290_v10  ;;  %v7166_v10 = vadd.f32 %v7165_v18, %v6997_v50  ;;  %v7259_v6 = vmax.f32 %v7169_v32, 0.0  ;;  %v6992_v45 = vadd.f32 %v20066_v47, %v6823_v59  ;;  %v20375_v18 = vpop.permute.xlu0 %7442  ;;  %v7159_v51 = vadd.f32 %v20288_v55, %v6990_v39  ;;  %v12533_v55 = vld [vmem:[%s21913_s7 + $0x1e0] sm:$0xf]  ;;  %v13443_v50 = vld [vmem:[%s21913_s7 + $0x1ec] sm:$0xf0] }
 0x9c1   :  { %v7161_v40 = vadd.f32 %v7160_v0, %v6992_v45  ;;  %v7258_v11 = vmax.f32 %v7166_v10, 0.0  ;;  %v7255_v37 = vmax.f32 %v7159_v51, 0.0  ;;  %v20409_v10 = vpop.permute.xlu1 %7532 }
 0x9c2   :  { %22547 = vst [vmem:[#allocation7_spill] sm:$0xff] %v20409_v10 }
 0x9c3   :  { %v20379_v56 = vpop.permute.xlu2 %7522  ;;  %v7256_v25 = vmax.f32 %v7161_v40, 0.0  ;;  %v7299_v45 = vpack.c.bf16 %v7258_v11, %v7257_v34 }
 0x9c4   :  { %v7170_v53 = vpop.f32.mrf.mxu1  ;;  %22546 = vst [vmem:[#allocation138_spill] sm:$0xff] %v20379_v56 }
 0x9c5   :  { %v7171_v3 = vadd.f32 %v7170_v53, %v7002_v63  ;;  %v6818_v63 = vadd.f32 %v19787_v20, %v6649_v21 }
 0x9c6   :  { %v20367_v54 = vpop.f32.mrf.mxu2 }
 0x9c7   :  { %v7260_v58 = vmax.f32 %v7171_v3, 0.0  ;;  %v6987_v32 = vadd.f32 %v20033_v2, %v6818_v63  ;;  %v7298_v2 = vpack.c.bf16 %v7256_v25, %v7255_v37  ;;  %v20402_v53 = vpop.permute.xlu0 %7427  ;;  %v20434_v63 = vpop.f32.mrf.mxu3 }
 0x9c9   :  { %v7300_v17 = vpack.c.bf16 %v7260_v58, %v7259_v6  ;;  %v7156_v7 = vadd.f32 %v20272_v4, %v6987_v32  ;;  %v20438_v11 = vpop.permute.xlu1 %7517 }
 0x9ca   :  { %8012 = vmatmul.bf16.gmra.mxu3 %v12394_v49  ;;  %22548 = vst [vmem:[#allocation88_spill] sm:$0xff] %v20438_v11  ;;  %v22563_v11 = vld [vmem:[#allocation118_spill] sm:$0xff] }
 0x9cb   :  { %7963 = vmatmul.bf16.gmra.mxu2 %v12518_v62  ;;  %v7254_v30 = vmax.f32 %v7156_v7, 0.0  ;;  %v20406_v59 = vpop.permute.xlu2 %7507 }
 0x9cc   :  { %8063 = vmatpush.bf16.msra.mxu2 %v7300_v17  ;;  %v7173_v47 = vpop.f32.mrf.mxu1  ;;  %v12407_v17 = vld [vmem:[%s21913_s7 + $0xf0] sm:$0xf0] }
 0x9cd   :  { %v20382_v20 = vadd.f32 %v7173_v47, %v20142_v27  ;;  %v7253_v27 = vmax.f32 %v20262_v43, 0.0  ;;  %v12410_v3 = vor.u32 %v13409_v19, %v12407_v17  ;;  %v12534_v43 = vor.u32 %v13443_v50, %v12533_v55  ;;  %v12439_v19 = vld [vmem:[%s21913_s7 + $0x130] sm:$0xf0] }
 0x9ce   :  { %v20385_v0 = vpop.f32.mrf.mxu2 }
 0x9cf   :  { %v7297_v33 = vpack.c.bf16 %v7254_v30, %v7253_v27  ;;  %v20416_v58 = vpop.permute.xlu0 %7512  ;;  %v13388_v27 = vld [vmem:[%s21913_s7 + $0x34] sm:$0xf0] }
 0x9d0   :  { %8064 = vmatpush.bf16.msra.mxu2 %v7299_v45 }
 0x9d1   :  { %v7433_v30 = vpop.permute.xlu1 %7432 }
 0x9d3   :  { %v7423_v62 = vpop.permute.xlu2 %7422 }
 0x9d4   :  { %8065 = vmatpush.bf16.msra.mxu2 %v7298_v2  ;;  %v20394_v4 = vpop.f32.mrf.mxu1 }
 0x9d6   :  { %v20404_v48 = vpop.f32.mrf.mxu2 }
 0x9d8   :  { %8066 = vmatpush.bf16.msra.mxu2 %v7297_v33 }
 0x9da   :  { %8017 = vmatmul.bf16.gmra.mxu3 %v12410_v3 }
 0x9db   :  { %7968 = vmatmul.bf16.gmra.mxu2 %v12534_v43  ;;  %v7408_v51 = vpop.permute.xlu2 %7407 }
 0x9dc   :  { %8067 = vmatpush.bf16.msra.mxu2 %v20256_v1  ;;  %v7178_v22 = vpop.f32.mrf.mxu1  ;;  %v12423_v1 = vld [vmem:[%s21913_s7 + $0x110] sm:$0xf0]  ;;  %v7895_v34 = vadd.f32 %v20200_v57, %v7408_v51 }
 0x9dd   :  { %v20412_v49 = vadd.f32 %v7178_v22, %v20165_v5  ;;  %v12301_v5 = vld [vmem:[%s21913_s7 + $0x8] sm:$0xf]  ;;  %v12426_v40 = vor.u32 %v13413_v14, %v12423_v1  ;;  %v7418_v22 = vpop.permute.xlu1 %7417  ;;  %v12455_v51 = vld [vmem:[%s21913_s7 + $0x150] sm:$0xf0] }
 0x9de   :  { %v20414_v6 = vpop.f32.mrf.mxu2 }
 0x9e0   :  { %8068 = vmatpush.bf16.msra.mxu2 %v20225_v61  ;;  %v13384_v61 = vld [vmem:[%s21913_s7 + $0x14] sm:$0xf0] }
 0x9e1   :  { %v12302_v32 = vor.u32 %v13384_v61, %v12301_v5 }
 0x9e4   :  { %8069 = vmatpush.bf16.msra.mxu2 %v20194_v12  ;;  %v20426_v21 = vpop.f32.mrf.mxu1  ;;  %v20441_v12 = vpop.permute.xlu0 %7497 }
 0x9e6   :  { %v20436_v39 = vpop.f32.mrf.mxu2 }
 0x9e8   :  { %8070 = vmatpush.bf16.msra.mxu2 %v20161_v28  ;;  %v13417_v28 = vld [vmem:[%s21913_s7 + $0x124] sm:$0xf] }
 0x9e9   :  { %v12442_v3 = vor.u32 %v13417_v28, %v12439_v19 }
 0x9ea   :  { %8022 = vmatmul.bf16.gmra.mxu3 %v12426_v40 }
 0x9eb   :  { %8071 = vmatmul.bf16.vlgmr.msra.gmra.mxu2 %v12302_v32  ;;  %v13421_v32 = vld [vmem:[%s21913_s7 + $0x144] sm:$0xf] }
 0x9ec   :  { %v7183_v47 = vpop.f32.mrf.mxu1  ;;  %v7413_v2 = vpop.permute.xlu0 %7412 }
 0x9ed   :  { %v20445_v7 = vadd.f32 %v7183_v47, %v20197_v38  ;;  %v7983_v25 = vpop.f32.mrf.mxu3  ;;  %v7897_v57 = vadd.f32 %v20217_v35, %v7413_v2  ;;  %v12317_v38 = vld [vmem:[%s21913_s7 + $0x28] sm:$0xf]  ;;  %v7900_v35 = vadd.f32 %v20231_v16, %v7418_v22  ;;  %v20485_v16 = vpop.f32.mrf.mxu0 }
 0x9ee   :  { %v20447_v45 = vpop.f32.mrf.mxu2  ;;  %v20449_v37 = vadd.f32 %v7983_v25, %v7895_v34  ;;  %v12318_v43 = vor.u32 %v13388_v27, %v12317_v38  ;;  %v7902_v34 = vadd.f32 %v20248_v29, %v7423_v62  ;;  %v13392_v25 = vld [vmem:[%s21913_s7 + $0x54] sm:$0xf0]  ;;  %v7905_v29 = vadd.f32 %v20264_v31, %v20402_v53 }
 0x9ef   :  { %v7907_v31 = vadd.f32 %v20280_v24, %v7433_v30  ;;  %v7910_v24 = vadd.f32 %v20290_v9, %v20346_v52  ;;  %v12365_v52 = vld [vmem:[%s21913_s7 + $0x88] sm:$0xf] }
 0x9f4   :  { %v20458_v17 = vpop.f32.mrf.mxu1 }
 0x9f5   :  { %v7985_v55 = vpop.f32.mrf.mxu3 }
 0x9f6   :  { %v20466_v50 = vpop.f32.mrf.mxu2  ;;  %v20468_v33 = vadd.f32 %v7985_v55, %v7897_v57  ;;  %v12458_v57 = vor.u32 %v13421_v32, %v12455_v51 }
 0x9fa   :  { %8027 = vmatmul.bf16.gmra.mxu3 %v12442_v3  ;;  %v20504_v3 = vpop.f32.mrf.mxu0 }
 0x9fb   :  { %8076 = vmatmul.bf16.gmra.mxu2 %v12318_v43 }
 0x9fc   :  { %v7188_v14 = vpop.f32.mrf.mxu1 }
 0x9fd   :  { %v20472_v1 = vadd.f32 %v7188_v14, %v20228_v23  ;;  %v7988_v5 = vpop.f32.mrf.mxu3  ;;  %v12333_v23 = vld [vmem:[%s21913_s7 + $0x48] sm:$0xf]  ;;  %v12471_v14 = vld [vmem:[%s21913_s7 + $0x170] sm:$0xf0] }
 0x9fe   :  { %v20474_v61 = vpop.f32.mrf.mxu2  ;;  %v20476_v40 = vadd.f32 %v7988_v5, %v7900_v35  ;;  %v12334_v38 = vor.u32 %v13392_v25, %v12333_v23  ;;  %v13425_v35 = vld [vmem:[%s21913_s7 + $0x164] sm:$0xf]  ;;  %v13396_v5 = vld [vmem:[%s21913_s7 + $0x74] sm:$0xf0] }
 0x9ff   :  { %v12474_v23 = vor.u32 %v13425_v35, %v12471_v14  ;;  %v12487_v35 = vld [vmem:[%s21913_s7 + $0x190] sm:$0xf0]  ;;  %v7912_v14 = vadd.f32 %v20304_v44, %v20375_v18  ;;  %v22555_v44 = vld [vmem:[#allocation131_spill] sm:$0xff] }
 0xa00   :  { %v7915_v18 = vadd.f32 %v20312_v15, %v22555_v44  ;;  %v12381_v15 = vld [vmem:[%s21913_s7 + $0xa8] sm:$0xf] }
 0xa04   :  { %v20487_v47 = vpop.f32.mrf.mxu1 }
 0xa05   :  { %v7990_v2 = vpop.f32.mrf.mxu3 }
 0xa06   :  { %v20495_v28 = vpop.f32.mrf.mxu2  ;;  %v20497_v19 = vadd.f32 %v7990_v2, %v7902_v34  ;;  %v20529_v2 = vpop.f32.mrf.mxu0 }
 0xa0a   :  { %8032 = vmatmul.bf16.gmra.mxu3 %v12458_v57 }
 0xa0b   :  { %8081 = vmatmul.bf16.gmra.mxu2 %v12334_v38 }
 0xa0c   :  { %v7193_v62 = vpop.f32.mrf.mxu1 }
 0xa0d   :  { %v20502_v27 = vadd.f32 %v7193_v62, %v20259_v60  ;;  %v7993_v55 = vpop.f32.mrf.mxu3  ;;  %v12349_v60 = vld [vmem:[%s21913_s7 + $0x68] sm:$0xf] }
 0xa0e   :  { %v20506_v43 = vpop.f32.mrf.mxu2  ;;  %v20508_v22 = vadd.f32 %v7993_v55, %v7905_v29  ;;  %v12350_v25 = vor.u32 %v13396_v5, %v12349_v60  ;;  %v7034_v62 = vpop.f32.mrf.mxu0  ;;  %v13429_v55 = vld [vmem:[%s21913_s7 + $0x184] sm:$0xf] }
 0xa14   :  { %v20517_v53 = vpop.f32.mrf.mxu1 }
 0xa15   :  { %v7995_v32 = vpop.f32.mrf.mxu3 }
 0xa16   :  { %v20525_v51 = vpop.f32.mrf.mxu2  ;;  %v20527_v34 = vadd.f32 %v7995_v32, %v7907_v31  ;;  %v13400_v31 = vld [vmem:[%s21913_s7 + $0x94] sm:$0xf0] }
 0xa17   :  { %22549 = vst [vmem:[#allocation15_spill] sm:$0xff] %v20525_v51  ;;  %v22564_v51 = vld [vmem:[#allocation58_spill] sm:$0xff] }
 0xa18   :  { %22550 = vst [vmem:[#allocation23_spill] sm:$0xff] %v20527_v34  ;;  %v6699_v34 = vadd.f32 %v20094_v36, %v22563_v11  ;;  %v13437_v36 = vld [vmem:[%s21913_s7 + $0x1c4] sm:$0xf] }
 0xa19   :  { %v22566_v11 = vld [vmem:[#allocation123_spill] sm:$0xff] }
 0xa1a   :  { %8037 = vmatmul.bf16.gmra.mxu3 %v12474_v23  ;;  %v12490_v23 = vor.u32 %v13429_v55, %v12487_v35  ;;  %v12503_v55 = vld [vmem:[%s21913_s7 + $0x1b0] sm:$0xf0]  ;;  %v22558_v35 = vld [vmem:[#allocation75_spill] sm:$0xff] }
 0xa1b   :  { %8086 = vmatmul.bf16.gmra.mxu2 %v12350_v25  ;;  %v12366_v25 = vor.u32 %v13400_v31, %v12365_v52 }
 0xa1c   :  { %v20533_v30 = vpop.f32.mrf.mxu1 }
 0xa1d   :  { %v7998_v57 = vpop.f32.mrf.mxu3 }
 0xa1e   :  { %v20535_v38 = vpop.f32.mrf.mxu2  ;;  %v20537_v29 = vadd.f32 %v7998_v57, %v7910_v24  ;;  %v7036_v24 = vpop.f32.mrf.mxu0 }
 0xa1f   :  { %22551 = vst [vmem:[#allocation74_spill] sm:$0xff] %v20535_v38 }
 0xa20   :  { %22552 = vst [vmem:[#allocation31_spill] sm:$0xff] %v20537_v29 }
 0xa24   :  { %v20547_v9 = vpop.f32.mrf.mxu1 }
 0xa25   :  { %v8000_v60 = vpop.f32.mrf.mxu3 }
 0xa26   :  { %v20555_v5 = vpop.f32.mrf.mxu2  ;;  %v20557_v32 = vadd.f32 %v8000_v60, %v7912_v14  ;;  %v7917_v14 = vadd.f32 %v20326_v41, %v22558_v35  ;;  %v7039_v60 = vpop.f32.mrf.mxu0  ;;  %v22560_v41 = vld [vmem:[#allocation129_spill] sm:$0xff] }
 0xa27   :  { %22553 = vst [vmem:[#allocation40_spill] sm:$0xff] %v20555_v5  ;;  %v13433_v5 = vld [vmem:[%s21913_s7 + $0x1a4] sm:$0xf]  ;;  %v7920_v35 = vadd.f32 %v20334_v46, %v22560_v41  ;;  %v22565_v46 = vld [vmem:[#allocation73_spill] sm:$0xff] }
 0xa28   :  { %22554 = vst [vmem:[#allocation55_spill] sm:$0xff] %v20557_v32  ;;  %v12506_v44 = vor.u32 %v13433_v5, %v12503_v55  ;;  %v6868_v5 = vadd.f32 %v20118_v26, %v6699_v34  ;;  %v13408_v34 = vld [vmem:[%s21913_s7 + $0xd4] sm:$0xf0] }
 0xa2a   :  { %8042 = vmatmul.bf16.gmra.mxu3 %v12490_v23 }
 0xa2b   :  { %8091 = vmatmul.bf16.gmra.mxu2 %v12366_v25 }
 0xa2c   :  { %v7203_v57 = vpop.f32.mrf.mxu1 }
 0xa2d   :  { %v8003_v10 = vpop.f32.mrf.mxu3 }
 0xa2e   :  { %v20561_v56 = vpop.f32.mrf.mxu2  ;;  %v20563_v29 = vadd.f32 %v8003_v10, %v7915_v18  ;;  %v13404_v10 = vld [vmem:[%s21913_s7 + $0xb4] sm:$0xf0] }
 0xa2f   :  { %22556 = vst [vmem:[#allocation17_spill] sm:$0xff] %v20561_v56  ;;  %v12382_v18 = vor.u32 %v13404_v10, %v12381_v15  ;;  %v7040_v15 = vadd.f32 %v7039_v60, %v20123_v42  ;;  %v6694_v10 = vadd.f32 %v20060_v8, %v22565_v46  ;;  %v12397_v8 = vld [vmem:[%s21913_s7 + $0xc8] sm:$0xf] }
 0xa30   :  { %22557 = vst [vmem:[#allocation53_spill] sm:$0xff] %v20563_v29 }
 0xa31   :  { %v6863_v26 = vadd.f32 %v22566_v11, %v6694_v10 }
 0xa34   :  { %v7205_v52 = vpop.f32.mrf.mxu1 }
 0xa35   :  { %v8005_v31 = vpop.f32.mrf.mxu3 }
 0xa36   :  { %v20579_v23 = vpop.f32.mrf.mxu2  ;;  %v20581_v25 = vadd.f32 %v8005_v31, %v7917_v14  ;;  %v6704_v14 = vadd.f32 %v20185_v13, %v22564_v51  ;;  %v7041_v31 = vpop.f32.mrf.mxu0  ;;  %v12519_v13 = vld [vmem:[%s21913_s7 + $0x1d0] sm:$0xf0]  ;;  %v22567_v51 = vld [vmem:[#allocation128_spill] sm:$0xff] }
 0xa37   :  { %v12522_v46 = vor.u32 %v13437_v36, %v12519_v13  ;;  %v22575_v36 = vld [vmem:[#allocation64_spill] sm:$0xff] }
 0xa38   :  { %22559 = vst [vmem:[#allocation59_spill] sm:$0xff] %v20581_v25  ;;  %v6873_v55 = vadd.f32 %v20434_v63, %v6704_v14  ;;  %v7922_v63 = vadd.f32 %v20367_v54, %v22567_v51  ;;  %v22569_v14 = vld [vmem:[#allocation94_spill] sm:$0xff]  ;;  %v22571_v25 = vld [vmem:[#allocation20_spill] sm:$0xff] }
 0xa39   :  { %v22576_v13 = vld [vmem:[#allocation44_spill] sm:$0xff] }
 0xa3a   :  { %8047 = vmatmul.bf16.gmra.mxu3 %v12506_v44  ;;  %v7037_v44 = vadd.f32 %v7036_v24, %v6868_v5 }
 0xa3b   :  { %8096 = vmatmul.bf16.gmra.mxu2 %v12382_v18  ;;  %v7042_v18 = vadd.f32 %v7041_v31, %v6873_v55  ;;  %v22570_v31 = vld [vmem:[#allocation43_spill] sm:$0xff]  ;;  %v7032_v55 = vadd.f32 %v20529_v2, %v6863_v26  ;;  %v22573_v2 = vld [vmem:[#allocation90_spill] sm:$0xff]  ;;  %v22574_v26 = vld [vmem:[#allocation93_spill] sm:$0xff] }
 0xa3c   :  { %v7208_v29 = vpop.f32.mrf.mxu1  ;;  %v7206_v60 = vadd.f32 %v7205_v52, %v7037_v44  ;;  %v6689_v5 = vadd.f32 %v22570_v31, %v22569_v14  ;;  %v22580_v31 = vld [vmem:[#allocation36_spill] sm:$0xff] }
 0xa3d   :  { %v8008_v56 = vpop.f32.mrf.mxu3  ;;  %v7201_v44 = vadd.f32 %v20547_v9, %v7032_v55 }
 0xa3e   :  { %v20585_v32 = vpop.f32.mrf.mxu2  ;;  %v20587_v38 = vadd.f32 %v8008_v56, %v7920_v35  ;;  %v7209_v56 = vadd.f32 %v7208_v29, %v7040_v15  ;;  %v22568_v29 = vld [vmem:[#allocation22_spill] sm:$0xff] }
 0xa3f   :  { %22561 = vst [vmem:[#allocation69_spill] sm:$0xff] %v20585_v32  ;;  %v7035_v24 = vadd.f32 %v7034_v62, %v22568_v29  ;;  %v6858_v32 = vadd.f32 %v22571_v25, %v6689_v5  ;;  %v22572_v62 = vld [vmem:[#allocation121_spill] sm:$0xff]  ;;  %v6684_v29 = vadd.f32 %v22574_v26, %v22573_v2  ;;  %v7925_v25 = vadd.f32 %v20385_v0, %v22575_v36  ;;  %v12413_v2 = vld [vmem:[%s21913_s7 + $0xe8] sm:$0xf] }
 0xa40   :  { %22562 = vst [vmem:[#allocation66_spill] sm:$0xff] %v20587_v38  ;;  %v7275_v11 = vmax.f32 %v7209_v56, 0.0  ;;  %v12398_v38 = vor.u32 %v13408_v34, %v12397_v8  ;;  %v7030_v52 = vadd.f32 %v20504_v3, %v22572_v62  ;;  %v7272_v8 = vmax.f32 %v7201_v44, 0.0  ;;  %v13441_v44 = vld [vmem:[%s21913_s7 + $0x1e4] sm:$0xf]  ;;  %v22585_v26 = vld [vmem:[#allocation76_spill] sm:$0xff] }
 0xa41   :  { %v7204_v10 = vadd.f32 %v7203_v57, %v7035_v24  ;;  %v6853_v3 = vadd.f32 %v22576_v13, %v6684_v29 }
 0xa42   :  { %v7199_v57 = vadd.f32 %v20533_v30, %v7030_v52  ;;  %v7269_v52 = vmax.f32 %v20502_v27, 0.0  ;;  %v13412_v27 = vld [vmem:[%s21913_s7 + $0xf4] sm:$0xf0] }
 0xa43   :  { %v7273_v56 = vmax.f32 %v7204_v10, 0.0  ;;  %v22582_v10 = vld [vmem:[#allocation83_spill] sm:$0xff] }
 0xa44   :  { %v7210_v42 = vpop.f32.mrf.mxu1  ;;  %v7271_v14 = vmax.f32 %v7199_v57, 0.0 }
 0xa45   :  { %v7211_v41 = vadd.f32 %v7210_v42, %v7042_v18  ;;  %v8010_v35 = vpop.f32.mrf.mxu3  ;;  %v7274_v18 = vmax.f32 %v7206_v60, 0.0 }
 0xa46   :  { %v20617_v54 = vpop.f32.mrf.mxu2  ;;  %v20619_v15 = vadd.f32 %v8010_v35, %v7922_v63  ;;  %v7027_v63 = vadd.f32 %v20485_v16, %v6858_v32  ;;  %v22577_v16 = vld [vmem:[#allocation13_spill] sm:$0xff]  ;;  %v22578_v32 = vld [vmem:[#allocation92_spill] sm:$0xff]  ;;  %v22579_v35 = vld [vmem:[#allocation134_spill] sm:$0xff] }
 0xa47   :  { %v7276_v51 = vmax.f32 %v7211_v41, 0.0  ;;  %v7307_v24 = vpack.c.bf16 %v7274_v18, %v7273_v56  ;;  %v6679_v30 = vadd.f32 %v22578_v32, %v22577_v16  ;;  %v12535_v18 = vld [vmem:[%s21913_s7 + $0x1f0] sm:$0xf0]  ;;  %v7267_v16 = vmax.f32 %v20472_v1, 0.0 }
 0xa48   :  { %v7196_v9 = vadd.f32 %v20517_v53, %v7027_v63  ;;  %v7306_v53 = vpack.c.bf16 %v7272_v8, %v7271_v14  ;;  %v12414_v32 = vor.u32 %v13412_v27, %v12413_v2 }
 0xa49   :  { %v7308_v42 = vpack.c.bf16 %v7276_v51, %v7275_v11  ;;  %v6848_v0 = vadd.f32 %v22580_v31, %v6679_v30  ;;  %v22583_v51 = vld [vmem:[#allocation133_spill] sm:$0xff]  ;;  %v22589_v30 = vld [vmem:[#allocation91_spill] sm:$0xff] }
 0xa4a   :  { %8052 = vmatmul.bf16.gmra.mxu3 %v12522_v46  ;;  %v7270_v55 = vmax.f32 %v7196_v9, 0.0  ;;  %v22581_v46 = vld [vmem:[#allocation26_spill] sm:$0xff]  ;;  %v22590_v31 = vld [vmem:[#allocation127_spill] sm:$0xff] }
 0xa4b   :  { %8101 = vmatmul.bf16.gmra.mxu2 %v12398_v38  ;;  %8152 = vmatpush.bf16.msra.mxu3 %v7308_v42  ;;  %v7022_v38 = vadd.f32 %v22579_v35, %v6853_v3  ;;  %v6674_v11 = vadd.f32 %v22582_v10, %v22581_v46  ;;  %v7017_v62 = vadd.f32 %v22583_v51, %v6848_v0  ;;  %v22584_v42 = vld [vmem:[#allocation126_spill] sm:$0xff]  ;;  %v22586_v3 = vld [vmem:[#allocation24_spill] sm:$0xff] }
 0xa4c   :  { %v7305_v36 = vpack.c.bf16 %v7270_v55, %v7269_v52  ;;  %v22587_v9 = vld [vmem:[#allocation98_spill] sm:$0xff]  ;;  %v7503_v52 = vpop.permute.xlu1 %7502 }
 0xa4d   :  { %v8013_v34 = vpop.f32.mrf.mxu3  ;;  %v7191_v5 = vadd.f32 %v20487_v47, %v7022_v38  ;;  %v7927_v47 = vadd.f32 %v20404_v48, %v22584_v42  ;;  %v6843_v29 = vadd.f32 %v22585_v26, %v6674_v11  ;;  %v7186_v63 = vadd.f32 %v20458_v17, %v7017_v62  ;;  %v22591_v55 = vld [vmem:[#allocation70_spill] sm:$0xff]  ;;  %v22592_v42 = vld [vmem:[#allocation16_spill] sm:$0xff] }
 0xa4e   :  { %v20633_v60 = vpop.f32.mrf.mxu2  ;;  %v20635_v41 = vadd.f32 %v8013_v34, %v7925_v25  ;;  %v12538_v48 = vor.u32 %v13441_v44, %v12535_v18  ;;  %v6669_v8 = vadd.f32 %v22587_v9, %v22586_v3  ;;  %v22588_v34 = vld [vmem:[#allocation130_spill] sm:$0xff]  ;;  %v7263_v62 = vmax.f32 %v20412_v49, 0.0  ;;  %v12429_v49 = vld [vmem:[%s21913_s7 + $0x108] sm:$0xf] }
 0xa4f   :  { %8153 = vmatpush.bf16.msra.mxu3 %v7307_v24  ;;  %v7268_v57 = vmax.f32 %v7191_v5, 0.0  ;;  %v7012_v24 = vadd.f32 %v22588_v34, %v6843_v29  ;;  %v7266_v38 = vmax.f32 %v7186_v63, 0.0  ;;  %v7265_v5 = vmax.f32 %v20445_v7, 0.0  ;;  %v13386_v34 = vld [vmem:[%s21913_s7 + $0x2c] sm:$0xf] }
 0xa50   :  { %v6838_v35 = vadd.f32 %v22589_v30, %v6669_v8  ;;  %v7261_v18 = vmax.f32 %v20382_v20, 0.0  ;;  %v13416_v20 = vld [vmem:[%s21913_s7 + $0x114] sm:$0xf0]  ;;  %v7493_v8 = vpop.permute.xlu2 %7492 }
 0xa51   :  { %v7181_v17 = vadd.f32 %v20426_v21, %v7012_v24  ;;  %v7304_v14 = vpack.c.bf16 %v7268_v57, %v7267_v16  ;;  %v7303_v11 = vpack.c.bf16 %v7266_v38, %v7265_v5  ;;  %v12430_v57 = vor.u32 %v13416_v20, %v12429_v49  ;;  %v12319_v24 = vld [vmem:[%s21913_s7 + $0x38] sm:$0xf0] }
 0xa52   :  { %v7007_v0 = vadd.f32 %v22590_v31, %v6838_v35  ;;  %v7937_v16 = vadd.f32 %v20466_v50, %v7493_v8  ;;  %v7940_v50 = vadd.f32 %v20474_v61, %v20441_v12  ;;  %v12461_v12 = vld [vmem:[%s21913_s7 + $0x148] sm:$0xf]  ;;  %v13424_v61 = vld [vmem:[%s21913_s7 + $0x154] sm:$0xf0] }
 0xa53   :  { %8154 = vmatpush.bf16.msra.mxu3 %v7306_v53  ;;  %v7930_v53 = vadd.f32 %v20414_v6, %v22591_v55  ;;  %v7264_v46 = vmax.f32 %v7181_v17, 0.0  ;;  %v12303_v6 = vld [vmem:[%s21913_s7 + $0x18] sm:$0xf0]  ;;  %v12322_v17 = vor.u32 %v13386_v34, %v12319_v24  ;;  %v22597_v34 = vld [vmem:[#allocation31_spill] sm:$0xff] }
 0xa54   :  { %v7176_v1 = vadd.f32 %v20394_v4, %v7007_v0  ;;  %v13382_v4 = vld [vmem:[%s21913_s7 + $0xc] sm:$0xf] }
 0xa55   :  { %v8015_v56 = vpop.f32.mrf.mxu3  ;;  %v7302_v7 = vpack.c.bf16 %v7264_v46, %v7263_v62  ;;  %v12306_v63 = vor.u32 %v13382_v4, %v12303_v6  ;;  %v13394_v6 = vld [vmem:[%s21913_s7 + $0x6c] sm:$0xf] }
 0xa56   :  { %v20662_v25 = vpop.f32.mrf.mxu2  ;;  %v20664_v13 = vadd.f32 %v8015_v56, %v7927_v47  ;;  %v7262_v44 = vmax.f32 %v7176_v1, 0.0  ;;  %v7932_v47 = vadd.f32 %v20436_v39, %v22592_v42  ;;  %v7488_v56 = vpop.permute.xlu1 %7487  ;;  %v7942_v1 = vadd.f32 %v20495_v28, %v7503_v52  ;;  %v22593_v42 = vld [vmem:[#allocation15_spill] sm:$0xff] }
 0xa57   :  { %8155 = vmatpush.bf16.msra.mxu3 %v7305_v36  ;;  %v7935_v39 = vadd.f32 %v20447_v45, %v7488_v56  ;;  %v12445_v45 = vld [vmem:[%s21913_s7 + $0x128] sm:$0xf]  ;;  %v7945_v28 = vadd.f32 %v20506_v43, %v20406_v59  ;;  %v13428_v43 = vld [vmem:[%s21913_s7 + $0x174] sm:$0xf0] }
 0xa58   :  { %v7301_v27 = vpack.c.bf16 %v7262_v44, %v7261_v18  ;;  %v12462_v44 = vor.u32 %v13424_v61, %v12461_v12  ;;  %v12477_v59 = vld [vmem:[%s21913_s7 + $0x168] sm:$0xf]  ;;  %v22596_v56 = vld [vmem:[#allocation74_spill] sm:$0xff] }
 0xa59   :  { %v22601_v61 = vld [vmem:[#allocation136_spill] sm:$0xff] }
 0xa5a   :  { %8057 = vmatmul.bf16.gmra.mxu3 %v12538_v48 }
 0xa5b   :  { %8106 = vmatmul.bf16.gmra.mxu2 %v12414_v32  ;;  %8156 = vmatpush.bf16.msra.mxu3 %v7304_v14 }
 0xa5d   :  { %v8018_v10 = vpop.f32.mrf.mxu3 }
 0xa5e   :  { %v20677_v51 = vpop.f32.mrf.mxu2  ;;  %v20679_v21 = vadd.f32 %v8018_v10, %v7930_v53  ;;  %v13390_v53 = vld [vmem:[%s21913_s7 + $0x4c] sm:$0xf] }
 0xa5f   :  { %8157 = vmatpush.bf16.msra.mxu3 %v7303_v11 }
 0xa63   :  { %8158 = vmatpush.bf16.msra.mxu3 %v7302_v7 }
 0xa65   :  { %v8020_v2 = vpop.f32.mrf.mxu3 }
 0xa66   :  { %v20697_v26 = vpop.f32.mrf.mxu2  ;;  %v20699_v29 = vadd.f32 %v8020_v2, %v7932_v47  ;;  %v7947_v47 = vadd.f32 %v22593_v42, %v20416_v58  ;;  %v22595_v58 = vld [vmem:[#allocation88_spill] sm:$0xff]  ;;  %v22604_v42 = vld [vmem:[#allocation7_spill] sm:$0xff] }
 0xa67   :  { %8159 = vmatpush.bf16.msra.mxu3 %v7301_v27  ;;  %v22594_v27 = vld [vmem:[#allocation23_spill] sm:$0xff] }
 0xa6a   :  { %8160 = vmatmul.bf16.vlgmr.msra.gmra.mxu3 %v12306_v63 }
 0xa6b   :  { %8111 = vmatmul.bf16.gmra.mxu2 %v12430_v57  ;;  %v12478_v57 = vor.u32 %v13428_v43, %v12477_v59  ;;  %v12509_v59 = vld [vmem:[%s21913_s7 + $0x1a8] sm:$0xf]  ;;  %v13436_v43 = vld [vmem:[%s21913_s7 + $0x1b4] sm:$0xf0] }
 0xa6d   :  { %v8023_v36 = vpop.f32.mrf.mxu3 }
 0xa6e   :  { %v20702_v48 = vadd.f32 %v8023_v36, %v7935_v39  ;;  %v8072_v3 = vpop.f32.mrf.mxu2  ;;  %v7950_v39 = vadd.f32 %v22596_v56, %v22595_v58  ;;  %v22605_v58 = vld [vmem:[#allocation62_spill] sm:$0xff]  ;;  %v22606_v56 = vld [vmem:[#allocation69_spill] sm:$0xff] }
 0xa6f   :  { %v20705_v9 = vadd.f32 %v8072_v3, %v20449_v37  ;;  %v13420_v37 = vld [vmem:[%s21913_s7 + $0x134] sm:$0xf0] }
 0xa70   :  { %v12446_v14 = vor.u32 %v13420_v37, %v12445_v45  ;;  %v12367_v45 = vld [vmem:[%s21913_s7 + $0x98] sm:$0xf0] }
 0xa71   :  { %v22598_v37 = vld [vmem:[#allocation138_spill] sm:$0xff] }
 0xa75   :  { %v8025_v32 = vpop.f32.mrf.mxu3 }
 0xa76   :  { %v20720_v30 = vadd.f32 %v8025_v32, %v7937_v16  ;;  %v8074_v35 = vpop.f32.mrf.mxu2  ;;  %v13398_v16 = vld [vmem:[%s21913_s7 + $0x8c] sm:$0xf] }
 0xa77   :  { %v20723_v38 = vadd.f32 %v8074_v35, %v20468_v33  ;;  %v12335_v33 = vld [vmem:[%s21913_s7 + $0x58] sm:$0xf0]  ;;  %v22599_v32 = vld [vmem:[#allocation40_spill] sm:$0xff] }
 0xa78   :  { %v12338_v11 = vor.u32 %v13390_v53, %v12335_v33  ;;  %v7952_v35 = vadd.f32 %v22599_v32, %v22598_v37  ;;  %v12370_v53 = vor.u32 %v13398_v16, %v12367_v45  ;;  %v22600_v33 = vld [vmem:[#allocation55_spill] sm:$0xff]  ;;  %v12399_v16 = vld [vmem:[%s21913_s7 + $0xd8] sm:$0xf0]  ;;  %v22607_v45 = vld [vmem:[#allocation132_spill] sm:$0xff] }
 0xa79   :  { %v7962_v37 = vadd.f32 %v20617_v54, %v22607_v45  ;;  %v12525_v32 = vld [vmem:[%s21913_s7 + $0x1c8] sm:$0xf] }
 0xa7a   :  { %8165 = vmatmul.bf16.gmra.mxu3 %v12322_v17  ;;  %v12493_v17 = vld [vmem:[%s21913_s7 + $0x188] sm:$0xf] }
 0xa7b   :  { %8116 = vmatmul.bf16.gmra.mxu2 %v12446_v14  ;;  %v13432_v14 = vld [vmem:[%s21913_s7 + $0x194] sm:$0xf0] }
 0xa7c   :  { %v12494_v12 = vor.u32 %v13432_v14, %v12493_v17 }
 0xa7d   :  { %v8028_v31 = vpop.f32.mrf.mxu3 }
 0xa7e   :  { %v20727_v0 = vadd.f32 %v8028_v31, %v7940_v50  ;;  %v8077_v5 = vpop.f32.mrf.mxu2 }
 0xa7f   :  { %v20730_v55 = vadd.f32 %v8077_v5, %v20476_v40 }
 0xa85   :  { %v8030_v40 = vpop.f32.mrf.mxu3 }
 0xa86   :  { %v20745_v46 = vadd.f32 %v8030_v40, %v7942_v1  ;;  %v8079_v10 = vpop.f32.mrf.mxu2  ;;  %v22602_v40 = vld [vmem:[#allocation17_spill] sm:$0xff] }
 0xa87   :  { %v20748_v62 = vadd.f32 %v8079_v10, %v20497_v19  ;;  %v12351_v19 = vld [vmem:[%s21913_s7 + $0x78] sm:$0xf0]  ;;  %v7955_v10 = vadd.f32 %v22602_v40, %v22601_v61 }
 0xa88   :  { %v12354_v2 = vor.u32 %v13394_v6, %v12351_v19  ;;  %v13402_v6 = vld [vmem:[%s21913_s7 + $0xac] sm:$0xf]  ;;  %v12383_v19 = vld [vmem:[%s21913_s7 + $0xb8] sm:$0xf0] }
 0xa8a   :  { %8170 = vmatmul.bf16.gmra.mxu3 %v12338_v11 }
 0xa8b   :  { %8121 = vmatmul.bf16.gmra.mxu2 %v12462_v44 }
 0xa8d   :  { %v8033_v52 = vpop.f32.mrf.mxu3 }
 0xa8e   :  { %v20752_v7 = vadd.f32 %v8033_v52, %v7945_v28  ;;  %v8082_v18 = vpop.f32.mrf.mxu2  ;;  %v22603_v52 = vld [vmem:[#allocation53_spill] sm:$0xff] }
 0xa8f   :  { %v20755_v4 = vadd.f32 %v8082_v18, %v20508_v22 }
 0xa95   :  { %v8035_v22 = vpop.f32.mrf.mxu3 }
 0xa96   :  { %v20771_v49 = vadd.f32 %v8035_v22, %v7947_v47  ;;  %v8084_v20 = vpop.f32.mrf.mxu2  ;;  %v7957_v47 = vadd.f32 %v20579_v23, %v22604_v42  ;;  %v7960_v23 = vadd.f32 %v22606_v56, %v22605_v58  ;;  %v13414_v56 = vld [vmem:[%s21913_s7 + $0x10c] sm:$0xf] }
 0xa97   :  { %v20774_v63 = vadd.f32 %v8084_v20, %v22594_v27  ;;  %v12386_v27 = vor.u32 %v13402_v6, %v12383_v19  ;;  %v13444_v6 = vld [vmem:[%s21913_s7 + $0x1f4] sm:$0xf0] }
 0xa9a   :  { %8175 = vmatmul.bf16.gmra.mxu3 %v12354_v2 }
 0xa9b   :  { %8126 = vmatmul.bf16.gmra.mxu2 %v12478_v57  ;;  %v12510_v57 = vor.u32 %v13436_v43, %v12509_v59 }
 0xa9d   :  { %v8038_v36 = vpop.f32.mrf.mxu3 }
 0xa9e   :  { %v20778_v3 = vadd.f32 %v8038_v36, %v7950_v39  ;;  %v8087_v8 = vpop.f32.mrf.mxu2 }
 0xa9f   :  { %v20781_v24 = vadd.f32 %v8087_v8, %v22597_v34  ;;  %v13406_v34 = vld [vmem:[%s21913_s7 + $0xcc] sm:$0xf] }
 0xaa5   :  { %v8040_v50 = vpop.f32.mrf.mxu3 }
 0xaa6   :  { %v20797_v31 = vadd.f32 %v8040_v50, %v7952_v35  ;;  %v8089_v5 = vpop.f32.mrf.mxu2  ;;  %v13440_v35 = vld [vmem:[%s21913_s7 + $0x1d4] sm:$0xf0] }
 0xaa7   :  { %v20800_v1 = vadd.f32 %v8089_v5, %v22600_v33  ;;  %v12402_v5 = vor.u32 %v13406_v34, %v12399_v16  ;;  %v22608_v33 = vld [vmem:[#allocation30_spill] sm:$0xff] }
 0xaa8   :  { %v7965_v54 = vadd.f32 %v20633_v60, %v22608_v33  ;;  %v12541_v60 = vld [vmem:[%s21913_s7 + $0x1e8] sm:$0xf] }
 0xaa9   :  { %v12542_v43 = vor.u32 %v13444_v6, %v12541_v60 }
 0xaaa   :  { %8180 = vmatmul.bf16.gmra.mxu3 %v12370_v53  ;;  %v12526_v53 = vor.u32 %v13440_v35, %v12525_v32 }
 0xaab   :  { %8131 = vmatmul.bf16.gmra.mxu2 %v12494_v12 }
 0xaad   :  { %v8043_v11 = vpop.f32.mrf.mxu3 }
 0xaae   :  { %v20804_v44 = vadd.f32 %v8043_v11, %v7955_v10  ;;  %v8092_v28 = vpop.f32.mrf.mxu2  ;;  %v13410_v10 = vld [vmem:[%s21913_s7 + $0xec] sm:$0xf]  ;;  %v12415_v11 = vld [vmem:[%s21913_s7 + $0xf8] sm:$0xf0] }
 0xaaf   :  { %v20807_v18 = vadd.f32 %v8092_v28, %v22603_v52  ;;  %v22609_v28 = vld [vmem:[#allocation125_spill] sm:$0xff]  ;;  %v12418_v59 = vor.u32 %v13410_v10, %v12415_v11 }
 0xab0   :  { %v7967_v52 = vadd.f32 %v20662_v25, %v22609_v28 }
 0xab5   :  { %v8045_v22 = vpop.f32.mrf.mxu3 }
 0xab6   :  { %v20823_v20 = vadd.f32 %v8045_v22, %v7957_v47  ;;  %v20825_v2 = vpop.f32.mrf.mxu2  ;;  %v22610_v22 = vld [vmem:[#allocation124_spill] sm:$0xff] }
 0xab7   :  { %v7970_v25 = vadd.f32 %v20677_v51, %v22610_v22 }
 0xaba   :  { %8185 = vmatmul.bf16.gmra.mxu3 %v12386_v27 }
 0xabb   :  { %8136 = vmatmul.bf16.gmra.mxu2 %v12510_v57 }
 0xabd   :  { %v8048_v39 = vpop.f32.mrf.mxu3 }
 0xabe   :  { %v20829_v36 = vadd.f32 %v8048_v39, %v7960_v23  ;;  %v20831_v8 = vpop.f32.mrf.mxu2  ;;  %v12431_v23 = vld [vmem:[%s21913_s7 + $0x118] sm:$0xf0] }
 0xabf   :  { %v22611_v39 = vld [vmem:[#allocation122_spill] sm:$0xff] }
 0xac0   :  { %v7972_v34 = vadd.f32 %v20697_v26, %v22611_v39  ;;  %v12447_v26 = vld [vmem:[%s21913_s7 + $0x138] sm:$0xf0] }
 0xac5   :  { %v8050_v17 = vpop.f32.mrf.mxu3 }
 0xac6   :  { %v20847_v14 = vadd.f32 %v8050_v17, %v7962_v37  ;;  %v20849_v50 = vpop.f32.mrf.mxu2  ;;  %v12434_v37 = vor.u32 %v13414_v56, %v12431_v23 }
 0xaca   :  { %8190 = vmatmul.bf16.gmra.mxu3 %v12402_v5 }
 0xacb   :  { %8141 = vmatmul.bf16.gmra.mxu2 %v12526_v53  ;;  %v13418_v53 = vld [vmem:[%s21913_s7 + $0x12c] sm:$0xf] }
 0xacc   :  { %v12450_v10 = vor.u32 %v13418_v53, %v12447_v26 }
 0xacd   :  { %v8053_v12 = vpop.f32.mrf.mxu3 }
 0xace   :  { %v20853_v61 = vadd.f32 %v8053_v12, %v7965_v54  ;;  %v20855_v40 = vpop.f32.mrf.mxu2 }
 0xad5   :  { %v8055_v19 = vpop.f32.mrf.mxu3 }
 0xad6   :  { %v20871_v42 = vadd.f32 %v8055_v19, %v7967_v52  ;;  %v20873_v47 = vpop.f32.mrf.mxu2  ;;  %v13422_v19 = vld [vmem:[%s21913_s7 + $0x14c] sm:$0xf] }
 0xada   :  { %8195 = vmatmul.bf16.gmra.mxu3 %v12418_v59 }
 0xadb   :  { %8146 = vmatmul.bf16.gmra.mxu2 %v12542_v43 }
 0xadd   :  { %v8058_v27 = vpop.f32.mrf.mxu3 }
 0xade   :  { %v20877_v57 = vadd.f32 %v8058_v27, %v7970_v25  ;;  %v20879_v58 = vpop.f32.mrf.mxu2 }
 0xae5   :  { %v8060_v16 = vpop.f32.mrf.mxu3 }
 0xae6   :  { %v20889_v45 = vadd.f32 %v8060_v16, %v7972_v34  ;;  %v20891_v51 = vpop.f32.mrf.mxu2  ;;  %v13426_v16 = vld [vmem:[%s21913_s7 + $0x16c] sm:$0xf] }
 0xaea   :  { %8200 = vmatmul.bf16.gmra.mxu3 %v12434_v37 }
 0xaed   :  { %v8161_v32 = vpop.f32.mrf.mxu3 }
 0xaee   :  { %v8112_v35 = vpop.f32.mrf.mxu2  ;;  %v8162_v17 = vadd.f32 %v8161_v32, %v20705_v9 }
 0xaef   :  { %v20895_v5 = vadd.f32 %v8112_v35, %v20702_v48 }
 0xaf0   :  { %v8241_v11 = vmax.f32 %v8162_v17, 0.0 }
 0xaf5   :  { %v8163_v33 = vpop.f32.mrf.mxu3 }
 0xaf6   :  { %v20903_v54 = vpop.f32.mrf.mxu2  ;;  %v8164_v12 = vadd.f32 %v8163_v33, %v20723_v38  ;;  %v12463_v38 = vld [vmem:[%s21913_s7 + $0x158] sm:$0xf0] }
 0xaf7   :  { %v12466_v25 = vor.u32 %v13422_v19, %v12463_v38 }
 0xaf8   :  { %v8242_v28 = vmax.f32 %v8164_v12, 0.0 }
 0xafa   :  { %8205 = vmatmul.bf16.gmra.mxu3 %v12450_v10  ;;  %v20906_v9 = vpack.c.bf16 %v8242_v28, %v8241_v11  ;;  %v13430_v11 = vld [vmem:[%s21913_s7 + $0x18c] sm:$0xf] }
 0xafd   :  { %v8166_v48 = vpop.f32.mrf.mxu3 }
 0xafe   :  { %v8117_v52 = vpop.f32.mrf.mxu2  ;;  %v8167_v60 = vadd.f32 %v8166_v48, %v20730_v55 }
 0xaff   :  { %v20910_v6 = vadd.f32 %v8117_v52, %v20727_v0 }
 0xb00   :  { %v8243_v27 = vmax.f32 %v8167_v60, 0.0 }
 0xb05   :  { %v8168_v59 = vpop.f32.mrf.mxu3 }
 0xb06   :  { %v20918_v43 = vpop.f32.mrf.mxu2  ;;  %v8169_v22 = vadd.f32 %v8168_v59, %v20748_v62  ;;  %v12479_v62 = vld [vmem:[%s21913_s7 + $0x178] sm:$0xf0] }
 0xb07   :  { %v12482_v17 = vor.u32 %v13426_v16, %v12479_v62 }
 0xb08   :  { %v8244_v56 = vmax.f32 %v8169_v22, 0.0 }
 0xb0a   :  { %8210 = vmatmul.bf16.gmra.mxu3 %v12466_v25  ;;  %v20921_v55 = vpack.c.bf16 %v8244_v56, %v8243_v27  ;;  %v13434_v27 = vld [vmem:[%s21913_s7 + $0x1ac] sm:$0xf]  ;;  %v22612_v56 = vld [vmem:[#allocation59_spill] sm:$0xff] }
 0xb0d   :  { %v8171_v0 = vpop.f32.mrf.mxu3 }
 0xb0e   :  { %v8122_v23 = vpop.f32.mrf.mxu2  ;;  %v8172_v39 = vadd.f32 %v8171_v0, %v20755_v4  ;;  %v8095_v0 = vadd.f32 %v20825_v2, %v22612_v56  ;;  %v8100_v2 = vadd.f32 %v20849_v50, %v20619_v15  ;;  %v12543_v15 = vld [vmem:[%s21913_s7 + $0x1f8] sm:$0xf0]  ;;  %v8105_v50 = vadd.f32 %v20873_v47, %v20664_v13 }
 0xb0f   :  { %v20925_v34 = vadd.f32 %v8122_v23, %v20752_v7 }
 0xb10   :  { %v8245_v53 = vmax.f32 %v8172_v39, 0.0 }
 0xb15   :  { %v8173_v37 = vpop.f32.mrf.mxu3 }
 0xb16   :  { %v20933_v32 = vpop.f32.mrf.mxu2  ;;  %v8174_v35 = vadd.f32 %v8173_v37, %v20774_v63  ;;  %v12495_v63 = vld [vmem:[%s21913_s7 + $0x198] sm:$0xf0] }
 0xb17   :  { %v12498_v60 = vor.u32 %v13430_v11, %v12495_v63 }
 0xb18   :  { %v8246_v26 = vmax.f32 %v8174_v35, 0.0  ;;  %v22613_v35 = vld [vmem:[#allocation66_spill] sm:$0xff] }
 0xb1a   :  { %8215 = vmatmul.bf16.gmra.mxu3 %v12482_v17  ;;  %v20936_v4 = vpack.c.bf16 %v8246_v26, %v8245_v53  ;;  %v8098_v17 = vadd.f32 %v20831_v8, %v22613_v35  ;;  %v13438_v53 = vld [vmem:[%s21913_s7 + $0x1cc] sm:$0xf]  ;;  %v12527_v26 = vld [vmem:[%s21913_s7 + $0x1d8] sm:$0xf0]  ;;  %v8115_v35 = vadd.f32 %v20903_v54, %v20720_v30  ;;  %v12549_v30 = vld [vmem:[%s21914_s9] sm:$0xf] }
 0xb1b   :  { %v12530_v11 = vor.u32 %v13438_v53, %v12527_v26  ;;  %v13446_v54 = vld [vmem:[%s21914_s9 + $0x4] sm:$0xf0] }
 0xb1d   :  { %v8176_v7 = vpop.f32.mrf.mxu3 }
 0xb1e   :  { %v8127_v33 = vpop.f32.mrf.mxu2  ;;  %v8177_v12 = vadd.f32 %v8176_v7, %v20781_v24 }
 0xb1f   :  { %v20940_v10 = vadd.f32 %v8127_v33, %v20778_v3 }
 0xb20   :  { %v8247_v19 = vmax.f32 %v8177_v12, 0.0 }
 0xb25   :  { %v8178_v28 = vpop.f32.mrf.mxu3 }
 0xb26   :  { %v20948_v48 = vpop.f32.mrf.mxu2  ;;  %v8179_v52 = vadd.f32 %v8178_v28, %v20800_v1  ;;  %v12511_v1 = vld [vmem:[%s21913_s7 + $0x1b8] sm:$0xf0] }
 0xb27   :  { %v12514_v16 = vor.u32 %v13434_v27, %v12511_v1 }
 0xb28   :  { %v8248_v38 = vmax.f32 %v8179_v52, 0.0 }
 0xb2a   :  { %8220 = vmatmul.bf16.gmra.mxu3 %v12498_v60  ;;  %v8276_v24 = vpack.c.bf16 %v8248_v38, %v8247_v19  ;;  %v8103_v60 = vadd.f32 %v20855_v40, %v20635_v41  ;;  %v13442_v19 = vld [vmem:[%s21913_s7 + $0x1ec] sm:$0xf]  ;;  %v8108_v40 = vadd.f32 %v20879_v58, %v20679_v21 }
 0xb2d   :  { %v8181_v3 = vpop.f32.mrf.mxu3 }
 0xb2e   :  { %v8132_v59 = vpop.f32.mrf.mxu2  ;;  %v8182_v22 = vadd.f32 %v8181_v3, %v20807_v18 }
 0xb2f   :  { %v20953_v25 = vadd.f32 %v8132_v59, %v20804_v44 }
 0xb30   :  { %v8249_v62 = vmax.f32 %v8182_v22, 0.0  ;;  %v12546_v22 = vor.u32 %v13442_v19, %v12543_v15  ;;  %v13450_v19 = vld [vmem:[%s21914_s9 + $0x24] sm:$0xf0] }
 0xb35   :  { %v8183_v23 = vpop.f32.mrf.mxu3 }
 0xb36   :  { %v8184_v39 = vadd.f32 %v8183_v23, %v8095_v0  ;;  %v8110_v0 = vadd.f32 %v20891_v51, %v20699_v29  ;;  %v8134_v15 = vpop.f32.mrf.mxu2 }
 0xb38   :  { %v8250_v37 = vmax.f32 %v8184_v39, 0.0 }
 0xb3a   :  { %8225 = vmatmul.bf16.gmra.mxu3 %v12514_v16  ;;  %v8277_v18 = vpack.c.bf16 %v8250_v37, %v8249_v62 }
 0xb3d   :  { %v8186_v44 = vpop.f32.mrf.mxu3 }
 0xb3e   :  { %v8187_v7 = vadd.f32 %v8186_v44, %v8098_v17 }
 0xb40   :  { %v8251_v63 = vmax.f32 %v8187_v7, 0.0 }
 0xb45   :  { %v8188_v33 = vpop.f32.mrf.mxu3 }
 0xb46   :  { %v8189_v12 = vadd.f32 %v8188_v33, %v8100_v2  ;;  %v12550_v2 = vor.u32 %v13446_v54, %v12549_v30  ;;  %v12557_v33 = vld [vmem:[%s21914_s9 + $0x10] sm:$0xf] }
 0xb48   :  { %v8252_v28 = vmax.f32 %v8189_v12, 0.0  ;;  %v13448_v12 = vld [vmem:[%s21914_s9 + $0x14] sm:$0xf0] }
 0xb4a   :  { %8230 = vmatmul.bf16.gmra.mxu3 %v12530_v11  ;;  %v8278_v52 = vpack.c.bf16 %v8252_v28, %v8251_v63 }
 0xb4d   :  { %v8191_v8 = vpop.f32.mrf.mxu3 }
 0xb4e   :  { %v8192_v38 = vadd.f32 %v8191_v8, %v8103_v60 }
 0xb50   :  { %v8253_v27 = vmax.f32 %v8192_v38, 0.0 }
 0xb55   :  { %v8193_v3 = vpop.f32.mrf.mxu3 }
 0xb56   :  { %v8194_v59 = vadd.f32 %v8193_v3, %v8105_v50 }
 0xb58   :  { %v8254_v1 = vmax.f32 %v8194_v59, 0.0 }
 0xb5a   :  { %8235 = vmatmul.bf16.gmra.mxu3 %v12546_v22  ;;  %v8279_v56 = vpack.c.bf16 %v8254_v1, %v8253_v27  ;;  %v8135_v1 = vadd.f32 %v8134_v15, %v20823_v20 }
 0xb5d   :  { %v8196_v41 = vpop.f32.mrf.mxu3 }
 0xb5e   :  { %v8197_v23 = vadd.f32 %v8196_v41, %v8108_v40  ;;  %v13452_v41 = vld [vmem:[%s21914_s9 + $0x34] sm:$0xf0] }
 0xb60   :  { %v8255_v62 = vmax.f32 %v8197_v23, 0.0 }
 0xb65   :  { %v8198_v39 = vpop.f32.mrf.mxu3 }
 0xb66   :  { %v8199_v16 = vadd.f32 %v8198_v39, %v8110_v0 }
 0xb68   :  { %v8256_v13 = vmax.f32 %v8199_v16, 0.0 }
 0xb6a   :  { %v8280_v47 = vpack.c.bf16 %v8256_v13, %v8255_v62 }
 0xb6c   :  { %8673 = vmatpush.bf16.msrb.mxu0 %v8280_v47 }
 0xb6d   :  { %v8201_v37 = vpop.f32.mrf.mxu3 }
 0xb6e   :  { %v8202_v44 = vadd.f32 %v8201_v37, %v20895_v5  ;;  %v8120_v5 = vadd.f32 %v20918_v43, %v20745_v46 }
 0xb70   :  { %8674 = vmatpush.bf16.msrb.mxu0 %v8279_v56  ;;  %v8257_v58 = vmax.f32 %v8202_v44, 0.0  ;;  %v12573_v56 = vld [vmem:[%s21914_s9 + $0x30] sm:$0xf] }
 0xb71   :  { %v12574_v23 = vor.u32 %v13452_v41, %v12573_v56  ;;  %v12629_v56 = vld [vmem:[%s21914_s9 + $0xa0] sm:$0xf]  ;;  %v13466_v41 = vld [vmem:[%s21914_s9 + $0xa4] sm:$0xf0] }
 0xb74   :  { %8675 = vmatpush.bf16.msrb.mxu0 %v8278_v52 }
 0xb75   :  { %v8203_v17 = vpop.f32.mrf.mxu3 }
 0xb76   :  { %v8204_v21 = vadd.f32 %v8203_v17, %v8115_v35  ;;  %v12581_v35 = vld [vmem:[%s21914_s9 + $0x40] sm:$0xf]  ;;  %v13454_v17 = vld [vmem:[%s21914_s9 + $0x44] sm:$0xf0] }
 0xb78   :  { %v8258_v53 = vmax.f32 %v8204_v21, 0.0  ;;  %8676 = vmatpush.bf16.msrb.mxu0 %v8277_v18 }
 0xb7a   :  { %v20990_v29 = vpack.c.bf16 %v8258_v53, %v8257_v58  ;;  %v12582_v53 = vor.u32 %v13454_v17, %v12581_v35 }
 0xb7c   :  { %8677 = vmatpush.bf16.msrb.mxu0 %v8276_v24 }
 0xb7d   :  { %v8206_v51 = vpop.f32.mrf.mxu3 }
 0xb7e   :  { %v8207_v26 = vadd.f32 %v8206_v51, %v20910_v6 }
 0xb80   :  { %8678 = vmatpush.bf16.msrb.mxu0 %v20936_v4  ;;  %v8259_v7 = vmax.f32 %v8207_v26, 0.0 }
 0xb84   :  { %8679 = vmatpush.bf16.msrb.mxu0 %v20921_v55  ;;  %v8125_v55 = vadd.f32 %v20933_v32, %v20771_v49  ;;  %v8130_v49 = vadd.f32 %v20948_v48, %v20797_v31  ;;  %v12565_v32 = vld [vmem:[%s21914_s9 + $0x20] sm:$0xf]  ;;  %v8137_v48 = vpop.f32.mrf.mxu2 }
 0xb85   :  { %v8208_v18 = vpop.f32.mrf.mxu3  ;;  %v12566_v3 = vor.u32 %v13450_v19, %v12565_v32  ;;  %v8138_v47 = vadd.f32 %v8137_v48, %v20829_v36  ;;  %v12559_v48 = vld [vmem:[%s21914_s9 + $0x18] sm:$0xf0] }
 0xb86   :  { %v8209_v24 = vadd.f32 %v8208_v18, %v8120_v5 }
 0xb88   :  { %v8260_v6 = vmax.f32 %v8209_v24, 0.0  ;;  %8680 = vmatpush.bf16.msrb.mxu0 %v20906_v9  ;;  %v12558_v9 = vor.u32 %v13448_v12, %v12557_v33  ;;  %v12589_v24 = vld [vmem:[%s21914_s9 + $0x50] sm:$0xf] }
 0xb8a   :  { %v21004_v4 = vpack.c.bf16 %v8260_v6, %v8259_v7 }
 0xb8b   :  { %8681 = vmatmul.bf16.vlgmr.msrb.gmra.mxu0 %v12550_v2  ;;  %v13456_v2 = vld [vmem:[%s21914_s9 + $0x54] sm:$0xf0] }
 0xb8c   :  { %v8139_v62 = vpop.f32.mrf.mxu2 }
 0xb8d   :  { %v8211_v46 = vpop.f32.mrf.mxu3  ;;  %v8140_v37 = vadd.f32 %v8139_v62, %v20847_v14  ;;  %v12637_v62 = vld [vmem:[%s21914_s9 + $0xb0] sm:$0xf] }
 0xb8e   :  { %v8212_v43 = vadd.f32 %v8211_v46, %v20925_v34 }
 0xb90   :  { %v8261_v28 = vmax.f32 %v8212_v43, 0.0  ;;  %v12590_v43 = vor.u32 %v13456_v2, %v12589_v24 }
 0xb94   :  { %v8142_v20 = vpop.f32.mrf.mxu2 }
 0xb95   :  { %v8213_v11 = vpop.f32.mrf.mxu3  ;;  %v8143_v14 = vadd.f32 %v8142_v20, %v20853_v61  ;;  %v12575_v20 = vld [vmem:[%s21914_s9 + $0x38] sm:$0xf0] }
 0xb96   :  { %v8214_v63 = vadd.f32 %v8213_v11, %v8125_v55 }
 0xb98   :  { %v8262_v52 = vmax.f32 %v8214_v63, 0.0 }
 0xb9a   :  { %v21015_v8 = vpack.c.bf16 %v8262_v52, %v8261_v28  ;;  %v12597_v28 = vld [vmem:[%s21914_s9 + $0x60] sm:$0xf]  ;;  %v13458_v52 = vld [vmem:[%s21914_s9 + $0x64] sm:$0xf0] }
 0xb9b   :  { %8686 = vmatmul.bf16.gmra.mxu0 %v12558_v9 }
 0xb9c   :  { %v8144_v36 = vpop.f32.mrf.mxu2 }
 0xb9d   :  { %v8216_v34 = vpop.f32.mrf.mxu3  ;;  %v8145_v54 = vadd.f32 %v8144_v36, %v20871_v42  ;;  %v12583_v36 = vld [vmem:[%s21914_s9 + $0x48] sm:$0xf0] }
 0xb9e   :  { %v8217_v60 = vadd.f32 %v8216_v34, %v20940_v10 }
 0xba0   :  { %v8263_v59 = vmax.f32 %v8217_v60, 0.0 }
 0xba4   :  { %v8147_v46 = vpop.f32.mrf.mxu2 }
 0xba5   :  { %v8218_v50 = vpop.f32.mrf.mxu3  ;;  %v8148_v42 = vadd.f32 %v8147_v46, %v20877_v57  ;;  %v12605_v57 = vld [vmem:[%s21914_s9 + $0x70] sm:$0xf] }
 0xba6   :  { %v8219_v38 = vadd.f32 %v8218_v50, %v8130_v49  ;;  %v12598_v49 = vor.u32 %v13458_v52, %v12597_v28 }
 0xba8   :  { %v8264_v22 = vmax.f32 %v8219_v38, 0.0  ;;  %v12613_v38 = vld [vmem:[%s21914_s9 + $0x80] sm:$0xf] }
 0xbaa   :  { %v21026_v27 = vpack.c.bf16 %v8264_v22, %v8263_v59  ;;  %v13445_v59 = vld [vmem:[%s21914_s9 + $0x4] sm:$0xf]  ;;  %v12551_v22 = vld [vmem:[%s21914_s9 + $0x8] sm:$0xf0] }
 0xbab   :  { %8691 = vmatmul.bf16.gmra.mxu0 %v12566_v3  ;;  %v13462_v3 = vld [vmem:[%s21914_s9 + $0x84] sm:$0xf0] }
 0xbac   :  { %v8149_v11 = vpop.f32.mrf.mxu2 }
 0xbad   :  { %v8221_v10 = vpop.f32.mrf.mxu3  ;;  %v8150_v63 = vadd.f32 %v8149_v11, %v20889_v45  ;;  %v13460_v45 = vld [vmem:[%s21914_s9 + $0x74] sm:$0xf0] }
 0xbae   :  { %v8222_v31 = vadd.f32 %v8221_v10, %v20953_v25  ;;  %v12606_v50 = vor.u32 %v13460_v45, %v12605_v57  ;;  %v13464_v10 = vld [vmem:[%s21914_s9 + $0x94] sm:$0xf0] }
 0xbb0   :  { %v8265_v39 = vmax.f32 %v8222_v31, 0.0  ;;  %v13447_v31 = vld [vmem:[%s21914_s9 + $0x14] sm:$0xf] }
 0xbb5   :  { %v8223_v40 = vpop.f32.mrf.mxu3 }
 0xbb6   :  { %v8224_v0 = vadd.f32 %v8223_v40, %v8135_v1  ;;  %v13449_v40 = vld [vmem:[%s21914_s9 + $0x24] sm:$0xf] }
 0xbb8   :  { %v8266_v16 = vmax.f32 %v8224_v0, 0.0  ;;  %v12567_v0 = vld [vmem:[%s21914_s9 + $0x28] sm:$0xf0] }
 0xbba   :  { %v8285_v13 = vpack.c.bf16 %v8266_v16, %v8265_v39  ;;  %v12570_v39 = vor.u32 %v13449_v40, %v12567_v0  ;;  %v21106_v16 = vpop.permute.xlu1 %8430 }
 0xbbb   :  { %8696 = vmatmul.bf16.gmra.mxu0 %v12574_v23  ;;  %v12630_v23 = vor.u32 %v13466_v41, %v12629_v56 }
 0xbbd   :  { %v8226_v25 = vpop.f32.mrf.mxu3 }
 0xbbe   :  { %v8227_v44 = vadd.f32 %v8226_v25, %v8138_v47  ;;  %v13468_v25 = vld [vmem:[%s21914_s9 + $0xb4] sm:$0xf0]  ;;  %v13451_v47 = vld [vmem:[%s21914_s9 + $0x34] sm:$0xf] }
 0xbbf   :  { %v12638_v35 = vor.u32 %v13468_v25, %v12637_v62  ;;  %v12578_v17 = vor.u32 %v13451_v47, %v12575_v20  ;;  %v12615_v62 = vld [vmem:[%s21914_s9 + $0x88] sm:$0xf0] }
 0xbc0   :  { %v8267_v51 = vmax.f32 %v8227_v44, 0.0 }
 0xbc2   :  { %v21124_v44 = vpop.permute.xlu1 %8415 }
 0xbc5   :  { %v8228_v21 = vpop.f32.mrf.mxu3 }
 0xbc6   :  { %v8229_v58 = vadd.f32 %v8228_v21, %v8140_v37 }
 0xbc8   :  { %v8268_v26 = vmax.f32 %v8229_v58, 0.0 }
 0xbca   :  { %v8286_v5 = vpack.c.bf16 %v8268_v26, %v8267_v51  ;;  %v12645_v51 = vld [vmem:[%s21914_s9 + $0xc0] sm:$0xf]  ;;  %v13470_v26 = vld [vmem:[%s21914_s9 + $0xc4] sm:$0xf0] }
 0xbcb   :  { %8701 = vmatmul.bf16.gmra.mxu0 %v12582_v53  ;;  %v21130_v53 = vpop.permute.xlu1 %8500 }
 0xbcd   :  { %v8231_v30 = vpop.f32.mrf.mxu3 }
 0xbce   :  { %v8232_v18 = vadd.f32 %v8231_v30, %v8143_v14  ;;  %v21144_v30 = vpop.permute.xlu0 %8425  ;;  %v12646_v14 = vor.u32 %v13470_v26, %v12645_v51 }
 0xbd0   :  { %v8269_v55 = vmax.f32 %v8232_v18, 0.0 }
 0xbd3   :  { %v21150_v2 = vpop.permute.xlu1 %8485 }
 0xbd5   :  { %v8233_v7 = vpop.f32.mrf.mxu3 }
 0xbd6   :  { %v8234_v6 = vadd.f32 %v8233_v7, %v8145_v54  ;;  %v21152_v7 = vpop.permute.xlu0 %8510 }
 0xbd8   :  { %v8270_v33 = vmax.f32 %v8234_v6, 0.0 }
 0xbda   :  { %v8287_v12 = vpack.c.bf16 %v8270_v33, %v8269_v55  ;;  %v13472_v33 = vld [vmem:[%s21914_s9 + $0xd4] sm:$0xf0] }
 0xbdb   :  { %8706 = vmatmul.bf16.gmra.mxu0 %v12590_v43  ;;  %v12653_v43 = vld [vmem:[%s21914_s9 + $0xd0] sm:$0xf]  ;;  %v21161_v55 = vpop.permute.xlu1 %8400 }
 0xbdc   :  { %v12654_v11 = vor.u32 %v13472_v33, %v12653_v43  ;;  %v13463_v33 = vld [vmem:[%s21914_s9 + $0x94] sm:$0xf] }
 0xbdd   :  { %v8236_v61 = vpop.f32.mrf.mxu3 }
 0xbde   :  { %v8237_v9 = vadd.f32 %v8236_v61, %v8148_v42  ;;  %v12591_v61 = vld [vmem:[%s21914_s9 + $0x58] sm:$0xf0] }
 0xbe0   :  { %v8271_v32 = vmax.f32 %v8237_v9, 0.0 }
 0xbe3   :  { %v21178_v52 = vpop.permute.xlu1 %8385 }
 0xbe5   :  { %v8238_v34 = vpop.f32.mrf.mxu3 }
 0xbe6   :  { %v8239_v60 = vadd.f32 %v8238_v34, %v8150_v63  ;;  %v21172_v63 = vpop.permute.xlu0 %8495  ;;  %v12661_v34 = vld [vmem:[%s21914_s9 + $0xe0] sm:$0xf] }
 0xbe8   :  { %v8272_v19 = vmax.f32 %v8239_v60, 0.0 }
 0xbea   :  { %v8288_v15 = vpack.c.bf16 %v8272_v19, %v8271_v32  ;;  %v13457_v32 = vld [vmem:[%s21914_s9 + $0x64] sm:$0xf]  ;;  %v12599_v19 = vld [vmem:[%s21914_s9 + $0x68] sm:$0xf0] }
 0xbeb   :  { %8711 = vmatmul.bf16.gmra.mxu0 %v12598_v49  ;;  %v13474_v49 = vld [vmem:[%s21914_s9 + $0xe4] sm:$0xf0] }
 0xbec   :  { %8762 = vmatpush.bf16.msra.mxu1 %v8288_v15  ;;  %v12662_v45 = vor.u32 %v13474_v49, %v12661_v34 }
 0xbee   :  { %v21183_v60 = vpop.permute.xlu0 %8410 }
 0xbf0   :  { %8763 = vmatpush.bf16.msra.mxu1 %v8287_v12  ;;  %v13455_v12 = vld [vmem:[%s21914_s9 + $0x54] sm:$0xf] }
 0xbf1   :  { %v12594_v42 = vor.u32 %v13455_v12, %v12591_v61 }
 0xbf4   :  { %8764 = vmatpush.bf16.msra.mxu1 %v8286_v5  ;;  %v13453_v5 = vld [vmem:[%s21914_s9 + $0x44] sm:$0xf] }
 0xbf5   :  { %v12586_v54 = vor.u32 %v13453_v5, %v12583_v36 }
 0xbf8   :  { %8765 = vmatpush.bf16.msra.mxu1 %v8285_v13  ;;  %v21111_v13 = vpop.permute.xlu2 %8505 }
 0xbfb   :  { %8716 = vmatmul.bf16.gmra.mxu0 %v12606_v50  ;;  %v12602_v50 = vor.u32 %v13457_v32, %v12599_v19 }
 0xbfc   :  { %8766 = vmatpush.bf16.msra.mxu1 %v21026_v27  ;;  %v12614_v27 = vor.u32 %v13462_v3, %v12613_v38  ;;  %v21198_v38 = vpop.permute.xlu1 %8470  ;;  %v21200_v3 = vpop.permute.xlu0 %8395 }
 0xc00   :  { %8767 = vmatpush.bf16.msra.mxu1 %v21015_v8  ;;  %v12554_v8 = vor.u32 %v13445_v59, %v12551_v22  ;;  %v21126_v21 = vpop.permute.xlu2 %8420 }
 0xc04   :  { %8768 = vmatpush.bf16.msra.mxu1 %v21004_v4  ;;  %v12621_v4 = vld [vmem:[%s21914_s9 + $0x90] sm:$0xf] }
 0xc05   :  { %v12622_v1 = vor.u32 %v13464_v10, %v12621_v4  ;;  %v13476_v4 = vld [vmem:[%s21914_s9 + $0xf4] sm:$0xf0]  ;;  %v13459_v10 = vld [vmem:[%s21914_s9 + $0x74] sm:$0xf] }
 0xc08   :  { %8769 = vmatpush.bf16.msra.mxu1 %v20990_v29  ;;  %v12562_v29 = vor.u32 %v13447_v31, %v12559_v48  ;;  %v21122_v37 = vpop.f32.mrf.mxu0  ;;  %v21146_v18 = vpop.permute.xlu2 %8405  ;;  %v12607_v31 = vld [vmem:[%s21914_s9 + $0x78] sm:$0xf0] }
 0xc0b   :  { %8721 = vmatmul.bf16.gmra.mxu0 %v12614_v27  ;;  %8770 = vmatmul.bf16.vlgmr.msra.gmra.mxu1 %v12554_v8  ;;  %v21204_v27 = vpop.permute.xlu1 %8455  ;;  %v12669_v8 = vld [vmem:[%s21914_s9 + $0xf0] sm:$0xf] }
 0xc0c   :  { %v12670_v48 = vor.u32 %v13476_v4, %v12669_v8 }
 0xc10   :  { %v21128_v58 = vpop.f32.mrf.mxu0  ;;  %v21154_v6 = vpop.permute.xlu2 %8490 }
 0xc13   :  { %v8371_v40 = vpop.permute.xlu1 %8370 }
 0xc18   :  { %v21148_v24 = vpop.f32.mrf.mxu0  ;;  %v21174_v9 = vpop.permute.xlu2 %8475 }
 0xc1b   :  { %8726 = vmatmul.bf16.gmra.mxu0 %v12622_v1  ;;  %8775 = vmatmul.bf16.gmra.mxu1 %v12562_v29  ;;  %v12610_v1 = vor.u32 %v13459_v10, %v12607_v31  ;;  %v21218_v29 = vpop.permute.xlu0 %8480  ;;  %v8356_v25 = vpop.permute.xlu1 %8355  ;;  %v13465_v10 = vld [vmem:[%s21914_s9 + $0xa4] sm:$0xf] }
 0xc1c   :  { %v8683_v47 = vadd.f32 %v21122_v37, %v8356_v25  ;;  %v12623_v37 = vld [vmem:[%s21914_s9 + $0x98] sm:$0xf0] }
 0xc1d   :  { %v12626_v34 = vor.u32 %v13463_v33, %v12623_v37 }
 0xc20   :  { %v21156_v46 = vpop.f32.mrf.mxu0  ;;  %v21194_v15 = vpop.permute.xlu2 %8390 }
 0xc21   :  { %v8690_v32 = vadd.f32 %v21156_v46, %v8371_v40 }
 0xc23   :  { %v21222_v0 = vpop.permute.xlu0 %8465 }
 0xc28   :  { %v21176_v28 = vpop.f32.mrf.mxu0  ;;  %v8376_v59 = vpop.permute.xlu2 %8375 }
 0xc2b   :  { %8731 = vmatmul.bf16.gmra.mxu0 %v12630_v23  ;;  %8780 = vmatmul.bf16.gmra.mxu1 %v12570_v39  ;;  %v13461_v39 = vld [vmem:[%s21914_s9 + $0x84] sm:$0xf]  ;;  %v8381_v51 = vpop.permute.xlu0 %8380 }
 0xc2c   :  { %v12618_v20 = vor.u32 %v13461_v39, %v12615_v62 }
 0xc30   :  { %v21196_v57 = vpop.f32.mrf.mxu0  ;;  %v21220_v56 = vpop.permute.xlu2 %8460 }
 0xc31   :  { %v8695_v62 = vadd.f32 %v21196_v57, %v8381_v51 }
 0xc33   :  { %v8366_v61 = vpop.permute.xlu0 %8365 }
 0xc38   :  { %v21202_v22 = vpop.f32.mrf.mxu0  ;;  %v21224_v23 = vpop.permute.xlu2 %8445 }
 0xc3b   :  { %8736 = vmatmul.bf16.gmra.mxu0 %v12638_v35  ;;  %8785 = vmatmul.bf16.gmra.mxu1 %v12578_v17 }
 0xc40   :  { %v8699_v41 = vpop.f32.mrf.mxu0  ;;  %v8361_v26 = vpop.permute.xlu2 %8360 }
 0xc41   :  { %v8685_v5 = vadd.f32 %v21128_v58, %v8361_v26  ;;  %v13467_v26 = vld [vmem:[%s21914_s9 + $0xb4] sm:$0xf] }
 0xc4b   :  { %8741 = vmatmul.bf16.gmra.mxu0 %v12646_v14  ;;  %8790 = vmatmul.bf16.gmra.mxu1 %v12586_v54 }
 0xc5b   :  { %8746 = vmatmul.bf16.gmra.mxu0 %v12654_v11  ;;  %8795 = vmatmul.bf16.gmra.mxu1 %v12594_v42  ;;  %v8702_v11 = vpop.f32.mrf.mxu0  ;;  %v8688_v42 = vadd.f32 %v21148_v24, %v8366_v61  ;;  %v12631_v24 = vld [vmem:[%s21914_s9 + $0xa8] sm:$0xf0] }
 0xc63   :  { %v21244_v19 = vpop.f32.mrf.mxu0 }
 0xc6b   :  { %8751 = vmatmul.bf16.gmra.mxu0 %v12662_v45  ;;  %8800 = vmatmul.bf16.gmra.mxu1 %v12602_v50  ;;  %v21255_v39 = vpop.f32.mrf.mxu0 }
 0xc7b   :  { %8756 = vmatmul.bf16.gmra.mxu0 %v12670_v48  ;;  %8805 = vmatmul.bf16.gmra.mxu1 %v12610_v1  ;;  %v8693_v48 = vadd.f32 %v21176_v28, %v8376_v59  ;;  %v12634_v1 = vor.u32 %v13465_v10, %v12631_v24  ;;  %v12639_v28 = vld [vmem:[%s21914_s9 + $0xb8] sm:$0xf0]  ;;  %v13473_v24 = vld [vmem:[%s21914_s9 + $0xe4] sm:$0xf] }
 0xc88   :  { %v8771_v35 = vpop.f32.mrf.mxu1 }
 0xc89   :  { %v8772_v17 = vadd.f32 %v8771_v35, %v8683_v47 }
 0xc8b   :  { %8810 = vmatmul.bf16.gmra.mxu1 %v12618_v20  ;;  %v8851_v54 = vmax.f32 %v8772_v17, 0.0  ;;  %v8709_v17 = vpop.f32.mrf.mxu0 }
 0xc90   :  { %v8773_v36 = vpop.f32.mrf.mxu1 }
 0xc91   :  { %v8774_v14 = vadd.f32 %v8773_v36, %v8685_v5  ;;  %v8698_v5 = vadd.f32 %v21202_v22, %v21178_v52  ;;  %v12642_v36 = vor.u32 %v13467_v26, %v12639_v28  ;;  %v8703_v22 = vadd.f32 %v8702_v11, %v21200_v3 }
 0xc93   :  { %v8852_v43 = vmax.f32 %v8774_v14, 0.0  ;;  %v8712_v14 = vpop.f32.mrf.mxu0 }
 0xc95   :  { %v21240_v12 = vpack.c.bf16 %v8852_v43, %v8851_v54  ;;  %v8700_v54 = vadd.f32 %v8699_v41, %v21194_v15 }
 0xc98   :  { %v8776_v58 = vpop.f32.mrf.mxu1 }
 0xc99   :  { %v8777_v49 = vadd.f32 %v8776_v58, %v8688_v42  ;;  %v13469_v42 = vld [vmem:[%s21914_s9 + $0xc4] sm:$0xf] }
 0xc9b   :  { %8815 = vmatmul.bf16.gmra.mxu1 %v12626_v34  ;;  %v8853_v8 = vmax.f32 %v8777_v49, 0.0  ;;  %v12647_v34 = vld [vmem:[%s21914_s9 + $0xc8] sm:$0xf0]  ;;  %v8714_v49 = vpop.f32.mrf.mxu0 }
 0xc9c   :  { %v12650_v58 = vor.u32 %v13469_v42, %v12647_v34  ;;  %v8710_v42 = vadd.f32 %v8709_v17, %v21183_v60 }
 0xca0   :  { %v8778_v45 = vpop.f32.mrf.mxu1 }
 0xca1   :  { %v8779_v50 = vadd.f32 %v8778_v45, %v8690_v32 }
 0xca3   :  { %v8854_v4 = vmax.f32 %v8779_v50, 0.0  ;;  %v8717_v45 = vpop.f32.mrf.mxu0  ;;  %v13471_v50 = vld [vmem:[%s21914_s9 + $0xd4] sm:$0xf] }
 0xca5   :  { %v21252_v31 = vpack.c.bf16 %v8854_v4, %v8853_v8  ;;  %v12655_v8 = vld [vmem:[%s21914_s9 + $0xd8] sm:$0xf0] }
 0xca6   :  { %v12658_v4 = vor.u32 %v13471_v50, %v12655_v8  ;;  %v8705_v50 = vadd.f32 %v21244_v19, %v21161_v55 }
 0xca8   :  { %v8781_v46 = vpop.f32.mrf.mxu1 }
 0xca9   :  { %v8782_v40 = vadd.f32 %v8781_v46, %v8693_v48  ;;  %v12663_v48 = vld [vmem:[%s21914_s9 + $0xe8] sm:$0xf0] }
 0xcaa   :  { %v12666_v46 = vor.u32 %v13473_v24, %v12663_v48 }
 0xcab   :  { %8820 = vmatmul.bf16.gmra.mxu1 %v12634_v1  ;;  %v8855_v20 = vmax.f32 %v8782_v40, 0.0  ;;  %v8719_v3 = vpop.f32.mrf.mxu0 }
 0xcb0   :  { %v8783_v25 = vpop.f32.mrf.mxu1 }
 0xcb1   :  { %v8784_v47 = vadd.f32 %v8783_v25, %v8695_v62 }
 0xcb3   :  { %v8856_v35 = vmax.f32 %v8784_v47, 0.0  ;;  %v8722_v1 = vpop.f32.mrf.mxu0  ;;  %v13475_v47 = vld [vmem:[%s21914_s9 + $0xf4] sm:$0xf] }
 0xcb5   :  { %v21264_v59 = vpack.c.bf16 %v8856_v35, %v8855_v20  ;;  %v12671_v20 = vld [vmem:[%s21914_s9 + $0xf8] sm:$0xf0] }
 0xcb6   :  { %v12674_v35 = vor.u32 %v13475_v47, %v12671_v20 }
 0xcb8   :  { %v8786_v57 = vpop.f32.mrf.mxu1 }
 0xcb9   :  { %v8787_v51 = vadd.f32 %v8786_v57, %v8698_v5  ;;  %v21300_v5 = vpop.permute.xlu0 %8450  ;;  %v8715_v57 = vadd.f32 %v8714_v49, %v21126_v21 }
 0xcbb   :  { %8825 = vmatmul.bf16.gmra.mxu1 %v12642_v36  ;;  %v8857_v37 = vmax.f32 %v8787_v51, 0.0  ;;  %v21292_v62 = vpop.f32.mrf.mxu0  ;;  %v8718_v36 = vadd.f32 %v8717_v45, %v21144_v30  ;;  %v8720_v51 = vadd.f32 %v8719_v3, %v21106_v16  ;;  %v8708_v30 = vadd.f32 %v21255_v39, %v21146_v18 }
 0xcc0   :  { %v8788_v43 = vpop.f32.mrf.mxu1 }
 0xcc1   :  { %v8789_v33 = vadd.f32 %v8788_v43, %v8700_v54  ;;  %v8436_v16 = vpop.permute.xlu0 %8435 }
 0xcc3   :  { %v8858_v61 = vmax.f32 %v8789_v33, 0.0  ;;  %v8727_v28 = vpop.f32.mrf.mxu0  ;;  %v8713_v33 = vadd.f32 %v8712_v14, %v21124_v44  ;;  %v8723_v44 = vadd.f32 %v8722_v1, %v8436_v16 }
 0xcc4   :  { %v8728_v19 = vadd.f32 %v8727_v28, %v21224_v23  ;;  %v13480_v28 = vld [vmem:[%s21915_s11 + $0x14] sm:$0xf0] }
 0xcc5   :  { %v21275_v52 = vpack.c.bf16 %v8858_v61, %v8857_v37 }
 0xcc8   :  { %v8791_v32 = vpop.f32.mrf.mxu1 }
 0xcc9   :  { %v21278_v15 = vadd.f32 %v8791_v32, %v8703_v22 }
 0xccb   :  { %8830 = vmatmul.bf16.gmra.mxu1 %v12650_v58  ;;  %v21307_v32 = vpop.f32.mrf.mxu0 }
 0xcd0   :  { %v8793_v41 = vpop.f32.mrf.mxu1 }
 0xcd1   :  { %v8794_v17 = vadd.f32 %v8793_v41, %v8705_v50 }
 0xcd3   :  { %v8860_v18 = vmax.f32 %v8794_v17, 0.0 }
 0xcd8   :  { %v8796_v10 = vpop.f32.mrf.mxu1 }
 0xcd9   :  { %v8797_v14 = vadd.f32 %v8796_v10, %v8708_v30  ;;  %v12701_v30 = vld [vmem:[%s21915_s11 + $0x30] sm:$0xf] }
 0xcdb   :  { %8835 = vmatmul.bf16.gmra.mxu1 %v12658_v4  ;;  %v8861_v48 = vmax.f32 %v8797_v14, 0.0  ;;  %v13486_v14 = vld [vmem:[%s21915_s11 + $0x44] sm:$0xf0] }
 0xce0   :  { %v8798_v11 = vpop.f32.mrf.mxu1 }
 0xce1   :  { %v8799_v45 = vadd.f32 %v8798_v11, %v8710_v42  ;;  %v8732_v11 = vpop.f32.mrf.mxu0 }
 0xce2   :  { %v8733_v20 = vadd.f32 %v8732_v11, %v21204_v27 }
 0xce3   :  { %v8862_v4 = vmax.f32 %v8799_v45, 0.0  ;;  %v13484_v45 = vld [vmem:[%s21915_s11 + $0x34] sm:$0xf0] }
 0xce5   :  { %v8888_v39 = vpack.c.bf16 %v8862_v4, %v8861_v48  ;;  %v13488_v48 = vld [vmem:[%s21915_s11 + $0x54] sm:$0xf0] }
 0xce8   :  { %v8801_v40 = vpop.f32.mrf.mxu1 }
 0xce9   :  { %v8802_v34 = vadd.f32 %v8801_v40, %v8713_v33  ;;  %v21320_v41 = vpop.f32.mrf.mxu0  ;;  %v13482_v33 = vld [vmem:[%s21915_s11 + $0x24] sm:$0xf0] }
 0xceb   :  { %8840 = vmatmul.bf16.gmra.mxu1 %v12666_v46  ;;  %v8863_v8 = vmax.f32 %v8802_v34, 0.0  ;;  %v8859_v46 = vmax.f32 %v21278_v15, 0.0  ;;  %v12677_v15 = vld [vmem:[%s21915_s11] sm:$0xf] }
 0xced   :  { %v8887_v55 = vpack.c.bf16 %v8860_v18, %v8859_v46 }
 0xcf0   :  { %v8803_v25 = vpop.f32.mrf.mxu1 }
 0xcf1   :  { %v8804_v37 = vadd.f32 %v8803_v25, %v8715_v57  ;;  %v13478_v25 = vld [vmem:[%s21915_s11 + $0x4] sm:$0xf0] }
 0xcf2   :  { %v12678_v47 = vor.u32 %v13478_v25, %v12677_v15 }
 0xcf3   :  { %v8864_v21 = vmax.f32 %v8804_v37, 0.0 }
 0xcf5   :  { %v8889_v24 = vpack.c.bf16 %v8864_v21, %v8863_v8 }
 0xcf8   :  { %v8806_v26 = vpop.f32.mrf.mxu1 }
 0xcf9   :  { %v8807_v54 = vadd.f32 %v8806_v26, %v8718_v36  ;;  %v12685_v26 = vld [vmem:[%s21915_s11 + $0x10] sm:$0xf] }
 0xcfa   :  { %v12686_v57 = vor.u32 %v13480_v28, %v12685_v26 }
 0xcfb   :  { %8845 = vmatmul.bf16.gmra.mxu1 %v12674_v35  ;;  %v8865_v22 = vmax.f32 %v8807_v54, 0.0 }
 0xd00   :  { %v8808_v43 = vpop.f32.mrf.mxu1 }
 0xd01   :  { %v8809_v61 = vadd.f32 %v8808_v43, %v8720_v51  ;;  %v12693_v43 = vld [vmem:[%s21915_s11 + $0x20] sm:$0xf] }
 0xd02   :  { %v12694_v42 = vor.u32 %v13482_v33, %v12693_v43 }
 0xd03   :  { %v8866_v58 = vmax.f32 %v8809_v61, 0.0 }
 0xd05   :  { %v8890_v49 = vpack.c.bf16 %v8866_v58, %v8865_v22 }
 0xd07   :  { %9283 = vmatpush.bf16.msrb.mxu2 %v8890_v49  ;;  %v12702_v49 = vor.u32 %v13484_v45, %v12701_v30 }
 0xd08   :  { %v8811_v60 = vpop.f32.mrf.mxu1 }
 0xd09   :  { %v21313_v3 = vadd.f32 %v8811_v60, %v8723_v44 }
 0xd0b   :  { %9284 = vmatpush.bf16.msrb.mxu2 %v8889_v24  ;;  %v12717_v24 = vld [vmem:[%s21915_s11 + $0x50] sm:$0xf] }
 0xd0c   :  { %v12718_v11 = vor.u32 %v13488_v48, %v12717_v24  ;;  %v12741_v48 = vld [vmem:[%s21915_s11 + $0x80] sm:$0xf] }
 0xd0f   :  { %9285 = vmatpush.bf16.msrb.mxu2 %v8888_v39 }
 0xd10   :  { %v21316_v40 = vpop.f32.mrf.mxu1 }
 0xd13   :  { %9286 = vmatpush.bf16.msrb.mxu2 %v8887_v55 }
 0xd17   :  { %9287 = vmatpush.bf16.msrb.mxu2 %v21275_v52  ;;  %v8737_v52 = vpop.f32.mrf.mxu0 }
 0xd18   :  { %v8816_v10 = vpop.f32.mrf.mxu1  ;;  %v8738_v27 = vadd.f32 %v8737_v52, %v21222_v0  ;;  %v12725_v52 = vld [vmem:[%s21915_s11 + $0x60] sm:$0xf] }
 0xd19   :  { %v21322_v1 = vadd.f32 %v8816_v10, %v8728_v19 }
 0xd1b   :  { %9288 = vmatpush.bf16.msrb.mxu2 %v21264_v59 }
 0xd1f   :  { %9289 = vmatpush.bf16.msrb.mxu2 %v21252_v31  ;;  %v21338_v31 = vpop.f32.mrf.mxu0 }
 0xd20   :  { %v21332_v23 = vpop.f32.mrf.mxu1 }
 0xd23   :  { %9290 = vmatpush.bf16.msrb.mxu2 %v21240_v12 }
 0xd26   :  { %9291 = vmatmul.bf16.vlgmr.msrb.gmra.mxu2 %v12678_v47  ;;  %v13490_v47 = vld [vmem:[%s21915_s11 + $0x64] sm:$0xf0] }
 0xd27   :  { %v8742_v12 = vpop.f32.mrf.mxu0 }
 0xd28   :  { %v8821_v59 = vpop.f32.mrf.mxu1  ;;  %v8743_v34 = vadd.f32 %v8742_v12, %v21174_v9  ;;  %v12709_v9 = vld [vmem:[%s21915_s11 + $0x40] sm:$0xf] }
 0xd29   :  { %v21336_v35 = vadd.f32 %v8821_v59, %v8733_v20  ;;  %v12710_v60 = vor.u32 %v13486_v14, %v12709_v9 }
 0xd2f   :  { %v8744_v37 = vpop.f32.mrf.mxu0 }
 0xd30   :  { %v21346_v36 = vpop.f32.mrf.mxu1 }
 0xd36   :  { %9296 = vmatmul.bf16.gmra.mxu2 %v12686_v57  ;;  %v12726_v57 = vor.u32 %v13490_v47, %v12725_v52  ;;  %v13481_v52 = vld [vmem:[%s21915_s11 + $0x24] sm:$0xf]  ;;  %v12695_v47 = vld [vmem:[%s21915_s11 + $0x28] sm:$0xf0] }
 0xd37   :  { %v8747_v0 = vpop.f32.mrf.mxu0 }
 0xd38   :  { %v8826_v51 = vpop.f32.mrf.mxu1 }
 0xd39   :  { %v21349_v54 = vadd.f32 %v8826_v51, %v8738_v27  ;;  %v8748_v27 = vadd.f32 %v8747_v0, %v21150_v2  ;;  %v8735_v0 = vadd.f32 %v21320_v41, %v21220_v56 }
 0xd3b   :  { %v8873_v56 = vmax.f32 %v21349_v54, 0.0 }
 0xd3f   :  { %v8749_v16 = vpop.f32.mrf.mxu0 }
 0xd40   :  { %v8828_v61 = vpop.f32.mrf.mxu1 }
 0xd46   :  { %9301 = vmatmul.bf16.gmra.mxu2 %v12694_v42  ;;  %v8745_v42 = vadd.f32 %v8744_v37, %v21218_v29  ;;  %v12733_v29 = vld [vmem:[%s21915_s11 + $0x70] sm:$0xf]  ;;  %v13492_v37 = vld [vmem:[%s21915_s11 + $0x74] sm:$0xf0] }
 0xd47   :  { %v8752_v44 = vpop.f32.mrf.mxu0 }
 0xd48   :  { %v8831_v22 = vpop.f32.mrf.mxu1  ;;  %v8753_v59 = vadd.f32 %v8752_v44, %v21172_v63 }
 0xd49   :  { %v21358_v58 = vadd.f32 %v8831_v22, %v8743_v34 }
 0xd4b   :  { %v8875_v9 = vmax.f32 %v21358_v58, 0.0 }
 0xd4f   :  { %v8754_v17 = vpop.f32.mrf.mxu0 }
 0xd50   :  { %v8833_v21 = vpop.f32.mrf.mxu1  ;;  %v8755_v10 = vadd.f32 %v8754_v17, %v21130_v53  ;;  %v8871_v17 = vmax.f32 %v21336_v35, 0.0 }
 0xd51   :  { %v8834_v63 = vadd.f32 %v8833_v21, %v8745_v42  ;;  %v12734_v21 = vor.u32 %v13492_v37, %v12733_v29  ;;  %v12773_v42 = vld [vmem:[%s21915_s11 + $0xc0] sm:$0xf]  ;;  %v12781_v29 = vld [vmem:[%s21915_s11 + $0xd0] sm:$0xf]  ;;  %v13504_v37 = vld [vmem:[%s21915_s11 + $0xd4] sm:$0xf0] }
 0xd53   :  { %v8876_v44 = vmax.f32 %v8834_v63, 0.0  ;;  %v13485_v63 = vld [vmem:[%s21915_s11 + $0x44] sm:$0xf] }
 0xd56   :  { %9306 = vmatmul.bf16.gmra.mxu2 %v12702_v49 }
 0xd57   :  { %v8757_v39 = vpop.f32.mrf.mxu0 }
 0xd58   :  { %v8836_v50 = vpop.f32.mrf.mxu1  ;;  %v8758_v19 = vadd.f32 %v8757_v39, %v21111_v13  ;;  %v8750_v13 = vadd.f32 %v8749_v16, %v21154_v6  ;;  %v8740_v6 = vadd.f32 %v21338_v31, %v21198_v38  ;;  %v8824_v38 = vadd.f32 %v21346_v36, %v8735_v0  ;;  %v12749_v39 = vld [vmem:[%s21915_s11 + $0x90] sm:$0xf] }
 0xd59   :  { %v8837_v34 = vadd.f32 %v8836_v50, %v8748_v27  ;;  %v8730_v50 = vadd.f32 %v21307_v32, %v21300_v5  ;;  %v8869_v5 = vmax.f32 %v21322_v1, 0.0  ;;  %v12679_v1 = vld [vmem:[%s21915_s11 + $0x8] sm:$0xf0] }
 0xd5a   :  { %v8829_v16 = vadd.f32 %v8828_v61, %v8740_v6  ;;  %v8895_v61 = vpack.c.bf16 %v8876_v44, %v8875_v9  ;;  %v8872_v58 = vmax.f32 %v8824_v38, 0.0  ;;  %v21488_v44 = vpop.permute.xlu2 %9035  ;;  %v13487_v38 = vld [vmem:[%s21915_s11 + $0x54] sm:$0xf] }
 0xd5b   :  { %v8877_v49 = vmax.f32 %v8837_v34, 0.0  ;;  %v8819_v41 = vadd.f32 %v21332_v23, %v8730_v50  ;;  %v8867_v23 = vmax.f32 %v21313_v3, 0.0 }
 0xd5c   :  { %v8874_v31 = vmax.f32 %v8829_v16, 0.0  ;;  %v8893_v24 = vpack.c.bf16 %v8872_v58, %v8871_v17 }
 0xd5e   :  { %v8894_v14 = vpack.c.bf16 %v8874_v31, %v8873_v56  ;;  %v12719_v31 = vld [vmem:[%s21915_s11 + $0x58] sm:$0xf0] }
 0xd5f   :  { %v8759_v55 = vpop.f32.mrf.mxu0  ;;  %v12722_v50 = vor.u32 %v13487_v38, %v12719_v31 }
 0xd60   :  { %v8838_v8 = vpop.f32.mrf.mxu1  ;;  %v8760_v15 = vadd.f32 %v8759_v55, %v21152_v7  ;;  %v12687_v55 = vld [vmem:[%s21915_s11 + $0x18] sm:$0xf0] }
 0xd61   :  { %v8839_v51 = vadd.f32 %v8838_v8, %v8750_v13  ;;  %v8441_v8 = vpop.permute.xlu1 %8440  ;;  %v13483_v13 = vld [vmem:[%s21915_s11 + $0x34] sm:$0xf] }
 0xd63   :  { %v8878_v30 = vmax.f32 %v8839_v51, 0.0 }
 0xd65   :  { %v8896_v2 = vpack.c.bf16 %v8878_v30, %v8877_v49  ;;  %v12711_v30 = vld [vmem:[%s21915_s11 + $0x48] sm:$0xf0] }
 0xd66   :  { %9311 = vmatmul.bf16.gmra.mxu2 %v12710_v60  ;;  %v8725_v60 = vadd.f32 %v21292_v62, %v8441_v8  ;;  %v13494_v62 = vld [vmem:[%s21915_s11 + $0x84] sm:$0xf0]  ;;  %v12714_v49 = vor.u32 %v13485_v63, %v12711_v30  ;;  %v13495_v63 = vld [vmem:[%s21915_s11 + $0x94] sm:$0xf]  ;;  %v12751_v30 = vld [vmem:[%s21915_s11 + $0x98] sm:$0xf0] }
 0xd68   :  { %v8841_v4 = vpop.f32.mrf.mxu1  ;;  %v8814_v36 = vadd.f32 %v21316_v40, %v8725_v60  ;;  %v13477_v40 = vld [vmem:[%s21915_s11 + $0x4] sm:$0xf]  ;;  %v12789_v60 = vld [vmem:[%s21915_s11 + $0xe0] sm:$0xf] }
 0xd69   :  { %v8842_v53 = vadd.f32 %v8841_v4, %v8753_v59  ;;  %v8870_v4 = vmax.f32 %v8819_v41, 0.0  ;;  %v12682_v3 = vor.u32 %v13477_v40, %v12679_v1  ;;  %v12698_v59 = vor.u32 %v13481_v52, %v12695_v47  ;;  %v21464_v51 = vpop.permute.xlu1 %9115  ;;  %v12797_v1 = vld [vmem:[%s21915_s11 + $0xf0] sm:$0xf]  ;;  %v13493_v47 = vld [vmem:[%s21915_s11 + $0x84] sm:$0xf] }
 0xd6a   :  { %v8868_v32 = vmax.f32 %v8814_v36, 0.0  ;;  %v13506_v36 = vld [vmem:[%s21915_s11 + $0xe4] sm:$0xf0] }
 0xd6b   :  { %v8879_v22 = vmax.f32 %v8842_v53, 0.0  ;;  %v8892_v54 = vpack.c.bf16 %v8870_v4, %v8869_v5  ;;  %v12703_v53 = vld [vmem:[%s21915_s11 + $0x38] sm:$0xf0]  ;;  %v13489_v4 = vld [vmem:[%s21915_s11 + $0x64] sm:$0xf] }
 0xd6c   :  { %v8891_v35 = vpack.c.bf16 %v8868_v32, %v8867_v23  ;;  %v12706_v27 = vor.u32 %v13483_v13, %v12703_v53  ;;  %v12790_v32 = vor.u32 %v13506_v36, %v12789_v60 }
 0xd70   :  { %v8843_v18 = vpop.f32.mrf.mxu1 }
 0xd71   :  { %v8844_v26 = vadd.f32 %v8843_v18, %v8755_v10  ;;  %v12742_v18 = vor.u32 %v13494_v62, %v12741_v48  ;;  %v21473_v34 = vpop.permute.xlu1 %9030 }
 0xd73   :  { %v8880_v43 = vmax.f32 %v8844_v26, 0.0  ;;  %v21448_v26 = vpop.permute.xlu0 %9040 }
 0xd75   :  { %v8897_v45 = vpack.c.bf16 %v8880_v43, %v8879_v22  ;;  %v13502_v22 = vld [vmem:[%s21915_s11 + $0xc4] sm:$0xf0] }
 0xd76   :  { %9316 = vmatmul.bf16.gmra.mxu2 %v12718_v11  ;;  %v13496_v11 = vld [vmem:[%s21915_s11 + $0x94] sm:$0xf0]  ;;  %v12774_v6 = vor.u32 %v13502_v22, %v12773_v42 }
 0xd78   :  { %v8846_v46 = vpop.f32.mrf.mxu1 }
 0xd79   :  { %v8847_v25 = vadd.f32 %v8846_v46, %v8758_v19  ;;  %v13479_v46 = vld [vmem:[%s21915_s11 + $0x14] sm:$0xf]  ;;  %v12750_v19 = vor.u32 %v13496_v11, %v12749_v39  ;;  %v12735_v39 = vld [vmem:[%s21915_s11 + $0x78] sm:$0xf0] }
 0xd7a   :  { %v12690_v10 = vor.u32 %v13479_v46, %v12687_v55 }
 0xd7b   :  { %v8881_v12 = vmax.f32 %v8847_v25, 0.0  ;;  %v13498_v25 = vld [vmem:[%s21915_s11 + $0xa4] sm:$0xf0]  ;;  %v21466_v43 = vpop.permute.xlu0 %9025 }
 0xd80   :  { %v8848_v20 = vpop.f32.mrf.mxu1 }
 0xd81   :  { %v8849_v28 = vadd.f32 %v8848_v20, %v8760_v15  ;;  %v12757_v15 = vld [vmem:[%s21915_s11 + $0xa0] sm:$0xf] }
 0xd82   :  { %v12758_v20 = vor.u32 %v13498_v25, %v12757_v15 }
 0xd83   :  { %v8882_v7 = vmax.f32 %v8849_v28, 0.0  ;;  %v12765_v28 = vld [vmem:[%s21915_s11 + $0xb0] sm:$0xf] }
 0xd85   :  { %v8898_v33 = vpack.c.bf16 %v8882_v7, %v8881_v12 }
 0xd86   :  { %9321 = vmatmul.bf16.gmra.mxu2 %v12726_v57  ;;  %v13500_v57 = vld [vmem:[%s21915_s11 + $0xb4] sm:$0xf0] }
 0xd87   :  { %9372 = vmatpush.bf16.msrb.mxu3 %v8898_v33  ;;  %v12766_v7 = vor.u32 %v13500_v57, %v12765_v28 }
 0xd8b   :  { %9373 = vmatpush.bf16.msrb.mxu3 %v8897_v45  ;;  %v21484_v45 = vpop.permute.xlu0 %9110 }
 0xd8f   :  { %9374 = vmatpush.bf16.msrb.mxu3 %v8896_v2  ;;  %v21490_v2 = vpop.permute.xlu1 %9015 }
 0xd93   :  { %9375 = vmatpush.bf16.msrb.mxu3 %v8895_v61  ;;  %v21492_v0 = vpop.permute.xlu0 %9095  ;;  %v21508_v61 = vpop.permute.xlu2 %9120 }
 0xd96   :  { %9326 = vmatmul.bf16.gmra.mxu2 %v12734_v21  ;;  %v12782_v21 = vor.u32 %v13504_v37, %v12781_v29  ;;  %v12754_v37 = vor.u32 %v13495_v63, %v12751_v30 }
 0xd97   :  { %9376 = vmatpush.bf16.msrb.mxu3 %v8894_v14  ;;  %v21510_v56 = vpop.permute.xlu1 %9100 }
 0xd9b   :  { %9377 = vmatpush.bf16.msrb.mxu3 %v8893_v24  ;;  %v21512_v41 = vpop.permute.xlu0 %9010  ;;  %v21516_v14 = vpop.permute.xlu2 %9105  ;;  %v12727_v24 = vld [vmem:[%s21915_s11 + $0x68] sm:$0xf0] }
 0xd9f   :  { %9378 = vmatpush.bf16.msrb.mxu3 %v8892_v54  ;;  %v21518_v8 = vpop.permute.xlu1 %9085  ;;  %v12730_v54 = vor.u32 %v13489_v4, %v12727_v24  ;;  %v13497_v24 = vld [vmem:[%s21915_s11 + $0xa4] sm:$0xf] }
 0xda3   :  { %9379 = vmatpush.bf16.msrb.mxu3 %v8891_v35  ;;  %v21523_v17 = vpop.permute.xlu0 %8995  ;;  %v21536_v23 = vpop.permute.xlu2 %9020 }
 0xda6   :  { %9331 = vmatmul.bf16.gmra.mxu2 %v12742_v18  ;;  %9380 = vmatmul.bf16.vlgmr.msrb.gmra.mxu3 %v12682_v3  ;;  %v13508_v18 = vld [vmem:[%s21915_s11 + $0xf4] sm:$0xf0]  ;;  %v13491_v3 = vld [vmem:[%s21915_s11 + $0x74] sm:$0xf] }
 0xda7   :  { %v21538_v48 = vpop.permute.xlu1 %9000  ;;  %v12798_v46 = vor.u32 %v13508_v18, %v12797_v1  ;;  %v12738_v55 = vor.u32 %v13491_v3, %v12735_v39 }
 0xda9   :  { %v21462_v12 = vpop.f32.mrf.mxu2 }
 0xdab   :  { %v21540_v62 = vpop.permute.xlu0 %9080  ;;  %v21547_v35 = vpop.permute.xlu2 %9005 }
 0xdaf   :  { %v8986_v11 = vpop.permute.xlu1 %8985 }
 0xdb1   :  { %v21468_v33 = vpop.f32.mrf.mxu2 }
 0xdb3   :  { %v21562_v15 = vpop.permute.xlu2 %9090 }
 0xdb6   :  { %9336 = vmatmul.bf16.gmra.mxu2 %v12750_v19  ;;  %9385 = vmatmul.bf16.gmra.mxu3 %v12690_v10  ;;  %v21558_v19 = vpop.permute.xlu0 %9065 }
 0xdb7   :  { %v21564_v25 = vpop.permute.xlu1 %9070 }
 0xdb9   :  { %v21486_v16 = vpop.f32.mrf.mxu2 }
 0xdbb   :  { %v21572_v28 = vpop.permute.xlu2 %9075 }
 0xdbe   :  { %v8981_v52 = vpop.permute.xlu0 %8980 }
 0xdbf   :  { %v21574_v57 = vpop.permute.xlu1 %9055 }
 0xdc1   :  { %v21494_v9 = vpop.f32.mrf.mxu2 }
 0xdc3   :  { %v8991_v42 = vpop.permute.xlu2 %8990 }
 0xdc6   :  { %9341 = vmatmul.bf16.gmra.mxu2 %v12758_v20  ;;  %9390 = vmatmul.bf16.gmra.mxu3 %v12698_v59  ;;  %v12743_v20 = vld [vmem:[%s21915_s11 + $0x88] sm:$0xf0]  ;;  %v8966_v13 = vpop.permute.xlu0 %8965 }
 0xdc7   :  { %v12746_v59 = vor.u32 %v13493_v47, %v12743_v20  ;;  %v9293_v53 = vadd.f32 %v21462_v12, %v8966_v13  ;;  %v8971_v22 = vpop.permute.xlu1 %8970 }
 0xdc9   :  { %v21514_v58 = vpop.f32.mrf.mxu2 }
 0xdd1   :  { %v21534_v5 = vpop.f32.mrf.mxu2 }
 0xdd2   :  { %v9305_v13 = vadd.f32 %v21534_v5, %v8991_v42  ;;  %v12775_v5 = vld [vmem:[%s21915_s11 + $0xc8] sm:$0xf0] }
 0xdd6   :  { %9346 = vmatmul.bf16.gmra.mxu2 %v12766_v7  ;;  %9395 = vmatmul.bf16.gmra.mxu3 %v12706_v27 }
 0xdd9   :  { %v21542_v40 = vpop.f32.mrf.mxu2 }
 0xdda   :  { %v9308_v30 = vadd.f32 %v21542_v40, %v21523_v17 }
 0xde1   :  { %v21560_v10 = vpop.f32.mrf.mxu2 }
 0xde2   :  { %v9310_v42 = vadd.f32 %v21560_v10, %v21538_v48  ;;  %v12783_v48 = vld [vmem:[%s21915_s11 + $0xd8] sm:$0xf0] }
 0xde6   :  { %9351 = vmatmul.bf16.gmra.mxu2 %v12774_v6  ;;  %9400 = vmatmul.bf16.gmra.mxu3 %v12714_v49  ;;  %v9295_v6 = vadd.f32 %v21468_v33, %v8971_v22  ;;  %v12759_v33 = vld [vmem:[%s21915_s11 + $0xa8] sm:$0xf0] }
 0xde7   :  { %v12762_v3 = vor.u32 %v13497_v24, %v12759_v33 }
 0xdf6   :  { %9356 = vmatmul.bf16.gmra.mxu2 %v12782_v21  ;;  %9405 = vmatmul.bf16.gmra.mxu3 %v12722_v50  ;;  %v8976_v21 = vpop.permute.xlu2 %8975  ;;  %v9312_v50 = vpop.f32.mrf.mxu2 }
 0xdf7   :  { %v9298_v60 = vadd.f32 %v21486_v16, %v8976_v21  ;;  %v9313_v40 = vadd.f32 %v9312_v50, %v21547_v35  ;;  %v13505_v35 = vld [vmem:[%s21915_s11 + $0xe4] sm:$0xf]  ;;  %v12791_v50 = vld [vmem:[%s21915_s11 + $0xe8] sm:$0xf0] }
 0xe06   :  { %9361 = vmatmul.bf16.gmra.mxu2 %v12790_v32  ;;  %9410 = vmatmul.bf16.gmra.mxu3 %v12730_v54  ;;  %v9300_v32 = vadd.f32 %v21494_v9, %v8981_v52  ;;  %v21594_v54 = vpop.f32.mrf.mxu2  ;;  %v13499_v9 = vld [vmem:[%s21915_s11 + $0xb4] sm:$0xf]  ;;  %v12767_v52 = vld [vmem:[%s21915_s11 + $0xb8] sm:$0xf0] }
 0xe16   :  { %9366 = vmatmul.bf16.gmra.mxu2 %v12798_v46  ;;  %9415 = vmatmul.bf16.gmra.mxu3 %v12738_v55  ;;  %v9303_v55 = vadd.f32 %v21514_v58, %v8986_v11 }
 0xe26   :  { %9420 = vmatmul.bf16.gmra.mxu3 %v12746_v59  ;;  %v21599_v59 = vpop.f32.mrf.mxu2 }
 0xe29   :  { %v9381_v7 = vpop.f32.mrf.mxu3 }
 0xe2a   :  { %v9382_v27 = vadd.f32 %v9381_v7, %v9293_v53 }
 0xe2c   :  { %v9461_v38 = vmax.f32 %v9382_v27, 0.0  ;;  %v12770_v27 = vor.u32 %v13499_v9, %v12767_v52  ;;  %v13507_v9 = vld [vmem:[%s21915_s11 + $0xf4] sm:$0xf]  ;;  %v12799_v52 = vld [vmem:[%s21915_s11 + $0xf8] sm:$0xf0] }
 0xe2e   :  { %v9319_v58 = vpop.f32.mrf.mxu2 }
 0xe31   :  { %v9383_v49 = vpop.f32.mrf.mxu3 }
 0xe32   :  { %v9384_v29 = vadd.f32 %v9383_v49, %v9295_v6 }
 0xe34   :  { %v9462_v31 = vmax.f32 %v9384_v29, 0.0 }
 0xe36   :  { %9425 = vmatmul.bf16.gmra.mxu3 %v12754_v37  ;;  %v21584_v12 = vpack.c.bf16 %v9462_v31, %v9461_v38  ;;  %v9322_v29 = vpop.f32.mrf.mxu2  ;;  %v13501_v37 = vld [vmem:[%s21915_s11 + $0xc4] sm:$0xf] }
 0xe37   :  { %v12778_v21 = vor.u32 %v13501_v37, %v12775_v5 }
 0xe39   :  { %v9386_v36 = vpop.f32.mrf.mxu3 }
 0xe3a   :  { %v9387_v4 = vadd.f32 %v9386_v36, %v9298_v60 }
 0xe3c   :  { %v9463_v39 = vmax.f32 %v9387_v4, 0.0 }
 0xe3e   :  { %v9324_v4 = vpop.f32.mrf.mxu2 }
 0xe41   :  { %v9388_v1 = vpop.f32.mrf.mxu3 }
 0xe42   :  { %v9389_v18 = vadd.f32 %v9388_v1, %v9300_v32  ;;  %v13503_v32 = vld [vmem:[%s21915_s11 + $0xd4] sm:$0xf] }
 0xe43   :  { %v12786_v1 = vor.u32 %v13503_v32, %v12783_v48  ;;  %v9315_v48 = vadd.f32 %v21594_v54, %v21512_v41 }
 0xe44   :  { %v9464_v46 = vmax.f32 %v9389_v18, 0.0 }
 0xe46   :  { %9430 = vmatmul.bf16.gmra.mxu3 %v12762_v3  ;;  %v21596_v16 = vpack.c.bf16 %v9464_v46, %v9463_v39  ;;  %v9327_v18 = vpop.f32.mrf.mxu2 }
 0xe49   :  { %v9391_v47 = vpop.f32.mrf.mxu3 }
 0xe4a   :  { %v9392_v20 = vadd.f32 %v9391_v47, %v9303_v55  ;;  %v12794_v55 = vor.u32 %v13505_v35, %v12791_v50 }
 0xe4c   :  { %v9465_v22 = vmax.f32 %v9392_v20, 0.0 }
 0xe4e   :  { %v9329_v39 = vpop.f32.mrf.mxu2 }
 0xe51   :  { %v9393_v53 = vpop.f32.mrf.mxu3 }
 0xe52   :  { %v9394_v7 = vadd.f32 %v9393_v53, %v9305_v13 }
 0xe54   :  { %v9466_v63 = vmax.f32 %v9394_v7, 0.0  ;;  %v12802_v7 = vor.u32 %v13507_v9, %v12799_v52  ;;  %v13510_v9 = vld [vmem:[%s21916_s13 + $0x4] sm:$0xf0] }
 0xe56   :  { %9435 = vmatmul.bf16.gmra.mxu3 %v12770_v27  ;;  %v21608_v11 = vpack.c.bf16 %v9466_v63, %v9465_v22  ;;  %v9332_v47 = vpop.f32.mrf.mxu2  ;;  %v21643_v63 = vpop.permute.xlu2 %9060 }
 0xe59   :  { %v9396_v6 = vpop.f32.mrf.mxu3 }
 0xe5a   :  { %v9397_v49 = vadd.f32 %v9396_v6, %v9308_v30  ;;  %v9328_v30 = vadd.f32 %v9327_v18, %v21488_v44  ;;  %v9325_v6 = vadd.f32 %v9324_v4, %v21473_v34  ;;  %v9318_v44 = vadd.f32 %v21599_v59, %v21490_v2 }
 0xe5c   :  { %v9467_v60 = vmax.f32 %v9397_v49, 0.0  ;;  %v9330_v49 = vadd.f32 %v9329_v39, %v21448_v26 }
 0xe5e   :  { %v21641_v13 = vpop.f32.mrf.mxu2  ;;  %v9046_v26 = vpop.permute.xlu2 %9045 }
 0xe61   :  { %v9398_v38 = vpop.f32.mrf.mxu3 }
 0xe62   :  { %v9399_v31 = vadd.f32 %v9398_v38, %v9310_v42  ;;  %v9323_v42 = vadd.f32 %v9322_v29, %v21466_v43  ;;  %v9333_v43 = vadd.f32 %v9332_v47, %v9046_v26 }
 0xe64   :  { %v9468_v36 = vmax.f32 %v9399_v31, 0.0 }
 0xe66   :  { %9440 = vmatmul.bf16.gmra.mxu3 %v12778_v21  ;;  %v21620_v17 = vpack.c.bf16 %v9468_v36, %v9467_v60  ;;  %v9337_v22 = vpop.f32.mrf.mxu2  ;;  %v9320_v21 = vadd.f32 %v9319_v58, %v21536_v23 }
 0xe67   :  { %v9338_v54 = vadd.f32 %v9337_v22, %v21574_v57  ;;  %v13512_v22 = vld [vmem:[%s21916_s13 + $0x14] sm:$0xf0] }
 0xe69   :  { %v9401_v24 = vpop.f32.mrf.mxu3 }
 0xe6a   :  { %v9402_v33 = vadd.f32 %v9401_v24, %v9313_v40 }
 0xe6e   :  { %v21650_v24 = vpop.f32.mrf.mxu2 }
 0xe71   :  { %v9403_v10 = vpop.f32.mrf.mxu3 }
 0xe72   :  { %v9404_v58 = vadd.f32 %v9403_v10, %v9315_v48 }
 0xe74   :  { %v9470_v2 = vmax.f32 %v9404_v58, 0.0 }
 0xe76   :  { %9445 = vmatmul.bf16.gmra.mxu3 %v12786_v1 }
 0xe79   :  { %v9406_v3 = vpop.f32.mrf.mxu3 }
 0xe7a   :  { %v9407_v29 = vadd.f32 %v9406_v3, %v9318_v44  ;;  %v12829_v44 = vld [vmem:[%s21916_s13 + $0x30] sm:$0xf] }
 0xe7c   :  { %v9471_v50 = vmax.f32 %v9407_v29, 0.0  ;;  %v13518_v29 = vld [vmem:[%s21916_s13 + $0x44] sm:$0xf0] }
 0xe81   :  { %v9408_v46 = vpop.f32.mrf.mxu3 }
 0xe82   :  { %v9409_v32 = vadd.f32 %v9408_v46, %v9320_v21  ;;  %v9342_v46 = vpop.f32.mrf.mxu2 }
 0xe84   :  { %v9472_v18 = vmax.f32 %v9409_v32, 0.0  ;;  %v13516_v32 = vld [vmem:[%s21916_s13 + $0x34] sm:$0xf0] }
 0xe86   :  { %9450 = vmatmul.bf16.gmra.mxu3 %v12794_v55  ;;  %v9498_v59 = vpack.c.bf16 %v9472_v18, %v9471_v50  ;;  %v9469_v55 = vmax.f32 %v9402_v33, 0.0  ;;  %v12805_v33 = vld [vmem:[%s21916_s13] sm:$0xf]  ;;  %v13520_v50 = vld [vmem:[%s21916_s13 + $0x54] sm:$0xf0] }
 0xe87   :  { %v12806_v52 = vor.u32 %v13510_v9, %v12805_v33 }
 0xe88   :  { %v9497_v41 = vpack.c.bf16 %v9470_v2, %v9469_v55 }
 0xe89   :  { %v9411_v20 = vpop.f32.mrf.mxu3 }
 0xe8a   :  { %v9412_v60 = vadd.f32 %v9411_v20, %v9323_v42  ;;  %v21662_v10 = vpop.f32.mrf.mxu2  ;;  %v13514_v42 = vld [vmem:[%s21916_s13 + $0x24] sm:$0xf0] }
 0xe8c   :  { %v9473_v1 = vmax.f32 %v9412_v60, 0.0 }
 0xe91   :  { %v9413_v53 = vpop.f32.mrf.mxu3 }
 0xe92   :  { %v9414_v38 = vadd.f32 %v9413_v53, %v9325_v6  ;;  %v9343_v53 = vadd.f32 %v9342_v46, %v21558_v19 }
 0xe94   :  { %v9474_v34 = vmax.f32 %v9414_v38, 0.0 }
 0xe96   :  { %9455 = vmatmul.bf16.gmra.mxu3 %v12802_v7  ;;  %v9499_v35 = vpack.c.bf16 %v9474_v34, %v9473_v1 }
 0xe99   :  { %v9416_v27 = vpop.f32.mrf.mxu3 }
 0xe9a   :  { %v9417_v37 = vadd.f32 %v9416_v27, %v9328_v30  ;;  %v12813_v27 = vld [vmem:[%s21916_s13 + $0x10] sm:$0xf] }
 0xe9b   :  { %v12814_v6 = vor.u32 %v13512_v22, %v12813_v27 }
 0xe9c   :  { %v9475_v36 = vmax.f32 %v9417_v37, 0.0 }
 0xea1   :  { %v9418_v5 = vpop.f32.mrf.mxu3 }
 0xea2   :  { %v9419_v31 = vadd.f32 %v9418_v5, %v9330_v49  ;;  %v12821_v5 = vld [vmem:[%s21916_s13 + $0x20] sm:$0xf] }
 0xea3   :  { %v12822_v21 = vor.u32 %v13514_v42, %v12821_v5 }
 0xea4   :  { %v9476_v40 = vmax.f32 %v9419_v31, 0.0 }
 0xea6   :  { %v9500_v4 = vpack.c.bf16 %v9476_v40, %v9475_v36 }
 0xea8   :  { %9701 = vmatpush.bf16.msra.mxu0 %v9500_v4  ;;  %v12830_v4 = vor.u32 %v13516_v32, %v12829_v44 }
 0xea9   :  { %v9421_v23 = vpop.f32.mrf.mxu3 }
 0xeaa   :  { %v21656_v39 = vadd.f32 %v9421_v23, %v9333_v43 }
 0xeac   :  { %9702 = vmatpush.bf16.msra.mxu0 %v9499_v35  ;;  %v12845_v35 = vld [vmem:[%s21916_s13 + $0x50] sm:$0xf] }
 0xead   :  { %v12846_v46 = vor.u32 %v13520_v50, %v12845_v35  ;;  %v13509_v50 = vld [vmem:[%s21916_s13 + $0x4] sm:$0xf] }
 0xeb0   :  { %9703 = vmatpush.bf16.msra.mxu0 %v9498_v59 }
 0xeb1   :  { %v21658_v20 = vpop.f32.mrf.mxu3 }
 0xeb4   :  { %9704 = vmatpush.bf16.msra.mxu0 %v9497_v41 }
 0xeb8   :  { %9705 = vmatpush.bf16.msra.mxu0 %v21620_v17  ;;  %v9347_v17 = vpop.f32.mrf.mxu2 }
 0xeb9   :  { %v9426_v3 = vpop.f32.mrf.mxu3  ;;  %v9348_v19 = vadd.f32 %v9347_v17, %v21572_v28  ;;  %v12853_v17 = vld [vmem:[%s21916_s13 + $0x60] sm:$0xf] }
 0xeba   :  { %v21664_v47 = vadd.f32 %v9426_v3, %v9338_v54 }
 0xebc   :  { %9706 = vmatpush.bf16.msra.mxu0 %v21608_v11 }
 0xec0   :  { %9707 = vmatpush.bf16.msra.mxu0 %v21596_v16  ;;  %v21680_v16 = vpop.f32.mrf.mxu2 }
 0xec1   :  { %v21674_v57 = vpop.f32.mrf.mxu3 }
 0xec4   :  { %9708 = vmatpush.bf16.msra.mxu0 %v21584_v12 }
 0xec7   :  { %9709 = vmatmul.bf16.vlgmr.msra.gmra.mxu0 %v12806_v52  ;;  %v13522_v52 = vld [vmem:[%s21916_s13 + $0x64] sm:$0xf0] }
 0xec8   :  { %v9352_v12 = vpop.f32.mrf.mxu2 }
 0xec9   :  { %v9431_v11 = vpop.f32.mrf.mxu3  ;;  %v9353_v60 = vadd.f32 %v9352_v12, %v21518_v8  ;;  %v12837_v8 = vld [vmem:[%s21916_s13 + $0x40] sm:$0xf] }
 0xeca   :  { %v21678_v7 = vadd.f32 %v9431_v11, %v9343_v53  ;;  %v12838_v23 = vor.u32 %v13518_v29, %v12837_v8 }
 0xed0   :  { %v9354_v38 = vpop.f32.mrf.mxu2 }
 0xed1   :  { %v21688_v30 = vpop.f32.mrf.mxu3 }
 0xed7   :  { %9714 = vmatmul.bf16.gmra.mxu0 %v12814_v6  ;;  %v12854_v6 = vor.u32 %v13522_v52, %v12853_v17  ;;  %v13519_v52 = vld [vmem:[%s21916_s13 + $0x54] sm:$0xf] }
 0xed8   :  { %v9357_v28 = vpop.f32.mrf.mxu2 }
 0xed9   :  { %v9436_v49 = vpop.f32.mrf.mxu3 }
 0xeda   :  { %v21691_v37 = vadd.f32 %v9436_v49, %v9348_v19  ;;  %v9358_v19 = vadd.f32 %v9357_v28, %v21492_v0  ;;  %v9345_v28 = vadd.f32 %v21662_v10, %v21564_v25 }
 0xedc   :  { %v9483_v25 = vmax.f32 %v21691_v37, 0.0 }
 0xee0   :  { %v9359_v26 = vpop.f32.mrf.mxu2 }
 0xee1   :  { %v9438_v31 = vpop.f32.mrf.mxu3 }
 0xee7   :  { %9719 = vmatmul.bf16.gmra.mxu0 %v12822_v21  ;;  %v9355_v21 = vadd.f32 %v9354_v38, %v21562_v15  ;;  %v12861_v15 = vld [vmem:[%s21916_s13 + $0x70] sm:$0xf]  ;;  %v13524_v38 = vld [vmem:[%s21916_s13 + $0x74] sm:$0xf0] }
 0xee8   :  { %v9362_v43 = vpop.f32.mrf.mxu2 }
 0xee9   :  { %v9441_v36 = vpop.f32.mrf.mxu3  ;;  %v9363_v11 = vadd.f32 %v9362_v43, %v21516_v14 }
 0xeea   :  { %v21700_v40 = vadd.f32 %v9441_v36, %v9353_v60 }
 0xeec   :  { %v9485_v8 = vmax.f32 %v21700_v40, 0.0 }
 0xef0   :  { %v9364_v58 = vpop.f32.mrf.mxu2 }
 0xef1   :  { %v9443_v34 = vpop.f32.mrf.mxu3  ;;  %v9365_v3 = vadd.f32 %v9364_v58, %v21484_v45  ;;  %v9481_v58 = vmax.f32 %v21678_v7, 0.0 }
 0xef2   :  { %v9444_v14 = vadd.f32 %v9443_v34, %v9355_v21  ;;  %v12862_v34 = vor.u32 %v13524_v38, %v12861_v15  ;;  %v13523_v21 = vld [vmem:[%s21916_s13 + $0x74] sm:$0xf] }
 0xef4   :  { %v9486_v43 = vmax.f32 %v9444_v14, 0.0 }
 0xef7   :  { %9724 = vmatmul.bf16.gmra.mxu0 %v12830_v4 }
 0xef8   :  { %v9367_v59 = vpop.f32.mrf.mxu2 }
 0xef9   :  { %v9446_v48 = vpop.f32.mrf.mxu3  ;;  %v9368_v54 = vadd.f32 %v9367_v59, %v21464_v51  ;;  %v9360_v51 = vadd.f32 %v9359_v26, %v21510_v56  ;;  %v9350_v56 = vadd.f32 %v21680_v16, %v21540_v62  ;;  %v9434_v62 = vadd.f32 %v21688_v30, %v9345_v28  ;;  %v13513_v59 = vld [vmem:[%s21916_s13 + $0x24] sm:$0xf] }
 0xefa   :  { %v9447_v60 = vadd.f32 %v9446_v48, %v9358_v19  ;;  %v9340_v48 = vadd.f32 %v21650_v24, %v21643_v63  ;;  %v9479_v63 = vmax.f32 %v21664_v47, 0.0  ;;  %v13511_v47 = vld [vmem:[%s21916_s13 + $0x14] sm:$0xf] }
 0xefb   :  { %v9439_v26 = vadd.f32 %v9438_v31, %v9350_v56  ;;  %v9505_v31 = vpack.c.bf16 %v9486_v43, %v9485_v8  ;;  %v9482_v40 = vmax.f32 %v9434_v62, 0.0 }
 0xefc   :  { %v9487_v4 = vmax.f32 %v9447_v60, 0.0  ;;  %v9429_v10 = vadd.f32 %v21674_v57, %v9340_v48  ;;  %v9477_v57 = vmax.f32 %v21656_v39, 0.0  ;;  %v12815_v39 = vld [vmem:[%s21916_s13 + $0x18] sm:$0xf0] }
 0xefd   :  { %v9484_v16 = vmax.f32 %v9439_v26, 0.0  ;;  %v9503_v35 = vpack.c.bf16 %v9482_v40, %v9481_v58  ;;  %v12863_v60 = vld [vmem:[%s21916_s13 + $0x78] sm:$0xf0] }
 0xefe   :  { %v12866_v14 = vor.u32 %v13523_v21, %v12863_v60 }
 0xeff   :  { %v9504_v29 = vpack.c.bf16 %v9484_v16, %v9483_v25 }
 0xf00   :  { %v9369_v41 = vpop.f32.mrf.mxu2 }
 0xf01   :  { %v9448_v1 = vpop.f32.mrf.mxu3  ;;  %v9370_v33 = vadd.f32 %v9369_v41, %v21508_v61  ;;  %v13515_v41 = vld [vmem:[%s21916_s13 + $0x34] sm:$0xf] }
 0xf02   :  { %v9449_v49 = vadd.f32 %v9448_v1, %v9360_v51  ;;  %v9051_v1 = vpop.permute.xlu0 %9050  ;;  %v12855_v51 = vld [vmem:[%s21916_s13 + $0x68] sm:$0xf0] }
 0xf04   :  { %v9488_v44 = vmax.f32 %v9449_v49, 0.0 }
 0xf06   :  { %v9506_v0 = vpack.c.bf16 %v9488_v44, %v9487_v4 }
 0xf07   :  { %9729 = vmatmul.bf16.gmra.mxu0 %v12838_v23  ;;  %v9335_v23 = vadd.f32 %v21641_v13, %v9051_v1  ;;  %v12807_v13 = vld [vmem:[%s21916_s13 + $0x8] sm:$0xf0] }
 0xf09   :  { %v9451_v18 = vpop.f32.mrf.mxu3  ;;  %v9424_v30 = vadd.f32 %v21658_v20, %v9335_v23  ;;  %v12810_v20 = vor.u32 %v13509_v50, %v12807_v13 }
 0xf0a   :  { %v9452_v45 = vadd.f32 %v9451_v18, %v9363_v11  ;;  %v9480_v18 = vmax.f32 %v9429_v10, 0.0 }
 0xf0b   :  { %v9478_v24 = vmax.f32 %v9424_v30, 0.0 }
 0xf0c   :  { %v9489_v36 = vmax.f32 %v9452_v45, 0.0  ;;  %v9502_v37 = vpack.c.bf16 %v9480_v18, %v9479_v63 }
 0xf0d   :  { %v9501_v7 = vpack.c.bf16 %v9478_v24, %v9477_v57 }
 0xf11   :  { %v9453_v2 = vpop.f32.mrf.mxu3 }
 0xf12   :  { %v9454_v27 = vadd.f32 %v9453_v2, %v9365_v3  ;;  %v12818_v2 = vor.u32 %v13511_v47, %v12815_v39 }
 0xf14   :  { %v9490_v5 = vmax.f32 %v9454_v27, 0.0  ;;  %v21790_v27 = vpop.permute.xlu1 %9613 }
 0xf16   :  { %v9507_v32 = vpack.c.bf16 %v9490_v5, %v9489_v36  ;;  %v21810_v36 = vpop.permute.xlu2 %9618 }
 0xf17   :  { %9734 = vmatmul.bf16.gmra.mxu0 %v12846_v46  ;;  %v12823_v46 = vld [vmem:[%s21916_s13 + $0x28] sm:$0xf0] }
 0xf19   :  { %v9456_v55 = vpop.f32.mrf.mxu3 }
 0xf1a   :  { %v9457_v9 = vadd.f32 %v9456_v55, %v9368_v54  ;;  %v12826_v55 = vor.u32 %v13513_v59, %v12823_v46  ;;  %v12831_v54 = vld [vmem:[%s21916_s13 + $0x38] sm:$0xf0] }
 0xf1b   :  { %v12834_v3 = vor.u32 %v13515_v41, %v12831_v54 }
 0xf1c   :  { %v9491_v12 = vmax.f32 %v9457_v9, 0.0  ;;  %v12839_v9 = vld [vmem:[%s21916_s13 + $0x48] sm:$0xf0]  ;;  %v21800_v45 = vpop.permute.xlu1 %9608 }
 0xf1e   :  { %v21812_v4 = vpop.permute.xlu2 %9593 }
 0xf21   :  { %v9458_v53 = vpop.f32.mrf.mxu3 }
 0xf22   :  { %v9459_v22 = vadd.f32 %v9458_v53, %v9370_v33  ;;  %v13517_v33 = vld [vmem:[%s21916_s13 + $0x44] sm:$0xf]  ;;  %v12847_v53 = vld [vmem:[%s21916_s13 + $0x58] sm:$0xf0] }
 0xf23   :  { %v12842_v17 = vor.u32 %v13517_v33, %v12839_v9  ;;  %v12850_v11 = vor.u32 %v13519_v52, %v12847_v53 }
 0xf24   :  { %v9492_v61 = vmax.f32 %v9459_v22, 0.0  ;;  %v21792_v22 = vpop.permute.xlu0 %9603  ;;  %v9584_v49 = vpop.permute.xlu1 %9583 }
 0xf26   :  { %v9508_v42 = vpack.c.bf16 %v9492_v61, %v9491_v12  ;;  %v21814_v38 = vpop.permute.xlu2 %9588 }
 0xf27   :  { %9739 = vmatmul.bf16.gmra.mxu0 %v12854_v6  ;;  %v13521_v6 = vld [vmem:[%s21916_s13 + $0x64] sm:$0xf] }
 0xf28   :  { %9750 = vmatpush.bf16.msrb.mxu1 %v9508_v42  ;;  %v12858_v61 = vor.u32 %v13521_v6, %v12855_v51 }
 0xf2c   :  { %9751 = vmatpush.bf16.msrb.mxu1 %v9507_v32  ;;  %v21802_v19 = vpop.permute.xlu0 %9598  ;;  %v9579_v44 = vpop.permute.xlu1 %9578 }
 0xf2e   :  { %v9564_v40 = vpop.permute.xlu2 %9563 }
 0xf30   :  { %9752 = vmatpush.bf16.msrb.mxu1 %v9506_v0 }
 0xf34   :  { %9753 = vmatpush.bf16.msrb.mxu1 %v9505_v31  ;;  %v9574_v42 = vpop.permute.xlu0 %9573  ;;  %v9554_v26 = vpop.permute.xlu1 %9553 }
 0xf36   :  { %v9559_v18 = vpop.permute.xlu2 %9558 }
 0xf37   :  { %9744 = vmatmul.bf16.gmra.mxu0 %v12862_v34 }
 0xf38   :  { %9754 = vmatpush.bf16.msrb.mxu1 %v9504_v29 }
 0xf3c   :  { %9755 = vmatpush.bf16.msrb.mxu1 %v9503_v35  ;;  %v9569_v56 = vpop.permute.xlu0 %9568  ;;  %v9549_v62 = vpop.permute.xlu1 %9548 }
 0xf40   :  { %9756 = vmatpush.bf16.msrb.mxu1 %v9502_v37 }
 0xf44   :  { %9757 = vmatpush.bf16.msrb.mxu1 %v9501_v7  ;;  %v9710_v12 = vpop.f32.mrf.mxu0  ;;  %v9544_v0 = vpop.permute.xlu0 %9543 }
 0xf45   :  { %v9711_v28 = vadd.f32 %v9710_v12, %v9544_v0 }
 0xf47   :  { %9758 = vmatmul.bf16.vlgmr.msrb.gmra.mxu1 %v12810_v20 }
 0xf4c   :  { %v9712_v5 = vpop.f32.mrf.mxu0 }
 0xf4d   :  { %v9713_v31 = vadd.f32 %v9712_v5, %v9549_v62 }
 0xf54   :  { %v9715_v32 = vpop.f32.mrf.mxu0 }
 0xf55   :  { %v9716_v1 = vadd.f32 %v9715_v32, %v9554_v26 }
 0xf57   :  { %9763 = vmatmul.bf16.gmra.mxu1 %v12818_v2 }
 0xf5c   :  { %v9717_v43 = vpop.f32.mrf.mxu0 }
 0xf5d   :  { %v9718_v35 = vadd.f32 %v9717_v43, %v9559_v18 }
 0xf64   :  { %v9720_v16 = vpop.f32.mrf.mxu0 }
 0xf65   :  { %v9721_v7 = vadd.f32 %v9720_v16, %v9564_v40 }
 0xf67   :  { %9768 = vmatmul.bf16.gmra.mxu1 %v12826_v55 }
 0xf6c   :  { %v9722_v23 = vpop.f32.mrf.mxu0 }
 0xf6d   :  { %v9723_v2 = vadd.f32 %v9722_v23, %v9569_v56 }
 0xf74   :  { %v9725_v37 = vpop.f32.mrf.mxu0 }
 0xf75   :  { %v9726_v33 = vadd.f32 %v9725_v37, %v9574_v42 }
 0xf77   :  { %9773 = vmatmul.bf16.gmra.mxu1 %v12834_v3 }
 0xf7c   :  { %v9727_v39 = vpop.f32.mrf.mxu0 }
 0xf7d   :  { %v9728_v52 = vadd.f32 %v9727_v39, %v9579_v44  ;;  %v13527_v39 = vld [vmem:[%s21917_s15 + $0x10] sm:$0xff] }
 0xf84   :  { %v9730_v3 = vpop.f32.mrf.mxu0 }
 0xf85   :  { %v9731_v5 = vadd.f32 %v9730_v3, %v9584_v49  ;;  %v13532_v3 = vld [vmem:[%s21917_s15 + $0x38] sm:$0xff] }
 0xf87   :  { %9778 = vmatmul.bf16.gmra.mxu1 %v12842_v17 }
 0xf8c   :  { %v9732_v53 = vpop.f32.mrf.mxu0 }
 0xf97   :  { %9783 = vmatmul.bf16.gmra.mxu1 %v12850_v11 }
 0xfa7   :  { %9788 = vmatmul.bf16.gmra.mxu1 %v12858_v61 }
 0xfb7   :  { %9793 = vmatmul.bf16.gmra.mxu1 %v12866_v14  ;;  %v9735_v14 = vpop.f32.mrf.mxu0 }
 0xfb8   :  { %v9736_v18 = vadd.f32 %v9735_v14, %v21812_v4  ;;  %v13525_v4 = vld [vmem:[%s21917_s15] sm:$0xff] }
 0xfbf   :  { %v9737_v56 = vpop.f32.mrf.mxu0 }
 0xfc4   :  { %v9759_v8 = vpop.f32.mrf.mxu1 }
 0xfc5   :  { %v9760_v15 = vadd.f32 %v9759_v8, %v9711_v28 }
 0xfc7   :  { %v9799_v25 = vmax.f32 %v9760_v15, 0.0  ;;  %v9740_v43 = vpop.f32.mrf.mxu0 }
 0xfcc   :  { %v9761_v34 = vpop.f32.mrf.mxu1 }
 0xfcd   :  { %v9762_v48 = vadd.f32 %v9761_v34, %v9713_v31 }
 0xfcf   :  { %v9800_v10 = vmax.f32 %v9762_v48, 0.0  ;;  %v9742_v28 = vpop.f32.mrf.mxu0 }
 0xfd0   :  { %v9743_v31 = vadd.f32 %v9742_v28, %v21800_v45  ;;  %v9733_v45 = vadd.f32 %v9732_v53, %v21814_v38  ;;  %v13526_v38 = vld [vmem:[%s21917_s15 + $0x8] sm:$0xff] }
 0xfd1   :  { %v21816_v29 = vpack.c.bf16 %v9800_v10, %v9799_v25  ;;  %v9741_v25 = vadd.f32 %v9740_v43, %v21792_v22 }
 0xfd4   :  { %v9764_v58 = vpop.f32.mrf.mxu1 }
 0xfd5   :  { %v9765_v30 = vadd.f32 %v9764_v58, %v9716_v1  ;;  %v9738_v1 = vadd.f32 %v9737_v56, %v21802_v19 }
 0xfd7   :  { %v9801_v57 = vmax.f32 %v9765_v30, 0.0  ;;  %v9745_v15 = vpop.f32.mrf.mxu0 }
 0xfd8   :  { %v9746_v16 = vadd.f32 %v9745_v15, %v21790_v27 }
 0xfdc   :  { %v9766_v63 = vpop.f32.mrf.mxu1 }
 0xfdd   :  { %v9767_v24 = vadd.f32 %v9766_v63, %v9718_v35 }
 0xfdf   :  { %v9802_v50 = vmax.f32 %v9767_v24, 0.0  ;;  %v9747_v62 = vpop.f32.mrf.mxu0 }
 0xfe0   :  { %v9748_v49 = vadd.f32 %v9747_v62, %v21810_v36 }
 0xfe1   :  { %v21818_v13 = vpack.c.bf16 %v9802_v50, %v9801_v57 }
 0xfe4   :  { %v9769_v20 = vpop.f32.mrf.mxu1 }
 0xfe5   :  { %v9770_v47 = vadd.f32 %v9769_v20, %v9721_v7 }
 0xfe7   :  { %v9803_v55 = vmax.f32 %v9770_v47, 0.0 }
 0xfec   :  { %v9771_v59 = vpop.f32.mrf.mxu1 }
 0xfed   :  { %v9772_v46 = vadd.f32 %v9771_v59, %v9723_v2  ;;  %v13530_v2 = vld [vmem:[%s21917_s15 + $0x28] sm:$0xff]  ;;  %v9928_v59 = vpop.permute.xlu2 %9927 }
 0xfef   :  { %v9804_v41 = vmax.f32 %v9772_v46, 0.0  ;;  %v13531_v46 = vld [vmem:[%s21917_s15 + $0x30] sm:$0xff] }
 0xff1   :  { %v9817_v54 = vpack.c.bf16 %v9804_v41, %v9803_v55  ;;  %v9918_v55 = vpop.permute.xlu1 %9917 }
 0xff4   :  { %v9774_v9 = vpop.f32.mrf.mxu1 }
 0xff5   :  { %v9775_v17 = vadd.f32 %v9774_v9, %v9726_v33  ;;  %v9923_v41 = vpop.permute.xlu2 %9922  ;;  %v9933_v9 = vpop.permute.xlu0 %9932 }
 0xff7   :  { %v9805_v51 = vmax.f32 %v9775_v17, 0.0 }
 0xffc   :  { %v9776_v11 = vpop.f32.mrf.mxu1 }
 0xffd   :  { %v9777_v6 = vadd.f32 %v9776_v11, %v9728_v52  ;;  %v21853_v33 = vpop.permute.xlu2 %9897  ;;  %v9908_v53 = vpop.permute.xlu0 %9907 }
 0xfff   :  { %v9806_v12 = vmax.f32 %v9777_v6, 0.0 }
0x1001   :  { %v9818_v61 = vpack.c.bf16 %v9806_v12, %v9805_v51 }
0x1004   :  { %v9779_v21 = vpop.f32.mrf.mxu1 }
0x1005   :  { %v9780_v60 = vadd.f32 %v9779_v21, %v9731_v5  ;;  %v9893_v52 = vpop.permute.xlu2 %9892  ;;  %v9903_v12 = vpop.permute.xlu0 %9902 }
0x1007   :  { %v9807_v20 = vmax.f32 %v9780_v60, 0.0 }
0x100c   :  { %v9781_v32 = vpop.f32.mrf.mxu1 }
0x100d   :  { %v9782_v37 = vadd.f32 %v9781_v32, %v9733_v45  ;;  %v9868_v6 = vpop.permute.xlu2 %9867  ;;  %v9878_v43 = vpop.permute.xlu0 %9877 }
0x100f   :  { %v9808_v7 = vmax.f32 %v9782_v37, 0.0 }
0x1011   :  { %v9819_v47 = vpack.c.bf16 %v9808_v7, %v9807_v20 }
0x1014   :  { %v9784_v26 = vpop.f32.mrf.mxu1 }
0x1015   :  { %v9785_v24 = vadd.f32 %v9784_v26, %v9736_v18  ;;  %v9863_v21 = vpop.permute.xlu2 %9862 }
0x1017   :  { %v9809_v50 = vmax.f32 %v9785_v24, 0.0 }
0x101c   :  { %v9786_v0 = vpop.f32.mrf.mxu1 }
0x101d   :  { %v9787_v35 = vadd.f32 %v9786_v0, %v9738_v1 }
0x101f   :  { %v9810_v57 = vmax.f32 %v9787_v35, 0.0 }
0x1021   :  { %v9820_v19 = vpack.c.bf16 %v9810_v57, %v9809_v50 }
0x1024   :  { %v9789_v42 = vpop.f32.mrf.mxu1 }
0x1025   :  { %v9790_v23 = vadd.f32 %v9789_v42, %v9741_v25  ;;  %v9873_v42 = vpop.permute.xlu0 %9872 }
0x1027   :  { %v9811_v36 = vmax.f32 %v9790_v23, 0.0 }
0x102c   :  { %v9791_v8 = vpop.f32.mrf.mxu1 }
0x102d   :  { %v9792_v10 = vadd.f32 %v9791_v8, %v9743_v31 }
0x102f   :  { %v9812_v63 = vmax.f32 %v9792_v10, 0.0 }
0x1031   :  { %v9821_v22 = vpack.c.bf16 %v9812_v63, %v9811_v36 }
0x1034   :  { %v9794_v44 = vpop.f32.mrf.mxu1 }
0x1035   :  { %v9795_v34 = vadd.f32 %v9794_v44, %v9746_v16 }
0x1037   :  { %v9813_v58 = vmax.f32 %v9795_v34, 0.0 }
0x103c   :  { %v9796_v48 = vpop.f32.mrf.mxu1 }
0x103d   :  { %v9797_v40 = vadd.f32 %v9796_v48, %v9748_v49 }
0x103f   :  { %v9814_v30 = vmax.f32 %v9797_v40, 0.0 }
0x1041   :  { %v9822_v27 = vpack.c.bf16 %v9814_v30, %v9813_v58 }
0x1043   :  { %9983 = vmatpush.bf16.msra.mxu2 %v9822_v27 }
0x1047   :  { %9984 = vmatpush.bf16.msra.mxu2 %v9821_v22 }
0x104b   :  { %9985 = vmatpush.bf16.msra.mxu2 %v9820_v19 }
0x104f   :  { %9986 = vmatpush.bf16.msra.mxu2 %v9819_v47 }
0x1053   :  { %9987 = vmatpush.bf16.msra.mxu2 %v9818_v61 }
0x1057   :  { %9988 = vmatpush.bf16.msra.mxu2 %v9817_v54  ;;  %v9913_v54 = vpop.permute.xlu1 %9912 }
0x105b   :  { %9989 = vmatpush.bf16.msra.mxu2 %v21818_v13  ;;  %v13528_v13 = vld [vmem:[%s21917_s15 + $0x18] sm:$0xff] }
0x105f   :  { %9990 = vmatpush.bf16.msra.mxu2 %v21816_v29  ;;  %v13529_v29 = vld [vmem:[%s21917_s15 + $0x20] sm:$0xff]  ;;  %v9888_v17 = vpop.permute.xlu1 %9887 }
0x1062   :  { %9991 = vmatmul.bf16.vlgmr.msra.gmra.mxu2 %v13525_v4 }
0x1067   :  { %v9883_v11 = vpop.permute.xlu1 %9882 }
0x106f   :  { %v9858_v61 = vpop.permute.xlu1 %9857 }
0x1072   :  { %9996 = vmatmul.bf16.gmra.mxu2 %v13526_v38 }
0x1082   :  { %10001 = vmatmul.bf16.gmra.mxu2 %v13527_v39 }
0x1092   :  { %10006 = vmatmul.bf16.gmra.mxu2 %v13528_v13 }
0x10a2   :  { %10011 = vmatmul.bf16.gmra.mxu2 %v13529_v29 }
0x10b2   :  { %10016 = vmatmul.bf16.gmra.mxu2 %v13530_v2 }
0x10c2   :  { %10021 = vmatmul.bf16.gmra.mxu2 %v13531_v46 }
0x10d2   :  { %10026 = vmatmul.bf16.gmra.mxu2 %v13532_v3 }
0x10e5   :  { %v9992_v51 = vpop.f32.mrf.mxu2 }
0x10e6   :  { %v9993_v5 = vadd.f32 %v9992_v51, %v9858_v61  ;;  %v13538_v61 = vld [vmem:[%s21918_s17 + $0x28] sm:$0xff] }
0x10e8   :  { %v10032_v32 = vmax.f32 %v9993_v5, 0.0  ;;  %v10091_v5 = vpop.permute.xlu0 %10090 }
0x10ed   :  { %v9994_v60 = vpop.f32.mrf.mxu2 }
0x10ee   :  { %v9995_v14 = vadd.f32 %v9994_v60, %v9863_v21  ;;  %v13539_v21 = vld [vmem:[%s21918_s17 + $0x30] sm:$0xff]  ;;  %v10101_v60 = vpop.permute.xlu2 %10100 }
0x10f0   :  { %v10033_v56 = vmax.f32 %v9995_v14, 0.0  ;;  %v10096_v14 = vpop.permute.xlu1 %10095 }
0x10f2   :  { %v10048_v26 = vpack.c.bf16 %v10033_v56, %v10032_v32  ;;  %v10106_v32 = vpop.permute.xlu0 %10105 }
0x10f5   :  { %v9997_v0 = vpop.f32.mrf.mxu2 }
0x10f6   :  { %v9998_v28 = vadd.f32 %v9997_v0, %v9868_v6  ;;  %v10116_v56 = vpop.permute.xlu2 %10115 }
0x10f8   :  { %v10034_v44 = vmax.f32 %v9998_v28, 0.0 }
0x10fa   :  { %v10121_v0 = vpop.permute.xlu0 %10120 }
0x10fd   :  { %v9999_v8 = vpop.f32.mrf.mxu2 }
0x10fe   :  { %v10000_v15 = vadd.f32 %v9999_v8, %v9873_v42  ;;  %v10131_v28 = vpop.permute.xlu2 %10130 }
0x1100   :  { %v10035_v62 = vmax.f32 %v10000_v15, 0.0 }
0x1102   :  { %v10049_v16 = vpack.c.bf16 %v10035_v62, %v10034_v44  ;;  %v10136_v8 = vpop.permute.xlu0 %10135 }
0x1105   :  { %v10002_v31 = vpop.f32.mrf.mxu2 }
0x1106   :  { %v10003_v49 = vadd.f32 %v10002_v31, %v9878_v43  ;;  %v13540_v43 = vld [vmem:[%s21918_s17 + $0x38] sm:$0xff]  ;;  %v21880_v15 = vpop.permute.xlu2 %10145 }
0x1108   :  { %v10036_v25 = vmax.f32 %v10003_v49, 0.0 }
0x110a   :  { %v21882_v62 = vpop.permute.xlu0 %10150 }
0x110d   :  { %v10004_v34 = vpop.f32.mrf.mxu2 }
0x110e   :  { %v10005_v48 = vadd.f32 %v10004_v34, %v9883_v11  ;;  %v21884_v31 = vpop.permute.xlu2 %10160 }
0x1110   :  { %v10037_v10 = vmax.f32 %v10005_v48, 0.0 }
0x1112   :  { %v10050_v40 = vpack.c.bf16 %v10037_v10, %v10036_v25 }
0x1115   :  { %v10007_v1 = vpop.f32.mrf.mxu2 }
0x1116   :  { %v10008_v23 = vadd.f32 %v10007_v1, %v9888_v17 }
0x1118   :  { %v10038_v18 = vmax.f32 %v10008_v23, 0.0  ;;  %v10306_v23 = vpop.permute.xlu2 %10305 }
0x111d   :  { %v10009_v58 = vpop.f32.mrf.mxu2 }
0x111e   :  { %v10010_v30 = vadd.f32 %v10009_v58, %v9893_v52 }
0x1120   :  { %v10039_v35 = vmax.f32 %v10010_v30, 0.0 }
0x1122   :  { %v10051_v63 = vpack.c.bf16 %v10039_v35, %v10038_v18 }
0x1125   :  { %v10012_v27 = vpop.f32.mrf.mxu2 }
0x1126   :  { %v10013_v11 = vadd.f32 %v10012_v27, %v21853_v33  ;;  %v13534_v33 = vld [vmem:[%s21918_s17 + $0x8] sm:$0xff] }
0x112d   :  { %v10014_v45 = vpop.f32.mrf.mxu2 }
0x112e   :  { %v10015_v3 = vadd.f32 %v10014_v45, %v9903_v12  ;;  %v13537_v12 = vld [vmem:[%s21918_s17 + $0x20] sm:$0xff] }
0x1135   :  { %v10017_v24 = vpop.f32.mrf.mxu2 }
0x1136   :  { %v10018_v2 = vadd.f32 %v10017_v24, %v9908_v53  ;;  %v13536_v53 = vld [vmem:[%s21918_s17 + $0x18] sm:$0xff] }
0x1138   :  { %v10042_v6 = vmax.f32 %v10018_v2, 0.0 }
0x113d   :  { %v10019_v36 = vpop.f32.mrf.mxu2 }
0x113e   :  { %v10020_v39 = vadd.f32 %v10019_v36, %v9913_v54  ;;  %v13533_v54 = vld [vmem:[%s21918_s17] sm:$0xff] }
0x1140   :  { %v10043_v17 = vmax.f32 %v10020_v39, 0.0  ;;  %v10321_v39 = vpop.permute.xlu2 %10320 }
0x1142   :  { %v10053_v51 = vpack.c.bf16 %v10043_v17, %v10042_v6 }
0x1145   :  { %v10022_v37 = vpop.f32.mrf.mxu2 }
0x1146   :  { %v10023_v47 = vadd.f32 %v10022_v37, %v9918_v55 }
0x1148   :  { %v10044_v46 = vmax.f32 %v10023_v47, 0.0 }
0x114d   :  { %v10024_v57 = vpop.f32.mrf.mxu2 }
0x114e   :  { %v10025_v19 = vadd.f32 %v10024_v57, %v9923_v41  ;;  %v10040_v41 = vmax.f32 %v10013_v11, 0.0 }
0x1150   :  { %v10045_v13 = vmax.f32 %v10025_v19, 0.0 }
0x1152   :  { %v10054_v52 = vpack.c.bf16 %v10045_v13, %v10044_v46 }
0x1155   :  { %v10027_v22 = vpop.f32.mrf.mxu2 }
0x1156   :  { %v10028_v50 = vadd.f32 %v10027_v22, %v9928_v59  ;;  %v10041_v59 = vmax.f32 %v10015_v3, 0.0 }
0x1158   :  { %v10046_v4 = vmax.f32 %v10028_v50, 0.0  ;;  %v10052_v55 = vpack.c.bf16 %v10041_v59, %v10040_v41 }
0x115d   :  { %v10029_v7 = vpop.f32.mrf.mxu2 }
0x115e   :  { %v10030_v20 = vadd.f32 %v10029_v7, %v9933_v9  ;;  %v13535_v9 = vld [vmem:[%s21918_s17 + $0x10] sm:$0xff] }
0x1160   :  { %v10047_v38 = vmax.f32 %v10030_v20, 0.0 }
0x1162   :  { %v10055_v29 = vpack.c.bf16 %v10047_v38, %v10046_v4 }
0x1164   :  { %10216 = vmatpush.bf16.msra.mxu3 %v10055_v29 }
0x1168   :  { %10217 = vmatpush.bf16.msra.mxu3 %v10054_v52 }
0x116c   :  { %10218 = vmatpush.bf16.msra.mxu3 %v10053_v51 }
0x1170   :  { %10219 = vmatpush.bf16.msra.mxu3 %v10052_v55 }
0x1174   :  { %10220 = vmatpush.bf16.msra.mxu3 %v10051_v63 }
0x1178   :  { %10221 = vmatpush.bf16.msra.mxu3 %v10050_v40  ;;  %v21888_v40 = vpop.permute.xlu0 %10165 }
0x117c   :  { %10222 = vmatpush.bf16.msra.mxu3 %v10049_v16 }
0x1180   :  { %10223 = vmatpush.bf16.msra.mxu3 %v10048_v26  ;;  %v10111_v26 = vpop.permute.xlu1 %10110  ;;  %v10311_v24 = vpop.permute.xlu0 %10310 }
0x1183   :  { %10224 = vmatmul.bf16.vlgmr.msra.gmra.mxu3 %v13533_v54 }
0x1188   :  { %v10126_v42 = vpop.permute.xlu1 %10125  ;;  %v10326_v59 = vpop.permute.xlu0 %10325 }
0x1190   :  { %v10141_v44 = vpop.permute.xlu1 %10140 }
0x1193   :  { %10229 = vmatmul.bf16.gmra.mxu3 %v13534_v33  ;;  %v10336_v33 = vpop.permute.xlu2 %10335 }
0x1198   :  { %v21886_v49 = vpop.permute.xlu1 %10155 }
0x11a0   :  { %v10301_v58 = vpop.permute.xlu1 %10300 }
0x11a3   :  { %10234 = vmatmul.bf16.gmra.mxu3 %v13535_v9 }
0x11a8   :  { %v10316_v7 = vpop.permute.xlu1 %10315 }
0x11b0   :  { %v10331_v51 = vpop.permute.xlu1 %10330 }
0x11b3   :  { %10239 = vmatmul.bf16.gmra.mxu3 %v13536_v53 }
0x11c3   :  { %10244 = vmatmul.bf16.gmra.mxu3 %v13537_v12  ;;  %v10341_v12 = vpop.permute.xlu0 %10340 }
0x11d3   :  { %10249 = vmatmul.bf16.gmra.mxu3 %v13538_v61 }
0x11e3   :  { %10254 = vmatmul.bf16.gmra.mxu3 %v13539_v21 }
0x11f3   :  { %10259 = vmatmul.bf16.gmra.mxu3 %v13540_v43 }
0x1206   :  { %v10225_v16 = vpop.f32.mrf.mxu3 }
0x1207   :  { %v10226_v34 = vadd.f32 %v10225_v16, %v10091_v5 }
0x1209   :  { %v10265_v25 = vmax.f32 %v10226_v34, 0.0 }
0x120b   :  { %v10378_v30 = vmul.f32 %v10301_v58, %v10265_v25 }
0x120e   :  { %v10227_v48 = vpop.f32.mrf.mxu3 }
0x120f   :  { %v10228_v10 = vadd.f32 %v10227_v48, %v10096_v14 }
0x1211   :  { %v10266_v1 = vmax.f32 %v10228_v10, 0.0 }
0x1213   :  { %v10379_v18 = vmul.f32 %v10306_v23, %v10266_v1 }
0x1215   :  { %v10394_v35 = vadd.f32 %v10379_v18, %v10378_v30 }
0x1216   :  { %v10230_v63 = vpop.f32.mrf.mxu3 }
0x1217   :  { %v10231_v27 = vadd.f32 %v10230_v63, %v10101_v60 }
0x1219   :  { %v10267_v45 = vmax.f32 %v10231_v27, 0.0 }
0x121b   :  { %v10380_v36 = vmul.f32 %v10311_v24, %v10267_v45 }
0x121d   :  { %v10395_v37 = vadd.f32 %v10394_v35, %v10380_v36 }
0x121e   :  { %v10232_v57 = vpop.f32.mrf.mxu3 }
0x121f   :  { %v10233_v22 = vadd.f32 %v10232_v57, %v10106_v32  ;;  %v10346_v32 = vpop.permute.xlu1 %10345 }
0x1221   :  { %v10268_v50 = vmax.f32 %v10233_v22, 0.0 }
0x1223   :  { %v10381_v19 = vmul.f32 %v10316_v7, %v10268_v50 }
0x1225   :  { %v10396_v20 = vadd.f32 %v10395_v37, %v10381_v19 }
0x1226   :  { %v10235_v47 = vpop.f32.mrf.mxu3 }
0x1227   :  { %v10236_v4 = vadd.f32 %v10235_v47, %v10111_v26  ;;  %v10361_v36 = vpop.permute.xlu1 %10360 }
0x1229   :  { %v10269_v38 = vmax.f32 %v10236_v4, 0.0 }
0x122b   :  { %v10382_v13 = vmul.f32 %v10321_v39, %v10269_v38 }
0x122d   :  { %v10397_v29 = vadd.f32 %v10396_v20, %v10382_v13 }
0x122e   :  { %v10237_v2 = vpop.f32.mrf.mxu3 }
0x122f   :  { %v10238_v41 = vadd.f32 %v10237_v2, %v10116_v56  ;;  %v10376_v2 = vpop.permute.xlu1 %10375 }
0x1231   :  { %v10270_v9 = vmax.f32 %v10238_v41, 0.0 }
0x1233   :  { %v10383_v21 = vmul.f32 %v10326_v59, %v10270_v9 }
0x1235   :  { %v10398_v48 = vadd.f32 %v10397_v29, %v10383_v21 }
0x1236   :  { %v10240_v46 = vpop.f32.mrf.mxu3 }
0x1237   :  { %v10241_v54 = vadd.f32 %v10240_v46, %v10121_v0  ;;  %v10351_v0 = vpop.permute.xlu2 %10350 }
0x1239   :  { %v10271_v61 = vmax.f32 %v10241_v54, 0.0 }
0x123b   :  { %v10384_v43 = vmul.f32 %v10331_v51, %v10271_v61 }
0x123d   :  { %v10399_v1 = vadd.f32 %v10398_v48, %v10384_v43 }
0x123e   :  { %v10242_v3 = vpop.f32.mrf.mxu3 }
0x123f   :  { %v10243_v53 = vadd.f32 %v10242_v3, %v10126_v42 }
0x1241   :  { %v10272_v60 = vmax.f32 %v10243_v53, 0.0 }
0x1243   :  { %v10385_v25 = vmul.f32 %v10336_v33, %v10272_v60 }
0x1245   :  { %v10400_v30 = vadd.f32 %v10399_v1, %v10385_v25 }
0x1246   :  { %v10245_v17 = vpop.f32.mrf.mxu3 }
0x1247   :  { %v10246_v5 = vadd.f32 %v10245_v17, %v10131_v28  ;;  %v10356_v28 = vpop.permute.xlu0 %10355 }
0x1249   :  { %v10273_v16 = vmax.f32 %v10246_v5, 0.0 }
0x124b   :  { %v10386_v23 = vmul.f32 %v10341_v12, %v10273_v16 }
0x124d   :  { %v10401_v27 = vadd.f32 %v10400_v30, %v10386_v23 }
0x124e   :  { %v10247_v52 = vpop.f32.mrf.mxu3 }
0x124f   :  { %v10248_v14 = vadd.f32 %v10247_v52, %v10136_v8  ;;  %v10371_v47 = vpop.permute.xlu0 %10370 }
0x1251   :  { %v10274_v10 = vmax.f32 %v10248_v14, 0.0 }
0x1253   :  { %v10387_v18 = vmul.f32 %v10346_v32, %v10274_v10 }
0x1256   :  { %v10250_v11 = vpop.f32.mrf.mxu3 }
0x1257   :  { %v10251_v34 = vadd.f32 %v10250_v11, %v10141_v44 }
0x1259   :  { %v10275_v42 = vmax.f32 %v10251_v34, 0.0 }
0x125b   :  { %v10388_v44 = vmul.f32 %v10351_v0, %v10275_v42 }
0x125e   :  { %v10252_v6 = vpop.f32.mrf.mxu3 }
0x125f   :  { %v10253_v56 = vadd.f32 %v10252_v6, %v21880_v15  ;;  %v10402_v15 = vadd.f32 %v10401_v27, %v10387_v18 }
0x1261   :  { %v10276_v8 = vmax.f32 %v10253_v56, 0.0  ;;  %v10403_v22 = vadd.f32 %v10402_v15, %v10388_v44 }
0x1263   :  { %v10389_v37 = vmul.f32 %v10356_v28, %v10276_v8 }
0x1265   :  { %v10404_v19 = vadd.f32 %v10403_v22, %v10389_v37 }
0x1266   :  { %v10255_v55 = vpop.f32.mrf.mxu3 }
0x1267   :  { %v10256_v58 = vadd.f32 %v10255_v55, %v21882_v62  ;;  %v10366_v62 = vpop.permute.xlu2 %10365 }
0x1269   :  { %v10277_v45 = vmax.f32 %v10256_v58, 0.0 }
0x126b   :  { %v10390_v50 = vmul.f32 %v10361_v36, %v10277_v45 }
0x126d   :  { %v10405_v38 = vadd.f32 %v10404_v19, %v10390_v50 }
0x126e   :  { %v10257_v26 = vpop.f32.mrf.mxu3 }
0x126f   :  { %v10258_v35 = vadd.f32 %v10257_v26, %v21886_v49  ;;  %v10418_v59 = vpop.permute.xlu2 %10417 }
0x1270   :  { %v10420_v41 = vperm.slane %v10418_v59, 0 }
0x1271   :  { %v10278_v57 = vmax.f32 %v10258_v35, 0.0 }
0x1273   :  { %v10391_v20 = vmul.f32 %v10366_v62, %v10278_v57 }
0x1275   :  { %v10406_v13 = vadd.f32 %v10405_v38, %v10391_v20 }
0x1276   :  { %v10260_v63 = vpop.f32.mrf.mxu3 }
0x1277   :  { %v10261_v24 = vadd.f32 %v10260_v63, %v21884_v31 }
0x1279   :  { %v10279_v7 = vmax.f32 %v10261_v24, 0.0 }
0x127b   :  { %v10392_v49 = vmul.f32 %v10371_v47, %v10279_v7 }
0x127d   :  { %v10407_v31 = vadd.f32 %v10406_v13, %v10392_v49 }
0x127e   :  { %v10262_v4 = vpop.f32.mrf.mxu3 }
0x127f   :  { %v10263_v39 = vadd.f32 %v10262_v4, %v21888_v40 }
0x1281   :  { %v10280_v29 = vmax.f32 %v10263_v39, 0.0 }
0x1283   :  { %v10393_v46 = vmul.f32 %v10376_v2, %v10280_v29 }
0x1285   :  { %v10408_v3 = vadd.f32 %v10407_v31, %v10393_v46 }
0x1287   :  { %v10409_v17 = vrot.slane %v10408_v3, 4 }
0x1289   :  { %v10410_v52 = vadd.f32 %v10409_v17, %v10408_v3 }
0x128b   :  { %v10411_v11 = vrot.slane %v10410_v52, 2 }
0x128d   :  { %v10412_v6 = vadd.f32 %v10411_v11, %v10410_v52 }
0x128f   :  { %v10413_v51 = vrot.slane %v10412_v6, 1 }
0x1291   :  { %v10414_v55 = vadd.f32 %v10413_v51, %v10412_v6 }
0x1293   :  { %v10421_v54 = vadd.f32 %v10420_v41, %v10414_v55 }
0x1295   :  { %10422 = vst [vmem:[%s21919_s21] sm:$0x1] %v10421_v54 }

</bundles_post_ra>
